<compile_context>
chip_gen: v7x
topology: tpu7x:2x2x1
jax: 0.10.0
libtpu: 0.0.40
codegen_flags: <defaults>
</compile_context>

<pallas_src>
import jax
import jax.numpy as jnp
from jax import lax
from jax.experimental import pallas as pl
from jax.experimental.pallas import tpu as pltpu

DIM = 192                     # Transformer(dim=192)
HEADS = 8                     # ReAttention(heads=8)
DIM_HEAD = 64                 # ReAttention(dim_head=64)
INNER = HEADS * DIM_HEAD      # 512
SCALE = DIM_HEAD ** -0.5      # 0.125 (pre-folded into the Q columns of wqkv)
HIDDEN = DIM * 4              # FeedForward hidden = dim * scale_dim
EPS = 1e-5                    # PyTorch LayerNorm default eps


# ----------------------------- in-kernel math helpers -----------------------------

def _erf(x):
    # Abramowitz & Stegun 7.1.26, |err| < 1.5e-7.  Hand-rolled so the exp routes to the
    # EUP; the divide is an approx EUP reciprocal (co-issues with the VALU polynomial).
    a1, a2, a3, a4, a5 = 0.254829592, -0.284496736, 1.421413741, -1.453152027, 1.061405429
    p = 0.3275911
    s = jnp.where(x >= 0.0, 1.0, -1.0)
    ax = jnp.abs(x)
    t = pl.reciprocal(1.0 + p * ax, approx=True)
    poly = ((((a5 * t + a4) * t + a3) * t + a2) * t + a1) * t
    return s * (1.0 - poly * jnp.exp(-ax * ax))


def _gelu(x):
    # exact (erf-based) GELU, matching torch.nn.GELU() default
    return 0.5 * x * (1.0 + _erf(x * 0.7071067811865476))


def _layernorm(x, gamma, beta):
    mu = jnp.mean(x, axis=-1, keepdims=True)
    var = jnp.mean((x - mu) ** 2, axis=-1, keepdims=True)
    return (x - mu) * lax.rsqrt(var + EPS) * gamma + beta


# ----------------------------------- kernel ---------------------------------------

def fused_transformer_kernel(
    # ---- inputs ----
    x_ref,                 # (Bt, N, D)             f32   input activations
    ln1_g, ln1_b,          # (depth, 1, D)          f32   PreNorm-1 LayerNorm
    wqkv,                  # (depth, D, 3*INNER)    bf16  to_qkv weight (scale folded in Q)
    wout, bout,            # (depth, INNER, D) bf16 / (depth, 1, D) f32   to_out Linear
    ln2_g, ln2_b,          # (depth, 1, D)          f32   PreNorm-2 LayerNorm
    w1, b1,                # (depth, D, HIDDEN) bf16 / (depth, 1, HIDDEN) f32
    w2, b2,                # (depth, HIDDEN, D) bf16 / (depth, 1, D) f32
    fin_g, fin_b,          # (1, D)                 f32   final LayerNorm
    rw_ref,                # (depth*H, H)           f32   SMEM  reattn_weights (row = l*H + h)
    rg_ref, rb_ref,        # (depth, H)             f32   SMEM  reattn_norm gamma / beta
    # ---- output ----
    o_ref,                 # (Bt, N, D)             f32
    # ---- scratch ----
    mix_ref,               # (H, Bt, N, N)          f32   staged (centered) mixed heads
):
    Bt, N, D = x_ref.shape
    M = Bt * N
    depth = wqkv.shape[0]

    def layer(l, x):                                   # x: (M, D) f32 residual stream
        # ---------------- PreNorm + ReAttention ----------------
        xn = _layernorm(x, ln1_g[l], ln1_b[l])
        qkv = jnp.dot(xn.astype(jnp.bfloat16), wqkv[l],
                      preferred_element_type=jnp.float32)          # (M, 3*INNER) f32

        def head(base, h):
            c0 = base + h * DIM_HEAD
            return qkv[:, c0:c0 + DIM_HEAD].reshape(Bt, N, DIM_HEAD).astype(jnp.bfloat16)

        # per-head scores + softmax (attention scale is pre-folded into wqkv's Q columns).
        # approx reciprocal in the softmax denominator: ~1e-4 relative error vs exact
        # softmax -- intentional, covered by the test tolerance.
        # TODO(synk): the per-head 64-lane slices of `qkv` are not 128-lane aligned; a
        # single head-major relayout (or query-block tiling at large N) would remove the
        # remaining XLU shuffle cost.
        p_heads = []
        for h in range(HEADS):
            qh = head(0, h)
            kh = head(INNER, h)
            s = jnp.einsum('bid,bjd->bij', qh, kh,
                           preferred_element_type=jnp.float32)     # (Bt, N, N) f32
            s = s - jnp.max(s, axis=-1, keepdims=True)
            e = jnp.exp(s)
            p_heads.append(
                e * pl.reciprocal(jnp.sum(e, axis=-1, keepdims=True), approx=True))

        # ----- re-attention: head mix + LayerNorm over the head dimension -----
        # mean over output heads g: mean = sum_h c_h * p_h, with c_h = mean_g rw[h, g]
        # (scalar SMEM reads, scalar-unit adds).  Centered mixed heads are staged in the
        # mix_ref VMEM scratch and the variance is accumulated on the fly, so only a few
        # (Bt, N, N) tiles are ever live simultaneously (kills the vreg-spill problem).
        inv_h = 1.0 / HEADS
        mean = None
        for h in range(HEADS):
            c_h = rw_ref[l * HEADS + h, 0]
            for g in range(1, HEADS):
                c_h = c_h + rw_ref[l * HEADS + h, g]
            c_h = c_h * inv_h
            mean = c_h * p_heads[h] if h == 0 else mean + c_h * p_heads[h]

        var = None
        for g in range(HEADS):
            acc = rw_ref[l * HEADS + 0, g] * p_heads[0]
            for h in range(1, HEADS):
                acc = acc + rw_ref[l * HEADS + h, g] * p_heads[h]
            acc = acc - mean                                       # centered mixed head g
            mix_ref[g] = acc
            var = acc * acc if g == 0 else var + acc * acc
        inv = lax.rsqrt(var * inv_h + EPS)

        # normalize -> P @ V -> output projection, one head at a time.  The (64, D)
        # per-head slices of W_out are sublane-aligned, so no lane concatenation is
        # needed; partial projections accumulate in f32.
        wout_l = wout[l]                                           # (INNER, D) bf16
        proj = None
        for g in range(HEADS):
            normed = (mix_ref[g] * inv * rg_ref[l, g] + rb_ref[l, g]).astype(jnp.bfloat16)
            vh = head(2 * INNER, g)
            oh = jnp.einsum('bij,bjd->bid', normed, vh,
                            preferred_element_type=jnp.float32)    # (Bt, N, d) f32
            ph = jnp.dot(oh.reshape(M, DIM_HEAD).astype(jnp.bfloat16),
                         wout_l[g * DIM_HEAD:(g + 1) * DIM_HEAD, :],
                         preferred_element_type=jnp.float32)       # (M, D) f32
            proj = ph if g == 0 else proj + ph
        x = x + proj + bout[l]                                     # residual

        # ---------------- PreNorm + FeedForward ----------------
        xn2 = _layernorm(x, ln2_g[l], ln2_b[l])
        h1 = _gelu(jnp.dot(xn2.astype(jnp.bfloat16), w1[l],
                           preferred_element_type=jnp.float32) + b1[l])
        ff = jnp.dot(h1.astype(jnp.bfloat16), w2[l],
                     preferred_element_type=jnp.float32) + b2[l]
        return x + ff                                              # residual

    x0 = x_ref[...].reshape(M, D)
    x_fin = lax.fori_loop(0, depth, layer, x0)
    # fused final LayerNorm of the whole Transformer
    o_ref[...] = _layernorm(x_fin, fin_g[...], fin_b[...]).reshape(Bt, N, D)


# ------------------------------ tiling heuristics ----------------------------------

def _weight_vmem_bytes(depth):
    bf16 = depth * (DIM * 3 * INNER + INNER * DIM + DIM * HIDDEN + HIDDEN * DIM) * 2
    f32 = depth * (6 * DIM + HIDDEN) * 4 + 2 * DIM * 4
    return 2 * (bf16 + f32)            # x2: BlockSpec inputs are double-buffered


def _block_vmem_bytes(Bt, N):
    M = Bt * N
    rows = M * (3 * INNER * 4          # qkv f32
                + 3 * INNER * 2        # bf16 per-head q/k/v views
                + 2 * HIDDEN * 4       # FFN hidden + GELU temporaries
                + 8 * DIM * 4)         # residual stream, proj, x blocks (in+out, 2 bufs)
    attn = (2 * HEADS + 4) * Bt * N * N * 4   # p heads + mix scratch + mean/var/normed
    return rows + attn


def _vmem_limit_bytes():
    # Per-generation scoped-VMEM limit: ~102 MiB on v5e/v6e (128 MiB physical),
    # ~51 MiB on v7x (64 MiB physical); conservative 64 MiB assumption if unknown.
    try:
        cap = int(pltpu.get_tpu_info().vmem_capacity_bytes)
        if cap <= 0:
            raise ValueError
    except Exception:
        cap = 64 * 1024 * 1024
    return min(int(cap * 0.8), 112 * 1024 * 1024)


def _pick_bt(B, N, depth, budget):
    """Pick the batch-block size Bt against the per-generation VMEM budget.

    Weights are fully VMEM-resident (loaded once), so the only reasons to grow Bt are
    (a) filling the 256-wide MXU M dimension on v6e/v7x (target Bt*N >= 512 rows) and
    (b) amortizing the ~0.35us/grid-step overhead.  Beyond that, larger blocks only
    inflate the (8*Bt, N, N) attention temporaries, so we take the SMALLEST block that
    reaches 512 rows and fits the budget, otherwise the LARGEST block that fits --
    while keeping >= 2 grid steps whenever B >= 2 so the "parallel" batch axis can be
    sharded across v7x's two TensorCores.
    """
    wbytes = _weight_vmem_bytes(depth)
    divs = [d for d in range(1, B + 1) if B % d == 0]
    fits = [d for d in divs if wbytes + _block_vmem_bytes(d, N) <= budget] or [1]
    pref = [d for d in fits if B // d >= 2] or fits
    full = [d for d in pref if d * N >= 512]
    return min(full) if full else max(pref)


# ----------------------------------- wrapper ---------------------------------------

def transformer_forward(x, params):
    B, N, D = x.shape
    assert D == DIM
    depth = params["wqkv"].shape[0]

    vmem_limit = _vmem_limit_bytes()
    Bt = _pick_bt(B, N, depth, int(vmem_limit * 0.85))
    nb = B // Bt

    def whole(arr):
        # full-array block, constant index map -> DMA'd once, resident across all blocks
        zeros = (0,) * arr.ndim
        return pl.BlockSpec(arr.shape, lambda b, zeros=zeros: zeros)

    smem = pl.BlockSpec(memory_space=pltpu.MemorySpace.SMEM)
    x_spec = pl.BlockSpec((Bt, N, DIM), lambda b: (b, 0, 0))

    rw2d = params["rw"].reshape(depth * HEADS, HEADS)    # 2D SMEM table, row = l*H + h

    grid_spec = pltpu.PrefetchScalarGridSpec(
        num_scalar_prefetch=0,
        grid=(nb,),
        in_specs=[
            x_spec,
            whole(params["ln1_g"]), whole(params["ln1_b"]),
            whole(params["wqkv"]),
            whole(params["wout"]), whole(params["bout"]),
            whole(params["ln2_g"]), whole(params["ln2_b"]),
            whole(params["w1"]), whole(params["b1"]),
            whole(params["w2"]), whole(params["b2"]),
            whole(params["fin_g"]), whole(params["fin_b"]),
            smem, smem, smem,                            # rw, rg, rb
        ],
        out_specs=x_spec,
        scratch_shapes=[pltpu.VMEM((HEADS, Bt, N, N), jnp.float32)],
    )

    return pl.pallas_call(
        fused_transformer_kernel,
        out_shape=jax.ShapeDtypeStruct((B, N, DIM), jnp.float32),
        grid_spec=grid_spec,
        compiler_params=pltpu.CompilerParams(
            dimension_semantics=("parallel",),
            vmem_limit_bytes=vmem_limit,
        ),
    )(x,
      params["ln1_g"], params["ln1_b"],
      params["wqkv"],
      params["wout"], params["bout"],
      params["ln2_g"], params["ln2_b"],
      params["w1"], params["b1"],
      params["w2"], params["b2"],
      params["fin_g"], params["fin_b"],
      rw2d, params["rg"], params["rb"])


# -------------------------- deterministic parameter init ---------------------------

def init_params(key, depth):
    ks = jax.random.split(key, 8)

    def nrm(k, shape, scale=0.02):
        return jax.random.normal(k, shape, jnp.float32) * scale

    # Fold the attention scale (dim_head ** -0.5) into the Q columns of to_qkv once at
    # parameter-build time, so the kernel never multiplies the (M, 512) Q block.
    wqkv = nrm(ks[0], (depth, DIM, 3 * INNER))
    col_scale = jnp.concatenate([jnp.full((INNER,), SCALE, jnp.float32),
                                 jnp.ones((2 * INNER,), jnp.float32)])
    wqkv = (wqkv * col_scale[None, None, :]).astype(jnp.bfloat16)

    return dict(
        ln1_g=jnp.ones((depth, 1, DIM), jnp.float32),
        ln1_b=jnp.zeros((depth, 1, DIM), jnp.float32),
        wqkv=wqkv,
        rw=jax.random.normal(ks[1], (depth, HEADS, HEADS), jnp.float32),   # torch.randn
        rg=jnp.ones((depth, HEADS), jnp.float32),
        rb=jnp.zeros((depth, HEADS), jnp.float32),
        wout=nrm(ks[2], (depth, INNER, DIM)).astype(jnp.bfloat16),
        bout=nrm(ks[3], (depth, 1, DIM)),
        ln2_g=jnp.ones((depth, 1, DIM), jnp.float32),
        ln2_b=jnp.zeros((depth, 1, DIM), jnp.float32),
        w1=nrm(ks[4], (depth, DIM, HIDDEN)).astype(jnp.bfloat16),
        b1=nrm(ks[5], (depth, 1, HIDDEN)),
        w2=nrm(ks[6], (depth, HIDDEN, DIM)).astype(jnp.bfloat16),
        b2=nrm(ks[7], (depth, 1, DIM)),
        fin_g=jnp.ones((1, DIM), jnp.float32),
        fin_b=jnp.zeros((1, DIM), jnp.float32),
    )


# ------------------------------ pure-JAX reference ---------------------------------

def _ln_ref(x, g, b):
    mu = x.mean(-1, keepdims=True)
    var = ((x - mu) ** 2).mean(-1, keepdims=True)
    return (x - mu) * lax.rsqrt(var + EPS) * g + b


def ref_forward(x, params):
    """float32 reference with the same (bf16-valued, scale-folded) weights as the kernel."""
    B, N, _ = x.shape
    depth = params["wqkv"].shape[0]
    f32 = lambda a: a.astype(jnp.float32)
    for l in range(depth):
        xn = _ln_ref(x, params["ln1_g"][l], params["ln1_b"][l])
        qkv = xn @ f32(params["wqkv"][l])
        q, k, v = jnp.split(qkv, 3, axis=-1)

        def sh(t):
            return t.reshape(B, N, HEADS, DIM_HEAD).transpose(0, 2, 1, 3)

        q, k, v = sh(q), sh(k), sh(v)
        dots = jnp.einsum("bhid,bhjd->bhij", q, k)     # scale pre-folded into wqkv Q cols
        attn = jax.nn.softmax(dots, axis=-1)
        attn = jnp.einsum("bhij,hg->bgij", attn, params["rw"][l])
        mu = attn.mean(axis=1, keepdims=True)
        var = ((attn - mu) ** 2).mean(axis=1, keepdims=True)
        attn = (attn - mu) * lax.rsqrt(var + EPS) \
            * params["rg"][l][None, :, None, None] + params["rb"][l][None, :, None, None]
        out = jnp.einsum("bhij,bhjd->bhid", attn, v)
        out = out.transpose(0, 2, 1, 3).reshape(B, N, INNER)
        out = out @ f32(params["wout"][l]) + params["bout"][l]
        x = x + out
        xn2 = _ln_ref(x, params["ln2_g"][l], params["ln2_b"][l])
        h = jax.nn.gelu(xn2 @ f32(params["w1"][l]) + params["b1"][l], approximate=False)
        ff = h @ f32(params["w2"][l]) + params["b2"][l]
        x = x + ff
    return _ln_ref(x, params["fin_g"], params["fin_b"])


# -------------------------------------- main ----------------------------------------

if __name__ == "__main__":
    key = jax.random.PRNGKey(0)
    kx, kp = jax.random.split(key)
    B, N, depth = 2, 8, 2
    x = jax.random.normal(kx, (B, N, DIM), jnp.float32)
    params = init_params(kp, depth)

    out = jax.block_until_ready(transformer_forward(x, params))
    ref = ref_forward(x, params)

    assert out.shape == (B, N, DIM)
    # tolerance accounts for bf16 matmul inputs inside the kernel (f32 accumulation) and
    # the approx EUP reciprocals in softmax / erf; observed error ~1e-2 worst case.
    if not jnp.allclose(out, ref, atol=3e-2, rtol=3e-2):
        raise AssertionError(
            f"kernel/reference mismatch, max abs err = {jnp.max(jnp.abs(out - ref))}")
    print("KERNEL_OK")
</pallas_src>

<mosaic_0001>
module attributes {stable_mosaic.version = 11 : i64} {
  func.func @fused_transformer_kernel(%arg0: i32, %arg1: memref<1x8x192xf32, #tpu.memory_space<vmem>>, %arg2: memref<2x1x192xf32, #tpu.memory_space<vmem>>, %arg3: memref<2x1x192xf32, #tpu.memory_space<vmem>>, %arg4: memref<2x192x1536xbf16, #tpu.memory_space<vmem>>, %arg5: memref<2x512x192xbf16, #tpu.memory_space<vmem>>, %arg6: memref<2x1x192xf32, #tpu.memory_space<vmem>>, %arg7: memref<2x1x192xf32, #tpu.memory_space<vmem>>, %arg8: memref<2x1x192xf32, #tpu.memory_space<vmem>>, %arg9: memref<2x192x768xbf16, #tpu.memory_space<vmem>>, %arg10: memref<2x1x768xf32, #tpu.memory_space<vmem>>, %arg11: memref<2x768x192xbf16, #tpu.memory_space<vmem>>, %arg12: memref<2x1x192xf32, #tpu.memory_space<vmem>>, %arg13: memref<1x192xf32, #tpu.memory_space<vmem>>, %arg14: memref<1x192xf32, #tpu.memory_space<vmem>>, %arg15: memref<16x8xf32, #tpu.memory_space<smem>>, %arg16: memref<2x8xf32, #tpu.memory_space<smem>>, %arg17: memref<2x8xf32, #tpu.memory_space<smem>>, %arg18: memref<1x8x192xf32, #tpu.memory_space<vmem>>, %arg19: memref<8x1x8x8xf32, #tpu.memory_space<vmem>>) attributes {dimension_semantics = [#tpu.dimension_semantics<parallel>], iteration_bounds = array<i64: 2>, scalar_prefetch = 0 : i64, scratch_operands = 1 : i64, tpu.core_type = #tpu.core_type<tc>, window_params = [{transform_indices = @transform_0, window_bounds = array<i64: 1, 8, 192>}, {pipeline_mode = #tpu.pipeline_mode<synchronous>, transform_indices = @transform_1, window_bounds = array<i64: 2, 1, 192>}, {pipeline_mode = #tpu.pipeline_mode<synchronous>, transform_indices = @transform_2, window_bounds = array<i64: 2, 1, 192>}, {pipeline_mode = #tpu.pipeline_mode<synchronous>, transform_indices = @transform_3, window_bounds = array<i64: 2, 192, 1536>}, {pipeline_mode = #tpu.pipeline_mode<synchronous>, transform_indices = @transform_4, window_bounds = array<i64: 2, 512, 192>}, {pipeline_mode = #tpu.pipeline_mode<synchronous>, transform_indices = @transform_5, window_bounds = array<i64: 2, 1, 192>}, {pipeline_mode = #tpu.pipeline_mode<synchronous>, transform_indices = @transform_6, window_bounds = array<i64: 2, 1, 192>}, {pipeline_mode = #tpu.pipeline_mode<synchronous>, transform_indices = @transform_7, window_bounds = array<i64: 2, 1, 192>}, {pipeline_mode = #tpu.pipeline_mode<synchronous>, transform_indices = @transform_8, window_bounds = array<i64: 2, 192, 768>}, {pipeline_mode = #tpu.pipeline_mode<synchronous>, transform_indices = @transform_9, window_bounds = array<i64: 2, 1, 768>}, {pipeline_mode = #tpu.pipeline_mode<synchronous>, transform_indices = @transform_10, window_bounds = array<i64: 2, 768, 192>}, {pipeline_mode = #tpu.pipeline_mode<synchronous>, transform_indices = @transform_11, window_bounds = array<i64: 2, 1, 192>}, {pipeline_mode = #tpu.pipeline_mode<synchronous>, transform_indices = @transform_12, window_bounds = array<i64: 1, 192>}, {pipeline_mode = #tpu.pipeline_mode<synchronous>, transform_indices = @transform_13, window_bounds = array<i64: 1, 192>}, {transform_indices = @transform_14, window_bounds = array<i64: 16, 8>}, {transform_indices = @transform_15, window_bounds = array<i64: 2, 8>}, {transform_indices = @transform_16, window_bounds = array<i64: 2, 8>}, {transform_indices = @transform_17, window_bounds = array<i64: 1, 8, 192>}]} {
    %c0 = arith.constant 0 : index
    %c0_0 = arith.constant 0 : index
    %c0_1 = arith.constant 0 : index
    %0 = vector.load %arg1[%c0, %c0_0, %c0_1] : memref<1x8x192xf32, #tpu.memory_space<vmem>>, vector<1x8x192xf32>
    %1 = vector.shape_cast %0 : vector<1x8x192xf32> to vector<8x192xf32>
    %c0_i32 = arith.constant 0 : i32
    %c2_i32 = arith.constant 2 : i32
    %2 = arith.addi %c0_i32, %c2_i32 : i32
    %c1_i32 = arith.constant 1 : i32
    %3 = scf.for %arg20 = %c0_i32 to %2 step %c1_i32 iter_args(%arg21 = %1) -> (vector<8x192xf32>)  : i32 {
      %30 = arith.index_cast %arg20 : i32 to index
      %c0_14 = arith.constant 0 : index
      %c0_15 = arith.constant 0 : index
      %31 = vector.load %arg2[%30, %c0_14, %c0_15] : memref<2x1x192xf32, #tpu.memory_space<vmem>>, vector<1x1x192xf32>
      %32 = vector.shape_cast %31 : vector<1x1x192xf32> to vector<1x192xf32>
      %33 = arith.index_cast %arg20 : i32 to index
      %c0_16 = arith.constant 0 : index
      %c0_17 = arith.constant 0 : index
      %34 = vector.load %arg3[%33, %c0_16, %c0_17] : memref<2x1x192xf32, #tpu.memory_space<vmem>>, vector<1x1x192xf32>
      %35 = vector.shape_cast %34 : vector<1x1x192xf32> to vector<1x192xf32>
      %cst_18 = arith.constant dense<0.000000e+00> : vector<8xf32>
      %36 = vector.multi_reduction <add>, %arg21, %cst_18 [1] : vector<8x192xf32> to vector<8xf32>
      %37 = vector.shape_cast %36 : vector<8xf32> to vector<8x1xf32>
      %cst_19 = arith.constant 1.920000e+02 : f32
      %38 = vector.broadcast %cst_19 : f32 to vector<8x1xf32>
      %39 = arith.divf %37, %38 : vector<8x1xf32>
      %40 = vector.broadcast %39 : vector<8x1xf32> to vector<8x192xf32>
      %41 = arith.subf %arg21, %40 : vector<8x192xf32>
      %42 = arith.mulf %41, %41 : vector<8x192xf32>
      %cst_20 = arith.constant dense<0.000000e+00> : vector<8xf32>
      %43 = vector.multi_reduction <add>, %42, %cst_20 [1] : vector<8x192xf32> to vector<8xf32>
      %44 = vector.shape_cast %43 : vector<8xf32> to vector<8x1xf32>
      %cst_21 = arith.constant 1.920000e+02 : f32
      %45 = vector.broadcast %cst_21 : f32 to vector<8x1xf32>
      %46 = arith.divf %44, %45 : vector<8x1xf32>
      %47 = vector.broadcast %39 : vector<8x1xf32> to vector<8x192xf32>
      %48 = arith.subf %arg21, %47 : vector<8x192xf32>
      %cst_22 = arith.constant 9.99999974E-6 : f32
      %49 = vector.broadcast %cst_22 : f32 to vector<8x1xf32>
      %50 = arith.addf %46, %49 : vector<8x1xf32>
      %51 = math.rsqrt %50 : vector<8x1xf32>
      %52 = vector.broadcast %51 : vector<8x1xf32> to vector<8x192xf32>
      %53 = arith.mulf %48, %52 : vector<8x192xf32>
      %54 = vector.broadcast %32 : vector<1x192xf32> to vector<8x192xf32>
      %55 = arith.mulf %53, %54 : vector<8x192xf32>
      %56 = vector.broadcast %35 : vector<1x192xf32> to vector<8x192xf32>
      %57 = arith.addf %55, %56 : vector<8x192xf32>
      %58 = arith.truncf %57 : vector<8x192xf32> to vector<8x192xbf16>
      %59 = arith.index_cast %arg20 : i32 to index
      %c0_23 = arith.constant 0 : index
      %c0_24 = arith.constant 0 : index
      %60 = vector.load %arg4[%59, %c0_23, %c0_24] : memref<2x192x1536xbf16, #tpu.memory_space<vmem>>, vector<1x192x1536xbf16>
      %61 = vector.shape_cast %60 : vector<1x192x1536xbf16> to vector<192x1536xbf16>
      %cst_25 = arith.constant dense<0.000000e+00> : vector<8x1536xf32>
      %62 = tpu.matmul %58, %61, %cst_25 {dimension_numbers = #tpu.dot_dimension_numbers<[1], [0], [0], [1], [0, 0, 1, 1], [], []>} : vector<8x192xbf16>, vector<192x1536xbf16>, vector<8x1536xf32> -> vector<8x1536xf32>
      %63 = vector.extract_strided_slice %62 {offsets = [0, 0], sizes = [8, 64], strides = [1, 1]} : vector<8x1536xf32> to vector<8x64xf32>
      %64 = vector.shape_cast %63 : vector<8x64xf32> to vector<1x8x64xf32>
      %65 = arith.truncf %64 : vector<1x8x64xf32> to vector<1x8x64xbf16>
      %66 = vector.extract_strided_slice %62 {offsets = [0, 512], sizes = [8, 64], strides = [1, 1]} : vector<8x1536xf32> to vector<8x64xf32>
      %67 = vector.shape_cast %66 : vector<8x64xf32> to vector<1x8x64xf32>
      %68 = arith.truncf %67 : vector<1x8x64xf32> to vector<1x8x64xbf16>
      "tpu.trace_start"() <{level = 10 : i32, message = "bid,bjd->bij"}> : () -> ()
      %cst_26 = arith.constant dense<0.000000e+00> : vector<1x8x8xf32>
      %69 = tpu.matmul %65, %68, %cst_26 {dimension_numbers = #tpu.dot_dimension_numbers<[2], [2], [1], [1], [0, 0, 0, 1, 1, 1], [0], [0]>} : vector<1x8x64xbf16>, vector<1x8x64xbf16>, vector<1x8x8xf32> -> vector<1x8x8xf32>
      "tpu.trace_stop"() : () -> ()
      %cst_27 = arith.constant dense<0xFF800000> : vector<1x8xf32>
      %70 = vector.multi_reduction <maximumf>, %69, %cst_27 [2] : vector<1x8x8xf32> to vector<1x8xf32>
      %71 = vector.shape_cast %70 : vector<1x8xf32> to vector<1x8x1xf32>
      %72 = vector.broadcast %71 : vector<1x8x1xf32> to vector<1x8x8xf32>
      %73 = arith.subf %69, %72 : vector<1x8x8xf32>
      %74 = math.exp %73 : vector<1x8x8xf32>
      %cst_28 = arith.constant dense<0.000000e+00> : vector<1x8xf32>
      %75 = vector.multi_reduction <add>, %74, %cst_28 [2] : vector<1x8x8xf32> to vector<1x8xf32>
      %76 = vector.shape_cast %75 : vector<1x8xf32> to vector<1x8x1xf32>
      %77 = tpu.reciprocal %76 {approx = true} : vector<1x8x1xf32> -> vector<1x8x1xf32>
      %78 = vector.broadcast %77 : vector<1x8x1xf32> to vector<1x8x8xf32>
      %79 = arith.mulf %74, %78 : vector<1x8x8xf32>
      %80 = vector.extract_strided_slice %62 {offsets = [0, 64], sizes = [8, 64], strides = [1, 1]} : vector<8x1536xf32> to vector<8x64xf32>
      %81 = vector.shape_cast %80 : vector<8x64xf32> to vector<1x8x64xf32>
      %82 = arith.truncf %81 : vector<1x8x64xf32> to vector<1x8x64xbf16>
      %83 = vector.extract_strided_slice %62 {offsets = [0, 576], sizes = [8, 64], strides = [1, 1]} : vector<8x1536xf32> to vector<8x64xf32>
      %84 = vector.shape_cast %83 : vector<8x64xf32> to vector<1x8x64xf32>
      %85 = arith.truncf %84 : vector<1x8x64xf32> to vector<1x8x64xbf16>
      "tpu.trace_start"() <{level = 10 : i32, message = "bid,bjd->bij"}> : () -> ()
      %cst_29 = arith.constant dense<0.000000e+00> : vector<1x8x8xf32>
      %86 = tpu.matmul %82, %85, %cst_29 {dimension_numbers = #tpu.dot_dimension_numbers<[2], [2], [1], [1], [0, 0, 0, 1, 1, 1], [0], [0]>} : vector<1x8x64xbf16>, vector<1x8x64xbf16>, vector<1x8x8xf32> -> vector<1x8x8xf32>
      "tpu.trace_stop"() : () -> ()
      %cst_30 = arith.constant dense<0xFF800000> : vector<1x8xf32>
      %87 = vector.multi_reduction <maximumf>, %86, %cst_30 [2] : vector<1x8x8xf32> to vector<1x8xf32>
      %88 = vector.shape_cast %87 : vector<1x8xf32> to vector<1x8x1xf32>
      %89 = vector.broadcast %88 : vector<1x8x1xf32> to vector<1x8x8xf32>
      %90 = arith.subf %86, %89 : vector<1x8x8xf32>
      %91 = math.exp %90 : vector<1x8x8xf32>
      %cst_31 = arith.constant dense<0.000000e+00> : vector<1x8xf32>
      %92 = vector.multi_reduction <add>, %91, %cst_31 [2] : vector<1x8x8xf32> to vector<1x8xf32>
      %93 = vector.shape_cast %92 : vector<1x8xf32> to vector<1x8x1xf32>
      %94 = tpu.reciprocal %93 {approx = true} : vector<1x8x1xf32> -> vector<1x8x1xf32>
      %95 = vector.broadcast %94 : vector<1x8x1xf32> to vector<1x8x8xf32>
      %96 = arith.mulf %91, %95 : vector<1x8x8xf32>
      %97 = vector.extract_strided_slice %62 {offsets = [0, 128], sizes = [8, 64], strides = [1, 1]} : vector<8x1536xf32> to vector<8x64xf32>
      %98 = vector.shape_cast %97 : vector<8x64xf32> to vector<1x8x64xf32>
      %99 = arith.truncf %98 : vector<1x8x64xf32> to vector<1x8x64xbf16>
      %100 = vector.extract_strided_slice %62 {offsets = [0, 640], sizes = [8, 64], strides = [1, 1]} : vector<8x1536xf32> to vector<8x64xf32>
      %101 = vector.shape_cast %100 : vector<8x64xf32> to vector<1x8x64xf32>
      %102 = arith.truncf %101 : vector<1x8x64xf32> to vector<1x8x64xbf16>
      "tpu.trace_start"() <{level = 10 : i32, message = "bid,bjd->bij"}> : () -> ()
      %cst_32 = arith.constant dense<0.000000e+00> : vector<1x8x8xf32>
      %103 = tpu.matmul %99, %102, %cst_32 {dimension_numbers = #tpu.dot_dimension_numbers<[2], [2], [1], [1], [0, 0, 0, 1, 1, 1], [0], [0]>} : vector<1x8x64xbf16>, vector<1x8x64xbf16>, vector<1x8x8xf32> -> vector<1x8x8xf32>
      "tpu.trace_stop"() : () -> ()
      %cst_33 = arith.constant dense<0xFF800000> : vector<1x8xf32>
      %104 = vector.multi_reduction <maximumf>, %103, %cst_33 [2] : vector<1x8x8xf32> to vector<1x8xf32>
      %105 = vector.shape_cast %104 : vector<1x8xf32> to vector<1x8x1xf32>
      %106 = vector.broadcast %105 : vector<1x8x1xf32> to vector<1x8x8xf32>
      %107 = arith.subf %103, %106 : vector<1x8x8xf32>
      %108 = math.exp %107 : vector<1x8x8xf32>
      %cst_34 = arith.constant dense<0.000000e+00> : vector<1x8xf32>
      %109 = vector.multi_reduction <add>, %108, %cst_34 [2] : vector<1x8x8xf32> to vector<1x8xf32>
      %110 = vector.shape_cast %109 : vector<1x8xf32> to vector<1x8x1xf32>
      %111 = tpu.reciprocal %110 {approx = true} : vector<1x8x1xf32> -> vector<1x8x1xf32>
      %112 = vector.broadcast %111 : vector<1x8x1xf32> to vector<1x8x8xf32>
      %113 = arith.mulf %108, %112 : vector<1x8x8xf32>
      %114 = vector.extract_strided_slice %62 {offsets = [0, 192], sizes = [8, 64], strides = [1, 1]} : vector<8x1536xf32> to vector<8x64xf32>
      %115 = vector.shape_cast %114 : vector<8x64xf32> to vector<1x8x64xf32>
      %116 = arith.truncf %115 : vector<1x8x64xf32> to vector<1x8x64xbf16>
      %117 = vector.extract_strided_slice %62 {offsets = [0, 704], sizes = [8, 64], strides = [1, 1]} : vector<8x1536xf32> to vector<8x64xf32>
      %118 = vector.shape_cast %117 : vector<8x64xf32> to vector<1x8x64xf32>
      %119 = arith.truncf %118 : vector<1x8x64xf32> to vector<1x8x64xbf16>
      "tpu.trace_start"() <{level = 10 : i32, message = "bid,bjd->bij"}> : () -> ()
      %cst_35 = arith.constant dense<0.000000e+00> : vector<1x8x8xf32>
      %120 = tpu.matmul %116, %119, %cst_35 {dimension_numbers = #tpu.dot_dimension_numbers<[2], [2], [1], [1], [0, 0, 0, 1, 1, 1], [0], [0]>} : vector<1x8x64xbf16>, vector<1x8x64xbf16>, vector<1x8x8xf32> -> vector<1x8x8xf32>
      "tpu.trace_stop"() : () -> ()
      %cst_36 = arith.constant dense<0xFF800000> : vector<1x8xf32>
      %121 = vector.multi_reduction <maximumf>, %120, %cst_36 [2] : vector<1x8x8xf32> to vector<1x8xf32>
      %122 = vector.shape_cast %121 : vector<1x8xf32> to vector<1x8x1xf32>
      %123 = vector.broadcast %122 : vector<1x8x1xf32> to vector<1x8x8xf32>
      %124 = arith.subf %120, %123 : vector<1x8x8xf32>
      %125 = math.exp %124 : vector<1x8x8xf32>
      %cst_37 = arith.constant dense<0.000000e+00> : vector<1x8xf32>
      %126 = vector.multi_reduction <add>, %125, %cst_37 [2] : vector<1x8x8xf32> to vector<1x8xf32>
      %127 = vector.shape_cast %126 : vector<1x8xf32> to vector<1x8x1xf32>
      %128 = tpu.reciprocal %127 {approx = true} : vector<1x8x1xf32> -> vector<1x8x1xf32>
      %129 = vector.broadcast %128 : vector<1x8x1xf32> to vector<1x8x8xf32>
      %130 = arith.mulf %125, %129 : vector<1x8x8xf32>
      %131 = vector.extract_strided_slice %62 {offsets = [0, 256], sizes = [8, 64], strides = [1, 1]} : vector<8x1536xf32> to vector<8x64xf32>
      %132 = vector.shape_cast %131 : vector<8x64xf32> to vector<1x8x64xf32>
      %133 = arith.truncf %132 : vector<1x8x64xf32> to vector<1x8x64xbf16>
      %134 = vector.extract_strided_slice %62 {offsets = [0, 768], sizes = [8, 64], strides = [1, 1]} : vector<8x1536xf32> to vector<8x64xf32>
      %135 = vector.shape_cast %134 : vector<8x64xf32> to vector<1x8x64xf32>
      %136 = arith.truncf %135 : vector<1x8x64xf32> to vector<1x8x64xbf16>
      "tpu.trace_start"() <{level = 10 : i32, message = "bid,bjd->bij"}> : () -> ()
      %cst_38 = arith.constant dense<0.000000e+00> : vector<1x8x8xf32>
      %137 = tpu.matmul %133, %136, %cst_38 {dimension_numbers = #tpu.dot_dimension_numbers<[2], [2], [1], [1], [0, 0, 0, 1, 1, 1], [0], [0]>} : vector<1x8x64xbf16>, vector<1x8x64xbf16>, vector<1x8x8xf32> -> vector<1x8x8xf32>
      "tpu.trace_stop"() : () -> ()
      %cst_39 = arith.constant dense<0xFF800000> : vector<1x8xf32>
      %138 = vector.multi_reduction <maximumf>, %137, %cst_39 [2] : vector<1x8x8xf32> to vector<1x8xf32>
      %139 = vector.shape_cast %138 : vector<1x8xf32> to vector<1x8x1xf32>
      %140 = vector.broadcast %139 : vector<1x8x1xf32> to vector<1x8x8xf32>
      %141 = arith.subf %137, %140 : vector<1x8x8xf32>
      %142 = math.exp %141 : vector<1x8x8xf32>
      %cst_40 = arith.constant dense<0.000000e+00> : vector<1x8xf32>
      %143 = vector.multi_reduction <add>, %142, %cst_40 [2] : vector<1x8x8xf32> to vector<1x8xf32>
      %144 = vector.shape_cast %143 : vector<1x8xf32> to vector<1x8x1xf32>
      %145 = tpu.reciprocal %144 {approx = true} : vector<1x8x1xf32> -> vector<1x8x1xf32>
      %146 = vector.broadcast %145 : vector<1x8x1xf32> to vector<1x8x8xf32>
      %147 = arith.mulf %142, %146 : vector<1x8x8xf32>
      %148 = vector.extract_strided_slice %62 {offsets = [0, 320], sizes = [8, 64], strides = [1, 1]} : vector<8x1536xf32> to vector<8x64xf32>
      %149 = vector.shape_cast %148 : vector<8x64xf32> to vector<1x8x64xf32>
      %150 = arith.truncf %149 : vector<1x8x64xf32> to vector<1x8x64xbf16>
      %151 = vector.extract_strided_slice %62 {offsets = [0, 832], sizes = [8, 64], strides = [1, 1]} : vector<8x1536xf32> to vector<8x64xf32>
      %152 = vector.shape_cast %151 : vector<8x64xf32> to vector<1x8x64xf32>
      %153 = arith.truncf %152 : vector<1x8x64xf32> to vector<1x8x64xbf16>
      "tpu.trace_start"() <{level = 10 : i32, message = "bid,bjd->bij"}> : () -> ()
      %cst_41 = arith.constant dense<0.000000e+00> : vector<1x8x8xf32>
      %154 = tpu.matmul %150, %153, %cst_41 {dimension_numbers = #tpu.dot_dimension_numbers<[2], [2], [1], [1], [0, 0, 0, 1, 1, 1], [0], [0]>} : vector<1x8x64xbf16>, vector<1x8x64xbf16>, vector<1x8x8xf32> -> vector<1x8x8xf32>
      "tpu.trace_stop"() : () -> ()
      %cst_42 = arith.constant dense<0xFF800000> : vector<1x8xf32>
      %155 = vector.multi_reduction <maximumf>, %154, %cst_42 [2] : vector<1x8x8xf32> to vector<1x8xf32>
      %156 = vector.shape_cast %155 : vector<1x8xf32> to vector<1x8x1xf32>
      %157 = vector.broadcast %156 : vector<1x8x1xf32> to vector<1x8x8xf32>
      %158 = arith.subf %154, %157 : vector<1x8x8xf32>
      %159 = math.exp %158 : vector<1x8x8xf32>
      %cst_43 = arith.constant dense<0.000000e+00> : vector<1x8xf32>
      %160 = vector.multi_reduction <add>, %159, %cst_43 [2] : vector<1x8x8xf32> to vector<1x8xf32>
      %161 = vector.shape_cast %160 : vector<1x8xf32> to vector<1x8x1xf32>
      %162 = tpu.reciprocal %161 {approx = true} : vector<1x8x1xf32> -> vector<1x8x1xf32>
      %163 = vector.broadcast %162 : vector<1x8x1xf32> to vector<1x8x8xf32>
      %164 = arith.mulf %159, %163 : vector<1x8x8xf32>
      %165 = vector.extract_strided_slice %62 {offsets = [0, 384], sizes = [8, 64], strides = [1, 1]} : vector<8x1536xf32> to vector<8x64xf32>
      %166 = vector.shape_cast %165 : vector<8x64xf32> to vector<1x8x64xf32>
      %167 = arith.truncf %166 : vector<1x8x64xf32> to vector<1x8x64xbf16>
      %168 = vector.extract_strided_slice %62 {offsets = [0, 896], sizes = [8, 64], strides = [1, 1]} : vector<8x1536xf32> to vector<8x64xf32>
      %169 = vector.shape_cast %168 : vector<8x64xf32> to vector<1x8x64xf32>
      %170 = arith.truncf %169 : vector<1x8x64xf32> to vector<1x8x64xbf16>
      "tpu.trace_start"() <{level = 10 : i32, message = "bid,bjd->bij"}> : () -> ()
      %cst_44 = arith.constant dense<0.000000e+00> : vector<1x8x8xf32>
      %171 = tpu.matmul %167, %170, %cst_44 {dimension_numbers = #tpu.dot_dimension_numbers<[2], [2], [1], [1], [0, 0, 0, 1, 1, 1], [0], [0]>} : vector<1x8x64xbf16>, vector<1x8x64xbf16>, vector<1x8x8xf32> -> vector<1x8x8xf32>
      "tpu.trace_stop"() : () -> ()
      %cst_45 = arith.constant dense<0xFF800000> : vector<1x8xf32>
      %172 = vector.multi_reduction <maximumf>, %171, %cst_45 [2] : vector<1x8x8xf32> to vector<1x8xf32>
      %173 = vector.shape_cast %172 : vector<1x8xf32> to vector<1x8x1xf32>
      %174 = vector.broadcast %173 : vector<1x8x1xf32> to vector<1x8x8xf32>
      %175 = arith.subf %171, %174 : vector<1x8x8xf32>
      %176 = math.exp %175 : vector<1x8x8xf32>
      %cst_46 = arith.constant dense<0.000000e+00> : vector<1x8xf32>
      %177 = vector.multi_reduction <add>, %176, %cst_46 [2] : vector<1x8x8xf32> to vector<1x8xf32>
      %178 = vector.shape_cast %177 : vector<1x8xf32> to vector<1x8x1xf32>
      %179 = tpu.reciprocal %178 {approx = true} : vector<1x8x1xf32> -> vector<1x8x1xf32>
      %180 = vector.broadcast %179 : vector<1x8x1xf32> to vector<1x8x8xf32>
      %181 = arith.mulf %176, %180 : vector<1x8x8xf32>
      %182 = vector.extract_strided_slice %62 {offsets = [0, 448], sizes = [8, 64], strides = [1, 1]} : vector<8x1536xf32> to vector<8x64xf32>
      %183 = vector.shape_cast %182 : vector<8x64xf32> to vector<1x8x64xf32>
      %184 = arith.truncf %183 : vector<1x8x64xf32> to vector<1x8x64xbf16>
      %185 = vector.extract_strided_slice %62 {offsets = [0, 960], sizes = [8, 64], strides = [1, 1]} : vector<8x1536xf32> to vector<8x64xf32>
      %186 = vector.shape_cast %185 : vector<8x64xf32> to vector<1x8x64xf32>
      %187 = arith.truncf %186 : vector<1x8x64xf32> to vector<1x8x64xbf16>
      "tpu.trace_start"() <{level = 10 : i32, message = "bid,bjd->bij"}> : () -> ()
      %cst_47 = arith.constant dense<0.000000e+00> : vector<1x8x8xf32>
      %188 = tpu.matmul %184, %187, %cst_47 {dimension_numbers = #tpu.dot_dimension_numbers<[2], [2], [1], [1], [0, 0, 0, 1, 1, 1], [0], [0]>} : vector<1x8x64xbf16>, vector<1x8x64xbf16>, vector<1x8x8xf32> -> vector<1x8x8xf32>
      "tpu.trace_stop"() : () -> ()
      %cst_48 = arith.constant dense<0xFF800000> : vector<1x8xf32>
      %189 = vector.multi_reduction <maximumf>, %188, %cst_48 [2] : vector<1x8x8xf32> to vector<1x8xf32>
      %190 = vector.shape_cast %189 : vector<1x8xf32> to vector<1x8x1xf32>
      %191 = vector.broadcast %190 : vector<1x8x1xf32> to vector<1x8x8xf32>
      %192 = arith.subf %188, %191 : vector<1x8x8xf32>
      %193 = math.exp %192 : vector<1x8x8xf32>
      %cst_49 = arith.constant dense<0.000000e+00> : vector<1x8xf32>
      %194 = vector.multi_reduction <add>, %193, %cst_49 [2] : vector<1x8x8xf32> to vector<1x8xf32>
      %195 = vector.shape_cast %194 : vector<1x8xf32> to vector<1x8x1xf32>
      %196 = tpu.reciprocal %195 {approx = true} : vector<1x8x1xf32> -> vector<1x8x1xf32>
      %197 = vector.broadcast %196 : vector<1x8x1xf32> to vector<1x8x8xf32>
      %198 = arith.mulf %193, %197 : vector<1x8x8xf32>
      %c8_i32 = arith.constant 8 : i32
      %199 = arith.muli %arg20, %c8_i32 : i32
      %c0_i32_50 = arith.constant 0 : i32
      %200 = arith.addi %199, %c0_i32_50 : i32
      %201 = arith.index_cast %200 : i32 to index
      %c0_51 = arith.constant 0 : index
      %202 = memref.load %arg15[%201, %c0_51] : memref<16x8xf32, #tpu.memory_space<smem>>
      %c8_i32_52 = arith.constant 8 : i32
      %203 = arith.muli %arg20, %c8_i32_52 : i32
      %c0_i32_53 = arith.constant 0 : i32
      %204 = arith.addi %203, %c0_i32_53 : i32
      %205 = arith.index_cast %204 : i32 to index
      %c1 = arith.constant 1 : index
      %206 = memref.load %arg15[%205, %c1] : memref<16x8xf32, #tpu.memory_space<smem>>
      %207 = arith.addf %202, %206 : f32
      %c8_i32_54 = arith.constant 8 : i32
      %208 = arith.muli %arg20, %c8_i32_54 : i32
      %c0_i32_55 = arith.constant 0 : i32
      %209 = arith.addi %208, %c0_i32_55 : i32
      %210 = arith.index_cast %209 : i32 to index
      %c2 = arith.constant 2 : index
      %211 = memref.load %arg15[%210, %c2] : memref<16x8xf32, #tpu.memory_space<smem>>
      %212 = arith.addf %207, %211 : f32
      %c8_i32_56 = arith.constant 8 : i32
      %213 = arith.muli %arg20, %c8_i32_56 : i32
      %c0_i32_57 = arith.constant 0 : i32
      %214 = arith.addi %213, %c0_i32_57 : i32
      %215 = arith.index_cast %214 : i32 to index
      %c3 = arith.constant 3 : index
      %216 = memref.load %arg15[%215, %c3] : memref<16x8xf32, #tpu.memory_space<smem>>
      %217 = arith.addf %212, %216 : f32
      %c8_i32_58 = arith.constant 8 : i32
      %218 = arith.muli %arg20, %c8_i32_58 : i32
      %c0_i32_59 = arith.constant 0 : i32
      %219 = arith.addi %218, %c0_i32_59 : i32
      %220 = arith.index_cast %219 : i32 to index
      %c4 = arith.constant 4 : index
      %221 = memref.load %arg15[%220, %c4] : memref<16x8xf32, #tpu.memory_space<smem>>
      %222 = arith.addf %217, %221 : f32
      %c8_i32_60 = arith.constant 8 : i32
      %223 = arith.muli %arg20, %c8_i32_60 : i32
      %c0_i32_61 = arith.constant 0 : i32
      %224 = arith.addi %223, %c0_i32_61 : i32
      %225 = arith.index_cast %224 : i32 to index
      %c5 = arith.constant 5 : index
      %226 = memref.load %arg15[%225, %c5] : memref<16x8xf32, #tpu.memory_space<smem>>
      %227 = arith.addf %222, %226 : f32
      %c8_i32_62 = arith.constant 8 : i32
      %228 = arith.muli %arg20, %c8_i32_62 : i32
      %c0_i32_63 = arith.constant 0 : i32
      %229 = arith.addi %228, %c0_i32_63 : i32
      %230 = arith.index_cast %229 : i32 to index
      %c6 = arith.constant 6 : index
      %231 = memref.load %arg15[%230, %c6] : memref<16x8xf32, #tpu.memory_space<smem>>
      %232 = arith.addf %227, %231 : f32
      %c8_i32_64 = arith.constant 8 : i32
      %233 = arith.muli %arg20, %c8_i32_64 : i32
      %c0_i32_65 = arith.constant 0 : i32
      %234 = arith.addi %233, %c0_i32_65 : i32
      %235 = arith.index_cast %234 : i32 to index
      %c7 = arith.constant 7 : index
      %236 = memref.load %arg15[%235, %c7] : memref<16x8xf32, #tpu.memory_space<smem>>
      %237 = arith.addf %232, %236 : f32
      %cst_66 = arith.constant 1.250000e-01 : f32
      %238 = arith.mulf %237, %cst_66 : f32
      %239 = vector.broadcast %238 : f32 to vector<1x8x8xf32>
      %240 = arith.mulf %239, %79 : vector<1x8x8xf32>
      %c8_i32_67 = arith.constant 8 : i32
      %241 = arith.muli %arg20, %c8_i32_67 : i32
      %c1_i32_68 = arith.constant 1 : i32
      %242 = arith.addi %241, %c1_i32_68 : i32
      %243 = arith.index_cast %242 : i32 to index
      %c0_69 = arith.constant 0 : index
      %244 = memref.load %arg15[%243, %c0_69] : memref<16x8xf32, #tpu.memory_space<smem>>
      %c8_i32_70 = arith.constant 8 : i32
      %245 = arith.muli %arg20, %c8_i32_70 : i32
      %c1_i32_71 = arith.constant 1 : i32
      %246 = arith.addi %245, %c1_i32_71 : i32
      %247 = arith.index_cast %246 : i32 to index
      %c1_72 = arith.constant 1 : index
      %248 = memref.load %arg15[%247, %c1_72] : memref<16x8xf32, #tpu.memory_space<smem>>
      %249 = arith.addf %244, %248 : f32
      %c8_i32_73 = arith.constant 8 : i32
      %250 = arith.muli %arg20, %c8_i32_73 : i32
      %c1_i32_74 = arith.constant 1 : i32
      %251 = arith.addi %250, %c1_i32_74 : i32
      %252 = arith.index_cast %251 : i32 to index
      %c2_75 = arith.constant 2 : index
      %253 = memref.load %arg15[%252, %c2_75] : memref<16x8xf32, #tpu.memory_space<smem>>
      %254 = arith.addf %249, %253 : f32
      %c8_i32_76 = arith.constant 8 : i32
      %255 = arith.muli %arg20, %c8_i32_76 : i32
      %c1_i32_77 = arith.constant 1 : i32
      %256 = arith.addi %255, %c1_i32_77 : i32
      %257 = arith.index_cast %256 : i32 to index
      %c3_78 = arith.constant 3 : index
      %258 = memref.load %arg15[%257, %c3_78] : memref<16x8xf32, #tpu.memory_space<smem>>
      %259 = arith.addf %254, %258 : f32
      %c8_i32_79 = arith.constant 8 : i32
      %260 = arith.muli %arg20, %c8_i32_79 : i32
      %c1_i32_80 = arith.constant 1 : i32
      %261 = arith.addi %260, %c1_i32_80 : i32
      %262 = arith.index_cast %261 : i32 to index
      %c4_81 = arith.constant 4 : index
      %263 = memref.load %arg15[%262, %c4_81] : memref<16x8xf32, #tpu.memory_space<smem>>
      %264 = arith.addf %259, %263 : f32
      %c8_i32_82 = arith.constant 8 : i32
      %265 = arith.muli %arg20, %c8_i32_82 : i32
      %c1_i32_83 = arith.constant 1 : i32
      %266 = arith.addi %265, %c1_i32_83 : i32
      %267 = arith.index_cast %266 : i32 to index
      %c5_84 = arith.constant 5 : index
      %268 = memref.load %arg15[%267, %c5_84] : memref<16x8xf32, #tpu.memory_space<smem>>
      %269 = arith.addf %264, %268 : f32
      %c8_i32_85 = arith.constant 8 : i32
      %270 = arith.muli %arg20, %c8_i32_85 : i32
      %c1_i32_86 = arith.constant 1 : i32
      %271 = arith.addi %270, %c1_i32_86 : i32
      %272 = arith.index_cast %271 : i32 to index
      %c6_87 = arith.constant 6 : index
      %273 = memref.load %arg15[%272, %c6_87] : memref<16x8xf32, #tpu.memory_space<smem>>
      %274 = arith.addf %269, %273 : f32
      %c8_i32_88 = arith.constant 8 : i32
      %275 = arith.muli %arg20, %c8_i32_88 : i32
      %c1_i32_89 = arith.constant 1 : i32
      %276 = arith.addi %275, %c1_i32_89 : i32
      %277 = arith.index_cast %276 : i32 to index
      %c7_90 = arith.constant 7 : index
      %278 = memref.load %arg15[%277, %c7_90] : memref<16x8xf32, #tpu.memory_space<smem>>
      %279 = arith.addf %274, %278 : f32
      %cst_91 = arith.constant 1.250000e-01 : f32
      %280 = arith.mulf %279, %cst_91 : f32
      %281 = vector.broadcast %280 : f32 to vector<1x8x8xf32>
      %282 = arith.mulf %281, %96 : vector<1x8x8xf32>
      %283 = arith.addf %240, %282 : vector<1x8x8xf32>
      %c8_i32_92 = arith.constant 8 : i32
      %284 = arith.muli %arg20, %c8_i32_92 : i32
      %c2_i32_93 = arith.constant 2 : i32
      %285 = arith.addi %284, %c2_i32_93 : i32
      %286 = arith.index_cast %285 : i32 to index
      %c0_94 = arith.constant 0 : index
      %287 = memref.load %arg15[%286, %c0_94] : memref<16x8xf32, #tpu.memory_space<smem>>
      %c8_i32_95 = arith.constant 8 : i32
      %288 = arith.muli %arg20, %c8_i32_95 : i32
      %c2_i32_96 = arith.constant 2 : i32
      %289 = arith.addi %288, %c2_i32_96 : i32
      %290 = arith.index_cast %289 : i32 to index
      %c1_97 = arith.constant 1 : index
      %291 = memref.load %arg15[%290, %c1_97] : memref<16x8xf32, #tpu.memory_space<smem>>
      %292 = arith.addf %287, %291 : f32
      %c8_i32_98 = arith.constant 8 : i32
      %293 = arith.muli %arg20, %c8_i32_98 : i32
      %c2_i32_99 = arith.constant 2 : i32
      %294 = arith.addi %293, %c2_i32_99 : i32
      %295 = arith.index_cast %294 : i32 to index
      %c2_100 = arith.constant 2 : index
      %296 = memref.load %arg15[%295, %c2_100] : memref<16x8xf32, #tpu.memory_space<smem>>
      %297 = arith.addf %292, %296 : f32
      %c8_i32_101 = arith.constant 8 : i32
      %298 = arith.muli %arg20, %c8_i32_101 : i32
      %c2_i32_102 = arith.constant 2 : i32
      %299 = arith.addi %298, %c2_i32_102 : i32
      %300 = arith.index_cast %299 : i32 to index
      %c3_103 = arith.constant 3 : index
      %301 = memref.load %arg15[%300, %c3_103] : memref<16x8xf32, #tpu.memory_space<smem>>
      %302 = arith.addf %297, %301 : f32
      %c8_i32_104 = arith.constant 8 : i32
      %303 = arith.muli %arg20, %c8_i32_104 : i32
      %c2_i32_105 = arith.constant 2 : i32
      %304 = arith.addi %303, %c2_i32_105 : i32
      %305 = arith.index_cast %304 : i32 to index
      %c4_106 = arith.constant 4 : index
      %306 = memref.load %arg15[%305, %c4_106] : memref<16x8xf32, #tpu.memory_space<smem>>
      %307 = arith.addf %302, %306 : f32
      %c8_i32_107 = arith.constant 8 : i32
      %308 = arith.muli %arg20, %c8_i32_107 : i32
      %c2_i32_108 = arith.constant 2 : i32
      %309 = arith.addi %308, %c2_i32_108 : i32
      %310 = arith.index_cast %309 : i32 to index
      %c5_109 = arith.constant 5 : index
      %311 = memref.load %arg15[%310, %c5_109] : memref<16x8xf32, #tpu.memory_space<smem>>
      %312 = arith.addf %307, %311 : f32
      %c8_i32_110 = arith.constant 8 : i32
      %313 = arith.muli %arg20, %c8_i32_110 : i32
      %c2_i32_111 = arith.constant 2 : i32
      %314 = arith.addi %313, %c2_i32_111 : i32
      %315 = arith.index_cast %314 : i32 to index
      %c6_112 = arith.constant 6 : index
      %316 = memref.load %arg15[%315, %c6_112] : memref<16x8xf32, #tpu.memory_space<smem>>
      %317 = arith.addf %312, %316 : f32
      %c8_i32_113 = arith.constant 8 : i32
      %318 = arith.muli %arg20, %c8_i32_113 : i32
      %c2_i32_114 = arith.constant 2 : i32
      %319 = arith.addi %318, %c2_i32_114 : i32
      %320 = arith.index_cast %319 : i32 to index
      %c7_115 = arith.constant 7 : index
      %321 = memref.load %arg15[%320, %c7_115] : memref<16x8xf32, #tpu.memory_space<smem>>
      %322 = arith.addf %317, %321 : f32
      %cst_116 = arith.constant 1.250000e-01 : f32
      %323 = arith.mulf %322, %cst_116 : f32
      %324 = vector.broadcast %323 : f32 to vector<1x8x8xf32>
      %325 = arith.mulf %324, %113 : vector<1x8x8xf32>
      %326 = arith.addf %283, %325 : vector<1x8x8xf32>
      %c8_i32_117 = arith.constant 8 : i32
      %327 = arith.muli %arg20, %c8_i32_117 : i32
      %c3_i32 = arith.constant 3 : i32
      %328 = arith.addi %327, %c3_i32 : i32
      %329 = arith.index_cast %328 : i32 to index
      %c0_118 = arith.constant 0 : index
      %330 = memref.load %arg15[%329, %c0_118] : memref<16x8xf32, #tpu.memory_space<smem>>
      %c8_i32_119 = arith.constant 8 : i32
      %331 = arith.muli %arg20, %c8_i32_119 : i32
      %c3_i32_120 = arith.constant 3 : i32
      %332 = arith.addi %331, %c3_i32_120 : i32
      %333 = arith.index_cast %332 : i32 to index
      %c1_121 = arith.constant 1 : index
      %334 = memref.load %arg15[%333, %c1_121] : memref<16x8xf32, #tpu.memory_space<smem>>
      %335 = arith.addf %330, %334 : f32
      %c8_i32_122 = arith.constant 8 : i32
      %336 = arith.muli %arg20, %c8_i32_122 : i32
      %c3_i32_123 = arith.constant 3 : i32
      %337 = arith.addi %336, %c3_i32_123 : i32
      %338 = arith.index_cast %337 : i32 to index
      %c2_124 = arith.constant 2 : index
      %339 = memref.load %arg15[%338, %c2_124] : memref<16x8xf32, #tpu.memory_space<smem>>
      %340 = arith.addf %335, %339 : f32
      %c8_i32_125 = arith.constant 8 : i32
      %341 = arith.muli %arg20, %c8_i32_125 : i32
      %c3_i32_126 = arith.constant 3 : i32
      %342 = arith.addi %341, %c3_i32_126 : i32
      %343 = arith.index_cast %342 : i32 to index
      %c3_127 = arith.constant 3 : index
      %344 = memref.load %arg15[%343, %c3_127] : memref<16x8xf32, #tpu.memory_space<smem>>
      %345 = arith.addf %340, %344 : f32
      %c8_i32_128 = arith.constant 8 : i32
      %346 = arith.muli %arg20, %c8_i32_128 : i32
      %c3_i32_129 = arith.constant 3 : i32
      %347 = arith.addi %346, %c3_i32_129 : i32
      %348 = arith.index_cast %347 : i32 to index
      %c4_130 = arith.constant 4 : index
      %349 = memref.load %arg15[%348, %c4_130] : memref<16x8xf32, #tpu.memory_space<smem>>
      %350 = arith.addf %345, %349 : f32
      %c8_i32_131 = arith.constant 8 : i32
      %351 = arith.muli %arg20, %c8_i32_131 : i32
      %c3_i32_132 = arith.constant 3 : i32
      %352 = arith.addi %351, %c3_i32_132 : i32
      %353 = arith.index_cast %352 : i32 to index
      %c5_133 = arith.constant 5 : index
      %354 = memref.load %arg15[%353, %c5_133] : memref<16x8xf32, #tpu.memory_space<smem>>
      %355 = arith.addf %350, %354 : f32
      %c8_i32_134 = arith.constant 8 : i32
      %356 = arith.muli %arg20, %c8_i32_134 : i32
      %c3_i32_135 = arith.constant 3 : i32
      %357 = arith.addi %356, %c3_i32_135 : i32
      %358 = arith.index_cast %357 : i32 to index
      %c6_136 = arith.constant 6 : index
      %359 = memref.load %arg15[%358, %c6_136] : memref<16x8xf32, #tpu.memory_space<smem>>
      %360 = arith.addf %355, %359 : f32
      %c8_i32_137 = arith.constant 8 : i32
      %361 = arith.muli %arg20, %c8_i32_137 : i32
      %c3_i32_138 = arith.constant 3 : i32
      %362 = arith.addi %361, %c3_i32_138 : i32
      %363 = arith.index_cast %362 : i32 to index
      %c7_139 = arith.constant 7 : index
      %364 = memref.load %arg15[%363, %c7_139] : memref<16x8xf32, #tpu.memory_space<smem>>
      %365 = arith.addf %360, %364 : f32
      %cst_140 = arith.constant 1.250000e-01 : f32
      %366 = arith.mulf %365, %cst_140 : f32
      %367 = vector.broadcast %366 : f32 to vector<1x8x8xf32>
      %368 = arith.mulf %367, %130 : vector<1x8x8xf32>
      %369 = arith.addf %326, %368 : vector<1x8x8xf32>
      %c8_i32_141 = arith.constant 8 : i32
      %370 = arith.muli %arg20, %c8_i32_141 : i32
      %c4_i32 = arith.constant 4 : i32
      %371 = arith.addi %370, %c4_i32 : i32
      %372 = arith.index_cast %371 : i32 to index
      %c0_142 = arith.constant 0 : index
      %373 = memref.load %arg15[%372, %c0_142] : memref<16x8xf32, #tpu.memory_space<smem>>
      %c8_i32_143 = arith.constant 8 : i32
      %374 = arith.muli %arg20, %c8_i32_143 : i32
      %c4_i32_144 = arith.constant 4 : i32
      %375 = arith.addi %374, %c4_i32_144 : i32
      %376 = arith.index_cast %375 : i32 to index
      %c1_145 = arith.constant 1 : index
      %377 = memref.load %arg15[%376, %c1_145] : memref<16x8xf32, #tpu.memory_space<smem>>
      %378 = arith.addf %373, %377 : f32
      %c8_i32_146 = arith.constant 8 : i32
      %379 = arith.muli %arg20, %c8_i32_146 : i32
      %c4_i32_147 = arith.constant 4 : i32
      %380 = arith.addi %379, %c4_i32_147 : i32
      %381 = arith.index_cast %380 : i32 to index
      %c2_148 = arith.constant 2 : index
      %382 = memref.load %arg15[%381, %c2_148] : memref<16x8xf32, #tpu.memory_space<smem>>
      %383 = arith.addf %378, %382 : f32
      %c8_i32_149 = arith.constant 8 : i32
      %384 = arith.muli %arg20, %c8_i32_149 : i32
      %c4_i32_150 = arith.constant 4 : i32
      %385 = arith.addi %384, %c4_i32_150 : i32
      %386 = arith.index_cast %385 : i32 to index
      %c3_151 = arith.constant 3 : index
      %387 = memref.load %arg15[%386, %c3_151] : memref<16x8xf32, #tpu.memory_space<smem>>
      %388 = arith.addf %383, %387 : f32
      %c8_i32_152 = arith.constant 8 : i32
      %389 = arith.muli %arg20, %c8_i32_152 : i32
      %c4_i32_153 = arith.constant 4 : i32
      %390 = arith.addi %389, %c4_i32_153 : i32
      %391 = arith.index_cast %390 : i32 to index
      %c4_154 = arith.constant 4 : index
      %392 = memref.load %arg15[%391, %c4_154] : memref<16x8xf32, #tpu.memory_space<smem>>
      %393 = arith.addf %388, %392 : f32
      %c8_i32_155 = arith.constant 8 : i32
      %394 = arith.muli %arg20, %c8_i32_155 : i32
      %c4_i32_156 = arith.constant 4 : i32
      %395 = arith.addi %394, %c4_i32_156 : i32
      %396 = arith.index_cast %395 : i32 to index
      %c5_157 = arith.constant 5 : index
      %397 = memref.load %arg15[%396, %c5_157] : memref<16x8xf32, #tpu.memory_space<smem>>
      %398 = arith.addf %393, %397 : f32
      %c8_i32_158 = arith.constant 8 : i32
      %399 = arith.muli %arg20, %c8_i32_158 : i32
      %c4_i32_159 = arith.constant 4 : i32
      %400 = arith.addi %399, %c4_i32_159 : i32
      %401 = arith.index_cast %400 : i32 to index
      %c6_160 = arith.constant 6 : index
      %402 = memref.load %arg15[%401, %c6_160] : memref<16x8xf32, #tpu.memory_space<smem>>
      %403 = arith.addf %398, %402 : f32
      %c8_i32_161 = arith.constant 8 : i32
      %404 = arith.muli %arg20, %c8_i32_161 : i32
      %c4_i32_162 = arith.constant 4 : i32
      %405 = arith.addi %404, %c4_i32_162 : i32
      %406 = arith.index_cast %405 : i32 to index
      %c7_163 = arith.constant 7 : index
      %407 = memref.load %arg15[%406, %c7_163] : memref<16x8xf32, #tpu.memory_space<smem>>
      %408 = arith.addf %403, %407 : f32
      %cst_164 = arith.constant 1.250000e-01 : f32
      %409 = arith.mulf %408, %cst_164 : f32
      %410 = vector.broadcast %409 : f32 to vector<1x8x8xf32>
      %411 = arith.mulf %410, %147 : vector<1x8x8xf32>
      %412 = arith.addf %369, %411 : vector<1x8x8xf32>
      %c8_i32_165 = arith.constant 8 : i32
      %413 = arith.muli %arg20, %c8_i32_165 : i32
      %c5_i32 = arith.constant 5 : i32
      %414 = arith.addi %413, %c5_i32 : i32
      %415 = arith.index_cast %414 : i32 to index
      %c0_166 = arith.constant 0 : index
      %416 = memref.load %arg15[%415, %c0_166] : memref<16x8xf32, #tpu.memory_space<smem>>
      %c8_i32_167 = arith.constant 8 : i32
      %417 = arith.muli %arg20, %c8_i32_167 : i32
      %c5_i32_168 = arith.constant 5 : i32
      %418 = arith.addi %417, %c5_i32_168 : i32
      %419 = arith.index_cast %418 : i32 to index
      %c1_169 = arith.constant 1 : index
      %420 = memref.load %arg15[%419, %c1_169] : memref<16x8xf32, #tpu.memory_space<smem>>
      %421 = arith.addf %416, %420 : f32
      %c8_i32_170 = arith.constant 8 : i32
      %422 = arith.muli %arg20, %c8_i32_170 : i32
      %c5_i32_171 = arith.constant 5 : i32
      %423 = arith.addi %422, %c5_i32_171 : i32
      %424 = arith.index_cast %423 : i32 to index
      %c2_172 = arith.constant 2 : index
      %425 = memref.load %arg15[%424, %c2_172] : memref<16x8xf32, #tpu.memory_space<smem>>
      %426 = arith.addf %421, %425 : f32
      %c8_i32_173 = arith.constant 8 : i32
      %427 = arith.muli %arg20, %c8_i32_173 : i32
      %c5_i32_174 = arith.constant 5 : i32
      %428 = arith.addi %427, %c5_i32_174 : i32
      %429 = arith.index_cast %428 : i32 to index
      %c3_175 = arith.constant 3 : index
      %430 = memref.load %arg15[%429, %c3_175] : memref<16x8xf32, #tpu.memory_space<smem>>
      %431 = arith.addf %426, %430 : f32
      %c8_i32_176 = arith.constant 8 : i32
      %432 = arith.muli %arg20, %c8_i32_176 : i32
      %c5_i32_177 = arith.constant 5 : i32
      %433 = arith.addi %432, %c5_i32_177 : i32
      %434 = arith.index_cast %433 : i32 to index
      %c4_178 = arith.constant 4 : index
      %435 = memref.load %arg15[%434, %c4_178] : memref<16x8xf32, #tpu.memory_space<smem>>
      %436 = arith.addf %431, %435 : f32
      %c8_i32_179 = arith.constant 8 : i32
      %437 = arith.muli %arg20, %c8_i32_179 : i32
      %c5_i32_180 = arith.constant 5 : i32
      %438 = arith.addi %437, %c5_i32_180 : i32
      %439 = arith.index_cast %438 : i32 to index
      %c5_181 = arith.constant 5 : index
      %440 = memref.load %arg15[%439, %c5_181] : memref<16x8xf32, #tpu.memory_space<smem>>
      %441 = arith.addf %436, %440 : f32
      %c8_i32_182 = arith.constant 8 : i32
      %442 = arith.muli %arg20, %c8_i32_182 : i32
      %c5_i32_183 = arith.constant 5 : i32
      %443 = arith.addi %442, %c5_i32_183 : i32
      %444 = arith.index_cast %443 : i32 to index
      %c6_184 = arith.constant 6 : index
      %445 = memref.load %arg15[%444, %c6_184] : memref<16x8xf32, #tpu.memory_space<smem>>
      %446 = arith.addf %441, %445 : f32
      %c8_i32_185 = arith.constant 8 : i32
      %447 = arith.muli %arg20, %c8_i32_185 : i32
      %c5_i32_186 = arith.constant 5 : i32
      %448 = arith.addi %447, %c5_i32_186 : i32
      %449 = arith.index_cast %448 : i32 to index
      %c7_187 = arith.constant 7 : index
      %450 = memref.load %arg15[%449, %c7_187] : memref<16x8xf32, #tpu.memory_space<smem>>
      %451 = arith.addf %446, %450 : f32
      %cst_188 = arith.constant 1.250000e-01 : f32
      %452 = arith.mulf %451, %cst_188 : f32
      %453 = vector.broadcast %452 : f32 to vector<1x8x8xf32>
      %454 = arith.mulf %453, %164 : vector<1x8x8xf32>
      %455 = arith.addf %412, %454 : vector<1x8x8xf32>
      %c8_i32_189 = arith.constant 8 : i32
      %456 = arith.muli %arg20, %c8_i32_189 : i32
      %c6_i32 = arith.constant 6 : i32
      %457 = arith.addi %456, %c6_i32 : i32
      %458 = arith.index_cast %457 : i32 to index
      %c0_190 = arith.constant 0 : index
      %459 = memref.load %arg15[%458, %c0_190] : memref<16x8xf32, #tpu.memory_space<smem>>
      %c8_i32_191 = arith.constant 8 : i32
      %460 = arith.muli %arg20, %c8_i32_191 : i32
      %c6_i32_192 = arith.constant 6 : i32
      %461 = arith.addi %460, %c6_i32_192 : i32
      %462 = arith.index_cast %461 : i32 to index
      %c1_193 = arith.constant 1 : index
      %463 = memref.load %arg15[%462, %c1_193] : memref<16x8xf32, #tpu.memory_space<smem>>
      %464 = arith.addf %459, %463 : f32
      %c8_i32_194 = arith.constant 8 : i32
      %465 = arith.muli %arg20, %c8_i32_194 : i32
      %c6_i32_195 = arith.constant 6 : i32
      %466 = arith.addi %465, %c6_i32_195 : i32
      %467 = arith.index_cast %466 : i32 to index
      %c2_196 = arith.constant 2 : index
      %468 = memref.load %arg15[%467, %c2_196] : memref<16x8xf32, #tpu.memory_space<smem>>
      %469 = arith.addf %464, %468 : f32
      %c8_i32_197 = arith.constant 8 : i32
      %470 = arith.muli %arg20, %c8_i32_197 : i32
      %c6_i32_198 = arith.constant 6 : i32
      %471 = arith.addi %470, %c6_i32_198 : i32
      %472 = arith.index_cast %471 : i32 to index
      %c3_199 = arith.constant 3 : index
      %473 = memref.load %arg15[%472, %c3_199] : memref<16x8xf32, #tpu.memory_space<smem>>
      %474 = arith.addf %469, %473 : f32
      %c8_i32_200 = arith.constant 8 : i32
      %475 = arith.muli %arg20, %c8_i32_200 : i32
      %c6_i32_201 = arith.constant 6 : i32
      %476 = arith.addi %475, %c6_i32_201 : i32
      %477 = arith.index_cast %476 : i32 to index
      %c4_202 = arith.constant 4 : index
      %478 = memref.load %arg15[%477, %c4_202] : memref<16x8xf32, #tpu.memory_space<smem>>
      %479 = arith.addf %474, %478 : f32
      %c8_i32_203 = arith.constant 8 : i32
      %480 = arith.muli %arg20, %c8_i32_203 : i32
      %c6_i32_204 = arith.constant 6 : i32
      %481 = arith.addi %480, %c6_i32_204 : i32
      %482 = arith.index_cast %481 : i32 to index
      %c5_205 = arith.constant 5 : index
      %483 = memref.load %arg15[%482, %c5_205] : memref<16x8xf32, #tpu.memory_space<smem>>
      %484 = arith.addf %479, %483 : f32
      %c8_i32_206 = arith.constant 8 : i32
      %485 = arith.muli %arg20, %c8_i32_206 : i32
      %c6_i32_207 = arith.constant 6 : i32
      %486 = arith.addi %485, %c6_i32_207 : i32
      %487 = arith.index_cast %486 : i32 to index
      %c6_208 = arith.constant 6 : index
      %488 = memref.load %arg15[%487, %c6_208] : memref<16x8xf32, #tpu.memory_space<smem>>
      %489 = arith.addf %484, %488 : f32
      %c8_i32_209 = arith.constant 8 : i32
      %490 = arith.muli %arg20, %c8_i32_209 : i32
      %c6_i32_210 = arith.constant 6 : i32
      %491 = arith.addi %490, %c6_i32_210 : i32
      %492 = arith.index_cast %491 : i32 to index
      %c7_211 = arith.constant 7 : index
      %493 = memref.load %arg15[%492, %c7_211] : memref<16x8xf32, #tpu.memory_space<smem>>
      %494 = arith.addf %489, %493 : f32
      %cst_212 = arith.constant 1.250000e-01 : f32
      %495 = arith.mulf %494, %cst_212 : f32
      %496 = vector.broadcast %495 : f32 to vector<1x8x8xf32>
      %497 = arith.mulf %496, %181 : vector<1x8x8xf32>
      %498 = arith.addf %455, %497 : vector<1x8x8xf32>
      %c8_i32_213 = arith.constant 8 : i32
      %499 = arith.muli %arg20, %c8_i32_213 : i32
      %c7_i32 = arith.constant 7 : i32
      %500 = arith.addi %499, %c7_i32 : i32
      %501 = arith.index_cast %500 : i32 to index
      %c0_214 = arith.constant 0 : index
      %502 = memref.load %arg15[%501, %c0_214] : memref<16x8xf32, #tpu.memory_space<smem>>
      %c8_i32_215 = arith.constant 8 : i32
      %503 = arith.muli %arg20, %c8_i32_215 : i32
      %c7_i32_216 = arith.constant 7 : i32
      %504 = arith.addi %503, %c7_i32_216 : i32
      %505 = arith.index_cast %504 : i32 to index
      %c1_217 = arith.constant 1 : index
      %506 = memref.load %arg15[%505, %c1_217] : memref<16x8xf32, #tpu.memory_space<smem>>
      %507 = arith.addf %502, %506 : f32
      %c8_i32_218 = arith.constant 8 : i32
      %508 = arith.muli %arg20, %c8_i32_218 : i32
      %c7_i32_219 = arith.constant 7 : i32
      %509 = arith.addi %508, %c7_i32_219 : i32
      %510 = arith.index_cast %509 : i32 to index
      %c2_220 = arith.constant 2 : index
      %511 = memref.load %arg15[%510, %c2_220] : memref<16x8xf32, #tpu.memory_space<smem>>
      %512 = arith.addf %507, %511 : f32
      %c8_i32_221 = arith.constant 8 : i32
      %513 = arith.muli %arg20, %c8_i32_221 : i32
      %c7_i32_222 = arith.constant 7 : i32
      %514 = arith.addi %513, %c7_i32_222 : i32
      %515 = arith.index_cast %514 : i32 to index
      %c3_223 = arith.constant 3 : index
      %516 = memref.load %arg15[%515, %c3_223] : memref<16x8xf32, #tpu.memory_space<smem>>
      %517 = arith.addf %512, %516 : f32
      %c8_i32_224 = arith.constant 8 : i32
      %518 = arith.muli %arg20, %c8_i32_224 : i32
      %c7_i32_225 = arith.constant 7 : i32
      %519 = arith.addi %518, %c7_i32_225 : i32
      %520 = arith.index_cast %519 : i32 to index
      %c4_226 = arith.constant 4 : index
      %521 = memref.load %arg15[%520, %c4_226] : memref<16x8xf32, #tpu.memory_space<smem>>
      %522 = arith.addf %517, %521 : f32
      %c8_i32_227 = arith.constant 8 : i32
      %523 = arith.muli %arg20, %c8_i32_227 : i32
      %c7_i32_228 = arith.constant 7 : i32
      %524 = arith.addi %523, %c7_i32_228 : i32
      %525 = arith.index_cast %524 : i32 to index
      %c5_229 = arith.constant 5 : index
      %526 = memref.load %arg15[%525, %c5_229] : memref<16x8xf32, #tpu.memory_space<smem>>
      %527 = arith.addf %522, %526 : f32
      %c8_i32_230 = arith.constant 8 : i32
      %528 = arith.muli %arg20, %c8_i32_230 : i32
      %c7_i32_231 = arith.constant 7 : i32
      %529 = arith.addi %528, %c7_i32_231 : i32
      %530 = arith.index_cast %529 : i32 to index
      %c6_232 = arith.constant 6 : index
      %531 = memref.load %arg15[%530, %c6_232] : memref<16x8xf32, #tpu.memory_space<smem>>
      %532 = arith.addf %527, %531 : f32
      %c8_i32_233 = arith.constant 8 : i32
      %533 = arith.muli %arg20, %c8_i32_233 : i32
      %c7_i32_234 = arith.constant 7 : i32
      %534 = arith.addi %533, %c7_i32_234 : i32
      %535 = arith.index_cast %534 : i32 to index
      %c7_235 = arith.constant 7 : index
      %536 = memref.load %arg15[%535, %c7_235] : memref<16x8xf32, #tpu.memory_space<smem>>
      %537 = arith.addf %532, %536 : f32
      %cst_236 = arith.constant 1.250000e-01 : f32
      %538 = arith.mulf %537, %cst_236 : f32
      %539 = vector.broadcast %538 : f32 to vector<1x8x8xf32>
      %540 = arith.mulf %539, %198 : vector<1x8x8xf32>
      %541 = arith.addf %498, %540 : vector<1x8x8xf32>
      %c8_i32_237 = arith.constant 8 : i32
      %542 = arith.muli %arg20, %c8_i32_237 : i32
      %c0_i32_238 = arith.constant 0 : i32
      %543 = arith.addi %542, %c0_i32_238 : i32
      %544 = arith.index_cast %543 : i32 to index
      %c0_239 = arith.constant 0 : index
      %545 = memref.load %arg15[%544, %c0_239] : memref<16x8xf32, #tpu.memory_space<smem>>
      %546 = vector.broadcast %545 : f32 to vector<1x8x8xf32>
      %547 = arith.mulf %546, %79 : vector<1x8x8xf32>
      %c8_i32_240 = arith.constant 8 : i32
      %548 = arith.muli %arg20, %c8_i32_240 : i32
      %c1_i32_241 = arith.constant 1 : i32
      %549 = arith.addi %548, %c1_i32_241 : i32
      %550 = arith.index_cast %549 : i32 to index
      %c0_242 = arith.constant 0 : index
      %551 = memref.load %arg15[%550, %c0_242] : memref<16x8xf32, #tpu.memory_space<smem>>
      %552 = vector.broadcast %551 : f32 to vector<1x8x8xf32>
      %553 = arith.mulf %552, %96 : vector<1x8x8xf32>
      %554 = arith.addf %547, %553 : vector<1x8x8xf32>
      %c8_i32_243 = arith.constant 8 : i32
      %555 = arith.muli %arg20, %c8_i32_243 : i32
      %c2_i32_244 = arith.constant 2 : i32
      %556 = arith.addi %555, %c2_i32_244 : i32
      %557 = arith.index_cast %556 : i32 to index
      %c0_245 = arith.constant 0 : index
      %558 = memref.load %arg15[%557, %c0_245] : memref<16x8xf32, #tpu.memory_space<smem>>
      %559 = vector.broadcast %558 : f32 to vector<1x8x8xf32>
      %560 = arith.mulf %559, %113 : vector<1x8x8xf32>
      %561 = arith.addf %554, %560 : vector<1x8x8xf32>
      %c8_i32_246 = arith.constant 8 : i32
      %562 = arith.muli %arg20, %c8_i32_246 : i32
      %c3_i32_247 = arith.constant 3 : i32
      %563 = arith.addi %562, %c3_i32_247 : i32
      %564 = arith.index_cast %563 : i32 to index
      %c0_248 = arith.constant 0 : index
      %565 = memref.load %arg15[%564, %c0_248] : memref<16x8xf32, #tpu.memory_space<smem>>
      %566 = vector.broadcast %565 : f32 to vector<1x8x8xf32>
      %567 = arith.mulf %566, %130 : vector<1x8x8xf32>
      %568 = arith.addf %561, %567 : vector<1x8x8xf32>
      %c8_i32_249 = arith.constant 8 : i32
      %569 = arith.muli %arg20, %c8_i32_249 : i32
      %c4_i32_250 = arith.constant 4 : i32
      %570 = arith.addi %569, %c4_i32_250 : i32
      %571 = arith.index_cast %570 : i32 to index
      %c0_251 = arith.constant 0 : index
      %572 = memref.load %arg15[%571, %c0_251] : memref<16x8xf32, #tpu.memory_space<smem>>
      %573 = vector.broadcast %572 : f32 to vector<1x8x8xf32>
      %574 = arith.mulf %573, %147 : vector<1x8x8xf32>
      %575 = arith.addf %568, %574 : vector<1x8x8xf32>
      %c8_i32_252 = arith.constant 8 : i32
      %576 = arith.muli %arg20, %c8_i32_252 : i32
      %c5_i32_253 = arith.constant 5 : i32
      %577 = arith.addi %576, %c5_i32_253 : i32
      %578 = arith.index_cast %577 : i32 to index
      %c0_254 = arith.constant 0 : index
      %579 = memref.load %arg15[%578, %c0_254] : memref<16x8xf32, #tpu.memory_space<smem>>
      %580 = vector.broadcast %579 : f32 to vector<1x8x8xf32>
      %581 = arith.mulf %580, %164 : vector<1x8x8xf32>
      %582 = arith.addf %575, %581 : vector<1x8x8xf32>
      %c8_i32_255 = arith.constant 8 : i32
      %583 = arith.muli %arg20, %c8_i32_255 : i32
      %c6_i32_256 = arith.constant 6 : i32
      %584 = arith.addi %583, %c6_i32_256 : i32
      %585 = arith.index_cast %584 : i32 to index
      %c0_257 = arith.constant 0 : index
      %586 = memref.load %arg15[%585, %c0_257] : memref<16x8xf32, #tpu.memory_space<smem>>
      %587 = vector.broadcast %586 : f32 to vector<1x8x8xf32>
      %588 = arith.mulf %587, %181 : vector<1x8x8xf32>
      %589 = arith.addf %582, %588 : vector<1x8x8xf32>
      %c8_i32_258 = arith.constant 8 : i32
      %590 = arith.muli %arg20, %c8_i32_258 : i32
      %c7_i32_259 = arith.constant 7 : i32
      %591 = arith.addi %590, %c7_i32_259 : i32
      %592 = arith.index_cast %591 : i32 to index
      %c0_260 = arith.constant 0 : index
      %593 = memref.load %arg15[%592, %c0_260] : memref<16x8xf32, #tpu.memory_space<smem>>
      %594 = vector.broadcast %593 : f32 to vector<1x8x8xf32>
      %595 = arith.mulf %594, %198 : vector<1x8x8xf32>
      %596 = arith.addf %589, %595 : vector<1x8x8xf32>
      %597 = arith.subf %596, %541 : vector<1x8x8xf32>
      %c0_261 = arith.constant 0 : index
      %c0_262 = arith.constant 0 : index
      %c0_263 = arith.constant 0 : index
      %c0_264 = arith.constant 0 : index
      %598 = vector.load %arg19[%c0_261, %c0_262, %c0_263, %c0_264] : memref<8x1x8x8xf32, #tpu.memory_space<vmem>>, vector<1x1x8x8xf32>
      %599 = vector.shape_cast %598 : vector<1x1x8x8xf32> to vector<1x8x8xf32>
      %600 = vector.shape_cast %597 : vector<1x8x8xf32> to vector<1x1x8x8xf32>
      tpu.vector_store %arg19[%c0_261, %c0_262, %c0_263, %c0_264], %600 {strides = array<i32>} : memref<8x1x8x8xf32, #tpu.memory_space<vmem>>, vector<1x1x8x8xf32>,
      %601 = arith.mulf %597, %597 : vector<1x8x8xf32>
      %c8_i32_265 = arith.constant 8 : i32
      %602 = arith.muli %arg20, %c8_i32_265 : i32
      %c0_i32_266 = arith.constant 0 : i32
      %603 = arith.addi %602, %c0_i32_266 : i32
      %604 = arith.index_cast %603 : i32 to index
      %c1_267 = arith.constant 1 : index
      %605 = memref.load %arg15[%604, %c1_267] : memref<16x8xf32, #tpu.memory_space<smem>>
      %606 = vector.broadcast %605 : f32 to vector<1x8x8xf32>
      %607 = arith.mulf %606, %79 : vector<1x8x8xf32>
      %c8_i32_268 = arith.constant 8 : i32
      %608 = arith.muli %arg20, %c8_i32_268 : i32
      %c1_i32_269 = arith.constant 1 : i32
      %609 = arith.addi %608, %c1_i32_269 : i32
      %610 = arith.index_cast %609 : i32 to index
      %c1_270 = arith.constant 1 : index
      %611 = memref.load %arg15[%610, %c1_270] : memref<16x8xf32, #tpu.memory_space<smem>>
      %612 = vector.broadcast %611 : f32 to vector<1x8x8xf32>
      %613 = arith.mulf %612, %96 : vector<1x8x8xf32>
      %614 = arith.addf %607, %613 : vector<1x8x8xf32>
      %c8_i32_271 = arith.constant 8 : i32
      %615 = arith.muli %arg20, %c8_i32_271 : i32
      %c2_i32_272 = arith.constant 2 : i32
      %616 = arith.addi %615, %c2_i32_272 : i32
      %617 = arith.index_cast %616 : i32 to index
      %c1_273 = arith.constant 1 : index
      %618 = memref.load %arg15[%617, %c1_273] : memref<16x8xf32, #tpu.memory_space<smem>>
      %619 = vector.broadcast %618 : f32 to vector<1x8x8xf32>
      %620 = arith.mulf %619, %113 : vector<1x8x8xf32>
      %621 = arith.addf %614, %620 : vector<1x8x8xf32>
      %c8_i32_274 = arith.constant 8 : i32
      %622 = arith.muli %arg20, %c8_i32_274 : i32
      %c3_i32_275 = arith.constant 3 : i32
      %623 = arith.addi %622, %c3_i32_275 : i32
      %624 = arith.index_cast %623 : i32 to index
      %c1_276 = arith.constant 1 : index
      %625 = memref.load %arg15[%624, %c1_276] : memref<16x8xf32, #tpu.memory_space<smem>>
      %626 = vector.broadcast %625 : f32 to vector<1x8x8xf32>
      %627 = arith.mulf %626, %130 : vector<1x8x8xf32>
      %628 = arith.addf %621, %627 : vector<1x8x8xf32>
      %c8_i32_277 = arith.constant 8 : i32
      %629 = arith.muli %arg20, %c8_i32_277 : i32
      %c4_i32_278 = arith.constant 4 : i32
      %630 = arith.addi %629, %c4_i32_278 : i32
      %631 = arith.index_cast %630 : i32 to index
      %c1_279 = arith.constant 1 : index
      %632 = memref.load %arg15[%631, %c1_279] : memref<16x8xf32, #tpu.memory_space<smem>>
      %633 = vector.broadcast %632 : f32 to vector<1x8x8xf32>
      %634 = arith.mulf %633, %147 : vector<1x8x8xf32>
      %635 = arith.addf %628, %634 : vector<1x8x8xf32>
      %c8_i32_280 = arith.constant 8 : i32
      %636 = arith.muli %arg20, %c8_i32_280 : i32
      %c5_i32_281 = arith.constant 5 : i32
      %637 = arith.addi %636, %c5_i32_281 : i32
      %638 = arith.index_cast %637 : i32 to index
      %c1_282 = arith.constant 1 : index
      %639 = memref.load %arg15[%638, %c1_282] : memref<16x8xf32, #tpu.memory_space<smem>>
      %640 = vector.broadcast %639 : f32 to vector<1x8x8xf32>
      %641 = arith.mulf %640, %164 : vector<1x8x8xf32>
      %642 = arith.addf %635, %641 : vector<1x8x8xf32>
      %c8_i32_283 = arith.constant 8 : i32
      %643 = arith.muli %arg20, %c8_i32_283 : i32
      %c6_i32_284 = arith.constant 6 : i32
      %644 = arith.addi %643, %c6_i32_284 : i32
      %645 = arith.index_cast %644 : i32 to index
      %c1_285 = arith.constant 1 : index
      %646 = memref.load %arg15[%645, %c1_285] : memref<16x8xf32, #tpu.memory_space<smem>>
      %647 = vector.broadcast %646 : f32 to vector<1x8x8xf32>
      %648 = arith.mulf %647, %181 : vector<1x8x8xf32>
      %649 = arith.addf %642, %648 : vector<1x8x8xf32>
      %c8_i32_286 = arith.constant 8 : i32
      %650 = arith.muli %arg20, %c8_i32_286 : i32
      %c7_i32_287 = arith.constant 7 : i32
      %651 = arith.addi %650, %c7_i32_287 : i32
      %652 = arith.index_cast %651 : i32 to index
      %c1_288 = arith.constant 1 : index
      %653 = memref.load %arg15[%652, %c1_288] : memref<16x8xf32, #tpu.memory_space<smem>>
      %654 = vector.broadcast %653 : f32 to vector<1x8x8xf32>
      %655 = arith.mulf %654, %198 : vector<1x8x8xf32>
      %656 = arith.addf %649, %655 : vector<1x8x8xf32>
      %657 = arith.subf %656, %541 : vector<1x8x8xf32>
      %c1_289 = arith.constant 1 : index
      %c0_290 = arith.constant 0 : index
      %c0_291 = arith.constant 0 : index
      %c0_292 = arith.constant 0 : index
      %658 = vector.load %arg19[%c1_289, %c0_290, %c0_291, %c0_292] : memref<8x1x8x8xf32, #tpu.memory_space<vmem>>, vector<1x1x8x8xf32>
      %659 = vector.shape_cast %658 : vector<1x1x8x8xf32> to vector<1x8x8xf32>
      %660 = vector.shape_cast %657 : vector<1x8x8xf32> to vector<1x1x8x8xf32>
      tpu.vector_store %arg19[%c1_289, %c0_290, %c0_291, %c0_292], %660 {strides = array<i32>} : memref<8x1x8x8xf32, #tpu.memory_space<vmem>>, vector<1x1x8x8xf32>,
      %661 = arith.mulf %657, %657 : vector<1x8x8xf32>
      %662 = arith.addf %601, %661 : vector<1x8x8xf32>
      %c8_i32_293 = arith.constant 8 : i32
      %663 = arith.muli %arg20, %c8_i32_293 : i32
      %c0_i32_294 = arith.constant 0 : i32
      %664 = arith.addi %663, %c0_i32_294 : i32
      %665 = arith.index_cast %664 : i32 to index
      %c2_295 = arith.constant 2 : index
      %666 = memref.load %arg15[%665, %c2_295] : memref<16x8xf32, #tpu.memory_space<smem>>
      %667 = vector.broadcast %666 : f32 to vector<1x8x8xf32>
      %668 = arith.mulf %667, %79 : vector<1x8x8xf32>
      %c8_i32_296 = arith.constant 8 : i32
      %669 = arith.muli %arg20, %c8_i32_296 : i32
      %c1_i32_297 = arith.constant 1 : i32
      %670 = arith.addi %669, %c1_i32_297 : i32
      %671 = arith.index_cast %670 : i32 to index
      %c2_298 = arith.constant 2 : index
      %672 = memref.load %arg15[%671, %c2_298] : memref<16x8xf32, #tpu.memory_space<smem>>
      %673 = vector.broadcast %672 : f32 to vector<1x8x8xf32>
      %674 = arith.mulf %673, %96 : vector<1x8x8xf32>
      %675 = arith.addf %668, %674 : vector<1x8x8xf32>
      %c8_i32_299 = arith.constant 8 : i32
      %676 = arith.muli %arg20, %c8_i32_299 : i32
      %c2_i32_300 = arith.constant 2 : i32
      %677 = arith.addi %676, %c2_i32_300 : i32
      %678 = arith.index_cast %677 : i32 to index
      %c2_301 = arith.constant 2 : index
      %679 = memref.load %arg15[%678, %c2_301] : memref<16x8xf32, #tpu.memory_space<smem>>
      %680 = vector.broadcast %679 : f32 to vector<1x8x8xf32>
      %681 = arith.mulf %680, %113 : vector<1x8x8xf32>
      %682 = arith.addf %675, %681 : vector<1x8x8xf32>
      %c8_i32_302 = arith.constant 8 : i32
      %683 = arith.muli %arg20, %c8_i32_302 : i32
      %c3_i32_303 = arith.constant 3 : i32
      %684 = arith.addi %683, %c3_i32_303 : i32
      %685 = arith.index_cast %684 : i32 to index
      %c2_304 = arith.constant 2 : index
      %686 = memref.load %arg15[%685, %c2_304] : memref<16x8xf32, #tpu.memory_space<smem>>
      %687 = vector.broadcast %686 : f32 to vector<1x8x8xf32>
      %688 = arith.mulf %687, %130 : vector<1x8x8xf32>
      %689 = arith.addf %682, %688 : vector<1x8x8xf32>
      %c8_i32_305 = arith.constant 8 : i32
      %690 = arith.muli %arg20, %c8_i32_305 : i32
      %c4_i32_306 = arith.constant 4 : i32
      %691 = arith.addi %690, %c4_i32_306 : i32
      %692 = arith.index_cast %691 : i32 to index
      %c2_307 = arith.constant 2 : index
      %693 = memref.load %arg15[%692, %c2_307] : memref<16x8xf32, #tpu.memory_space<smem>>
      %694 = vector.broadcast %693 : f32 to vector<1x8x8xf32>
      %695 = arith.mulf %694, %147 : vector<1x8x8xf32>
      %696 = arith.addf %689, %695 : vector<1x8x8xf32>
      %c8_i32_308 = arith.constant 8 : i32
      %697 = arith.muli %arg20, %c8_i32_308 : i32
      %c5_i32_309 = arith.constant 5 : i32
      %698 = arith.addi %697, %c5_i32_309 : i32
      %699 = arith.index_cast %698 : i32 to index
      %c2_310 = arith.constant 2 : index
      %700 = memref.load %arg15[%699, %c2_310] : memref<16x8xf32, #tpu.memory_space<smem>>
      %701 = vector.broadcast %700 : f32 to vector<1x8x8xf32>
      %702 = arith.mulf %701, %164 : vector<1x8x8xf32>
      %703 = arith.addf %696, %702 : vector<1x8x8xf32>
      %c8_i32_311 = arith.constant 8 : i32
      %704 = arith.muli %arg20, %c8_i32_311 : i32
      %c6_i32_312 = arith.constant 6 : i32
      %705 = arith.addi %704, %c6_i32_312 : i32
      %706 = arith.index_cast %705 : i32 to index
      %c2_313 = arith.constant 2 : index
      %707 = memref.load %arg15[%706, %c2_313] : memref<16x8xf32, #tpu.memory_space<smem>>
      %708 = vector.broadcast %707 : f32 to vector<1x8x8xf32>
      %709 = arith.mulf %708, %181 : vector<1x8x8xf32>
      %710 = arith.addf %703, %709 : vector<1x8x8xf32>
      %c8_i32_314 = arith.constant 8 : i32
      %711 = arith.muli %arg20, %c8_i32_314 : i32
      %c7_i32_315 = arith.constant 7 : i32
      %712 = arith.addi %711, %c7_i32_315 : i32
      %713 = arith.index_cast %712 : i32 to index
      %c2_316 = arith.constant 2 : index
      %714 = memref.load %arg15[%713, %c2_316] : memref<16x8xf32, #tpu.memory_space<smem>>
      %715 = vector.broadcast %714 : f32 to vector<1x8x8xf32>
      %716 = arith.mulf %715, %198 : vector<1x8x8xf32>
      %717 = arith.addf %710, %716 : vector<1x8x8xf32>
      %718 = arith.subf %717, %541 : vector<1x8x8xf32>
      %c2_317 = arith.constant 2 : index
      %c0_318 = arith.constant 0 : index
      %c0_319 = arith.constant 0 : index
      %c0_320 = arith.constant 0 : index
      %719 = vector.load %arg19[%c2_317, %c0_318, %c0_319, %c0_320] : memref<8x1x8x8xf32, #tpu.memory_space<vmem>>, vector<1x1x8x8xf32>
      %720 = vector.shape_cast %719 : vector<1x1x8x8xf32> to vector<1x8x8xf32>
      %721 = vector.shape_cast %718 : vector<1x8x8xf32> to vector<1x1x8x8xf32>
      tpu.vector_store %arg19[%c2_317, %c0_318, %c0_319, %c0_320], %721 {strides = array<i32>} : memref<8x1x8x8xf32, #tpu.memory_space<vmem>>, vector<1x1x8x8xf32>,
      %722 = arith.mulf %718, %718 : vector<1x8x8xf32>
      %723 = arith.addf %662, %722 : vector<1x8x8xf32>
      %c8_i32_321 = arith.constant 8 : i32
      %724 = arith.muli %arg20, %c8_i32_321 : i32
      %c0_i32_322 = arith.constant 0 : i32
      %725 = arith.addi %724, %c0_i32_322 : i32
      %726 = arith.index_cast %725 : i32 to index
      %c3_323 = arith.constant 3 : index
      %727 = memref.load %arg15[%726, %c3_323] : memref<16x8xf32, #tpu.memory_space<smem>>
      %728 = vector.broadcast %727 : f32 to vector<1x8x8xf32>
      %729 = arith.mulf %728, %79 : vector<1x8x8xf32>
      %c8_i32_324 = arith.constant 8 : i32
      %730 = arith.muli %arg20, %c8_i32_324 : i32
      %c1_i32_325 = arith.constant 1 : i32
      %731 = arith.addi %730, %c1_i32_325 : i32
      %732 = arith.index_cast %731 : i32 to index
      %c3_326 = arith.constant 3 : index
      %733 = memref.load %arg15[%732, %c3_326] : memref<16x8xf32, #tpu.memory_space<smem>>
      %734 = vector.broadcast %733 : f32 to vector<1x8x8xf32>
      %735 = arith.mulf %734, %96 : vector<1x8x8xf32>
      %736 = arith.addf %729, %735 : vector<1x8x8xf32>
      %c8_i32_327 = arith.constant 8 : i32
      %737 = arith.muli %arg20, %c8_i32_327 : i32
      %c2_i32_328 = arith.constant 2 : i32
      %738 = arith.addi %737, %c2_i32_328 : i32
      %739 = arith.index_cast %738 : i32 to index
      %c3_329 = arith.constant 3 : index
      %740 = memref.load %arg15[%739, %c3_329] : memref<16x8xf32, #tpu.memory_space<smem>>
      %741 = vector.broadcast %740 : f32 to vector<1x8x8xf32>
      %742 = arith.mulf %741, %113 : vector<1x8x8xf32>
      %743 = arith.addf %736, %742 : vector<1x8x8xf32>
      %c8_i32_330 = arith.constant 8 : i32
      %744 = arith.muli %arg20, %c8_i32_330 : i32
      %c3_i32_331 = arith.constant 3 : i32
      %745 = arith.addi %744, %c3_i32_331 : i32
      %746 = arith.index_cast %745 : i32 to index
      %c3_332 = arith.constant 3 : index
      %747 = memref.load %arg15[%746, %c3_332] : memref<16x8xf32, #tpu.memory_space<smem>>
      %748 = vector.broadcast %747 : f32 to vector<1x8x8xf32>
      %749 = arith.mulf %748, %130 : vector<1x8x8xf32>
      %750 = arith.addf %743, %749 : vector<1x8x8xf32>
      %c8_i32_333 = arith.constant 8 : i32
      %751 = arith.muli %arg20, %c8_i32_333 : i32
      %c4_i32_334 = arith.constant 4 : i32
      %752 = arith.addi %751, %c4_i32_334 : i32
      %753 = arith.index_cast %752 : i32 to index
      %c3_335 = arith.constant 3 : index
      %754 = memref.load %arg15[%753, %c3_335] : memref<16x8xf32, #tpu.memory_space<smem>>
      %755 = vector.broadcast %754 : f32 to vector<1x8x8xf32>
      %756 = arith.mulf %755, %147 : vector<1x8x8xf32>
      %757 = arith.addf %750, %756 : vector<1x8x8xf32>
      %c8_i32_336 = arith.constant 8 : i32
      %758 = arith.muli %arg20, %c8_i32_336 : i32
      %c5_i32_337 = arith.constant 5 : i32
      %759 = arith.addi %758, %c5_i32_337 : i32
      %760 = arith.index_cast %759 : i32 to index
      %c3_338 = arith.constant 3 : index
      %761 = memref.load %arg15[%760, %c3_338] : memref<16x8xf32, #tpu.memory_space<smem>>
      %762 = vector.broadcast %761 : f32 to vector<1x8x8xf32>
      %763 = arith.mulf %762, %164 : vector<1x8x8xf32>
      %764 = arith.addf %757, %763 : vector<1x8x8xf32>
      %c8_i32_339 = arith.constant 8 : i32
      %765 = arith.muli %arg20, %c8_i32_339 : i32
      %c6_i32_340 = arith.constant 6 : i32
      %766 = arith.addi %765, %c6_i32_340 : i32
      %767 = arith.index_cast %766 : i32 to index
      %c3_341 = arith.constant 3 : index
      %768 = memref.load %arg15[%767, %c3_341] : memref<16x8xf32, #tpu.memory_space<smem>>
      %769 = vector.broadcast %768 : f32 to vector<1x8x8xf32>
      %770 = arith.mulf %769, %181 : vector<1x8x8xf32>
      %771 = arith.addf %764, %770 : vector<1x8x8xf32>
      %c8_i32_342 = arith.constant 8 : i32
      %772 = arith.muli %arg20, %c8_i32_342 : i32
      %c7_i32_343 = arith.constant 7 : i32
      %773 = arith.addi %772, %c7_i32_343 : i32
      %774 = arith.index_cast %773 : i32 to index
      %c3_344 = arith.constant 3 : index
      %775 = memref.load %arg15[%774, %c3_344] : memref<16x8xf32, #tpu.memory_space<smem>>
      %776 = vector.broadcast %775 : f32 to vector<1x8x8xf32>
      %777 = arith.mulf %776, %198 : vector<1x8x8xf32>
      %778 = arith.addf %771, %777 : vector<1x8x8xf32>
      %779 = arith.subf %778, %541 : vector<1x8x8xf32>
      %c3_345 = arith.constant 3 : index
      %c0_346 = arith.constant 0 : index
      %c0_347 = arith.constant 0 : index
      %c0_348 = arith.constant 0 : index
      %780 = vector.load %arg19[%c3_345, %c0_346, %c0_347, %c0_348] : memref<8x1x8x8xf32, #tpu.memory_space<vmem>>, vector<1x1x8x8xf32>
      %781 = vector.shape_cast %780 : vector<1x1x8x8xf32> to vector<1x8x8xf32>
      %782 = vector.shape_cast %779 : vector<1x8x8xf32> to vector<1x1x8x8xf32>
      tpu.vector_store %arg19[%c3_345, %c0_346, %c0_347, %c0_348], %782 {strides = array<i32>} : memref<8x1x8x8xf32, #tpu.memory_space<vmem>>, vector<1x1x8x8xf32>,
      %783 = arith.mulf %779, %779 : vector<1x8x8xf32>
      %784 = arith.addf %723, %783 : vector<1x8x8xf32>
      %c8_i32_349 = arith.constant 8 : i32
      %785 = arith.muli %arg20, %c8_i32_349 : i32
      %c0_i32_350 = arith.constant 0 : i32
      %786 = arith.addi %785, %c0_i32_350 : i32
      %787 = arith.index_cast %786 : i32 to index
      %c4_351 = arith.constant 4 : index
      %788 = memref.load %arg15[%787, %c4_351] : memref<16x8xf32, #tpu.memory_space<smem>>
      %789 = vector.broadcast %788 : f32 to vector<1x8x8xf32>
      %790 = arith.mulf %789, %79 : vector<1x8x8xf32>
      %c8_i32_352 = arith.constant 8 : i32
      %791 = arith.muli %arg20, %c8_i32_352 : i32
      %c1_i32_353 = arith.constant 1 : i32
      %792 = arith.addi %791, %c1_i32_353 : i32
      %793 = arith.index_cast %792 : i32 to index
      %c4_354 = arith.constant 4 : index
      %794 = memref.load %arg15[%793, %c4_354] : memref<16x8xf32, #tpu.memory_space<smem>>
      %795 = vector.broadcast %794 : f32 to vector<1x8x8xf32>
      %796 = arith.mulf %795, %96 : vector<1x8x8xf32>
      %797 = arith.addf %790, %796 : vector<1x8x8xf32>
      %c8_i32_355 = arith.constant 8 : i32
      %798 = arith.muli %arg20, %c8_i32_355 : i32
      %c2_i32_356 = arith.constant 2 : i32
      %799 = arith.addi %798, %c2_i32_356 : i32
      %800 = arith.index_cast %799 : i32 to index
      %c4_357 = arith.constant 4 : index
      %801 = memref.load %arg15[%800, %c4_357] : memref<16x8xf32, #tpu.memory_space<smem>>
      %802 = vector.broadcast %801 : f32 to vector<1x8x8xf32>
      %803 = arith.mulf %802, %113 : vector<1x8x8xf32>
      %804 = arith.addf %797, %803 : vector<1x8x8xf32>
      %c8_i32_358 = arith.constant 8 : i32
      %805 = arith.muli %arg20, %c8_i32_358 : i32
      %c3_i32_359 = arith.constant 3 : i32
      %806 = arith.addi %805, %c3_i32_359 : i32
      %807 = arith.index_cast %806 : i32 to index
      %c4_360 = arith.constant 4 : index
      %808 = memref.load %arg15[%807, %c4_360] : memref<16x8xf32, #tpu.memory_space<smem>>
      %809 = vector.broadcast %808 : f32 to vector<1x8x8xf32>
      %810 = arith.mulf %809, %130 : vector<1x8x8xf32>
      %811 = arith.addf %804, %810 : vector<1x8x8xf32>
      %c8_i32_361 = arith.constant 8 : i32
      %812 = arith.muli %arg20, %c8_i32_361 : i32
      %c4_i32_362 = arith.constant 4 : i32
      %813 = arith.addi %812, %c4_i32_362 : i32
      %814 = arith.index_cast %813 : i32 to index
      %c4_363 = arith.constant 4 : index
      %815 = memref.load %arg15[%814, %c4_363] : memref<16x8xf32, #tpu.memory_space<smem>>
      %816 = vector.broadcast %815 : f32 to vector<1x8x8xf32>
      %817 = arith.mulf %816, %147 : vector<1x8x8xf32>
      %818 = arith.addf %811, %817 : vector<1x8x8xf32>
      %c8_i32_364 = arith.constant 8 : i32
      %819 = arith.muli %arg20, %c8_i32_364 : i32
      %c5_i32_365 = arith.constant 5 : i32
      %820 = arith.addi %819, %c5_i32_365 : i32
      %821 = arith.index_cast %820 : i32 to index
      %c4_366 = arith.constant 4 : index
      %822 = memref.load %arg15[%821, %c4_366] : memref<16x8xf32, #tpu.memory_space<smem>>
      %823 = vector.broadcast %822 : f32 to vector<1x8x8xf32>
      %824 = arith.mulf %823, %164 : vector<1x8x8xf32>
      %825 = arith.addf %818, %824 : vector<1x8x8xf32>
      %c8_i32_367 = arith.constant 8 : i32
      %826 = arith.muli %arg20, %c8_i32_367 : i32
      %c6_i32_368 = arith.constant 6 : i32
      %827 = arith.addi %826, %c6_i32_368 : i32
      %828 = arith.index_cast %827 : i32 to index
      %c4_369 = arith.constant 4 : index
      %829 = memref.load %arg15[%828, %c4_369] : memref<16x8xf32, #tpu.memory_space<smem>>
      %830 = vector.broadcast %829 : f32 to vector<1x8x8xf32>
      %831 = arith.mulf %830, %181 : vector<1x8x8xf32>
      %832 = arith.addf %825, %831 : vector<1x8x8xf32>
      %c8_i32_370 = arith.constant 8 : i32
      %833 = arith.muli %arg20, %c8_i32_370 : i32
      %c7_i32_371 = arith.constant 7 : i32
      %834 = arith.addi %833, %c7_i32_371 : i32
      %835 = arith.index_cast %834 : i32 to index
      %c4_372 = arith.constant 4 : index
      %836 = memref.load %arg15[%835, %c4_372] : memref<16x8xf32, #tpu.memory_space<smem>>
      %837 = vector.broadcast %836 : f32 to vector<1x8x8xf32>
      %838 = arith.mulf %837, %198 : vector<1x8x8xf32>
      %839 = arith.addf %832, %838 : vector<1x8x8xf32>
      %840 = arith.subf %839, %541 : vector<1x8x8xf32>
      %c4_373 = arith.constant 4 : index
      %c0_374 = arith.constant 0 : index
      %c0_375 = arith.constant 0 : index
      %c0_376 = arith.constant 0 : index
      %841 = vector.load %arg19[%c4_373, %c0_374, %c0_375, %c0_376] : memref<8x1x8x8xf32, #tpu.memory_space<vmem>>, vector<1x1x8x8xf32>
      %842 = vector.shape_cast %841 : vector<1x1x8x8xf32> to vector<1x8x8xf32>
      %843 = vector.shape_cast %840 : vector<1x8x8xf32> to vector<1x1x8x8xf32>
      tpu.vector_store %arg19[%c4_373, %c0_374, %c0_375, %c0_376], %843 {strides = array<i32>} : memref<8x1x8x8xf32, #tpu.memory_space<vmem>>, vector<1x1x8x8xf32>,
      %844 = arith.mulf %840, %840 : vector<1x8x8xf32>
      %845 = arith.addf %784, %844 : vector<1x8x8xf32>
      %c8_i32_377 = arith.constant 8 : i32
      %846 = arith.muli %arg20, %c8_i32_377 : i32
      %c0_i32_378 = arith.constant 0 : i32
      %847 = arith.addi %846, %c0_i32_378 : i32
      %848 = arith.index_cast %847 : i32 to index
      %c5_379 = arith.constant 5 : index
      %849 = memref.load %arg15[%848, %c5_379] : memref<16x8xf32, #tpu.memory_space<smem>>
      %850 = vector.broadcast %849 : f32 to vector<1x8x8xf32>
      %851 = arith.mulf %850, %79 : vector<1x8x8xf32>
      %c8_i32_380 = arith.constant 8 : i32
      %852 = arith.muli %arg20, %c8_i32_380 : i32
      %c1_i32_381 = arith.constant 1 : i32
      %853 = arith.addi %852, %c1_i32_381 : i32
      %854 = arith.index_cast %853 : i32 to index
      %c5_382 = arith.constant 5 : index
      %855 = memref.load %arg15[%854, %c5_382] : memref<16x8xf32, #tpu.memory_space<smem>>
      %856 = vector.broadcast %855 : f32 to vector<1x8x8xf32>
      %857 = arith.mulf %856, %96 : vector<1x8x8xf32>
      %858 = arith.addf %851, %857 : vector<1x8x8xf32>
      %c8_i32_383 = arith.constant 8 : i32
      %859 = arith.muli %arg20, %c8_i32_383 : i32
      %c2_i32_384 = arith.constant 2 : i32
      %860 = arith.addi %859, %c2_i32_384 : i32
      %861 = arith.index_cast %860 : i32 to index
      %c5_385 = arith.constant 5 : index
      %862 = memref.load %arg15[%861, %c5_385] : memref<16x8xf32, #tpu.memory_space<smem>>
      %863 = vector.broadcast %862 : f32 to vector<1x8x8xf32>
      %864 = arith.mulf %863, %113 : vector<1x8x8xf32>
      %865 = arith.addf %858, %864 : vector<1x8x8xf32>
      %c8_i32_386 = arith.constant 8 : i32
      %866 = arith.muli %arg20, %c8_i32_386 : i32
      %c3_i32_387 = arith.constant 3 : i32
      %867 = arith.addi %866, %c3_i32_387 : i32
      %868 = arith.index_cast %867 : i32 to index
      %c5_388 = arith.constant 5 : index
      %869 = memref.load %arg15[%868, %c5_388] : memref<16x8xf32, #tpu.memory_space<smem>>
      %870 = vector.broadcast %869 : f32 to vector<1x8x8xf32>
      %871 = arith.mulf %870, %130 : vector<1x8x8xf32>
      %872 = arith.addf %865, %871 : vector<1x8x8xf32>
      %c8_i32_389 = arith.constant 8 : i32
      %873 = arith.muli %arg20, %c8_i32_389 : i32
      %c4_i32_390 = arith.constant 4 : i32
      %874 = arith.addi %873, %c4_i32_390 : i32
      %875 = arith.index_cast %874 : i32 to index
      %c5_391 = arith.constant 5 : index
      %876 = memref.load %arg15[%875, %c5_391] : memref<16x8xf32, #tpu.memory_space<smem>>
      %877 = vector.broadcast %876 : f32 to vector<1x8x8xf32>
      %878 = arith.mulf %877, %147 : vector<1x8x8xf32>
      %879 = arith.addf %872, %878 : vector<1x8x8xf32>
      %c8_i32_392 = arith.constant 8 : i32
      %880 = arith.muli %arg20, %c8_i32_392 : i32
      %c5_i32_393 = arith.constant 5 : i32
      %881 = arith.addi %880, %c5_i32_393 : i32
      %882 = arith.index_cast %881 : i32 to index
      %c5_394 = arith.constant 5 : index
      %883 = memref.load %arg15[%882, %c5_394] : memref<16x8xf32, #tpu.memory_space<smem>>
      %884 = vector.broadcast %883 : f32 to vector<1x8x8xf32>
      %885 = arith.mulf %884, %164 : vector<1x8x8xf32>
      %886 = arith.addf %879, %885 : vector<1x8x8xf32>
      %c8_i32_395 = arith.constant 8 : i32
      %887 = arith.muli %arg20, %c8_i32_395 : i32
      %c6_i32_396 = arith.constant 6 : i32
      %888 = arith.addi %887, %c6_i32_396 : i32
      %889 = arith.index_cast %888 : i32 to index
      %c5_397 = arith.constant 5 : index
      %890 = memref.load %arg15[%889, %c5_397] : memref<16x8xf32, #tpu.memory_space<smem>>
      %891 = vector.broadcast %890 : f32 to vector<1x8x8xf32>
      %892 = arith.mulf %891, %181 : vector<1x8x8xf32>
      %893 = arith.addf %886, %892 : vector<1x8x8xf32>
      %c8_i32_398 = arith.constant 8 : i32
      %894 = arith.muli %arg20, %c8_i32_398 : i32
      %c7_i32_399 = arith.constant 7 : i32
      %895 = arith.addi %894, %c7_i32_399 : i32
      %896 = arith.index_cast %895 : i32 to index
      %c5_400 = arith.constant 5 : index
      %897 = memref.load %arg15[%896, %c5_400] : memref<16x8xf32, #tpu.memory_space<smem>>
      %898 = vector.broadcast %897 : f32 to vector<1x8x8xf32>
      %899 = arith.mulf %898, %198 : vector<1x8x8xf32>
      %900 = arith.addf %893, %899 : vector<1x8x8xf32>
      %901 = arith.subf %900, %541 : vector<1x8x8xf32>
      %c5_401 = arith.constant 5 : index
      %c0_402 = arith.constant 0 : index
      %c0_403 = arith.constant 0 : index
      %c0_404 = arith.constant 0 : index
      %902 = vector.load %arg19[%c5_401, %c0_402, %c0_403, %c0_404] : memref<8x1x8x8xf32, #tpu.memory_space<vmem>>, vector<1x1x8x8xf32>
      %903 = vector.shape_cast %902 : vector<1x1x8x8xf32> to vector<1x8x8xf32>
      %904 = vector.shape_cast %901 : vector<1x8x8xf32> to vector<1x1x8x8xf32>
      tpu.vector_store %arg19[%c5_401, %c0_402, %c0_403, %c0_404], %904 {strides = array<i32>} : memref<8x1x8x8xf32, #tpu.memory_space<vmem>>, vector<1x1x8x8xf32>,
      %905 = arith.mulf %901, %901 : vector<1x8x8xf32>
      %906 = arith.addf %845, %905 : vector<1x8x8xf32>
      %c8_i32_405 = arith.constant 8 : i32
      %907 = arith.muli %arg20, %c8_i32_405 : i32
      %c0_i32_406 = arith.constant 0 : i32
      %908 = arith.addi %907, %c0_i32_406 : i32
      %909 = arith.index_cast %908 : i32 to index
      %c6_407 = arith.constant 6 : index
      %910 = memref.load %arg15[%909, %c6_407] : memref<16x8xf32, #tpu.memory_space<smem>>
      %911 = vector.broadcast %910 : f32 to vector<1x8x8xf32>
      %912 = arith.mulf %911, %79 : vector<1x8x8xf32>
      %c8_i32_408 = arith.constant 8 : i32
      %913 = arith.muli %arg20, %c8_i32_408 : i32
      %c1_i32_409 = arith.constant 1 : i32
      %914 = arith.addi %913, %c1_i32_409 : i32
      %915 = arith.index_cast %914 : i32 to index
      %c6_410 = arith.constant 6 : index
      %916 = memref.load %arg15[%915, %c6_410] : memref<16x8xf32, #tpu.memory_space<smem>>
      %917 = vector.broadcast %916 : f32 to vector<1x8x8xf32>
      %918 = arith.mulf %917, %96 : vector<1x8x8xf32>
      %919 = arith.addf %912, %918 : vector<1x8x8xf32>
      %c8_i32_411 = arith.constant 8 : i32
      %920 = arith.muli %arg20, %c8_i32_411 : i32
      %c2_i32_412 = arith.constant 2 : i32
      %921 = arith.addi %920, %c2_i32_412 : i32
      %922 = arith.index_cast %921 : i32 to index
      %c6_413 = arith.constant 6 : index
      %923 = memref.load %arg15[%922, %c6_413] : memref<16x8xf32, #tpu.memory_space<smem>>
      %924 = vector.broadcast %923 : f32 to vector<1x8x8xf32>
      %925 = arith.mulf %924, %113 : vector<1x8x8xf32>
      %926 = arith.addf %919, %925 : vector<1x8x8xf32>
      %c8_i32_414 = arith.constant 8 : i32
      %927 = arith.muli %arg20, %c8_i32_414 : i32
      %c3_i32_415 = arith.constant 3 : i32
      %928 = arith.addi %927, %c3_i32_415 : i32
      %929 = arith.index_cast %928 : i32 to index
      %c6_416 = arith.constant 6 : index
      %930 = memref.load %arg15[%929, %c6_416] : memref<16x8xf32, #tpu.memory_space<smem>>
      %931 = vector.broadcast %930 : f32 to vector<1x8x8xf32>
      %932 = arith.mulf %931, %130 : vector<1x8x8xf32>
      %933 = arith.addf %926, %932 : vector<1x8x8xf32>
      %c8_i32_417 = arith.constant 8 : i32
      %934 = arith.muli %arg20, %c8_i32_417 : i32
      %c4_i32_418 = arith.constant 4 : i32
      %935 = arith.addi %934, %c4_i32_418 : i32
      %936 = arith.index_cast %935 : i32 to index
      %c6_419 = arith.constant 6 : index
      %937 = memref.load %arg15[%936, %c6_419] : memref<16x8xf32, #tpu.memory_space<smem>>
      %938 = vector.broadcast %937 : f32 to vector<1x8x8xf32>
      %939 = arith.mulf %938, %147 : vector<1x8x8xf32>
      %940 = arith.addf %933, %939 : vector<1x8x8xf32>
      %c8_i32_420 = arith.constant 8 : i32
      %941 = arith.muli %arg20, %c8_i32_420 : i32
      %c5_i32_421 = arith.constant 5 : i32
      %942 = arith.addi %941, %c5_i32_421 : i32
      %943 = arith.index_cast %942 : i32 to index
      %c6_422 = arith.constant 6 : index
      %944 = memref.load %arg15[%943, %c6_422] : memref<16x8xf32, #tpu.memory_space<smem>>
      %945 = vector.broadcast %944 : f32 to vector<1x8x8xf32>
      %946 = arith.mulf %945, %164 : vector<1x8x8xf32>
      %947 = arith.addf %940, %946 : vector<1x8x8xf32>
      %c8_i32_423 = arith.constant 8 : i32
      %948 = arith.muli %arg20, %c8_i32_423 : i32
      %c6_i32_424 = arith.constant 6 : i32
      %949 = arith.addi %948, %c6_i32_424 : i32
      %950 = arith.index_cast %949 : i32 to index
      %c6_425 = arith.constant 6 : index
      %951 = memref.load %arg15[%950, %c6_425] : memref<16x8xf32, #tpu.memory_space<smem>>
      %952 = vector.broadcast %951 : f32 to vector<1x8x8xf32>
      %953 = arith.mulf %952, %181 : vector<1x8x8xf32>
      %954 = arith.addf %947, %953 : vector<1x8x8xf32>
      %c8_i32_426 = arith.constant 8 : i32
      %955 = arith.muli %arg20, %c8_i32_426 : i32
      %c7_i32_427 = arith.constant 7 : i32
      %956 = arith.addi %955, %c7_i32_427 : i32
      %957 = arith.index_cast %956 : i32 to index
      %c6_428 = arith.constant 6 : index
      %958 = memref.load %arg15[%957, %c6_428] : memref<16x8xf32, #tpu.memory_space<smem>>
      %959 = vector.broadcast %958 : f32 to vector<1x8x8xf32>
      %960 = arith.mulf %959, %198 : vector<1x8x8xf32>
      %961 = arith.addf %954, %960 : vector<1x8x8xf32>
      %962 = arith.subf %961, %541 : vector<1x8x8xf32>
      %c6_429 = arith.constant 6 : index
      %c0_430 = arith.constant 0 : index
      %c0_431 = arith.constant 0 : index
      %c0_432 = arith.constant 0 : index
      %963 = vector.load %arg19[%c6_429, %c0_430, %c0_431, %c0_432] : memref<8x1x8x8xf32, #tpu.memory_space<vmem>>, vector<1x1x8x8xf32>
      %964 = vector.shape_cast %963 : vector<1x1x8x8xf32> to vector<1x8x8xf32>
      %965 = vector.shape_cast %962 : vector<1x8x8xf32> to vector<1x1x8x8xf32>
      tpu.vector_store %arg19[%c6_429, %c0_430, %c0_431, %c0_432], %965 {strides = array<i32>} : memref<8x1x8x8xf32, #tpu.memory_space<vmem>>, vector<1x1x8x8xf32>,
      %966 = arith.mulf %962, %962 : vector<1x8x8xf32>
      %967 = arith.addf %906, %966 : vector<1x8x8xf32>
      %c8_i32_433 = arith.constant 8 : i32
      %968 = arith.muli %arg20, %c8_i32_433 : i32
      %c0_i32_434 = arith.constant 0 : i32
      %969 = arith.addi %968, %c0_i32_434 : i32
      %970 = arith.index_cast %969 : i32 to index
      %c7_435 = arith.constant 7 : index
      %971 = memref.load %arg15[%970, %c7_435] : memref<16x8xf32, #tpu.memory_space<smem>>
      %972 = vector.broadcast %971 : f32 to vector<1x8x8xf32>
      %973 = arith.mulf %972, %79 : vector<1x8x8xf32>
      %c8_i32_436 = arith.constant 8 : i32
      %974 = arith.muli %arg20, %c8_i32_436 : i32
      %c1_i32_437 = arith.constant 1 : i32
      %975 = arith.addi %974, %c1_i32_437 : i32
      %976 = arith.index_cast %975 : i32 to index
      %c7_438 = arith.constant 7 : index
      %977 = memref.load %arg15[%976, %c7_438] : memref<16x8xf32, #tpu.memory_space<smem>>
      %978 = vector.broadcast %977 : f32 to vector<1x8x8xf32>
      %979 = arith.mulf %978, %96 : vector<1x8x8xf32>
      %980 = arith.addf %973, %979 : vector<1x8x8xf32>
      %c8_i32_439 = arith.constant 8 : i32
      %981 = arith.muli %arg20, %c8_i32_439 : i32
      %c2_i32_440 = arith.constant 2 : i32
      %982 = arith.addi %981, %c2_i32_440 : i32
      %983 = arith.index_cast %982 : i32 to index
      %c7_441 = arith.constant 7 : index
      %984 = memref.load %arg15[%983, %c7_441] : memref<16x8xf32, #tpu.memory_space<smem>>
      %985 = vector.broadcast %984 : f32 to vector<1x8x8xf32>
      %986 = arith.mulf %985, %113 : vector<1x8x8xf32>
      %987 = arith.addf %980, %986 : vector<1x8x8xf32>
      %c8_i32_442 = arith.constant 8 : i32
      %988 = arith.muli %arg20, %c8_i32_442 : i32
      %c3_i32_443 = arith.constant 3 : i32
      %989 = arith.addi %988, %c3_i32_443 : i32
      %990 = arith.index_cast %989 : i32 to index
      %c7_444 = arith.constant 7 : index
      %991 = memref.load %arg15[%990, %c7_444] : memref<16x8xf32, #tpu.memory_space<smem>>
      %992 = vector.broadcast %991 : f32 to vector<1x8x8xf32>
      %993 = arith.mulf %992, %130 : vector<1x8x8xf32>
      %994 = arith.addf %987, %993 : vector<1x8x8xf32>
      %c8_i32_445 = arith.constant 8 : i32
      %995 = arith.muli %arg20, %c8_i32_445 : i32
      %c4_i32_446 = arith.constant 4 : i32
      %996 = arith.addi %995, %c4_i32_446 : i32
      %997 = arith.index_cast %996 : i32 to index
      %c7_447 = arith.constant 7 : index
      %998 = memref.load %arg15[%997, %c7_447] : memref<16x8xf32, #tpu.memory_space<smem>>
      %999 = vector.broadcast %998 : f32 to vector<1x8x8xf32>
      %1000 = arith.mulf %999, %147 : vector<1x8x8xf32>
      %1001 = arith.addf %994, %1000 : vector<1x8x8xf32>
      %c8_i32_448 = arith.constant 8 : i32
      %1002 = arith.muli %arg20, %c8_i32_448 : i32
      %c5_i32_449 = arith.constant 5 : i32
      %1003 = arith.addi %1002, %c5_i32_449 : i32
      %1004 = arith.index_cast %1003 : i32 to index
      %c7_450 = arith.constant 7 : index
      %1005 = memref.load %arg15[%1004, %c7_450] : memref<16x8xf32, #tpu.memory_space<smem>>
      %1006 = vector.broadcast %1005 : f32 to vector<1x8x8xf32>
      %1007 = arith.mulf %1006, %164 : vector<1x8x8xf32>
      %1008 = arith.addf %1001, %1007 : vector<1x8x8xf32>
      %c8_i32_451 = arith.constant 8 : i32
      %1009 = arith.muli %arg20, %c8_i32_451 : i32
      %c6_i32_452 = arith.constant 6 : i32
      %1010 = arith.addi %1009, %c6_i32_452 : i32
      %1011 = arith.index_cast %1010 : i32 to index
      %c7_453 = arith.constant 7 : index
      %1012 = memref.load %arg15[%1011, %c7_453] : memref<16x8xf32, #tpu.memory_space<smem>>
      %1013 = vector.broadcast %1012 : f32 to vector<1x8x8xf32>
      %1014 = arith.mulf %1013, %181 : vector<1x8x8xf32>
      %1015 = arith.addf %1008, %1014 : vector<1x8x8xf32>
      %c8_i32_454 = arith.constant 8 : i32
      %1016 = arith.muli %arg20, %c8_i32_454 : i32
      %c7_i32_455 = arith.constant 7 : i32
      %1017 = arith.addi %1016, %c7_i32_455 : i32
      %1018 = arith.index_cast %1017 : i32 to index
      %c7_456 = arith.constant 7 : index
      %1019 = memref.load %arg15[%1018, %c7_456] : memref<16x8xf32, #tpu.memory_space<smem>>
      %1020 = vector.broadcast %1019 : f32 to vector<1x8x8xf32>
      %1021 = arith.mulf %1020, %198 : vector<1x8x8xf32>
      %1022 = arith.addf %1015, %1021 : vector<1x8x8xf32>
      %1023 = arith.subf %1022, %541 : vector<1x8x8xf32>
      %c7_457 = arith.constant 7 : index
      %c0_458 = arith.constant 0 : index
      %c0_459 = arith.constant 0 : index
      %c0_460 = arith.constant 0 : index
      %1024 = vector.load %arg19[%c7_457, %c0_458, %c0_459, %c0_460] : memref<8x1x8x8xf32, #tpu.memory_space<vmem>>, vector<1x1x8x8xf32>
      %1025 = vector.shape_cast %1024 : vector<1x1x8x8xf32> to vector<1x8x8xf32>
      %1026 = vector.shape_cast %1023 : vector<1x8x8xf32> to vector<1x1x8x8xf32>
      tpu.vector_store %arg19[%c7_457, %c0_458, %c0_459, %c0_460], %1026 {strides = array<i32>} : memref<8x1x8x8xf32, #tpu.memory_space<vmem>>, vector<1x1x8x8xf32>,
      %1027 = arith.mulf %1023, %1023 : vector<1x8x8xf32>
      %1028 = arith.addf %967, %1027 : vector<1x8x8xf32>
      %cst_461 = arith.constant 1.250000e-01 : f32
      %1029 = vector.broadcast %cst_461 : f32 to vector<1x8x8xf32>
      %1030 = arith.mulf %1028, %1029 : vector<1x8x8xf32>
      %cst_462 = arith.constant 9.99999974E-6 : f32
      %1031 = vector.broadcast %cst_462 : f32 to vector<1x8x8xf32>
      %1032 = arith.addf %1030, %1031 : vector<1x8x8xf32>
      %1033 = math.rsqrt %1032 : vector<1x8x8xf32>
      %1034 = arith.index_cast %arg20 : i32 to index
      %c0_463 = arith.constant 0 : index
      %c0_464 = arith.constant 0 : index
      %1035 = vector.load %arg5[%1034, %c0_463, %c0_464] : memref<2x512x192xbf16, #tpu.memory_space<vmem>>, vector<1x512x192xbf16>
      %1036 = vector.shape_cast %1035 : vector<1x512x192xbf16> to vector<512x192xbf16>
      %c0_465 = arith.constant 0 : index
      %c0_466 = arith.constant 0 : index
      %c0_467 = arith.constant 0 : index
      %c0_468 = arith.constant 0 : index
      %1037 = vector.load %arg19[%c0_465, %c0_466, %c0_467, %c0_468] : memref<8x1x8x8xf32, #tpu.memory_space<vmem>>, vector<1x1x8x8xf32>
      %1038 = vector.shape_cast %1037 : vector<1x1x8x8xf32> to vector<1x8x8xf32>
      %1039 = arith.mulf %1038, %1033 : vector<1x8x8xf32>
      %1040 = arith.index_cast %arg20 : i32 to index
      %c0_469 = arith.constant 0 : index
      %1041 = memref.load %arg16[%1040, %c0_469] : memref<2x8xf32, #tpu.memory_space<smem>>
      %1042 = vector.broadcast %1041 : f32 to vector<1x8x8xf32>
      %1043 = arith.mulf %1039, %1042 : vector<1x8x8xf32>
      %1044 = arith.index_cast %arg20 : i32 to index
      %c0_470 = arith.constant 0 : index
      %1045 = memref.load %arg17[%1044, %c0_470] : memref<2x8xf32, #tpu.memory_space<smem>>
      %1046 = vector.broadcast %1045 : f32 to vector<1x8x8xf32>
      %1047 = arith.addf %1043, %1046 : vector<1x8x8xf32>
      %1048 = arith.truncf %1047 : vector<1x8x8xf32> to vector<1x8x8xbf16>
      %1049 = vector.extract_strided_slice %62 {offsets = [0, 1024], sizes = [8, 64], strides = [1, 1]} : vector<8x1536xf32> to vector<8x64xf32>
      %1050 = vector.shape_cast %1049 : vector<8x64xf32> to vector<1x8x64xf32>
      %1051 = arith.truncf %1050 : vector<1x8x64xf32> to vector<1x8x64xbf16>
      "tpu.trace_start"() <{level = 10 : i32, message = "bij,bjd->bid"}> : () -> ()
      %cst_471 = arith.constant dense<0.000000e+00> : vector<1x8x64xf32>
      %1052 = tpu.matmul %1048, %1051, %cst_471 {dimension_numbers = #tpu.dot_dimension_numbers<[2], [1], [1], [2], [0, 0, 0, 1, 1, 2], [0], [0]>} : vector<1x8x8xbf16>, vector<1x8x64xbf16>, vector<1x8x64xf32> -> vector<1x8x64xf32>
      "tpu.trace_stop"() : () -> ()
      %1053 = vector.shape_cast %1052 : vector<1x8x64xf32> to vector<8x64xf32>
      %1054 = arith.truncf %1053 : vector<8x64xf32> to vector<8x64xbf16>
      %1055 = vector.extract_strided_slice %1036 {offsets = [0, 0], sizes = [64, 192], strides = [1, 1]} : vector<512x192xbf16> to vector<64x192xbf16>
      %cst_472 = arith.constant dense<0.000000e+00> : vector<8x192xf32>
      %1056 = tpu.matmul %1054, %1055, %cst_472 {dimension_numbers = #tpu.dot_dimension_numbers<[1], [0], [0], [1], [0, 0, 1, 1], [], []>} : vector<8x64xbf16>, vector<64x192xbf16>, vector<8x192xf32> -> vector<8x192xf32>
      %c1_473 = arith.constant 1 : index
      %c0_474 = arith.constant 0 : index
      %c0_475 = arith.constant 0 : index
      %c0_476 = arith.constant 0 : index
      %1057 = vector.load %arg19[%c1_473, %c0_474, %c0_475, %c0_476] : memref<8x1x8x8xf32, #tpu.memory_space<vmem>>, vector<1x1x8x8xf32>
      %1058 = vector.shape_cast %1057 : vector<1x1x8x8xf32> to vector<1x8x8xf32>
      %1059 = arith.mulf %1058, %1033 : vector<1x8x8xf32>
      %1060 = arith.index_cast %arg20 : i32 to index
      %c1_477 = arith.constant 1 : index
      %1061 = memref.load %arg16[%1060, %c1_477] : memref<2x8xf32, #tpu.memory_space<smem>>
      %1062 = vector.broadcast %1061 : f32 to vector<1x8x8xf32>
      %1063 = arith.mulf %1059, %1062 : vector<1x8x8xf32>
      %1064 = arith.index_cast %arg20 : i32 to index
      %c1_478 = arith.constant 1 : index
      %1065 = memref.load %arg17[%1064, %c1_478] : memref<2x8xf32, #tpu.memory_space<smem>>
      %1066 = vector.broadcast %1065 : f32 to vector<1x8x8xf32>
      %1067 = arith.addf %1063, %1066 : vector<1x8x8xf32>
      %1068 = arith.truncf %1067 : vector<1x8x8xf32> to vector<1x8x8xbf16>
      %1069 = vector.extract_strided_slice %62 {offsets = [0, 1088], sizes = [8, 64], strides = [1, 1]} : vector<8x1536xf32> to vector<8x64xf32>
      %1070 = vector.shape_cast %1069 : vector<8x64xf32> to vector<1x8x64xf32>
      %1071 = arith.truncf %1070 : vector<1x8x64xf32> to vector<1x8x64xbf16>
      "tpu.trace_start"() <{level = 10 : i32, message = "bij,bjd->bid"}> : () -> ()
      %cst_479 = arith.constant dense<0.000000e+00> : vector<1x8x64xf32>
      %1072 = tpu.matmul %1068, %1071, %cst_479 {dimension_numbers = #tpu.dot_dimension_numbers<[2], [1], [1], [2], [0, 0, 0, 1, 1, 2], [0], [0]>} : vector<1x8x8xbf16>, vector<1x8x64xbf16>, vector<1x8x64xf32> -> vector<1x8x64xf32>
      "tpu.trace_stop"() : () -> ()
      %1073 = vector.shape_cast %1072 : vector<1x8x64xf32> to vector<8x64xf32>
      %1074 = arith.truncf %1073 : vector<8x64xf32> to vector<8x64xbf16>
      %1075 = vector.extract_strided_slice %1036 {offsets = [64, 0], sizes = [64, 192], strides = [1, 1]} : vector<512x192xbf16> to vector<64x192xbf16>
      %cst_480 = arith.constant dense<0.000000e+00> : vector<8x192xf32>
      %1076 = tpu.matmul %1074, %1075, %cst_480 {dimension_numbers = #tpu.dot_dimension_numbers<[1], [0], [0], [1], [0, 0, 1, 1], [], []>} : vector<8x64xbf16>, vector<64x192xbf16>, vector<8x192xf32> -> vector<8x192xf32>
      %1077 = arith.addf %1056, %1076 : vector<8x192xf32>
      %c2_481 = arith.constant 2 : index
      %c0_482 = arith.constant 0 : index
      %c0_483 = arith.constant 0 : index
      %c0_484 = arith.constant 0 : index
      %1078 = vector.load %arg19[%c2_481, %c0_482, %c0_483, %c0_484] : memref<8x1x8x8xf32, #tpu.memory_space<vmem>>, vector<1x1x8x8xf32>
      %1079 = vector.shape_cast %1078 : vector<1x1x8x8xf32> to vector<1x8x8xf32>
      %1080 = arith.mulf %1079, %1033 : vector<1x8x8xf32>
      %1081 = arith.index_cast %arg20 : i32 to index
      %c2_485 = arith.constant 2 : index
      %1082 = memref.load %arg16[%1081, %c2_485] : memref<2x8xf32, #tpu.memory_space<smem>>
      %1083 = vector.broadcast %1082 : f32 to vector<1x8x8xf32>
      %1084 = arith.mulf %1080, %1083 : vector<1x8x8xf32>
      %1085 = arith.index_cast %arg20 : i32 to index
      %c2_486 = arith.constant 2 : index
      %1086 = memref.load %arg17[%1085, %c2_486] : memref<2x8xf32, #tpu.memory_space<smem>>
      %1087 = vector.broadcast %1086 : f32 to vector<1x8x8xf32>
      %1088 = arith.addf %1084, %1087 : vector<1x8x8xf32>
      %1089 = arith.truncf %1088 : vector<1x8x8xf32> to vector<1x8x8xbf16>
      %1090 = vector.extract_strided_slice %62 {offsets = [0, 1152], sizes = [8, 64], strides = [1, 1]} : vector<8x1536xf32> to vector<8x64xf32>
      %1091 = vector.shape_cast %1090 : vector<8x64xf32> to vector<1x8x64xf32>
      %1092 = arith.truncf %1091 : vector<1x8x64xf32> to vector<1x8x64xbf16>
      "tpu.trace_start"() <{level = 10 : i32, message = "bij,bjd->bid"}> : () -> ()
      %cst_487 = arith.constant dense<0.000000e+00> : vector<1x8x64xf32>
      %1093 = tpu.matmul %1089, %1092, %cst_487 {dimension_numbers = #tpu.dot_dimension_numbers<[2], [1], [1], [2], [0, 0, 0, 1, 1, 2], [0], [0]>} : vector<1x8x8xbf16>, vector<1x8x64xbf16>, vector<1x8x64xf32> -> vector<1x8x64xf32>
      "tpu.trace_stop"() : () -> ()
      %1094 = vector.shape_cast %1093 : vector<1x8x64xf32> to vector<8x64xf32>
      %1095 = arith.truncf %1094 : vector<8x64xf32> to vector<8x64xbf16>
      %1096 = vector.extract_strided_slice %1036 {offsets = [128, 0], sizes = [64, 192], strides = [1, 1]} : vector<512x192xbf16> to vector<64x192xbf16>
      %cst_488 = arith.constant dense<0.000000e+00> : vector<8x192xf32>
      %1097 = tpu.matmul %1095, %1096, %cst_488 {dimension_numbers = #tpu.dot_dimension_numbers<[1], [0], [0], [1], [0, 0, 1, 1], [], []>} : vector<8x64xbf16>, vector<64x192xbf16>, vector<8x192xf32> -> vector<8x192xf32>
      %1098 = arith.addf %1077, %1097 : vector<8x192xf32>
      %c3_489 = arith.constant 3 : index
      %c0_490 = arith.constant 0 : index
      %c0_491 = arith.constant 0 : index
      %c0_492 = arith.constant 0 : index
      %1099 = vector.load %arg19[%c3_489, %c0_490, %c0_491, %c0_492] : memref<8x1x8x8xf32, #tpu.memory_space<vmem>>, vector<1x1x8x8xf32>
      %1100 = vector.shape_cast %1099 : vector<1x1x8x8xf32> to vector<1x8x8xf32>
      %1101 = arith.mulf %1100, %1033 : vector<1x8x8xf32>
      %1102 = arith.index_cast %arg20 : i32 to index
      %c3_493 = arith.constant 3 : index
      %1103 = memref.load %arg16[%1102, %c3_493] : memref<2x8xf32, #tpu.memory_space<smem>>
      %1104 = vector.broadcast %1103 : f32 to vector<1x8x8xf32>
      %1105 = arith.mulf %1101, %1104 : vector<1x8x8xf32>
      %1106 = arith.index_cast %arg20 : i32 to index
      %c3_494 = arith.constant 3 : index
      %1107 = memref.load %arg17[%1106, %c3_494] : memref<2x8xf32, #tpu.memory_space<smem>>
      %1108 = vector.broadcast %1107 : f32 to vector<1x8x8xf32>
      %1109 = arith.addf %1105, %1108 : vector<1x8x8xf32>
      %1110 = arith.truncf %1109 : vector<1x8x8xf32> to vector<1x8x8xbf16>
      %1111 = vector.extract_strided_slice %62 {offsets = [0, 1216], sizes = [8, 64], strides = [1, 1]} : vector<8x1536xf32> to vector<8x64xf32>
      %1112 = vector.shape_cast %1111 : vector<8x64xf32> to vector<1x8x64xf32>
      %1113 = arith.truncf %1112 : vector<1x8x64xf32> to vector<1x8x64xbf16>
      "tpu.trace_start"() <{level = 10 : i32, message = "bij,bjd->bid"}> : () -> ()
      %cst_495 = arith.constant dense<0.000000e+00> : vector<1x8x64xf32>
      %1114 = tpu.matmul %1110, %1113, %cst_495 {dimension_numbers = #tpu.dot_dimension_numbers<[2], [1], [1], [2], [0, 0, 0, 1, 1, 2], [0], [0]>} : vector<1x8x8xbf16>, vector<1x8x64xbf16>, vector<1x8x64xf32> -> vector<1x8x64xf32>
      "tpu.trace_stop"() : () -> ()
      %1115 = vector.shape_cast %1114 : vector<1x8x64xf32> to vector<8x64xf32>
      %1116 = arith.truncf %1115 : vector<8x64xf32> to vector<8x64xbf16>
      %1117 = vector.extract_strided_slice %1036 {offsets = [192, 0], sizes = [64, 192], strides = [1, 1]} : vector<512x192xbf16> to vector<64x192xbf16>
      %cst_496 = arith.constant dense<0.000000e+00> : vector<8x192xf32>
      %1118 = tpu.matmul %1116, %1117, %cst_496 {dimension_numbers = #tpu.dot_dimension_numbers<[1], [0], [0], [1], [0, 0, 1, 1], [], []>} : vector<8x64xbf16>, vector<64x192xbf16>, vector<8x192xf32> -> vector<8x192xf32>
      %1119 = arith.addf %1098, %1118 : vector<8x192xf32>
      %c4_497 = arith.constant 4 : index
      %c0_498 = arith.constant 0 : index
      %c0_499 = arith.constant 0 : index
      %c0_500 = arith.constant 0 : index
      %1120 = vector.load %arg19[%c4_497, %c0_498, %c0_499, %c0_500] : memref<8x1x8x8xf32, #tpu.memory_space<vmem>>, vector<1x1x8x8xf32>
      %1121 = vector.shape_cast %1120 : vector<1x1x8x8xf32> to vector<1x8x8xf32>
      %1122 = arith.mulf %1121, %1033 : vector<1x8x8xf32>
      %1123 = arith.index_cast %arg20 : i32 to index
      %c4_501 = arith.constant 4 : index
      %1124 = memref.load %arg16[%1123, %c4_501] : memref<2x8xf32, #tpu.memory_space<smem>>
      %1125 = vector.broadcast %1124 : f32 to vector<1x8x8xf32>
      %1126 = arith.mulf %1122, %1125 : vector<1x8x8xf32>
      %1127 = arith.index_cast %arg20 : i32 to index
      %c4_502 = arith.constant 4 : index
      %1128 = memref.load %arg17[%1127, %c4_502] : memref<2x8xf32, #tpu.memory_space<smem>>
      %1129 = vector.broadcast %1128 : f32 to vector<1x8x8xf32>
      %1130 = arith.addf %1126, %1129 : vector<1x8x8xf32>
      %1131 = arith.truncf %1130 : vector<1x8x8xf32> to vector<1x8x8xbf16>
      %1132 = vector.extract_strided_slice %62 {offsets = [0, 1280], sizes = [8, 64], strides = [1, 1]} : vector<8x1536xf32> to vector<8x64xf32>
      %1133 = vector.shape_cast %1132 : vector<8x64xf32> to vector<1x8x64xf32>
      %1134 = arith.truncf %1133 : vector<1x8x64xf32> to vector<1x8x64xbf16>
      "tpu.trace_start"() <{level = 10 : i32, message = "bij,bjd->bid"}> : () -> ()
      %cst_503 = arith.constant dense<0.000000e+00> : vector<1x8x64xf32>
      %1135 = tpu.matmul %1131, %1134, %cst_503 {dimension_numbers = #tpu.dot_dimension_numbers<[2], [1], [1], [2], [0, 0, 0, 1, 1, 2], [0], [0]>} : vector<1x8x8xbf16>, vector<1x8x64xbf16>, vector<1x8x64xf32> -> vector<1x8x64xf32>
      "tpu.trace_stop"() : () -> ()
      %1136 = vector.shape_cast %1135 : vector<1x8x64xf32> to vector<8x64xf32>
      %1137 = arith.truncf %1136 : vector<8x64xf32> to vector<8x64xbf16>
      %1138 = vector.extract_strided_slice %1036 {offsets = [256, 0], sizes = [64, 192], strides = [1, 1]} : vector<512x192xbf16> to vector<64x192xbf16>
      %cst_504 = arith.constant dense<0.000000e+00> : vector<8x192xf32>
      %1139 = tpu.matmul %1137, %1138, %cst_504 {dimension_numbers = #tpu.dot_dimension_numbers<[1], [0], [0], [1], [0, 0, 1, 1], [], []>} : vector<8x64xbf16>, vector<64x192xbf16>, vector<8x192xf32> -> vector<8x192xf32>
      %1140 = arith.addf %1119, %1139 : vector<8x192xf32>
      %c5_505 = arith.constant 5 : index
      %c0_506 = arith.constant 0 : index
      %c0_507 = arith.constant 0 : index
      %c0_508 = arith.constant 0 : index
      %1141 = vector.load %arg19[%c5_505, %c0_506, %c0_507, %c0_508] : memref<8x1x8x8xf32, #tpu.memory_space<vmem>>, vector<1x1x8x8xf32>
      %1142 = vector.shape_cast %1141 : vector<1x1x8x8xf32> to vector<1x8x8xf32>
      %1143 = arith.mulf %1142, %1033 : vector<1x8x8xf32>
      %1144 = arith.index_cast %arg20 : i32 to index
      %c5_509 = arith.constant 5 : index
      %1145 = memref.load %arg16[%1144, %c5_509] : memref<2x8xf32, #tpu.memory_space<smem>>
      %1146 = vector.broadcast %1145 : f32 to vector<1x8x8xf32>
      %1147 = arith.mulf %1143, %1146 : vector<1x8x8xf32>
      %1148 = arith.index_cast %arg20 : i32 to index
      %c5_510 = arith.constant 5 : index
      %1149 = memref.load %arg17[%1148, %c5_510] : memref<2x8xf32, #tpu.memory_space<smem>>
      %1150 = vector.broadcast %1149 : f32 to vector<1x8x8xf32>
      %1151 = arith.addf %1147, %1150 : vector<1x8x8xf32>
      %1152 = arith.truncf %1151 : vector<1x8x8xf32> to vector<1x8x8xbf16>
      %1153 = vector.extract_strided_slice %62 {offsets = [0, 1344], sizes = [8, 64], strides = [1, 1]} : vector<8x1536xf32> to vector<8x64xf32>
      %1154 = vector.shape_cast %1153 : vector<8x64xf32> to vector<1x8x64xf32>
      %1155 = arith.truncf %1154 : vector<1x8x64xf32> to vector<1x8x64xbf16>
      "tpu.trace_start"() <{level = 10 : i32, message = "bij,bjd->bid"}> : () -> ()
      %cst_511 = arith.constant dense<0.000000e+00> : vector<1x8x64xf32>
      %1156 = tpu.matmul %1152, %1155, %cst_511 {dimension_numbers = #tpu.dot_dimension_numbers<[2], [1], [1], [2], [0, 0, 0, 1, 1, 2], [0], [0]>} : vector<1x8x8xbf16>, vector<1x8x64xbf16>, vector<1x8x64xf32> -> vector<1x8x64xf32>
      "tpu.trace_stop"() : () -> ()
      %1157 = vector.shape_cast %1156 : vector<1x8x64xf32> to vector<8x64xf32>
      %1158 = arith.truncf %1157 : vector<8x64xf32> to vector<8x64xbf16>
      %1159 = vector.extract_strided_slice %1036 {offsets = [320, 0], sizes = [64, 192], strides = [1, 1]} : vector<512x192xbf16> to vector<64x192xbf16>
      %cst_512 = arith.constant dense<0.000000e+00> : vector<8x192xf32>
      %1160 = tpu.matmul %1158, %1159, %cst_512 {dimension_numbers = #tpu.dot_dimension_numbers<[1], [0], [0], [1], [0, 0, 1, 1], [], []>} : vector<8x64xbf16>, vector<64x192xbf16>, vector<8x192xf32> -> vector<8x192xf32>
      %1161 = arith.addf %1140, %1160 : vector<8x192xf32>
      %c6_513 = arith.constant 6 : index
      %c0_514 = arith.constant 0 : index
      %c0_515 = arith.constant 0 : index
      %c0_516 = arith.constant 0 : index
      %1162 = vector.load %arg19[%c6_513, %c0_514, %c0_515, %c0_516] : memref<8x1x8x8xf32, #tpu.memory_space<vmem>>, vector<1x1x8x8xf32>
      %1163 = vector.shape_cast %1162 : vector<1x1x8x8xf32> to vector<1x8x8xf32>
      %1164 = arith.mulf %1163, %1033 : vector<1x8x8xf32>
      %1165 = arith.index_cast %arg20 : i32 to index
      %c6_517 = arith.constant 6 : index
      %1166 = memref.load %arg16[%1165, %c6_517] : memref<2x8xf32, #tpu.memory_space<smem>>
      %1167 = vector.broadcast %1166 : f32 to vector<1x8x8xf32>
      %1168 = arith.mulf %1164, %1167 : vector<1x8x8xf32>
      %1169 = arith.index_cast %arg20 : i32 to index
      %c6_518 = arith.constant 6 : index
      %1170 = memref.load %arg17[%1169, %c6_518] : memref<2x8xf32, #tpu.memory_space<smem>>
      %1171 = vector.broadcast %1170 : f32 to vector<1x8x8xf32>
      %1172 = arith.addf %1168, %1171 : vector<1x8x8xf32>
      %1173 = arith.truncf %1172 : vector<1x8x8xf32> to vector<1x8x8xbf16>
      %1174 = vector.extract_strided_slice %62 {offsets = [0, 1408], sizes = [8, 64], strides = [1, 1]} : vector<8x1536xf32> to vector<8x64xf32>
      %1175 = vector.shape_cast %1174 : vector<8x64xf32> to vector<1x8x64xf32>
      %1176 = arith.truncf %1175 : vector<1x8x64xf32> to vector<1x8x64xbf16>
      "tpu.trace_start"() <{level = 10 : i32, message = "bij,bjd->bid"}> : () -> ()
      %cst_519 = arith.constant dense<0.000000e+00> : vector<1x8x64xf32>
      %1177 = tpu.matmul %1173, %1176, %cst_519 {dimension_numbers = #tpu.dot_dimension_numbers<[2], [1], [1], [2], [0, 0, 0, 1, 1, 2], [0], [0]>} : vector<1x8x8xbf16>, vector<1x8x64xbf16>, vector<1x8x64xf32> -> vector<1x8x64xf32>
      "tpu.trace_stop"() : () -> ()
      %1178 = vector.shape_cast %1177 : vector<1x8x64xf32> to vector<8x64xf32>
      %1179 = arith.truncf %1178 : vector<8x64xf32> to vector<8x64xbf16>
      %1180 = vector.extract_strided_slice %1036 {offsets = [384, 0], sizes = [64, 192], strides = [1, 1]} : vector<512x192xbf16> to vector<64x192xbf16>
      %cst_520 = arith.constant dense<0.000000e+00> : vector<8x192xf32>
      %1181 = tpu.matmul %1179, %1180, %cst_520 {dimension_numbers = #tpu.dot_dimension_numbers<[1], [0], [0], [1], [0, 0, 1, 1], [], []>} : vector<8x64xbf16>, vector<64x192xbf16>, vector<8x192xf32> -> vector<8x192xf32>
      %1182 = arith.addf %1161, %1181 : vector<8x192xf32>
      %c7_521 = arith.constant 7 : index
      %c0_522 = arith.constant 0 : index
      %c0_523 = arith.constant 0 : index
      %c0_524 = arith.constant 0 : index
      %1183 = vector.load %arg19[%c7_521, %c0_522, %c0_523, %c0_524] : memref<8x1x8x8xf32, #tpu.memory_space<vmem>>, vector<1x1x8x8xf32>
      %1184 = vector.shape_cast %1183 : vector<1x1x8x8xf32> to vector<1x8x8xf32>
      %1185 = arith.mulf %1184, %1033 : vector<1x8x8xf32>
      %1186 = arith.index_cast %arg20 : i32 to index
      %c7_525 = arith.constant 7 : index
      %1187 = memref.load %arg16[%1186, %c7_525] : memref<2x8xf32, #tpu.memory_space<smem>>
      %1188 = vector.broadcast %1187 : f32 to vector<1x8x8xf32>
      %1189 = arith.mulf %1185, %1188 : vector<1x8x8xf32>
      %1190 = arith.index_cast %arg20 : i32 to index
      %c7_526 = arith.constant 7 : index
      %1191 = memref.load %arg17[%1190, %c7_526] : memref<2x8xf32, #tpu.memory_space<smem>>
      %1192 = vector.broadcast %1191 : f32 to vector<1x8x8xf32>
      %1193 = arith.addf %1189, %1192 : vector<1x8x8xf32>
      %1194 = arith.truncf %1193 : vector<1x8x8xf32> to vector<1x8x8xbf16>
      %1195 = vector.extract_strided_slice %62 {offsets = [0, 1472], sizes = [8, 64], strides = [1, 1]} : vector<8x1536xf32> to vector<8x64xf32>
      %1196 = vector.shape_cast %1195 : vector<8x64xf32> to vector<1x8x64xf32>
      %1197 = arith.truncf %1196 : vector<1x8x64xf32> to vector<1x8x64xbf16>
      "tpu.trace_start"() <{level = 10 : i32, message = "bij,bjd->bid"}> : () -> ()
      %cst_527 = arith.constant dense<0.000000e+00> : vector<1x8x64xf32>
      %1198 = tpu.matmul %1194, %1197, %cst_527 {dimension_numbers = #tpu.dot_dimension_numbers<[2], [1], [1], [2], [0, 0, 0, 1, 1, 2], [0], [0]>} : vector<1x8x8xbf16>, vector<1x8x64xbf16>, vector<1x8x64xf32> -> vector<1x8x64xf32>
      "tpu.trace_stop"() : () -> ()
      %1199 = vector.shape_cast %1198 : vector<1x8x64xf32> to vector<8x64xf32>
      %1200 = arith.truncf %1199 : vector<8x64xf32> to vector<8x64xbf16>
      %1201 = vector.extract_strided_slice %1036 {offsets = [448, 0], sizes = [64, 192], strides = [1, 1]} : vector<512x192xbf16> to vector<64x192xbf16>
      %cst_528 = arith.constant dense<0.000000e+00> : vector<8x192xf32>
      %1202 = tpu.matmul %1200, %1201, %cst_528 {dimension_numbers = #tpu.dot_dimension_numbers<[1], [0], [0], [1], [0, 0, 1, 1], [], []>} : vector<8x64xbf16>, vector<64x192xbf16>, vector<8x192xf32> -> vector<8x192xf32>
      %1203 = arith.addf %1182, %1202 : vector<8x192xf32>
      %1204 = arith.addf %arg21, %1203 : vector<8x192xf32>
      %1205 = arith.index_cast %arg20 : i32 to index
      %c0_529 = arith.constant 0 : index
      %c0_530 = arith.constant 0 : index
      %1206 = vector.load %arg6[%1205, %c0_529, %c0_530] : memref<2x1x192xf32, #tpu.memory_space<vmem>>, vector<1x1x192xf32>
      %1207 = vector.shape_cast %1206 : vector<1x1x192xf32> to vector<1x192xf32>
      %1208 = vector.broadcast %1207 : vector<1x192xf32> to vector<8x192xf32>
      %1209 = arith.addf %1204, %1208 : vector<8x192xf32>
      %1210 = arith.index_cast %arg20 : i32 to index
      %c0_531 = arith.constant 0 : index
      %c0_532 = arith.constant 0 : index
      %1211 = vector.load %arg7[%1210, %c0_531, %c0_532] : memref<2x1x192xf32, #tpu.memory_space<vmem>>, vector<1x1x192xf32>
      %1212 = vector.shape_cast %1211 : vector<1x1x192xf32> to vector<1x192xf32>
      %1213 = arith.index_cast %arg20 : i32 to index
      %c0_533 = arith.constant 0 : index
      %c0_534 = arith.constant 0 : index
      %1214 = vector.load %arg8[%1213, %c0_533, %c0_534] : memref<2x1x192xf32, #tpu.memory_space<vmem>>, vector<1x1x192xf32>
      %1215 = vector.shape_cast %1214 : vector<1x1x192xf32> to vector<1x192xf32>
      %cst_535 = arith.constant dense<0.000000e+00> : vector<8xf32>
      %1216 = vector.multi_reduction <add>, %1209, %cst_535 [1] : vector<8x192xf32> to vector<8xf32>
      %1217 = vector.shape_cast %1216 : vector<8xf32> to vector<8x1xf32>
      %cst_536 = arith.constant 1.920000e+02 : f32
      %1218 = vector.broadcast %cst_536 : f32 to vector<8x1xf32>
      %1219 = arith.divf %1217, %1218 : vector<8x1xf32>
      %1220 = vector.broadcast %1219 : vector<8x1xf32> to vector<8x192xf32>
      %1221 = arith.subf %1209, %1220 : vector<8x192xf32>
      %1222 = arith.mulf %1221, %1221 : vector<8x192xf32>
      %cst_537 = arith.constant dense<0.000000e+00> : vector<8xf32>
      %1223 = vector.multi_reduction <add>, %1222, %cst_537 [1] : vector<8x192xf32> to vector<8xf32>
      %1224 = vector.shape_cast %1223 : vector<8xf32> to vector<8x1xf32>
      %cst_538 = arith.constant 1.920000e+02 : f32
      %1225 = vector.broadcast %cst_538 : f32 to vector<8x1xf32>
      %1226 = arith.divf %1224, %1225 : vector<8x1xf32>
      %1227 = vector.broadcast %1219 : vector<8x1xf32> to vector<8x192xf32>
      %1228 = arith.subf %1209, %1227 : vector<8x192xf32>
      %cst_539 = arith.constant 9.99999974E-6 : f32
      %1229 = vector.broadcast %cst_539 : f32 to vector<8x1xf32>
      %1230 = arith.addf %1226, %1229 : vector<8x1xf32>
      %1231 = math.rsqrt %1230 : vector<8x1xf32>
      %1232 = vector.broadcast %1231 : vector<8x1xf32> to vector<8x192xf32>
      %1233 = arith.mulf %1228, %1232 : vector<8x192xf32>
      %1234 = vector.broadcast %1212 : vector<1x192xf32> to vector<8x192xf32>
      %1235 = arith.mulf %1233, %1234 : vector<8x192xf32>
      %1236 = vector.broadcast %1215 : vector<1x192xf32> to vector<8x192xf32>
      %1237 = arith.addf %1235, %1236 : vector<8x192xf32>
      %1238 = arith.truncf %1237 : vector<8x192xf32> to vector<8x192xbf16>
      %1239 = arith.index_cast %arg20 : i32 to index
      %c0_540 = arith.constant 0 : index
      %c0_541 = arith.constant 0 : index
      %1240 = vector.load %arg9[%1239, %c0_540, %c0_541] : memref<2x192x768xbf16, #tpu.memory_space<vmem>>, vector<1x192x768xbf16>
      %1241 = vector.shape_cast %1240 : vector<1x192x768xbf16> to vector<192x768xbf16>
      %cst_542 = arith.constant dense<0.000000e+00> : vector<8x768xf32>
      %1242 = tpu.matmul %1238, %1241, %cst_542 {dimension_numbers = #tpu.dot_dimension_numbers<[1], [0], [0], [1], [0, 0, 1, 1], [], []>} : vector<8x192xbf16>, vector<192x768xbf16>, vector<8x768xf32> -> vector<8x768xf32>
      %1243 = arith.index_cast %arg20 : i32 to index
      %c0_543 = arith.constant 0 : index
      %c0_544 = arith.constant 0 : index
      %1244 = vector.load %arg10[%1243, %c0_543, %c0_544] : memref<2x1x768xf32, #tpu.memory_space<vmem>>, vector<1x1x768xf32>
      %1245 = vector.shape_cast %1244 : vector<1x1x768xf32> to vector<1x768xf32>
      %1246 = vector.broadcast %1245 : vector<1x768xf32> to vector<8x768xf32>
      %1247 = arith.addf %1242, %1246 : vector<8x768xf32>
      %cst_545 = arith.constant 5.000000e-01 : f32
      %1248 = vector.broadcast %cst_545 : f32 to vector<8x768xf32>
      %1249 = arith.mulf %1248, %1247 : vector<8x768xf32>
      %cst_546 = arith.constant 0.707106769 : f32
      %1250 = vector.broadcast %cst_546 : f32 to vector<8x768xf32>
      %1251 = arith.mulf %1247, %1250 : vector<8x768xf32>
      %cst_547 = arith.constant 0.000000e+00 : f32
      %1252 = vector.broadcast %cst_547 : f32 to vector<8x768xf32>
      %1253 = arith.cmpf oge, %1251, %1252 : vector<8x768xf32>
      %cst_548 = arith.constant 1.000000e+00 : f32
      %cst_549 = arith.constant -1.000000e+00 : f32
      %1254 = vector.broadcast %cst_548 : f32 to vector<8x768xf32>
      %1255 = vector.broadcast %cst_549 : f32 to vector<8x768xf32>
      %1256 = arith.select %1253, %1254, %1255 : vector<8x768xi1>, vector<8x768xf32>
      %1257 = math.absf %1251 : vector<8x768xf32>
      %cst_550 = arith.constant 0.327591091 : f32
      %1258 = vector.broadcast %cst_550 : f32 to vector<8x768xf32>
      %1259 = arith.mulf %1258, %1257 : vector<8x768xf32>
      %cst_551 = arith.constant 1.000000e+00 : f32
      %1260 = vector.broadcast %cst_551 : f32 to vector<8x768xf32>
      %1261 = arith.addf %1260, %1259 : vector<8x768xf32>
      %1262 = tpu.reciprocal %1261 {approx = true} : vector<8x768xf32> -> vector<8x768xf32>
      %cst_552 = arith.constant 1.06140542 : f32
      %1263 = vector.broadcast %cst_552 : f32 to vector<8x768xf32>
      %1264 = arith.mulf %1263, %1262 : vector<8x768xf32>
      %cst_553 = arith.constant -1.45315206 : f32
      %1265 = vector.broadcast %cst_553 : f32 to vector<8x768xf32>
      %1266 = arith.addf %1264, %1265 : vector<8x768xf32>
      %1267 = arith.mulf %1266, %1262 : vector<8x768xf32>
      %cst_554 = arith.constant 1.42141378 : f32
      %1268 = vector.broadcast %cst_554 : f32 to vector<8x768xf32>
      %1269 = arith.addf %1267, %1268 : vector<8x768xf32>
      %1270 = arith.mulf %1269, %1262 : vector<8x768xf32>
      %cst_555 = arith.constant -0.284496725 : f32
      %1271 = vector.broadcast %cst_555 : f32 to vector<8x768xf32>
      %1272 = arith.addf %1270, %1271 : vector<8x768xf32>
      %1273 = arith.mulf %1272, %1262 : vector<8x768xf32>
      %cst_556 = arith.constant 0.254829586 : f32
      %1274 = vector.broadcast %cst_556 : f32 to vector<8x768xf32>
      %1275 = arith.addf %1273, %1274 : vector<8x768xf32>
      %1276 = arith.mulf %1275, %1262 : vector<8x768xf32>
      %cst_557 = arith.constant 0.000000e+00 : f32
      %1277 = vector.broadcast %cst_557 : f32 to vector<8x768xf32>
      %1278 = arith.subf %1277, %1257 : vector<8x768xf32>
      %1279 = arith.mulf %1278, %1257 : vector<8x768xf32>
      %1280 = math.exp %1279 : vector<8x768xf32>
      %1281 = arith.mulf %1276, %1280 : vector<8x768xf32>
      %cst_558 = arith.constant 1.000000e+00 : f32
      %1282 = vector.broadcast %cst_558 : f32 to vector<8x768xf32>
      %1283 = arith.subf %1282, %1281 : vector<8x768xf32>
      %1284 = arith.mulf %1256, %1283 : vector<8x768xf32>
      %cst_559 = arith.constant 1.000000e+00 : f32
      %1285 = vector.broadcast %cst_559 : f32 to vector<8x768xf32>
      %1286 = arith.addf %1285, %1284 : vector<8x768xf32>
      %1287 = arith.mulf %1249, %1286 : vector<8x768xf32>
      %1288 = arith.truncf %1287 : vector<8x768xf32> to vector<8x768xbf16>
      %1289 = arith.index_cast %arg20 : i32 to index
      %c0_560 = arith.constant 0 : index
      %c0_561 = arith.constant 0 : index
      %1290 = vector.load %arg11[%1289, %c0_560, %c0_561] : memref<2x768x192xbf16, #tpu.memory_space<vmem>>, vector<1x768x192xbf16>
      %1291 = vector.shape_cast %1290 : vector<1x768x192xbf16> to vector<768x192xbf16>
      %cst_562 = arith.constant dense<0.000000e+00> : vector<8x192xf32>
      %1292 = tpu.matmul %1288, %1291, %cst_562 {dimension_numbers = #tpu.dot_dimension_numbers<[1], [0], [0], [1], [0, 0, 1, 1], [], []>} : vector<8x768xbf16>, vector<768x192xbf16>, vector<8x192xf32> -> vector<8x192xf32>
      %1293 = arith.index_cast %arg20 : i32 to index
      %c0_563 = arith.constant 0 : index
      %c0_564 = arith.constant 0 : index
      %1294 = vector.load %arg12[%1293, %c0_563, %c0_564] : memref<2x1x192xf32, #tpu.memory_space<vmem>>, vector<1x1x192xf32>
      %1295 = vector.shape_cast %1294 : vector<1x1x192xf32> to vector<1x192xf32>
      %1296 = vector.broadcast %1295 : vector<1x192xf32> to vector<8x192xf32>
      %1297 = arith.addf %1292, %1296 : vector<8x192xf32>
      %1298 = arith.addf %1209, %1297 : vector<8x192xf32>
      scf.yield %1298 : vector<8x192xf32>
    }
    %c2_i32_2 = arith.constant 2 : i32
    %c0_3 = arith.constant 0 : index
    %c0_4 = arith.constant 0 : index
    %4 = vector.load %arg13[%c0_3, %c0_4] : memref<1x192xf32, #tpu.memory_space<vmem>>, vector<1x192xf32>
    %c0_5 = arith.constant 0 : index
    %c0_6 = arith.constant 0 : index
    %5 = vector.load %arg14[%c0_5, %c0_6] : memref<1x192xf32, #tpu.memory_space<vmem>>, vector<1x192xf32>
    %cst = arith.constant dense<0.000000e+00> : vector<8xf32>
    %6 = vector.multi_reduction <add>, %3, %cst [1] : vector<8x192xf32> to vector<8xf32>
    %7 = vector.shape_cast %6 : vector<8xf32> to vector<8x1xf32>
    %cst_7 = arith.constant 1.920000e+02 : f32
    %8 = vector.broadcast %cst_7 : f32 to vector<8x1xf32>
    %9 = arith.divf %7, %8 : vector<8x1xf32>
    %10 = vector.broadcast %9 : vector<8x1xf32> to vector<8x192xf32>
    %11 = arith.subf %3, %10 : vector<8x192xf32>
    %12 = arith.mulf %11, %11 : vector<8x192xf32>
    %cst_8 = arith.constant dense<0.000000e+00> : vector<8xf32>
    %13 = vector.multi_reduction <add>, %12, %cst_8 [1] : vector<8x192xf32> to vector<8xf32>
    %14 = vector.shape_cast %13 : vector<8xf32> to vector<8x1xf32>
    %cst_9 = arith.constant 1.920000e+02 : f32
    %15 = vector.broadcast %cst_9 : f32 to vector<8x1xf32>
    %16 = arith.divf %14, %15 : vector<8x1xf32>
    %17 = vector.broadcast %9 : vector<8x1xf32> to vector<8x192xf32>
    %18 = arith.subf %3, %17 : vector<8x192xf32>
    %cst_10 = arith.constant 9.99999974E-6 : f32
    %19 = vector.broadcast %cst_10 : f32 to vector<8x1xf32>
    %20 = arith.addf %16, %19 : vector<8x1xf32>
    %21 = math.rsqrt %20 : vector<8x1xf32>
    %22 = vector.broadcast %21 : vector<8x1xf32> to vector<8x192xf32>
    %23 = arith.mulf %18, %22 : vector<8x192xf32>
    %24 = vector.broadcast %4 : vector<1x192xf32> to vector<8x192xf32>
    %25 = arith.mulf %23, %24 : vector<8x192xf32>
    %26 = vector.broadcast %5 : vector<1x192xf32> to vector<8x192xf32>
    %27 = arith.addf %25, %26 : vector<8x192xf32>
    %28 = vector.shape_cast %27 : vector<8x192xf32> to vector<1x8x192xf32>
    %c0_11 = arith.constant 0 : index
    %c0_12 = arith.constant 0 : index
    %c0_13 = arith.constant 0 : index
    %29 = vector.load %arg18[%c0_11, %c0_12, %c0_13] : memref<1x8x192xf32, #tpu.memory_space<vmem>>, vector<1x8x192xf32>
    tpu.vector_store %arg18[%c0_11, %c0_12, %c0_13], %28 {strides = array<i32>} : memref<1x8x192xf32, #tpu.memory_space<vmem>>, vector<1x8x192xf32>,
    return
  }
  func.func @transform_0(%arg0: i32) -> (i32, i32, i32) {
    %c0_i32 = arith.constant 0 : i32
    %c0_i32_0 = arith.constant 0 : i32
    %c0_i32_1 = arith.constant 0 : i32
    return %arg0, %c0_i32, %c0_i32_0 : i32, i32, i32
  }
  func.func @transform_1(%arg0: i32) -> (i32, i32, i32) {
    %c0_i32 = arith.constant 0 : i32
    %c0_i32_0 = arith.constant 0 : i32
    %c0_i32_1 = arith.constant 0 : i32
    %c0_i32_2 = arith.constant 0 : i32
    return %c0_i32, %c0_i32_0, %c0_i32_1 : i32, i32, i32
  }
  func.func @transform_2(%arg0: i32) -> (i32, i32, i32) {
    %c0_i32 = arith.constant 0 : i32
    %c0_i32_0 = arith.constant 0 : i32
    %c0_i32_1 = arith.constant 0 : i32
    %c0_i32_2 = arith.constant 0 : i32
    return %c0_i32, %c0_i32_0, %c0_i32_1 : i32, i32, i32
  }
  func.func @transform_3(%arg0: i32) -> (i32, i32, i32) {
    %c0_i32 = arith.constant 0 : i32
    %c0_i32_0 = arith.constant 0 : i32
    %c0_i32_1 = arith.constant 0 : i32
    %c0_i32_2 = arith.constant 0 : i32
    return %c0_i32, %c0_i32_0, %c0_i32_1 : i32, i32, i32
  }
  func.func @transform_4(%arg0: i32) -> (i32, i32, i32) {
    %c0_i32 = arith.constant 0 : i32
    %c0_i32_0 = arith.constant 0 : i32
    %c0_i32_1 = arith.constant 0 : i32
    %c0_i32_2 = arith.constant 0 : i32
    return %c0_i32, %c0_i32_0, %c0_i32_1 : i32, i32, i32
  }
  func.func @transform_5(%arg0: i32) -> (i32, i32, i32) {
    %c0_i32 = arith.constant 0 : i32
    %c0_i32_0 = arith.constant 0 : i32
    %c0_i32_1 = arith.constant 0 : i32
    %c0_i32_2 = arith.constant 0 : i32
    return %c0_i32, %c0_i32_0, %c0_i32_1 : i32, i32, i32
  }
  func.func @transform_6(%arg0: i32) -> (i32, i32, i32) {
    %c0_i32 = arith.constant 0 : i32
    %c0_i32_0 = arith.constant 0 : i32
    %c0_i32_1 = arith.constant 0 : i32
    %c0_i32_2 = arith.constant 0 : i32
    return %c0_i32, %c0_i32_0, %c0_i32_1 : i32, i32, i32
  }
  func.func @transform_7(%arg0: i32) -> (i32, i32, i32) {
    %c0_i32 = arith.constant 0 : i32
    %c0_i32_0 = arith.constant 0 : i32
    %c0_i32_1 = arith.constant 0 : i32
    %c0_i32_2 = arith.constant 0 : i32
    return %c0_i32, %c0_i32_0, %c0_i32_1 : i32, i32, i32
  }
  func.func @transform_8(%arg0: i32) -> (i32, i32, i32) {
    %c0_i32 = arith.constant 0 : i32
    %c0_i32_0 = arith.constant 0 : i32
    %c0_i32_1 = arith.constant 0 : i32
    %c0_i32_2 = arith.constant 0 : i32
    return %c0_i32, %c0_i32_0, %c0_i32_1 : i32, i32, i32
  }
  func.func @transform_9(%arg0: i32) -> (i32, i32, i32) {
    %c0_i32 = arith.constant 0 : i32
    %c0_i32_0 = arith.constant 0 : i32
    %c0_i32_1 = arith.constant 0 : i32
    %c0_i32_2 = arith.constant 0 : i32
    return %c0_i32, %c0_i32_0, %c0_i32_1 : i32, i32, i32
  }
  func.func @transform_10(%arg0: i32) -> (i32, i32, i32) {
    %c0_i32 = arith.constant 0 : i32
    %c0_i32_0 = arith.constant 0 : i32
    %c0_i32_1 = arith.constant 0 : i32
    %c0_i32_2 = arith.constant 0 : i32
    return %c0_i32, %c0_i32_0, %c0_i32_1 : i32, i32, i32
  }
  func.func @transform_11(%arg0: i32) -> (i32, i32, i32) {
    %c0_i32 = arith.constant 0 : i32
    %c0_i32_0 = arith.constant 0 : i32
    %c0_i32_1 = arith.constant 0 : i32
    %c0_i32_2 = arith.constant 0 : i32
    return %c0_i32, %c0_i32_0, %c0_i32_1 : i32, i32, i32
  }
  func.func @transform_12(%arg0: i32) -> (i32, i32) {
    %c0_i32 = arith.constant 0 : i32
    %c0_i32_0 = arith.constant 0 : i32
    %c0_i32_1 = arith.constant 0 : i32
    return %c0_i32, %c0_i32_0 : i32, i32
  }
  func.func @transform_13(%arg0: i32) -> (i32, i32) {
    %c0_i32 = arith.constant 0 : i32
    %c0_i32_0 = arith.constant 0 : i32
    %c0_i32_1 = arith.constant 0 : i32
    return %c0_i32, %c0_i32_0 : i32, i32
  }
  func.func @transform_14(%arg0: i32) -> (i32, i32) {
    %c0_i32 = arith.constant 0 : i32
    %c0_i32_0 = arith.constant 0 : i32
    %c0_i32_1 = arith.constant 0 : i32
    return %c0_i32, %c0_i32_0 : i32, i32
  }
  func.func @transform_15(%arg0: i32) -> (i32, i32) {
    %c0_i32 = arith.constant 0 : i32
    %c0_i32_0 = arith.constant 0 : i32
    %c0_i32_1 = arith.constant 0 : i32
    return %c0_i32, %c0_i32_0 : i32, i32
  }
  func.func @transform_16(%arg0: i32) -> (i32, i32) {
    %c0_i32 = arith.constant 0 : i32
    %c0_i32_0 = arith.constant 0 : i32
    %c0_i32_1 = arith.constant 0 : i32
    return %c0_i32, %c0_i32_0 : i32, i32
  }
  func.func @transform_17(%arg0: i32) -> (i32, i32, i32) {
    %c0_i32 = arith.constant 0 : i32
    %c0_i32_0 = arith.constant 0 : i32
    %c0_i32_1 = arith.constant 0 : i32
    return %arg0, %c0_i32, %c0_i32_0 : i32, i32, i32
  }
}

</mosaic_0001>

<bundles_post_ra>
// kernel: tpu_custom_call.1
= control target key start
LH: loop header
LB: loop body
LE: loop exit
PB: predicated region body
PF: predicated region fallthrough
CT: control target
= control target key end

     0   :  { %s9203_s0 = inlined_call_operand.vmem [shape: f32[2,8,192], index: 0, kind: input, shape index: {}]   ;;  %s9204_s1 = inlined_call_operand.vmem [shape: f32[2,1,192], index: 1, kind: input, shape index: {}]   ;;  %s9205_s2 = inlined_call_operand.vmem [shape: f32[2,1,192], index: 2, kind: input, shape index: {}]   ;;  %s9206_s3 = inlined_call_operand.vmem [shape: bf16[2,192,1536], index: 3, kind: input, shape index: {}]   ;;  %s9207_s4 = inlined_call_operand.vmem [shape: bf16[2,512,192], index: 4, kind: input, shape index: {}]   ;;  %s9208_s5 = inlined_call_operand.vmem [shape: f32[2,1,192], index: 5, kind: input, shape index: {}]   ;;  %s9209_s6 = inlined_call_operand.vmem [shape: f32[2,1,192], index: 6, kind: input, shape index: {}]   ;;  %s9210_s7 = inlined_call_operand.vmem [shape: f32[2,1,192], index: 7, kind: input, shape index: {}]   ;;  %s9211_s8 = inlined_call_operand.hbm [shape: bf16[2,192,768], index: 8, kind: input, shape index: {}]   ;;  %s9212_s9 = inlined_call_operand.vmem [shape: f32[2,1,768], index: 9, kind: input, shape index: {}]   ;;  %s9213_s10 = inlined_call_operand.vmem [shape: bf16[2,768,192], index: 10, kind: input, shape index: {}]   ;;  %s9214_s11 = inlined_call_operand.vmem [shape: f32[2,1,192], index: 11, kind: input, shape index: {}]   ;;  %s9215_s12 = inlined_call_operand.vmem [shape: f32[1,192], index: 12, kind: input, shape index: {}]   ;;  %s9216_s13 = inlined_call_operand.vmem [shape: f32[1,192], index: 13, kind: input, shape index: {}]   ;;  %s9217_s14 = inlined_call_operand.vmem [shape: f32[16,8], index: 14, kind: input, shape index: {}]   ;;  %s9218_s15 = inlined_call_operand.vmem [shape: f32[2,8], index: 15, kind: input, shape index: {}]   ;;  %s9219_s16 = inlined_call_operand.vmem [shape: f32[2,8], index: 16, kind: input, shape index: {}]   ;;  %s9220_s17 = inlined_call_operand.hbm [shape: f32[2,8,192], index: 17, kind: output, shape index: {}]  }
   0x1   :  { %9350 = sst [smem:[#allocation82_spill]] %s9203_s0 }
   0x2   :  { %9351 = sst [smem:[#allocation83_spill]] %s9204_s1 }
   0x3   :  { %9352 = sst [smem:[#allocation84_spill]] %s9205_s2 }
   0x4   :  { %9353 = sst [smem:[#allocation85_spill]] %s9206_s3 }
   0x5   :  { %9354 = sst [smem:[#allocation86_spill]] %s9207_s4 }
   0x6   :  { %9355 = sst [smem:[#allocation87_spill]] %s9208_s5 }
   0x7   :  { %9356 = sst [smem:[#allocation88_spill]] %s9209_s6 }
   0x8   :  { %9357 = sst [smem:[#allocation89_spill]] %s9210_s7 }
   0x9   :  { %9358 = sst [smem:[#allocation90_spill]] %s9211_s8 }
   0xa   :  { %9359 = sst [smem:[#allocation91_spill]] %s9212_s9 }
   0xb   :  { %9360 = sst [smem:[#allocation92_spill]] %s9213_s10 }
   0xc   :  { %9361 = sst [smem:[#allocation93_spill]] %s9214_s11 }
   0xd   :  { %9362 = sst [smem:[#allocation94_spill]] %s9215_s12 }
   0xe   :  { %9363 = sst [smem:[#allocation95_spill]] %s9216_s13 }
   0xf   :  { %9364 = sst [smem:[#allocation96_spill]] %s9217_s14 }
  0x10   :  { %9365 = sst [smem:[#allocation97_spill]] %s9218_s15 }
  0x11   :  { %9366 = sst [smem:[#allocation98_spill]] %s9219_s16 }
  0x12   :  { %9367 = sst [smem:[#allocation99_spill]] %s9220_s17 }
  0x13   :  { %22 = vsyncpa [#allocation4], 0 }
  0x14   :  { %23 = vsyncpa [#allocation6], 0 }
  0x15   :  { %24 = vsyncpa [#allocation9], 0 }
  0x16   :  { %25 = vsyncpa [#allocation5], 0 }
  0x17   :  { %27 = vsyncpa [#allocation5 + $0x1], 0  ;;  %s7358_s24 = smov 0   ;;  %s7360_s25 = smov 0  }
  0x18   :  { %s7362_s26 = smov 0   ;;  %s7364_s27 = smov 0  }
  0x19 LB: > { %9368 = sst [smem:[#allocation16_spill]] %s7228_s24  ;;  %s7379_s28 = sadd.s32 4294967295, %s7240_s27   ;;  %s7240_s27 = sphi %s7364_s27, %s9691_s27   ;;  %s7236_s26 = sphi %s7362_s26, %s9694_s26   ;;  %s7232_s25 = sphi %s7360_s25, %s9693_s25   ;;  %s7228_s24 = sphi %s7358_s24, %s9692_s24  }
  0x1a   : > { %9369 = sst [smem:[#allocation17_spill]] %s7232_s25  ;;  %s5740_s29 = sadd.s32 4294967294, %s7240_s27  }
  0x1b   : > { %9370 = sst [smem:[#allocation18_spill]] %s7236_s26  ;;  %s7383_s0 = sadd.s32 1, %s7240_s27  }
  0x1c   : > { %9371 = sst [smem:[#allocation19_spill]] %s7240_s27  ;;  %s402_s30 = sadd.s32 1, %s7236_s26 }
  0x1d   : > { %9372 = sst [smem:[#allocation20_spill]] %s7379_s28  ;;  %s399_s18 = ssub.s32 %s7240_s27, %s7383_s0 }
  0x1e   : > { %9373 = sst [smem:[#allocation21_spill]] %s7383_s0  ;;  %p412_p0 = scmp.ne.s32.totalorder %s7236_s26, %s7232_s25 }
  0x1f   : > { %p400_p1 = scmp.eq.s32.totalorder %s399_s18, 0  ;;  %p413_p2 = scmp.eq.s32.totalorder %s7379_s28, 1 }
  0x20   : > { %p418_p3 = scmp.ne.s32.totalorder %s7232_s25, %s7228_s24  ;;  %p419_p4 = scmp.eq.s32.totalorder %s5740_s29, 1 }
  0x21   : > { %s7394_s19 = scalar_select %p400_p1, %s7236_s26, %s402_s30  }
  0x22   : > { %p7396_p5 = por %p413_p2, %p412_p0  ;;  %p7400_p6 = por %p419_p4, %p418_p3 }
  0x23   : > { %9374 = sst [smem:[#allocation22_spill]] %s7394_s19  ;;  %p5741_p7 = scmp.ge.s32.totalorder %s7240_s27, 1 }
  0x24   : > { %s9375_s1 = scalar_select %p7396_p5, 1, 0 }
  0x25   : > { %s9377_s20 = scalar_select %p7400_p6, 1, 0 }
  0x26   : > { %9376 = sst [smem:[#allocation23_spill]] %s9375_s1  ;;  %p426_p8 = scmp.lt.s32.totalorder %s7240_s27, 3 }
  0x27   : > { %9378 = sst [smem:[#allocation24_spill]] %s9377_s20  ;;  %p9227_p9 = scmp.eq.s32.totalorder %s7379_s28, 0 }
  0x28   : > { %p7407_p10 = pnand %p5741_p7, %p426_p8  ;;  %s9380_s15 = sld [smem:[#allocation97_spill]] }
  0x29   : > { %s7254_s30 = smov [#allocation3]   ;;  %s9382_s14 = sld [smem:[#allocation96_spill]] }
  0x2a   : > { %p6358_p11 = pneg %p7407_p10  ;;  %s459_s18 = sshll.u32 %s7254_s30, 4  ;;  %s7422_s18 = int_to_ptr.vmem [resolvable:$true] %s459_s18 }
  0x2c   : > { %p7418_p12 = pnand %p9227_p9, %p6358_p11 }
  0x2e   : > { %s501_s29 = sshll.u32 %s9380_s15, 4  ;;  %p7431_p0 = pneg %p7418_p12  ;;  %s502_s29 = int_to_ptr.vmem [resolvable:$true] %s501_s29 }
  0x2f   : > { %s487_s20 = sshll.u32 %s9382_s14, 4  ;;  %s7081_s22 = scalar_lea.vmem %s502_s29, 32  ;;  %s7427_s20 = int_to_ptr.vmem [resolvable:$true] %s487_s20 }
  0x30   : > { %p7082_p13 = scmp.ne.s32.totalorder %s502_s29, %s7081_s22  ;;  %p7089_p3 = scmp.lt.s32.totalorder %s502_s29, %s502_s29 }
  0x31   : > { %p7090_p4 = scmp.lt.s32.totalorder %s7081_s22, %s7081_s22 }
  0x32   : > { %p7084_p1 = pnand %p7431_p0, %p7082_p13 }
  0x33   : > { %p7091_p7 = por %p7090_p4, %p7089_p3 }
  0x34   : > { %p7085_p2 = pneg %p7084_p1 }
  0x36   : > { %p7092_p8 = pnand %p7091_p7, %p7085_p2 }
  0x38   : > { %7095 = shalt.err (!%p7092_p8)
}
  0x39   : > { %s7255_s26 = smov [#allocation8]   ;;  %s9384_s8 = sld [smem:[#allocation90_spill]] }
  0x3a   : > { %6367 = dma.vmem_to_smem (!%p7418_p12), %s502_s29, 32, %s7255_s26, [#allocation9]  }
  0x3f   : > { %s7096_s14 = scalar_lea.hbm %s9384_s8, 18432 }
  0x40   : > { %p7097_p11 = scmp.ne.s32.totalorder %s9384_s8, %s7096_s14  ;;  %p7103_p2 = scmp.lt.u32.totalorder %s7096_s14, %s9384_s8 }
  0x42   : > { %p7099_p13 = pnand %p7097_p11, %p7431_p0 }
  0x44   : > { %p7100_p1 = pneg %p7099_p13 }
  0x46   : > { %p7105_p3 = pnand %p7103_p2, %p7100_p1 }
  0x48   : > { %7108 = shalt.err (!%p7105_p3)
}
  0x49   : > { %s7109_s29 = scalar_lea.vmem %s7422_s18, 18432  ;;  %p7117_p9 = scmp.lt.s32.totalorder %s7422_s18, %s7422_s18 }
  0x4a   : > { %p7110_p4 = scmp.ne.s32.totalorder %s7422_s18, %s7109_s29  ;;  %p7118_p6 = scmp.lt.s32.totalorder %s7109_s29, %s7109_s29 }
  0x4c   : > { %p7112_p7 = pnand %p7110_p4, %p7431_p0  ;;  %p7119_p11 = por %p7118_p6, %p7117_p9 }
  0x4e   : > { %p7113_p8 = pneg %p7112_p7 }
  0x50   : > { %p7120_p13 = pnand %p7119_p11, %p7113_p8 }
  0x52   : > { %7123 = shalt.err (!%p7120_p13)
}
  0x53   : > { %s7256_s15 = smov 384   ;;  %s7257_s14 = smov 24  }
  0x54   : > { %6361 = dma.hbm_to_vmem [thread:$0]  (!%p7418_p12), %s9384_s8, 18432, %s7422_s18, [#allocation4], %s7256_s15, %s7256_s15, %s7257_s14  }
  0x55   : > { %s9385_s16 = sld [smem:[#allocation98_spill]]  ;;  %s7124_s22 = scalar_lea.vmem %s7427_s20, 256 }
  0x56   : > { %p7125_p6 = scmp.ne.s32.totalorder %s7427_s20, %s7124_s22  ;;  %p7132_p2 = scmp.lt.s32.totalorder %s7427_s20, %s7427_s20 }
  0x57   : > { %p7133_p3 = scmp.lt.s32.totalorder %s7124_s22, %s7124_s22 }
  0x58   : > { %p7127_p9 = pnand %p7125_p6, %p7431_p0 }
  0x59   : > { %p7134_p4 = por %p7133_p3, %p7132_p2 }
  0x5a   : > { %p7128_p1 = pneg %p7127_p9 }
  0x5b   : > { %s512_s30 = sshll.u32 %s9385_s16, 4  ;;  %s513_s30 = int_to_ptr.vmem [resolvable:$true] %s512_s30 }
  0x5c   : > { %p7135_p7 = pnand %p7134_p4, %p7128_p1 }
  0x5e   : > { %7138 = shalt.err (!%p7135_p7)
}
  0x5f   : > { %s7258_s29 = smov [#allocation7]   ;;  %s7259_s18 = smov 128  }
  0x60   : > { %s7260_s15 = smov 8   ;;  %s7139_s14 = scalar_lea.vmem %s513_s30, 32 }
  0x61   : > { %6364 = dma.vmem_to_smem (!%p7418_p12), %s7427_s20, 256, %s7258_s29, [#allocation6], %s7259_s18, %s7259_s18, %s7260_s15  }
  0x62   : > { %p7140_p8 = scmp.ne.s32.totalorder %s513_s30, %s7139_s14  ;;  %p7147_p6 = scmp.lt.s32.totalorder %s513_s30, %s513_s30 }
  0x63   : > { %p7148_p9 = scmp.lt.s32.totalorder %s7139_s14, %s7139_s14 }
  0x64   : > { %p7142_p11 = pnand %p7140_p8, %p7431_p0 }
  0x65   : > { %p7149_p5 = por %p7148_p9, %p7147_p6 }
  0x66   : > { %p7143_p13 = pneg %p7142_p11 }
  0x68   : > { %p7150_p2 = pnand %p7149_p5, %p7143_p13 }
  0x6a   : > { %7153 = shalt.err (!%p7150_p2)
}
  0x6b   : > { %s7261_s24 = smov [#allocation10]   ;;  %533 = sbr.rel (%p7407_p10) target bundleno = 3610 (0xe1a), region = 88 }
  0x6c   : > { %6370 = dma.vmem_to_smem (!%p7418_p12), %s513_s30, 32, %s7261_s24, [#allocation9]  }
  0x72   : > { %p9386_p1 = scmp.eq.s32.totalorder %s7379_s28, 0 }
  0x74   : > { %7211 = dma.done.wait (%p9386_p1), [#allocation4], 18432   ;;  %p9387_p3 = pmov %p9386_p1 }
  0x75   : > { %p9388_p0 = pmov %p9386_p1 }
  0x76   : > { %7213 = vsyncadd (%p9387_p3), [#allocation4], 4294948864 }
  0x77   : > { %7215 = dma.done.wait (%p9388_p0), [#allocation6], 256   ;;  %p9389_p4 = pmov %p9388_p0 }
  0x78   : > { %p9390_p5 = pmov %p9388_p0 }
  0x79   : > { %7217 = vsyncadd (%p9389_p4), [#allocation6], 4294967040 }
  0x7a   : > { %7219 = dma.done.wait (%p9390_p5), [#allocation9], 64   ;;  %p9391_p12 = pmov %p9388_p0 }
  0x7c   : > { %7221 = vsyncadd (%p9391_p12), [#allocation9], 4294967232 }
  0x7d   : > { %551 = sfence }
  0x7e   : > { %s9229_s19 = sand.u32 1, %s7232_s25   ;;  %p598_p10 = scmp.lt.s32.totalorder %s7379_s28, 1 }
  0x7f   : > { %s5752_s20 = sshll.u32 %s9229_s19, 4  ;;  %s9392_s0 = sld [smem:[#allocation82_spill]] }
  0x80   : > { %s599_s21 = scalar_select %p598_p10, %s7379_s28, 1 }
  0x81   : > { %s7500_s22 = scalar_lea.vmem [#allocation11], %s5752_s20  ;;  %s7506_s29 = smov 0  }
  0x82   : > { %s6184_s23 = sshll.u32 %s599_s21, 4  ;;  %9393 = sst [smem:[#allocation25_spill]] %s7500_s22 }
  0x85   : > { %s602_s30 = scalar_lea.vmem %s9392_s0, %s6184_s23 }
  0x86   : > { %v604_v0 = vld [vmem:[%s602_s30] sm:$0xff]   ;;  %v605_v1 = vld [vmem:[%s602_s30 + $0x8] sm:$0xff]  }
  0x87 LB: >> { %9394 = sst [smem:[#allocation26_spill]] %s7252_s29  ;;  %vm619_vm0 = vcmask 523264   ;;  %s6185_s18 = smul.u32 1152, %s7252_s29  ;;  %vm7263_vm1 = vmmov 0   ;;  %vm2856_vm2 = vcmask 1043456   ;;  %vm1831_vm3 = vcmask 64512   ;;  %s7252_s29 = sphi %s7506_s29, %s611_s29   ;;  %v7248_v0 = vphi %v604_v0, %v9677_v0   ;;  %v7244_v1 = vphi %v605_v1, %v9676_v1  }
  0x88   : >> { %v620_v2 = vsel %vm619_vm0, %v7244_v1, 0.0  ;;  %s9395_s3 = sld [smem:[#allocation85_spill]]  ;;  %s7588_s20 = sshll.u32 %s7252_s29, 1 }
  0x89   : >> { %v621_v3 = vadd.f32 %v7248_v0, %v620_v2  ;;  %v640_v2 = vlaneseq  ;;  %9396 = sst [smem:[#allocation27_spill]] %s7588_s20  ;;  %s9397_s27 = sld [smem:[#allocation83_spill]] }
  0x8a   : >> { %s9398_s2 = sld [smem:[#allocation84_spill]]  ;;  %s9230_s15 = smov 64  }
  0x8b   : >> { %622 = vadd.xlane.f32.xlu0 %v621_v3  ;;  %s7826_s14 = sshll.u32 %s7252_s29, 10  ;;  %s9400_s12 = smov 64  }
  0x8c   : >> { %s7834_s21 = sld [smem:[#allocation7 + %s7826_s14]]  ;;  %s2281_s0 = sadd.s32 3, %s7826_s14 }
  0x8d   : >> { %s2282_s30 = sld [smem:[#allocation7 + %s2281_s0]]  ;;  %s2284_s19 = sadd.s32 4, %s7826_s14 }
  0x8e   : >> { %s7524_s24 = scalar_lea.vmem %s9395_s3, %s6185_s18  ;;  %s7845_s3 = sadd.s32 128, %s7826_s14 }
  0x8f   : >> { %v6453_v4 = vld [vmem:[%s7524_s24 + $0x4] ss:$48 sps:$4 sm:$0xff]   ;;  %v6455_v5 = vld [vmem:[%s7524_s24 + $0xc] ss:$48 sps:$4 sm:$0xff]   ;;  %v6457_v6 = vld [vmem:[%s7524_s24] ss:$48 sps:$4 sm:$0xff]   ;;  %s615_s26 = scalar_lea.vmem %s9397_s27, %s7588_s20 }
  0x90   : >> { %1537 = vmatprep.subr.bf16.mxu0 %v6453_v4  ;;  %v6458_v7 = vld [vmem:[%s7524_s24 + $0x8] ss:$48 sps:$4 sm:$0xff]   ;;  %1578 = vmatprep.subr.bf16.mxu1 %v6455_v5  ;;  %v6459_v8 = vld [vmem:[%s7524_s24 + $0x64] ss:$48 sps:$4 sm:$0xff]   ;;  %v6461_v9 = vld [vmem:[%s7524_s24 + $0x6c] ss:$48 sps:$4 sm:$0xff]   ;;  %s617_s18 = scalar_lea.vmem %s9398_s2, %s7588_s20 }
  0x91   : >> { %1538 = vmatpush1.bf16.msra.mxu0 %v6457_v6  ;;  %1579 = vmatpush1.bf16.msra.mxu1 %v6458_v7  ;;  %v6463_v10 = vld [vmem:[%s7524_s24 + $0x60] ss:$48 sps:$4 sm:$0xff]   ;;  %v6464_v11 = vld [vmem:[%s7524_s24 + $0x68] ss:$48 sps:$4 sm:$0xff]   ;;  %v6465_v12 = vld [vmem:[%s7524_s24 + $0xc4] ss:$48 sps:$4 sm:$0xff]  }
  0x92   : >> { %1539 = vmatprep.subr.bf16.mxu0 %v6459_v8  ;;  %1580 = vmatprep.subr.bf16.mxu1 %v6461_v9  ;;  %v6467_v13 = vld [vmem:[%s7524_s24 + $0xcc] ss:$48 sps:$4 sm:$0xff]   ;;  %v6469_v14 = vld [vmem:[%s7524_s24 + $0xc0] ss:$48 sps:$4 sm:$0xff]   ;;  %v6470_v15 = vld [vmem:[%s7524_s24 + $0xc8] ss:$48 sps:$4 sm:$0xff]  }
  0x93   : >> { %v6471_v16 = vld [vmem:[%s7524_s24 + $0x124] ss:$48 sps:$4 sm:$0xff]   ;;  %v6473_v17 = vld [vmem:[%s7524_s24 + $0x12c] ss:$48 sps:$4 sm:$0xff]   ;;  %v6475_v18 = vld [vmem:[%s7524_s24 + $0x120] ss:$48 sps:$4 sm:$0xff]  }
  0x94   : >> { %v6476_v19 = vld [vmem:[%s7524_s24 + $0x128] ss:$48 sps:$4 sm:$0xff]   ;;  %v6477_v20 = vld [vmem:[%s7524_s24 + $0x184] ss:$48 sps:$4 sm:$0xff]   ;;  %v6479_v21 = vld [vmem:[%s7524_s24 + $0x18c] ss:$48 sps:$4 sm:$0xff]  }
  0x95   : >> { %1540 = vmatpush1.bf16.msra.mxu0 %v6463_v10  ;;  %1581 = vmatpush1.bf16.msra.mxu1 %v6464_v11  ;;  %v6481_v22 = vld [vmem:[%s7524_s24 + $0x180] ss:$48 sps:$4 sm:$0xff]   ;;  %v6482_v23 = vld [vmem:[%s7524_s24 + $0x188] ss:$48 sps:$4 sm:$0xff]   ;;  %v6483_v24 = vld [vmem:[%s7524_s24 + $0x1e4] ss:$48 sps:$4 sm:$0xff]  }
  0x96   : >> { %1541 = vmatprep.subr.bf16.mxu0 %v6465_v12  ;;  %1582 = vmatprep.subr.bf16.mxu1 %v6467_v13  ;;  %v6485_v25 = vld [vmem:[%s7524_s24 + $0x1ec] ss:$48 sps:$4 sm:$0xff]   ;;  %v6487_v26 = vld [vmem:[%s7524_s24 + $0x1e0] ss:$48 sps:$4 sm:$0xff]   ;;  %v6488_v27 = vld [vmem:[%s7524_s24 + $0x1e8] ss:$48 sps:$4 sm:$0xff]  }
  0x97   : >> { %v6489_v28 = vld [vmem:[%s7524_s24 + $0x244] ss:$48 sps:$4 sm:$0xff]   ;;  %v6491_v29 = vld [vmem:[%s7524_s24 + $0x24c] ss:$48 sps:$4 sm:$0xff]   ;;  %v6493_v38 = vld [vmem:[%s7524_s24 + $0x240] ss:$48 sps:$4 sm:$0xff]  }
  0x98   : >> { %v6494_v39 = vld [vmem:[%s7524_s24 + $0x248] ss:$48 sps:$4 sm:$0xff]   ;;  %v6495_v40 = vld [vmem:[%s7524_s24 + $0x2a4] ss:$48 sps:$4 sm:$0xff]   ;;  %v6497_v41 = vld [vmem:[%s7524_s24 + $0x2ac] ss:$48 sps:$4 sm:$0xff]  }
  0x99   : >> { %1542 = vmatpush1.bf16.msra.mxu0 %v6469_v14  ;;  %1583 = vmatpush1.bf16.msra.mxu1 %v6470_v15  ;;  %v6499_v42 = vld [vmem:[%s7524_s24 + $0x2a0] ss:$48 sps:$4 sm:$0xff]   ;;  %v6500_v43 = vld [vmem:[%s7524_s24 + $0x2a8] ss:$48 sps:$4 sm:$0xff]   ;;  %v6501_v44 = vld [vmem:[%s7524_s24 + $0x304] ss:$48 sps:$4 sm:$0xff]  }
  0x9a   : >> { %1543 = vmatprep.subr.bf16.mxu0 %v6471_v16  ;;  %1584 = vmatprep.subr.bf16.mxu1 %v6473_v17  ;;  %v6503_v45 = vld [vmem:[%s7524_s24 + $0x30c] ss:$48 sps:$4 sm:$0xff]   ;;  %v6505_v46 = vld [vmem:[%s7524_s24 + $0x300] ss:$48 sps:$4 sm:$0xff]   ;;  %v6506_v47 = vld [vmem:[%s7524_s24 + $0x308] ss:$48 sps:$4 sm:$0xff]  }
  0x9b   : >> { %v6507_v48 = vld [vmem:[%s7524_s24 + $0x364] ss:$48 sps:$4 sm:$0xff]   ;;  %v6509_v49 = vld [vmem:[%s7524_s24 + $0x36c] ss:$48 sps:$4 sm:$0xff]   ;;  %v6511_v50 = vld [vmem:[%s7524_s24 + $0x360] ss:$48 sps:$4 sm:$0xff]  }
  0x9c   : >> { %v6512_v51 = vld [vmem:[%s7524_s24 + $0x368] ss:$48 sps:$4 sm:$0xff]   ;;  %v6513_v52 = vld [vmem:[%s7524_s24 + $0x3c4] ss:$48 sps:$4 sm:$0xff]   ;;  %v6515_v53 = vld [vmem:[%s7524_s24 + $0x3cc] ss:$48 sps:$4 sm:$0xff]  }
  0x9d   : >> { %1544 = vmatpush1.bf16.msra.mxu0 %v6475_v18  ;;  %1585 = vmatpush1.bf16.msra.mxu1 %v6476_v19  ;;  %v6517_v54 = vld [vmem:[%s7524_s24 + $0x3c0] ss:$48 sps:$4 sm:$0xff]   ;;  %v6518_v55 = vld [vmem:[%s7524_s24 + $0x3c8] ss:$48 sps:$4 sm:$0xff]   ;;  %v6519_v56 = vld [vmem:[%s7524_s24 + $0x424] ss:$48 sps:$4 sm:$0xff]  }
  0x9e   : >> { %1545 = vmatprep.subr.bf16.mxu0 %v6477_v20  ;;  %1586 = vmatprep.subr.bf16.mxu1 %v6479_v21  ;;  %v6521_v57 = vld [vmem:[%s7524_s24 + $0x42c] ss:$48 sps:$4 sm:$0xff]   ;;  %v6523_v58 = vld [vmem:[%s7524_s24 + $0x420] ss:$48 sps:$4 sm:$0xff]   ;;  %v6524_v59 = vld [vmem:[%s7524_s24 + $0x428] ss:$48 sps:$4 sm:$0xff]  }
  0x9f   : >> { %v6527_v60 = vld [vmem:[%s7524_s24 + $0x14] ss:$48 sps:$4 sm:$0xff]   ;;  %v6530_v61 = vld [vmem:[%s7524_s24 + $0x1c] ss:$48 sps:$4 sm:$0xff]   ;;  %v7590_v4 = vshrl.u32 %v640_v2, 7  ;;  %9399 = sst [smem:[#allocation28_spill]] %s7834_s21 }
  0xa0   : >> { %v616_v7 = vld [vmem:[%s615_s26] sm:$0x3]  ;;  %v6593_v2 = vld [vmem:[%s7524_s24 + $0x434] ss:$48 sps:$4 sm:$0xff]   ;;  %s2278_s27 = sadd.s32 2, %s7826_s14  ;;  %s2287_s8 = sadd.s32 5, %s7826_s14 }
  0xa1   : >> { %1546 = vmatpush1.bf16.msra.mxu0 %v6481_v22  ;;  %1587 = vmatpush1.bf16.msra.mxu1 %v6482_v23  ;;  %v7601_v5 = vsub.s32 0, %v7590_v4  ;;  %v7604_v6 = vsub.s32 1, %v7590_v4  ;;  %v618_v8 = vld [vmem:[%s617_s18] sm:$0x3]  ;;  %v6528_v23 = vld [vmem:[%s7524_s24 + $0x18] ss:$48 sps:$4 sm:$0xff]  }
  0xa2   : >> { %1547 = vmatprep.subr.bf16.mxu0 %v6483_v24  ;;  %1588 = vmatprep.subr.bf16.mxu1 %v6485_v25  ;;  %v6525_v22 = vld [vmem:[%s7524_s24 + $0x10] ss:$48 sps:$4 sm:$0xff]   ;;  %v6533_v24 = vld [vmem:[%s7524_s24 + $0x74] ss:$48 sps:$4 sm:$0xff]   ;;  %v6536_v25 = vld [vmem:[%s7524_s24 + $0x7c] ss:$48 sps:$4 sm:$0xff]  }
  0xa3   : >> { %v643_v9 = vrot.slane %v616_v7, %v7601_v5  ;;  %v647_v10 = vrot.slane %v616_v7, %v7604_v6  ;;  %v656_v12 = vrot.slane %v618_v8, %v7601_v5  ;;  %v660_v13 = vrot.slane %v618_v8, %v7604_v6  ;;  %v6591_v7 = vld [vmem:[%s7524_s24 + $0x430] ss:$48 sps:$4 sm:$0xff]   ;;  %v6594_v8 = vld [vmem:[%s7524_s24 + $0x438] ss:$48 sps:$4 sm:$0xff]   ;;  %s2279_s26 = sld [smem:[#allocation7 + %s2278_s27]]  ;;  %s2290_s16 = sadd.s32 6, %s7826_s14 }
  0xa4   : >> { %s9237_s17 = sadd.s32 7, %s7826_s14  ;;  %s9239_s1 = sadd.s32 1, %s7845_s3 }
  0xa5   : >> { %1548 = vmatpush1.bf16.msra.mxu0 %v6487_v26  ;;  %1589 = vmatpush1.bf16.msra.mxu1 %v6488_v27  ;;  %v6531_v26 = vld [vmem:[%s7524_s24 + $0x70] ss:$48 sps:$4 sm:$0xff]   ;;  %v6534_v27 = vld [vmem:[%s7524_s24 + $0x78] ss:$48 sps:$4 sm:$0xff]   ;;  %s7851_s13 = sld [smem:[#allocation7 + %s2287_s8]]  ;;  %s9240_s22 = sadd.s32 2, %s7845_s3 }
  0xa6   : >> { %1549 = vmatprep.subr.bf16.mxu0 %v6489_v28  ;;  %1590 = vmatprep.subr.bf16.mxu1 %v6491_v29  ;;  %v6539_v28 = vld [vmem:[%s7524_s24 + $0xd4] ss:$48 sps:$4 sm:$0xff]   ;;  %v6542_v29 = vld [vmem:[%s7524_s24 + $0xdc] ss:$48 sps:$4 sm:$0xff]   ;;  %s7877_s28 = sld [smem:[#allocation7 + %s2278_s27]]  ;;  %s9409_s10 = sadd.s32 7, %s7826_s14 }
  0xa7   : >> { %s7881_s11 = sld [smem:[#allocation7 + %s2281_s0]] }
  0xa8   : >> { %s7893_s27 = sld [smem:[#allocation7 + %s2287_s8]] }
  0xa9   : >> { %1550 = vmatpush1.bf16.msra.mxu0 %v6493_v38  ;;  %1591 = vmatpush1.bf16.msra.mxu1 %v6494_v39  ;;  %v6549_v38 = vld [vmem:[%s7524_s24 + $0x190] ss:$48 sps:$4 sm:$0xff]   ;;  %v6552_v39 = vld [vmem:[%s7524_s24 + $0x198] ss:$48 sps:$4 sm:$0xff]   ;;  %s7901_s7 = sld [smem:[#allocation7 + %s2290_s16]] }
  0xaa   : >> { %1551 = vmatprep.subr.bf16.mxu0 %v6495_v40  ;;  %1592 = vmatprep.subr.bf16.mxu1 %v6497_v41  ;;  %v6557_v40 = vld [vmem:[%s7524_s24 + $0x1f4] ss:$48 sps:$4 sm:$0xff]   ;;  %v6560_v41 = vld [vmem:[%s7524_s24 + $0x1fc] ss:$48 sps:$4 sm:$0xff]   ;;  %s7918_s5 = sld [smem:[#allocation7 + %s9409_s10]] }
  0xac   : >> { %9403 = sst [smem:[#allocation31_spill]] %s7877_s28 }
  0xad   : >> { %1552 = vmatpush1.bf16.msra.mxu0 %v6499_v42  ;;  %1593 = vmatpush1.bf16.msra.mxu1 %v6500_v43  ;;  %v6555_v42 = vld [vmem:[%s7524_s24 + $0x1f0] ss:$48 sps:$4 sm:$0xff]   ;;  %v6558_v43 = vld [vmem:[%s7524_s24 + $0x1f8] ss:$48 sps:$4 sm:$0xff]   ;;  %9404 = sst [smem:[#allocation32_spill]] %s7881_s11 }
  0xae   : >> { %1553 = vmatprep.subr.bf16.mxu0 %v6501_v44  ;;  %1594 = vmatprep.subr.bf16.mxu1 %v6503_v45  ;;  %v6563_v44 = vld [vmem:[%s7524_s24 + $0x254] ss:$48 sps:$4 sm:$0xff]   ;;  %v6566_v45 = vld [vmem:[%s7524_s24 + $0x25c] ss:$48 sps:$4 sm:$0xff]   ;;  %9406 = sst [smem:[#allocation34_spill]] %s7893_s27 }
  0xaf   : >> { %9407 = sst [smem:[#allocation35_spill]] %s7901_s7  ;;  %s7935_s7 = sadd.s32 384, %s7826_s14 }
  0xb0   : >> { %9410 = sst [smem:[#allocation37_spill]] %s7918_s5 }
  0xb1   : >> { %1554 = vmatpush1.bf16.msra.mxu0 %v6505_v46  ;;  %1595 = vmatpush1.bf16.msra.mxu1 %v6506_v47  ;;  %v6561_v46 = vld [vmem:[%s7524_s24 + $0x250] ss:$48 sps:$4 sm:$0xff]   ;;  %v6564_v47 = vld [vmem:[%s7524_s24 + $0x258] ss:$48 sps:$4 sm:$0xff]  }
  0xb2   : >> { %1555 = vmatprep.subr.bf16.mxu0 %v6507_v48  ;;  %1596 = vmatprep.subr.bf16.mxu1 %v6509_v49  ;;  %v6569_v48 = vld [vmem:[%s7524_s24 + $0x2b4] ss:$48 sps:$4 sm:$0xff]   ;;  %v6572_v49 = vld [vmem:[%s7524_s24 + $0x2bc] ss:$48 sps:$4 sm:$0xff]  }
  0xb5   : >> { %1556 = vmatpush1.bf16.msra.mxu0 %v6511_v50  ;;  %1597 = vmatpush1.bf16.msra.mxu1 %v6512_v51  ;;  %v6567_v50 = vld [vmem:[%s7524_s24 + $0x2b0] ss:$48 sps:$4 sm:$0xff]   ;;  %v6570_v51 = vld [vmem:[%s7524_s24 + $0x2b8] ss:$48 sps:$4 sm:$0xff]  }
  0xb6   : >> { %1557 = vmatprep.subr.bf16.mxu0 %v6513_v52  ;;  %1598 = vmatprep.subr.bf16.mxu1 %v6515_v53  ;;  %v6575_v52 = vld [vmem:[%s7524_s24 + $0x314] ss:$48 sps:$4 sm:$0xff]   ;;  %v6578_v53 = vld [vmem:[%s7524_s24 + $0x31c] ss:$48 sps:$4 sm:$0xff]  }
  0xb9   : >> { %1558 = vmatpush1.bf16.msra.mxu0 %v6517_v54  ;;  %1599 = vmatpush1.bf16.msra.mxu1 %v6518_v55  ;;  %v6573_v54 = vld [vmem:[%s7524_s24 + $0x310] ss:$48 sps:$4 sm:$0xff]   ;;  %v6576_v55 = vld [vmem:[%s7524_s24 + $0x318] ss:$48 sps:$4 sm:$0xff]  }
  0xba   : >> { %1559 = vmatprep.subr.bf16.mxu0 %v6519_v56  ;;  %1600 = vmatprep.subr.bf16.mxu1 %v6521_v57  ;;  %v6581_v56 = vld [vmem:[%s7524_s24 + $0x374] ss:$48 sps:$4 sm:$0xff]   ;;  %v6584_v57 = vld [vmem:[%s7524_s24 + $0x37c] ss:$48 sps:$4 sm:$0xff]  }
  0xbd   : >> { %1560 = vmatpush1.bf16.msra.mxu0 %v6523_v58  ;;  %1601 = vmatpush1.bf16.msra.mxu1 %v6524_v59  ;;  %v6579_v58 = vld [vmem:[%s7524_s24 + $0x370] ss:$48 sps:$4 sm:$0xff]   ;;  %v6582_v59 = vld [vmem:[%s7524_s24 + $0x378] ss:$48 sps:$4 sm:$0xff]  }
  0xbe   : >> { %1619 = vmatprep.subr.bf16.mxu0 %v6527_v60  ;;  %1660 = vmatprep.subr.bf16.mxu1 %v6530_v61  ;;  %v6587_v60 = vld [vmem:[%s7524_s24 + $0x3d4] ss:$48 sps:$4 sm:$0xff]   ;;  %v6590_v61 = vld [vmem:[%s7524_s24 + $0x3dc] ss:$48 sps:$4 sm:$0xff]  }
 0x118   : >> { %v623_v30 = vpop.xlane.xlu0 %622 }
 0x119   : >> { %v625_v31 = vmul.f32 0.0052083335, %v623_v30  ;;  %v6537_v30 = vld [vmem:[%s7524_s24 + $0xd0] ss:$48 sps:$4 sm:$0xff]  }
 0x11b   : >> { %v7553_v32 = vsub.f32 %v7248_v0, %v625_v31  ;;  %v7556_v33 = vsub.f32 %v7244_v1, %v625_v31  ;;  %v6540_v31 = vld [vmem:[%s7524_s24 + $0xd8] ss:$48 sps:$4 sm:$0xff]  }
 0x11d   : >> { %v628_v34 = vmul.f32 %v7553_v32, %v7553_v32  ;;  %v629_v35 = vmul.f32 %v7556_v33, %v7556_v33 }
 0x11f   : >> { %v630_v36 = vsel %vm619_vm0, %v629_v35, 0.0  ;;  %v6546_v35 = vld [vmem:[%s7524_s24 + $0x138] ss:$48 sps:$4 sm:$0xff]  }
 0x120   : >> { %v631_v37 = vadd.f32 %v630_v36, %v628_v34  ;;  %v6543_v34 = vld [vmem:[%s7524_s24 + $0x130] ss:$48 sps:$4 sm:$0xff]   ;;  %v6551_v36 = vld [vmem:[%s7524_s24 + $0x194] ss:$48 sps:$4 sm:$0xff]  }
 0x122   : >> { %632 = vadd.xlane.f32.xlu0 %v631_v37  ;;  %v6554_v37 = vld [vmem:[%s7524_s24 + $0x19c] ss:$48 sps:$4 sm:$0xff]  }
 0x1af   : >> { %v633_v62 = vpop.xlane.xlu0 %632 }
 0x1b0   : >> { %v634_v63 = vmul.f32 0.0052083335, %v633_v62  ;;  %v6585_v62 = vld [vmem:[%s7524_s24 + $0x3d0] ss:$48 sps:$4 sm:$0xff]  }
 0x1b2   : >> { %v635_v3 = vadd.f32 1e-05, %v634_v63  ;;  %v6588_v63 = vld [vmem:[%s7524_s24 + $0x3d8] ss:$48 sps:$4 sm:$0xff]  }
 0x1b4   : >> { %7017 = vrsqrt.f32 %v635_v3  ;;  %v6596_v3 = vld [vmem:[%s7524_s24 + $0x43c] ss:$48 sps:$4 sm:$0xff]  }
 0x1be   : >> { %v7018_v11 = vpop.eup %7017 }
 0x1bf   : >> { %v637_v14 = vmul.f32 %v7018_v11, %v7553_v32  ;;  %v638_v15 = vmul.f32 %v7018_v11, %v7556_v33  ;;  %v6545_v32 = vld [vmem:[%s7524_s24 + $0x134] ss:$48 sps:$4 sm:$0xff]   ;;  %v6548_v33 = vld [vmem:[%s7524_s24 + $0x13c] ss:$48 sps:$4 sm:$0xff]   ;;  %v6597_v11 = vld [vmem:[%s7524_s24 + $0x20] ss:$48 sps:$4 sm:$0xff]  }
 0x1c1   : >> { %v650_v16 = vmul.f32 %v643_v9, %v637_v14  ;;  %v651_v17 = vmul.f32 %v647_v10, %v638_v15  ;;  %v6599_v9 = vld [vmem:[%s7524_s24 + $0x24] ss:$48 sps:$4 sm:$0xff]   ;;  %v6602_v10 = vld [vmem:[%s7524_s24 + $0x2c] ss:$48 sps:$4 sm:$0xff]   ;;  %v6603_v15 = vld [vmem:[%s7524_s24 + $0x80] ss:$48 sps:$4 sm:$0xff]  }
 0x1c2   : >> { %v6608_v14 = vld [vmem:[%s7524_s24 + $0x8c] ss:$48 sps:$4 sm:$0xff]  }
 0x1c3   : >> { %v663_v18 = vadd.f32 %v656_v12, %v650_v16  ;;  %v664_v19 = vadd.f32 %v660_v13, %v651_v17  ;;  %v6600_v12 = vld [vmem:[%s7524_s24 + $0x28] ss:$48 sps:$4 sm:$0xff]   ;;  %v6605_v13 = vld [vmem:[%s7524_s24 + $0x84] ss:$48 sps:$4 sm:$0xff]  }
 0x1c4   : >> { %v6606_v16 = vld [vmem:[%s7524_s24 + $0x88] ss:$48 sps:$4 sm:$0xff]   ;;  %v6611_v17 = vld [vmem:[%s7524_s24 + $0xe4] ss:$48 sps:$4 sm:$0xff]  }
 0x1c5   : >> { %v7612_v20 = vpack.c.bf16 %v663_v18, %v663_v18  ;;  %v7614_v21 = vpack.c.bf16 %v664_v19, %v664_v19  ;;  %v6614_v18 = vld [vmem:[%s7524_s24 + $0xec] ss:$48 sps:$4 sm:$0xff]   ;;  %v6609_v19 = vld [vmem:[%s7524_s24 + $0xe0] ss:$48 sps:$4 sm:$0xff]  }
 0x1c7   : >> { %5901 = vmatprep.mubr.msk.bf16.mxu0 %vm619_vm0, %v7614_v21  ;;  %5902 = vmatprep.mubr.msk.bf16.mxu1 %vm619_vm0, %v7614_v21 }
 0x1c8   : >> { %1570 = vmatmul.mubr.bf16.vlgmr.msra.gmra.mrb[0].mxu0 %v7612_v20  ;;  %1611 = vmatmul.mubr.bf16.vlgmr.msra.gmra.mrb[0].mxu1 %v7612_v20 }
 0x1c9   : >> { %1620 = vmatpush1.bf16.msra.mxu0 %v6525_v22  ;;  %1661 = vmatpush1.bf16.msra.mxu1 %v6528_v23  ;;  %v6612_v22 = vld [vmem:[%s7524_s24 + $0xe8] ss:$48 sps:$4 sm:$0xff]   ;;  %v6617_v23 = vld [vmem:[%s7524_s24 + $0x144] ss:$48 sps:$4 sm:$0xff]  }
 0x1ca   : >> { %5903 = vmatprep.mubr.msk.bf16.mxu0 %vm619_vm0, %v7614_v21  ;;  %5904 = vmatprep.mubr.msk.bf16.mxu1 %vm619_vm0, %v7614_v21 }
 0x1cb   : >> { %1621 = vmatprep.subr.bf16.mxu0 %v6533_v24  ;;  %1662 = vmatprep.subr.bf16.mxu1 %v6536_v25  ;;  %v6620_v24 = vld [vmem:[%s7524_s24 + $0x14c] ss:$48 sps:$4 sm:$0xff]   ;;  %v6618_v25 = vld [vmem:[%s7524_s24 + $0x148] ss:$48 sps:$4 sm:$0xff]  }
 0x1cd   : >> { %1622 = vmatpush1.bf16.msra.mxu0 %v6531_v26  ;;  %1663 = vmatpush1.bf16.msra.mxu1 %v6534_v27  ;;  %v6623_v26 = vld [vmem:[%s7524_s24 + $0x1a4] ss:$48 sps:$4 sm:$0xff]   ;;  %v6626_v27 = vld [vmem:[%s7524_s24 + $0x1ac] ss:$48 sps:$4 sm:$0xff]  }
 0x1ce   : >> { %1623 = vmatprep.subr.bf16.mxu0 %v6539_v28  ;;  %1664 = vmatprep.subr.bf16.mxu1 %v6542_v29  ;;  %v6621_v28 = vld [vmem:[%s7524_s24 + $0x1a0] ss:$48 sps:$4 sm:$0xff]   ;;  %v6624_v29 = vld [vmem:[%s7524_s24 + $0x1a8] ss:$48 sps:$4 sm:$0xff]  }
 0x1d1   : >> { %1624 = vmatpush1.bf16.msra.mxu0 %v6537_v30  ;;  %1665 = vmatpush1.bf16.msra.mxu1 %v6540_v31  ;;  %v6629_v30 = vld [vmem:[%s7524_s24 + $0x204] ss:$48 sps:$4 sm:$0xff]   ;;  %v6632_v31 = vld [vmem:[%s7524_s24 + $0x20c] ss:$48 sps:$4 sm:$0xff]  }
 0x1d2   : >> { %1625 = vmatprep.subr.bf16.mxu0 %v6545_v32  ;;  %1666 = vmatprep.subr.bf16.mxu1 %v6548_v33  ;;  %v6627_v32 = vld [vmem:[%s7524_s24 + $0x200] ss:$48 sps:$4 sm:$0xff]   ;;  %v6630_v33 = vld [vmem:[%s7524_s24 + $0x208] ss:$48 sps:$4 sm:$0xff]  }
 0x1d5   : >> { %1626 = vmatpush1.bf16.msra.mxu0 %v6543_v34  ;;  %1667 = vmatpush1.bf16.msra.mxu1 %v6546_v35  ;;  %v6635_v34 = vld [vmem:[%s7524_s24 + $0x264] ss:$48 sps:$4 sm:$0xff]   ;;  %v6638_v35 = vld [vmem:[%s7524_s24 + $0x26c] ss:$48 sps:$4 sm:$0xff]  }
 0x1d6   : >> { %1627 = vmatprep.subr.bf16.mxu0 %v6551_v36  ;;  %1668 = vmatprep.subr.bf16.mxu1 %v6554_v37  ;;  %v6633_v36 = vld [vmem:[%s7524_s24 + $0x260] ss:$48 sps:$4 sm:$0xff]   ;;  %v6636_v37 = vld [vmem:[%s7524_s24 + $0x268] ss:$48 sps:$4 sm:$0xff]  }
 0x1d9   : >> { %1628 = vmatpush1.bf16.msra.mxu0 %v6549_v38  ;;  %1669 = vmatpush1.bf16.msra.mxu1 %v6552_v39  ;;  %v6641_v38 = vld [vmem:[%s7524_s24 + $0x2c4] ss:$48 sps:$4 sm:$0xff]   ;;  %v6644_v39 = vld [vmem:[%s7524_s24 + $0x2cc] ss:$48 sps:$4 sm:$0xff]  }
 0x1da   : >> { %1629 = vmatprep.subr.bf16.mxu0 %v6557_v40  ;;  %1670 = vmatprep.subr.bf16.mxu1 %v6560_v41  ;;  %v6639_v40 = vld [vmem:[%s7524_s24 + $0x2c0] ss:$48 sps:$4 sm:$0xff]   ;;  %v6642_v41 = vld [vmem:[%s7524_s24 + $0x2c8] ss:$48 sps:$4 sm:$0xff]  }
 0x1dd   : >> { %1630 = vmatpush1.bf16.msra.mxu0 %v6555_v42  ;;  %1671 = vmatpush1.bf16.msra.mxu1 %v6558_v43  ;;  %v6647_v42 = vld [vmem:[%s7524_s24 + $0x324] ss:$48 sps:$4 sm:$0xff]   ;;  %v6650_v43 = vld [vmem:[%s7524_s24 + $0x32c] ss:$48 sps:$4 sm:$0xff]  }
 0x1de   : >> { %1631 = vmatprep.subr.bf16.mxu0 %v6563_v44  ;;  %1672 = vmatprep.subr.bf16.mxu1 %v6566_v45  ;;  %v6645_v44 = vld [vmem:[%s7524_s24 + $0x320] ss:$48 sps:$4 sm:$0xff]   ;;  %v6648_v45 = vld [vmem:[%s7524_s24 + $0x328] ss:$48 sps:$4 sm:$0xff]  }
 0x1e1   : >> { %1632 = vmatpush1.bf16.msra.mxu0 %v6561_v46  ;;  %1673 = vmatpush1.bf16.msra.mxu1 %v6564_v47  ;;  %v6653_v46 = vld [vmem:[%s7524_s24 + $0x384] ss:$48 sps:$4 sm:$0xff]   ;;  %v6656_v47 = vld [vmem:[%s7524_s24 + $0x38c] ss:$48 sps:$4 sm:$0xff]  }
 0x1e2   : >> { %1633 = vmatprep.subr.bf16.mxu0 %v6569_v48  ;;  %1674 = vmatprep.subr.bf16.mxu1 %v6572_v49  ;;  %v6651_v48 = vld [vmem:[%s7524_s24 + $0x380] ss:$48 sps:$4 sm:$0xff]   ;;  %v6654_v49 = vld [vmem:[%s7524_s24 + $0x388] ss:$48 sps:$4 sm:$0xff]  }
 0x1e5   : >> { %1634 = vmatpush1.bf16.msra.mxu0 %v6567_v50  ;;  %1675 = vmatpush1.bf16.msra.mxu1 %v6570_v51  ;;  %v6659_v50 = vld [vmem:[%s7524_s24 + $0x3e4] ss:$48 sps:$4 sm:$0xff]   ;;  %v6662_v51 = vld [vmem:[%s7524_s24 + $0x3ec] ss:$48 sps:$4 sm:$0xff]  }
 0x1e6   : >> { %1635 = vmatprep.subr.bf16.mxu0 %v6575_v52  ;;  %1676 = vmatprep.subr.bf16.mxu1 %v6578_v53  ;;  %v6657_v52 = vld [vmem:[%s7524_s24 + $0x3e0] ss:$48 sps:$4 sm:$0xff]   ;;  %v6660_v53 = vld [vmem:[%s7524_s24 + $0x3e8] ss:$48 sps:$4 sm:$0xff]  }
 0x1e9   : >> { %1636 = vmatpush1.bf16.msra.mxu0 %v6573_v54  ;;  %1677 = vmatpush1.bf16.msra.mxu1 %v6576_v55  ;;  %v6665_v54 = vld [vmem:[%s7524_s24 + $0x444] ss:$48 sps:$4 sm:$0xff]   ;;  %v6668_v55 = vld [vmem:[%s7524_s24 + $0x44c] ss:$48 sps:$4 sm:$0xff]  }
 0x1ea   : >> { %1637 = vmatprep.subr.bf16.mxu0 %v6581_v56  ;;  %1678 = vmatprep.subr.bf16.mxu1 %v6584_v57  ;;  %v6663_v56 = vld [vmem:[%s7524_s24 + $0x440] ss:$48 sps:$4 sm:$0xff]   ;;  %v6666_v57 = vld [vmem:[%s7524_s24 + $0x448] ss:$48 sps:$4 sm:$0xff]  }
 0x1ed   : >> { %1638 = vmatpush1.bf16.msra.mxu0 %v6579_v58  ;;  %1679 = vmatpush1.bf16.msra.mxu1 %v6582_v59  ;;  %v9348_v58 = vmov 0.0  }
 0x1ee   : >> { %1639 = vmatprep.subr.bf16.mxu0 %v6587_v60  ;;  %1680 = vmatprep.subr.bf16.mxu1 %v6590_v61 }
 0x1f1   : >> { %1640 = vmatpush1.bf16.msra.mxu0 %v6585_v62  ;;  %1681 = vmatpush1.bf16.msra.mxu1 %v6588_v63 }
 0x1f2   : >> { %1641 = vmatprep.subr.bf16.mxu0 %v6593_v2  ;;  %1682 = vmatprep.subr.bf16.mxu1 %v6596_v3 }
 0x1f5   : >> { %1642 = vmatpush1.bf16.msra.mxu0 %v6591_v7  ;;  %1683 = vmatpush1.bf16.msra.mxu1 %v6594_v8 }
 0x1f6   : >> { %1701 = vmatprep.subr.bf16.mxu0 %v6599_v9  ;;  %1742 = vmatprep.subr.bf16.mxu1 %v6602_v10 }
 0x1f8   : >> { %1652 = vmatmul.mubr.bf16.vlgmr.msra.gmra.mrb[4].mxu0 %v7612_v20  ;;  %1693 = vmatmul.mubr.bf16.vlgmr.msra.gmra.mrb[4].mxu1 %v7612_v20 }
 0x1f9   : >> { %1702 = vmatpush1.bf16.msra.mxu0 %v6597_v11  ;;  %5905 = vmatprep.mubr.msk.bf16.mxu0 %vm619_vm0, %v7614_v21 }
 0x1fa   : >> { %1743 = vmatpush1.bf16.msra.mxu1 %v6600_v12  ;;  %5906 = vmatprep.mubr.msk.bf16.mxu1 %vm619_vm0, %v7614_v21  ;;  %v6615_v21 = vld [vmem:[%s7524_s24 + $0x140] ss:$48 sps:$4 sm:$0xff]   ;;  %s2275_s24 = sadd.s32 1, %s7826_s14 }
 0x1fb   : >> { %1703 = vmatprep.subr.bf16.mxu0 %v6605_v13  ;;  %1744 = vmatprep.subr.bf16.mxu1 %v6608_v14  ;;  %s2276_s23 = sld [smem:[#allocation7 + %s2275_s24]] }
 0x1fd   : >> { %1704 = vmatpush1.bf16.msra.mxu0 %v6603_v15 }
 0x1fe   : >> { %1745 = vmatpush1.bf16.msra.mxu1 %v6606_v16  ;;  %1705 = vmatprep.subr.bf16.mxu0 %v6611_v17 }
 0x1ff   : >> { %1746 = vmatprep.subr.bf16.mxu1 %v6614_v18 }
 0x201   : >> { %1706 = vmatpush1.bf16.msra.mxu0 %v6609_v19  ;;  %s2277_s18 = sadd.f32 %s2276_s23, %s7834_s21  ;;  %s2291_s23 = sld [smem:[#allocation7 + %s2290_s16]] }
 0x202   : >> { %1747 = vmatpush1.bf16.msra.mxu1 %v6612_v22  ;;  %1707 = vmatprep.subr.bf16.mxu0 %v6617_v23 }
 0x203   : >> { %1748 = vmatprep.subr.bf16.mxu1 %v6620_v24  ;;  %s2280_s2 = sadd.f32 %s2279_s26, %s2277_s18  ;;  %s7857_s26 = sld [smem:[#allocation7 + %s9237_s17]] }
 0x204   : >> { %s7864_s18 = sld [smem:[#allocation7 + %s7845_s3]] }
 0x205   : >> { %1708 = vmatpush1.bf16.msra.mxu0 %v6615_v21  ;;  %s2283_s25 = sadd.f32 %s2282_s30, %s2280_s2  ;;  %s7868_s2 = sld [smem:[#allocation7 + %s9239_s1]] }
 0x206   : >> { %1749 = vmatpush1.bf16.msra.mxu1 %v6618_v25  ;;  %1709 = vmatprep.subr.bf16.mxu0 %v6623_v26  ;;  %s7870_s30 = sld [smem:[#allocation7 + %s2275_s24]]  ;;  %s7884_s1 = sadd.s32 256, %s7826_s14 }
 0x207   : >> { %1750 = vmatprep.subr.bf16.mxu1 %v6626_v27  ;;  %s7891_s24 = sld [smem:[#allocation7 + %s2284_s19]]  ;;  %s9246_s9 = sadd.s32 1, %s7884_s1 }
 0x208   : >> { %s7911_s6 = sld [smem:[#allocation7 + %s7884_s1]]  ;;  %s9252_s16 = sadd.s32 2, %s7884_s1 }
 0x209   : >> { %1710 = vmatpush1.bf16.msra.mxu0 %v6621_v28  ;;  %s2334_s20 = sld [smem:[#allocation7 + %s9252_s16]]  ;;  %s9251_s4 = sadd.s32 3, %s7884_s1 }
 0x20a   : >> { %1751 = vmatpush1.bf16.msra.mxu1 %v6624_v29  ;;  %1711 = vmatprep.subr.bf16.mxu0 %v6629_v30  ;;  %9401 = sst [smem:[#allocation29_spill]] %s7864_s18  ;;  %s9412_s16 = sadd.s32 1, %s7845_s3 }
 0x20b   : >> { %1752 = vmatprep.subr.bf16.mxu1 %v6632_v31  ;;  %s2304_s8 = sadd.f32 %s7868_s2, %s7864_s18  ;;  %s2337_s10 = sld [smem:[#allocation7 + %s9251_s4]] }
 0x20c   : >> { %9402 = sst [smem:[#allocation30_spill]] %s7870_s30 }
 0x20d   : >> { %1712 = vmatpush1.bf16.msra.mxu0 %v6627_v32  ;;  %9405 = sst [smem:[#allocation33_spill]] %s7891_s24 }
 0x20e   : >> { %1753 = vmatpush1.bf16.msra.mxu1 %v6630_v33  ;;  %1713 = vmatprep.subr.bf16.mxu0 %v6635_v34  ;;  %9408 = sst [smem:[#allocation36_spill]] %s7911_s6 }
 0x20f   : >> { %1754 = vmatprep.subr.bf16.mxu1 %v6638_v35 }
 0x211   : >> { %1714 = vmatpush1.bf16.msra.mxu0 %v6633_v36 }
 0x212   : >> { %1755 = vmatpush1.bf16.msra.mxu1 %v6636_v37  ;;  %1715 = vmatprep.subr.bf16.mxu0 %v6641_v38 }
 0x213   : >> { %1756 = vmatprep.subr.bf16.mxu1 %v6644_v39 }
 0x215   : >> { %1716 = vmatpush1.bf16.msra.mxu0 %v6639_v40 }
 0x216   : >> { %1757 = vmatpush1.bf16.msra.mxu1 %v6642_v41  ;;  %1717 = vmatprep.subr.bf16.mxu0 %v6647_v42 }
 0x217   : >> { %1758 = vmatprep.subr.bf16.mxu1 %v6650_v43 }
 0x219   : >> { %1718 = vmatpush1.bf16.msra.mxu0 %v6645_v44 }
 0x21a   : >> { %1759 = vmatpush1.bf16.msra.mxu1 %v6648_v45  ;;  %1719 = vmatprep.subr.bf16.mxu0 %v6653_v46 }
 0x21b   : >> { %1760 = vmatprep.subr.bf16.mxu1 %v6656_v47 }
 0x21d   : >> { %1720 = vmatpush1.bf16.msra.mxu0 %v6651_v48 }
 0x21e   : >> { %1761 = vmatpush1.bf16.msra.mxu1 %v6654_v49  ;;  %1721 = vmatprep.subr.bf16.mxu0 %v6659_v50 }
 0x21f   : >> { %1762 = vmatprep.subr.bf16.mxu1 %v6662_v51 }
 0x221   : >> { %1722 = vmatpush1.bf16.msra.mxu0 %v6657_v52 }
 0x222   : >> { %1763 = vmatpush1.bf16.msra.mxu1 %v6660_v53  ;;  %1723 = vmatprep.subr.bf16.mxu0 %v6665_v54 }
 0x223   : >> { %1764 = vmatprep.subr.bf16.mxu1 %v6668_v55 }
 0x225   : >> { %1724 = vmatpush1.bf16.msra.mxu0 %v6663_v56 }
 0x226   : >> { %1765 = vmatpush1.bf16.msra.mxu1 %v6666_v57  ;;  %6244 = vmatprep.subr.bf16.mxu0 %v9348_v58 }
 0x227   : >> { %6250 = vmatprep.subr.bf16.mxu1 %v9348_v58 }
 0x228   : >> { %1734 = vmatmul.mubr.bf16.vlgmr.msra.gmra.mrb[8].mxu0 %v7612_v20 }
 0x229   : >> { %1775 = vmatmul.mubr.bf16.vlgmr.msra.gmra.mrb[8].mxu1 %v7612_v20  ;;  %6246 = vmatprep.mubr.msk.bf16.mxu0 %vm7263_vm1, %v9348_v58 }
 0x22a   : >> { %6252 = vmatprep.mubr.msk.bf16.mxu1 %vm7263_vm1, %v9348_v58 }
 0x29b   : >> { %v1571_v59 = vpop.f32.mrb[0].mxu0  ;;  %v1612_v60 = vpop.f32.mrb[0].mxu1 }
 0x29c   : >> { %v1573_v61 = vpop.f32.mrb[1].mxu0  ;;  %v1614_v62 = vpop.f32.mrb[1].mxu1  ;;  %v1783_v18 = vpack.c.bf16 %v1571_v59, %v1571_v59  ;;  %v2028_v24 = vpack.c.bf16 %v1612_v60, %v1612_v60 }
 0x29d   : >> { %v1575_v63 = vpop.f32.mrb[2].mxu0  ;;  %v1616_v2 = vpop.f32.mrb[2].mxu1  ;;  %v1906_v19 = vpack.c.bf16 %v1573_v61, %v1573_v61  ;;  %v2150_v26 = vpack.c.bf16 %v1614_v62, %v1614_v62 }
 0x29e   : >> { %v1576_v3 = vpop.f32.mrb[3].mxu0  ;;  %v1617_v20 = vpop.f32.mrb[3].mxu1 }
 0x2cb   : >> { %v1653_v7 = vpop.f32.mrb[4].mxu0  ;;  %v1694_v8 = vpop.f32.mrb[4].mxu1 }
 0x2cc   : >> { %v1784_v9 = vpack.c.bf16 %v1653_v7, %v1653_v7  ;;  %v1655_v10 = vpop.f32.mrb[5].mxu0  ;;  %v1696_v11 = vpop.f32.mrb[5].mxu1  ;;  %v2029_v23 = vpack.c.bf16 %v1694_v8, %v1694_v8 }
 0x2cd   : >> { %v1907_v12 = vpack.c.bf16 %v1655_v10, %v1655_v10  ;;  %v1657_v13 = vpop.f32.mrb[6].mxu0  ;;  %v1698_v14 = vpop.f32.mrb[6].mxu1  ;;  %v2151_v25 = vpack.c.bf16 %v1696_v11, %v1696_v11 }
 0x2ce   : >> { %v1789_v15 = vsel %vm619_vm0, %v1784_v9, 0  ;;  %v1699_v16 = vpop.f32.mrb[7].mxu1  ;;  %1847 = vrot.lane.b32.xlu1 %v1784_v9, %s9230_s15  ;;  %v1658_v17 = vpop.f32.mrb[7].mxu0  ;;  %v2034_v21 = vsel %vm619_vm0, %v2029_v23, 0 }
 0x2cf   : >> { %6245 = vmatpush3.bf16.xpose.msra.mxu0 %v1789_v15  ;;  %1969 = vrot.lane.b32.xlu0 %v1907_v12, %s9230_s15  ;;  %v1912_v22 = vsel %vm619_vm0, %v1907_v12, 0  ;;  %v2156_v27 = vsel %vm619_vm0, %v2151_v25, 0 }
 0x2d0   : >> { %6256 = vmatprep.subr.bf16.mxu0 %v9348_v58 }
 0x2d2   : >> { %1844 = vrot.lane.b32.xlu1 %v1783_v18, %s9230_s15 }
 0x2d6   : >> { %1966 = vrot.lane.b32.xlu1 %v1906_v19, %s9230_s15  ;;  %6247 = vmatmul.mubr.msk.bf16.vlgmr.msra.gmra.mrb[12].mxu0 %vm619_vm0, %v1783_v18 }
 0x2d7   : >> { %6257 = vmatpush3.bf16.xpose.msra.mxu0 %v1912_v22  ;;  %6258 = vmatprep.mubr.msk.bf16.mxu0 %vm7263_vm1, %v9348_v58 }
 0x2d8   : >> { %6268 = vmatprep.subr.bf16.mxu0 %v9348_v58 }
 0x2da   : >> { %2091 = vrot.lane.b32.xlu1 %v2029_v23, %s9230_s15 }
 0x2de   : >> { %2088 = vrot.lane.b32.xlu1 %v2028_v24, %s9230_s15  ;;  %6259 = vmatmul.mubr.msk.bf16.vlgmr.msra.gmra.mrb[16].mxu0 %vm619_vm0, %v1906_v19 }
 0x2df   : >> { %6269 = vmatpush3.bf16.xpose.msra.mxu0 %v2034_v21  ;;  %6270 = vmatprep.mubr.msk.bf16.mxu0 %vm7263_vm1, %v9348_v58 }
 0x2e0   : >> { %6280 = vmatprep.subr.bf16.mxu0 %v9348_v58 }
 0x2e2   : >> { %2213 = vrot.lane.b32.xlu1 %v2151_v25, %s9230_s15 }
 0x2e6   : >> { %2210 = vrot.lane.b32.xlu1 %v2150_v26, %s9230_s15  ;;  %6271 = vmatmul.mubr.msk.bf16.vlgmr.msra.gmra.mrb[20].mxu0 %vm619_vm0, %v2028_v24  ;;  %s2285_s15 = sld [smem:[#allocation7 + %s2284_s19]]  ;;  %s9254_s19 = sadd.s32 4, %s7845_s3 }
 0x2e7   : >> { %6281 = vmatpush3.bf16.xpose.msra.mxu0 %v2156_v27  ;;  %6282 = vmatprep.mubr.msk.bf16.mxu0 %vm7263_vm1, %v9348_v58  ;;  %s2312_s2 = sld [smem:[#allocation7 + %s9254_s19]] }
 0x2e8   : >> { %6292 = vmatprep.subr.bf16.mxu0 %v9348_v58  ;;  %s7955_s19 = sld [smem:[#allocation7 + %s7935_s7]] }
 0x2ec   : >> { %s2286_s17 = sadd.f32 %s2285_s15, %s2283_s25  ;;  %s2306_s25 = sld [smem:[#allocation7 + %s9240_s22]] }
 0x2ed   : >> { %s9241_s15 = sadd.s32 3, %s7845_s3 }
 0x2ee   : >> { %6283 = vmatmul.mubr.msk.bf16.vlgmr.msra.gmra.mrb[24].mxu0 %vm619_vm0, %v2150_v26  ;;  %s2289_s0 = sadd.f32 %s7851_s13, %s2286_s17  ;;  %s2309_s22 = sld [smem:[#allocation7 + %s9241_s15]] }
 0x2ef   : >> { %6294 = vmatprep.mubr.msk.bf16.mxu0 %vm7263_vm1, %v9348_v58  ;;  %s2331_s13 = sld [smem:[#allocation7 + %s9246_s9]]  ;;  %s9253_s15 = sadd.s32 5, %s7845_s3 }
 0x2f0   : >> { %s2292_s17 = sadd.f32 %s2291_s23, %s2289_s0  ;;  %s2315_s9 = sld [smem:[#allocation7 + %s9253_s15]] }
 0x2f1   : >> { %s9256_s23 = sadd.s32 6, %s7845_s3  ;;  %s9255_s0 = sadd.s32 7, %s7845_s3 }
 0x2f2   : >> { %s2295_s29 = sadd.f32 %s7857_s26, %s2292_s17  ;;  %s9257_s26 = sadd.s32 4, %s7884_s1 }
 0x2f3   : >> { %s9261_s17 = sadd.s32 1, %s7935_s7  ;;  %s2340_s4 = sld [smem:[#allocation7 + %s9257_s26]] }
 0x2f4   : >> { %s9263_s15 = sadd.s32 5, %s7884_s1  ;;  %9414 = sst [smem:[#allocation40_spill]] %s7955_s19 }
 0x2f5   : >> { %s2332_s5 = sadd.f32 %s2331_s13, %s7911_s6  ;;  %s9417_s26 = sadd.s32 3, %s7845_s3 }
 0x2f6   : >> { %s7968_s6 = sld [smem:[#allocation7 + %s9417_s26]] }
 0x2fb   : >> { %v1735_v28 = vpop.f32.mrb[8].mxu0 }
 0x2fc   : >> { %v7762_v29 = vpack.c.bf16 %v1735_v28, %v1735_v28  ;;  %v7764_v30 = vpop.f32.mrb[8].mxu1  ;;  %v7766_v31 = vpop.f32.mrb[9].mxu0  ;;  %9418 = sst [smem:[#allocation42_spill]] %s7968_s6 }
 0x2fd   : >> { %v7768_v32 = vpop.f32.mrb[9].mxu1  ;;  %v1739_v33 = vpop.f32.mrb[10].mxu0 }
 0x2fe   : >> { %v2858_v34 = vsel %vm2856_vm2, %v7762_v29, 0  ;;  %v1780_v35 = vpop.f32.mrb[10].mxu1  ;;  %v1740_v36 = vpop.f32.mrb[11].mxu0 }
 0x2ff   : >> { %v1781_v37 = vpop.f32.mrb[11].mxu1  ;;  %6293 = vmatpush3.bf16.msra.mxu0 %v2858_v34 }
 0x300   : >> { %6304 = vmatprep.subr.bf16.mxu0 %v9348_v58 }
 0x340   : >> { %v1848_v38 = vpop.permute.xlu1 %1847 }
 0x341   : >> { %v1853_v39 = vsel %vm619_vm0, %v1848_v38, 0  ;;  %v1970_v41 = vpop.permute.xlu0 %1969 }
 0x342   : >> { %6251 = vmatpush3.bf16.xpose.msra.mxu1 %v1853_v39  ;;  %v1975_v43 = vsel %vm619_vm0, %v1970_v41, 0 }
 0x343   : >> { %6262 = vmatprep.subr.bf16.mxu1 %v9348_v58 }
 0x344   : >> { %v1845_v40 = vpop.permute.xlu1 %1844 }
 0x348   : >> { %v1967_v42 = vpop.permute.xlu1 %1966 }
 0x349   : >> { %6253 = vmatmul.mubr.msk.bf16.vlgmr.msra.gmra.mrb[12].mxu1 %vm619_vm0, %v1845_v40 }
 0x34a   : >> { %6263 = vmatpush3.bf16.xpose.msra.mxu1 %v1975_v43  ;;  %6264 = vmatprep.mubr.msk.bf16.mxu1 %vm7263_vm1, %v9348_v58 }
 0x34b   : >> { %6274 = vmatprep.subr.bf16.mxu1 %v9348_v58 }
 0x34c   : >> { %v2092_v44 = vpop.permute.xlu1 %2091 }
 0x34d   : >> { %v2097_v46 = vsel %vm619_vm0, %v2092_v44, 0 }
 0x350   : >> { %v2089_v45 = vpop.permute.xlu1 %2088 }
 0x351   : >> { %6265 = vmatmul.mubr.msk.bf16.vlgmr.msra.gmra.mrb[16].mxu1 %vm619_vm0, %v1967_v42 }
 0x352   : >> { %6275 = vmatpush3.bf16.xpose.msra.mxu1 %v2097_v46  ;;  %6276 = vmatprep.mubr.msk.bf16.mxu1 %vm7263_vm1, %v9348_v58 }
 0x353   : >> { %6286 = vmatprep.subr.bf16.mxu1 %v9348_v58 }
 0x354   : >> { %v2214_v47 = vpop.permute.xlu1 %2213 }
 0x355   : >> { %v2219_v48 = vsel %vm619_vm0, %v2214_v47, 0 }
 0x358   : >> { %v2211_v49 = vpop.permute.xlu1 %2210 }
 0x359   : >> { %6277 = vmatmul.mubr.msk.bf16.vlgmr.msra.gmra.mrb[20].mxu1 %vm619_vm0, %v2089_v45 }
 0x35a   : >> { %6287 = vmatpush3.bf16.xpose.msra.mxu1 %v2219_v48  ;;  %6288 = vmatprep.mubr.msk.bf16.mxu1 %vm7263_vm1, %v9348_v58 }
 0x35b   : >> { %6298 = vmatprep.subr.bf16.mxu1 %v9348_v58 }
 0x361   : >> { %6289 = vmatmul.mubr.msk.bf16.vlgmr.msra.gmra.mrb[24].mxu1 %vm619_vm0, %v2211_v49 }
 0x362   : >> { %6300 = vmatprep.mubr.msk.bf16.mxu1 %vm7263_vm1, %v9348_v58 }
 0x3a9   : >> { %v1825_v50 = vpop.f32.mrb[12].mxu0 }
 0x3aa   : >> { %v6248_v51 = vpop.f32.mrb[13].mxu0  ;;  %v1832_v52 = vsel %vm1831_vm3, %v1825_v50, -inf }
 0x3ab   : >> { %1833 = vmax.xlane.f32.xlu1 %v1832_v52  ;;  %v1828_v53 = vpop.f32.mrb[14].mxu0 }
 0x3ac   : >> { %v6249_v54 = vpop.f32.mrb[15].mxu0 }
 0x3b1   : >> { %v1948_v55 = vpop.f32.mrb[16].mxu0 }
 0x3b2   : >> { %v6260_v56 = vpop.f32.mrb[17].mxu0  ;;  %v1954_v13 = vsel %vm1831_vm3, %v1948_v55, -inf }
 0x3b3   : >> { %v1951_v57 = vpop.f32.mrb[18].mxu0 }
 0x3b4   : >> { %v6261_v59 = vpop.f32.mrb[19].mxu0 }
 0x3b9   : >> { %v2070_v60 = vpop.f32.mrb[20].mxu0 }
 0x3ba   : >> { %v6272_v61 = vpop.f32.mrb[21].mxu0  ;;  %v2076_v17 = vsel %vm1831_vm3, %v2070_v60, -inf }
 0x3bb   : >> { %v2073_v62 = vpop.f32.mrb[22].mxu0 }
 0x3bc   : >> { %v6273_v63 = vpop.f32.mrb[23].mxu0 }
 0x3c1   : >> { %v2192_v2 = vpop.f32.mrb[24].mxu0 }
 0x3c2   : >> { %v6284_v3 = vpop.f32.mrb[25].mxu0  ;;  %v2198_v22 = vsel %vm1831_vm3, %v2192_v2, -inf }
 0x3c3   : >> { %v2195_v20 = vpop.f32.mrb[26].mxu0 }
 0x3c4   : >> { %v6285_v7 = vpop.f32.mrb[27].mxu0 }
 0x41c   : >> { %v1889_v8 = vpop.f32.mrb[12].mxu1 }
 0x41d   : >> { %v6254_v9 = vpop.f32.mrb[13].mxu1  ;;  %v1895_v10 = vsel %vm1831_vm3, %v1889_v8, -inf }
 0x41e   : >> { %v1892_v11 = vpop.f32.mrb[14].mxu1  ;;  %1896 = vmax.xlane.f32.xlu0 %v1895_v10 }
 0x41f   : >> { %v6255_v12 = vpop.f32.mrb[15].mxu1 }
 0x422   : >> { %1955 = vmax.xlane.f32.xlu0 %v1954_v13 }
 0x424   : >> { %v2011_v14 = vpop.f32.mrb[16].mxu1 }
 0x425   : >> { %v6266_v15 = vpop.f32.mrb[17].mxu1  ;;  %v2017_v16 = vsel %vm1831_vm3, %v2011_v14, -inf }
 0x426   : >> { %v2014_v18 = vpop.f32.mrb[18].mxu1  ;;  %2018 = vmax.xlane.f32.xlu1 %v2017_v16  ;;  %2077 = vmax.xlane.f32.xlu0 %v2076_v17  ;;  %v7861_v17 = vpack.c.bf16 %v7768_v32, %v7768_v32  ;;  %v2522_v32 = vstv %s7870_s30 }
 0x427   : >> { %v6267_v19 = vpop.f32.mrb[19].mxu1  ;;  %v2558_v18 = vstv %s7877_s28 }
 0x428   : >> { %v2594_v19 = vstv %s7881_s11 }
 0x42a   : >> { %2199 = vmax.xlane.f32.xlu0 %v2198_v22  ;;  %v2630_v22 = vstv %s7891_s24 }
 0x42c   : >> { %v2133_v23 = vpop.f32.mrb[20].mxu1 }
 0x42d   : >> { %v6278_v24 = vpop.f32.mrb[21].mxu1  ;;  %v2139_v21 = vsel %vm1831_vm3, %v2133_v23, -inf }
 0x42e   : >> { %v2136_v25 = vpop.f32.mrb[22].mxu1  ;;  %2140 = vmax.xlane.f32.xlu1 %v2139_v21 }
 0x42f   : >> { %v6279_v26 = vpop.f32.mrb[23].mxu1 }
 0x434   : >> { %v2255_v27 = vpop.f32.mrb[24].mxu1 }
 0x435   : >> { %v6290_v28 = vpop.f32.mrb[25].mxu1  ;;  %v2261_v33 = vsel %vm1831_vm3, %v2255_v27, -inf }
 0x436   : >> { %v2258_v34 = vpop.f32.mrb[26].mxu1  ;;  %2262 = vmax.xlane.f32.xlu1 %v2261_v33 }
 0x437   : >> { %v6291_v35 = vpop.f32.mrb[27].mxu1 }
 0x438   : >> { %v1834_v36 = vpop.xlane.xlu1 %1833 }
 0x439   : >> { %v1835_v37 = vsub.f32 %v1825_v50, %v1834_v36 }
 0x43b   : >> { %v1836_v38 = vmul.f32 1.442695, %v1835_v37 }
 0x43d   : >> { %7019 = vpow2.f32 %v1836_v38 }
 0x447   : >> { %v7801_v39 = vpop.eup %7019 }
 0x448   : >> { %v1838_v40 = vsel %vm1831_vm3, %v7801_v39, 0.0 }
 0x449   : >> { %1839 = vadd.xlane.f32.xlu0 %v1838_v40 }
 0x4ab   : >> { %v1897_v41 = vpop.xlane.xlu0 %1896 }
 0x4ac   : >> { %v1898_v42 = vsub.f32 %v1889_v8, %v1897_v41 }
 0x4ae   : >> { %v1899_v43 = vmul.f32 1.442695, %v1898_v42 }
 0x4af   : >> { %v1956_v44 = vpop.xlane.xlu0 %1955 }
 0x4b0   : >> { %7021 = vpow2.f32 %v1899_v43  ;;  %v1957_v45 = vsub.f32 %v1948_v55, %v1956_v44 }
 0x4b2   : >> { %v1958_v46 = vmul.f32 1.442695, %v1957_v45 }
 0x4b3   : >> { %v2019_v47 = vpop.xlane.xlu1 %2018  ;;  %v2078_v48 = vpop.xlane.xlu0 %2077 }
 0x4b4   : >> { %7023 = vpow2.f32 %v1958_v46  ;;  %v2020_v49 = vsub.f32 %v2011_v14, %v2019_v47  ;;  %v2079_v50 = vsub.f32 %v2070_v60, %v2078_v48 }
 0x4b6   : >> { %v2021_v51 = vmul.f32 1.442695, %v2020_v49  ;;  %v2080_v52 = vmul.f32 1.442695, %v2079_v50 }
 0x4b7   : >> { %v2200_v53 = vpop.xlane.xlu0 %2199 }
 0x4b8   : >> { %7025 = vpow2.f32 %v2021_v51  ;;  %v2201_v54 = vsub.f32 %v2192_v2, %v2200_v53 }
 0x4b9   : >> { %7027 = vpow2.f32 %v2080_v52 }
 0x4ba   : >> { %v7805_v56 = vpop.eup %7021  ;;  %v2202_v57 = vmul.f32 1.442695, %v2201_v54 }
 0x4bb   : >> { %v2141_v59 = vpop.xlane.xlu1 %2140  ;;  %v1901_v61 = vsel %vm1831_vm3, %v7805_v56, 0.0 }
 0x4bc   : >> { %7029 = vpow2.f32 %v2202_v57  ;;  %v2142_v55 = vsub.f32 %v2133_v23, %v2141_v59  ;;  %1902 = vadd.xlane.f32.xlu1 %v1901_v61 }
 0x4be   : >> { %v7809_v62 = vpop.eup %7023  ;;  %v2143_v63 = vmul.f32 1.442695, %v2142_v55 }
 0x4bf   : >> { %v1960_v60 = vsel %vm1831_vm3, %v7809_v62, 0.0 }
 0x4c0   : >> { %7031 = vpow2.f32 %v2143_v63  ;;  %1961 = vadd.xlane.f32.xlu0 %v1960_v60 }
 0x4c2   : >> { %v7813_v2 = vpop.eup %7025 }
 0x4c3   : >> { %v7815_v3 = vpop.eup %7027  ;;  %v2263_v20 = vpop.xlane.xlu1 %2262  ;;  %v2023_v7 = vsel %vm1831_vm3, %v7813_v2, 0.0 }
 0x4c4   : >> { %v2264_v8 = vsub.f32 %v2255_v27, %v2263_v20  ;;  %2024 = vadd.xlane.f32.xlu1 %v2023_v7  ;;  %v2082_v9 = vsel %vm1831_vm3, %v7815_v3, 0.0 }
 0x4c5   : >> { %2083 = vadd.xlane.f32.xlu0 %v2082_v9 }
 0x4c6   : >> { %v7821_v10 = vpop.eup %7029  ;;  %v2265_v11 = vmul.f32 1.442695, %v2264_v8 }
 0x4c7   : >> { %v2204_v12 = vsel %vm1831_vm3, %v7821_v10, 0.0 }
 0x4c8   : >> { %7033 = vpow2.f32 %v2265_v11 }
 0x4c9   : >> { %2205 = vadd.xlane.f32.xlu0 %v2204_v12 }
 0x4ca   : >> { %v7828_v13 = vpop.eup %7031 }
 0x4cb   : >> { %v2145_v14 = vsel %vm1831_vm3, %v7828_v13, 0.0 }
 0x4cc   : >> { %2146 = vadd.xlane.f32.xlu1 %v2145_v14 }
 0x4d2   : >> { %v7837_v15 = vpop.eup %7033 }
 0x4d3   : >> { %v2267_v16 = vsel %vm1831_vm3, %v7837_v15, 0.0 }
 0x4d4   : >> { %2268 = vadd.xlane.f32.xlu1 %v2267_v16 }
 0x4d6   : >> { %v1840_v38 = vpop.xlane.xlu0 %1839 }
 0x4d7   : >> { %7035 = vrcp.f32 %v1840_v38 }
 0x4df   : >> { %2912 = vrot.lane.b32.xlu0 %v7762_v29, %s9400_s12  ;;  %v7875_v29 = vpack.c.bf16 %v7766_v31, %v7766_v31  ;;  %v7897_v31 = vpack.c.bf16 %v7764_v30, %v7764_v30  ;;  %v2495_v30 = vstv %s7834_s21  ;;  %s9506_s21 = sld [smem:[#allocation86_spill]] }
 0x4e1   : >> { %v7036_v60 = vpop.eup %7035 }
 0x4e2   : >> { %v8351_v11 = vmul.f32 %v7036_v60, %v7801_v39 }
 0x4e3   : >> { %3864 = vrot.lane.b32.xlu0 %v7861_v17, %s9400_s12 }
 0x4e4   : >> { %v8408_v58 = vmul.f32 %v2522_v32, %v8351_v11  ;;  %v8432_v32 = vmul.f32 %v2630_v22, %v8351_v11 }
 0x4e5   : >> { %3284 = vrot.lane.b32.xlu1 %v7875_v29, %s9400_s12 }
 0x4e9   : >> { %3574 = vrot.lane.b32.xlu1 %v7897_v31, %s9400_s12  ;;  %s2307_s12 = sadd.f32 %s2306_s25, %s2304_s8  ;;  %s7937_s25 = smul.f32 0.125, %s2295_s29 }
 0x4ea   : >> { %s2318_s8 = sld [smem:[#allocation7 + %s9256_s23]] }
 0x4eb   : >> { %s2310_s18 = sadd.f32 %s2309_s22, %s2307_s12  ;;  %s7944_s22 = sld [smem:[#allocation7 + %s9255_s0]] }
 0x4ec   : >> { %9411 = sst [smem:[#allocation38_spill]] %s7937_s25  ;;  %s9419_s25 = sadd.s32 4, %s7845_s3 }
 0x4ed   : >> { %s2313_s13 = sadd.f32 %s2312_s2, %s2310_s18  ;;  %s7951_s29 = sld [smem:[#allocation7 + %s9412_s16]] }
 0x4ee   : >> { %s2335_s12 = sadd.f32 %s2334_s20, %s2332_s5  ;;  %s2359_s0 = sld [smem:[#allocation7 + %s9261_s17]] }
 0x4ef   : >> { %s2316_s23 = sadd.f32 %s2315_s9, %s2313_s13  ;;  %s9267_s18 = sadd.s32 2, %s7935_s7 }
 0x4f0   : >> { %s2338_s5 = sadd.f32 %s2337_s10, %s2335_s12  ;;  %s2343_s20 = sld [smem:[#allocation7 + %s9263_s15]] }
 0x4f1   : >> { %s9415_s2 = sadd.s32 2, %s7845_s3  ;;  %s2362_s17 = sld [smem:[#allocation7 + %s9267_s18]] }
 0x4f2   : >> { %s7964_s16 = sld [smem:[#allocation7 + %s9415_s2]]  ;;  %s2319_s9 = sadd.f32 %s2318_s8, %s2316_s23 }
 0x4f3   : >> { %9413 = sst [smem:[#allocation39_spill]] %s7951_s29  ;;  %s9270_s29 = sadd.s32 6, %s7884_s1 }
 0x4f4   : >> { %s9269_s13 = sadd.s32 3, %s7935_s7  ;;  %s7976_s10 = sld [smem:[#allocation7 + %s9419_s25]] }
 0x4f5   : >> { %s2341_s12 = sadd.f32 %s2340_s4, %s2338_s5  ;;  %s9421_s15 = sadd.s32 5, %s7845_s3 }
 0x4f6   : >> { %s7980_s2 = sld [smem:[#allocation7 + %s9421_s15]]  ;;  %s2360_s26 = sadd.f32 %s2359_s0, %s7955_s19 }
 0x4f7   : >> { %s2365_s6 = sld [smem:[#allocation7 + %s9269_s13]]  ;;  %s2322_s27 = sadd.f32 %s7944_s22, %s2319_s9 }
 0x4f8   : >> { %9416 = sst [smem:[#allocation41_spill]] %s7964_s16  ;;  %s9423_s18 = sadd.s32 6, %s7845_s3 }
 0x4f9   : >> { %s2346_s16 = sld [smem:[#allocation7 + %s9270_s29]]  ;;  %s2344_s8 = sadd.f32 %s2343_s20, %s2341_s12 }
 0x4fa   : >> { %9420 = sst [smem:[#allocation43_spill]] %s7976_s10  ;;  %s9271_s25 = sadd.s32 7, %s7884_s1 }
 0x4fb   : >> { %s7990_s23 = sld [smem:[#allocation7 + %s9423_s18]]  ;;  %s9272_s10 = sadd.s32 4, %s7935_s7 }
 0x4fc   : >> { %9422 = sst [smem:[#allocation44_spill]] %s7980_s2  ;;  %s7995_s4 = sadd.s32 512, %s7826_s14  ;;  %v2669_v35 = vstv %s7980_s2 }
 0x4fd   : >> { %s9425_s15 = sadd.s32 7, %s7845_s3  ;;  %s2363_s22 = sadd.f32 %s2362_s17, %s2360_s26 }
 0x4fe   : >> { %s7999_s0 = sld [smem:[#allocation7 + %s9425_s15]]  ;;  %s8001_s18 = smul.f32 0.125, %s2322_s27 }
 0x4ff   : >> { %s2349_s5 = sld [smem:[#allocation7 + %s9271_s25]]  ;;  %s9275_s9 = sadd.s32 1, %s7995_s4 }
 0x500   : >> { %9427 = sst [smem:[#allocation47_spill]] %s8001_s18  ;;  %s9277_s12 = sadd.s32 5, %s7935_s7 }
 0x501   : >> { %9424 = sst [smem:[#allocation45_spill]] %s7990_s23  ;;  %s9281_s15 = sadd.s32 6, %s7935_s7 }
 0x502   : >> { %s2368_s20 = sld [smem:[#allocation7 + %s9272_s10]]  ;;  %s2347_s3 = sadd.f32 %s2346_s16, %s2344_s8 }
 0x503   : >> { %s2366_s13 = sadd.f32 %s2365_s6, %s2363_s22  ;;  %s8011_s29 = sld [smem:[#allocation7 + %s7995_s4]] }
 0x504   : >> { %9426 = sst [smem:[#allocation46_spill]] %s7999_s0  ;;  %s9283_s26 = sadd.s32 2, %s7995_s4 }
 0x505   : >> { %s2387_s27 = sld [smem:[#allocation7 + %s9275_s9]]  ;;  %s9429_s25 = sadd.s32 1, %s7884_s1 }
 0x506   : >> { %s2371_s17 = sld [smem:[#allocation7 + %s9277_s12]]  ;;  %s9431_s16 = sadd.s32 2, %s7884_s1 }
 0x507   : >> { %s8020_s10 = sld [smem:[#allocation7 + %s9429_s25]]  ;;  %s9433_s6 = sadd.s32 3, %s7884_s1 }
 0x508   : >> { %s8024_s8 = sld [smem:[#allocation7 + %s9431_s16]]  ;;  %s9286_s9 = sadd.s32 7, %s7935_s7 }
 0x509   : >> { %9428 = sst [smem:[#allocation48_spill]] %s8011_s29  ;;  %s9287_s0 = sadd.s32 3, %s7995_s4 }
 0x50a   : >> { %s8028_s22 = sld [smem:[#allocation7 + %s9433_s6]]  ;;  %s2369_s12 = sadd.f32 %s2368_s20, %s2366_s13 }
 0x50b   : >> { %s2374_s19 = sld [smem:[#allocation7 + %s9281_s15]]  ;;  %s2350_s25 = sadd.f32 %s2349_s5, %s2347_s3 }
 0x50c   : >> { %s2390_s18 = sld [smem:[#allocation7 + %s9283_s26]]  ;;  %s2372_s13 = sadd.f32 %s2371_s17, %s2369_s12 }
 0x50d   : >> { %9430 = sst [smem:[#allocation49_spill]] %s8020_s10  ;;  %s9435_s10 = sadd.s32 4, %s7884_s1 }
 0x50e   : >> { %9432 = sst [smem:[#allocation50_spill]] %s8024_s8  ;;  %s9437_s8 = sadd.s32 5, %s7884_s1 }
 0x50f   : >> { %s8038_s16 = sld [smem:[#allocation7 + %s9435_s10]]  ;;  %s9292_s20 = sadd.s32 4, %s7995_s4 }
 0x510   : >> { %9434 = sst [smem:[#allocation51_spill]] %s8028_s22  ;;  %s8050_s5 = smul.f32 0.125, %s2350_s25 }
 0x511   : >> { %s8042_s6 = sld [smem:[#allocation7 + %s9437_s8]]  ;;  %s2388_s22 = sadd.f32 %s2387_s27, %s8011_s29 }
 0x512   : >> { %s2377_s15 = sld [smem:[#allocation7 + %s9286_s9]]  ;;  %s9440_s3 = sadd.s32 6, %s7884_s1 }
 0x513   : >> { %s2393_s26 = sld [smem:[#allocation7 + %s9287_s0]]  ;;  %s2391_s9 = sadd.f32 %s2390_s18, %s2388_s22 }
 0x514   : >> { %9439 = sst [smem:[#allocation54_spill]] %s8050_s5  ;;  %s9444_s29 = sadd.s32 1, %s7935_s7 }
 0x515   : >> { %9436 = sst [smem:[#allocation52_spill]] %s8038_s16  ;;  %s9442_s16 = sadd.s32 7, %s7884_s1 }
 0x516   : >> { %s8054_s10 = sld [smem:[#allocation7 + %s9440_s3]]  ;;  %s2375_s0 = sadd.f32 %s2374_s19, %s2372_s13 }
 0x517   : >> { %9438 = sst [smem:[#allocation53_spill]] %s8042_s6  ;;  %s9293_s6 = sadd.s32 5, %s7995_s4 }
 0x518   : >> { %s8058_s8 = sld [smem:[#allocation7 + %s9442_s16]]  ;;  %s9446_s17 = sadd.s32 2, %s7935_s7 }
 0x519   : >> { %s2396_s27 = sld [smem:[#allocation7 + %s9292_s20]]  ;;  %s9448_s5 = sadd.s32 3, %s7935_s7 }
 0x51a   : >> { %s8065_s12 = sld [smem:[#allocation7 + %s9444_s29]]  ;;  %s9450_s1 = sadd.s32 4, %s7935_s7 }
 0x51b   : >> { %s8069_s25 = sld [smem:[#allocation7 + %s9446_s17]]  ;;  %s2394_s18 = sadd.f32 %s2393_s26, %s2391_s9 }
 0x51c   : >> { %9441 = sst [smem:[#allocation55_spill]] %s8054_s10  ;;  %s2401_s22 = sadd.s32 6, %s7995_s4 }
 0x51d   : >> { %s8073_s3 = sld [smem:[#allocation7 + %s9448_s5]]  ;;  %s2378_s20 = sadd.f32 %s2377_s15, %s2375_s0 }
 0x51e   : >> { %9443 = sst [smem:[#allocation56_spill]] %s8058_s8  ;;  %s8083_s19 = sadd.s32 768, %s7826_s14 }
 0x51f   : >> { %s8077_s16 = sld [smem:[#allocation7 + %s9450_s1]]  ;;  %s9453_s29 = sadd.s32 5, %s7935_s7 }
 0x520   : >> { %9445 = sst [smem:[#allocation57_spill]] %s8065_s12  ;;  %s9455_s5 = sadd.s32 6, %s7935_s7 }
 0x521   : >> { %9447 = sst [smem:[#allocation58_spill]] %s8069_s25  ;;  %s2404_s9 = sadd.s32 7, %s7995_s4 }
 0x522   : >> { %s2399_s8 = sld [smem:[#allocation7 + %s9293_s6]]  ;;  %s2397_s0 = sadd.f32 %s2396_s27, %s2394_s18 }
 0x523   : >> { %9449 = sst [smem:[#allocation59_spill]] %s8073_s3  ;;  %s9302_s15 = sadd.s32 1, %s8083_s19 }
 0x524   : >> { %9452 = sst [smem:[#allocation61_spill]] %s8083_s19  ;;  %s8095_s26 = smul.f32 0.125, %s2378_s20 }
 0x525   : >> { %9451 = sst [smem:[#allocation60_spill]] %s8077_s16  ;;  %s9458_s6 = sadd.s32 7, %s7935_s7 }
 0x526   : >> { %s8087_s13 = sld [smem:[#allocation7 + %s9453_s29]]  ;;  %s9460_s29 = sadd.s32 1, %s7995_s4 }
 0x527   : >> { %s8091_s17 = sld [smem:[#allocation7 + %s9455_s5]]  ;;  %s9306_s20 = sadd.s32 2, %s8083_s19 }
 0x528   : >> { %s2402_s1 = sld [smem:[#allocation7 + %s2401_s22]]  ;;  %s2400_s18 = sadd.f32 %s2399_s8, %s2397_s0 }
 0x529   : >> { %9457 = sst [smem:[#allocation64_spill]] %s8095_s26  ;;  %s9463_s7 = sadd.s32 2, %s7995_s4 }
 0x52a   : >> { %s8099_s16 = sld [smem:[#allocation7 + %s9458_s6]]  ;;  %s9465_s26 = sadd.s32 3, %s7995_s4 }
 0x52b   : >> { %s8101_s3 = sld [smem:[#allocation7 + %s2404_s9]]  ;;  %s9309_s12 = sadd.s32 4, %s8083_s19 }
 0x52c   : >> { %9454 = sst [smem:[#allocation62_spill]] %s8087_s13  ;;  %s9487_s10 = sld [smem:[#allocation29_spill]] }
 0x52d   : >> { %9456 = sst [smem:[#allocation63_spill]] %s8091_s17  ;;  %s9469_s17 = sadd.s32 5, %s7995_s4 }
 0x52e   : >> { %s8105_s13 = sld [smem:[#allocation7 + %s9460_s29]]  ;;  %s9467_s29 = sadd.s32 4, %s7995_s4 }
 0x52f   : >> { %s8108_s5 = sld [smem:[#allocation7 + %s8083_s19]]  ;;  %s2403_s0 = sadd.f32 %s2402_s1, %s2400_s18 }
 0x530   : >> { %9459 = sst [smem:[#allocation65_spill]] %s8099_s16  ;;  %s9500_s28 = sld [smem:[#allocation61_spill]] }
 0x531   : >> { %s2443_s27 = sld [smem:[#allocation7 + %s9302_s15]] }
 0x532   : >> { %s8115_s6 = sld [smem:[#allocation7 + %s9463_s7]]  ;;  %s9310_s7 = sadd.s32 3, %s8083_s19  ;;  %v2497_v26 = vstv %s9487_s10 }
 0x533   : >> { %s8119_s16 = sld [smem:[#allocation7 + %s9465_s26]]  ;;  %s9308_s26 = sadd.s32 5, %s8083_s19 }
 0x534   : >> { %9461 = sst [smem:[#allocation66_spill]] %s8105_s13  ;;  %s9502_s24 = sld [smem:[#allocation54_spill]] }
 0x535   : >> { %9462 = sst [smem:[#allocation67_spill]] %s8108_s5 }
 0x536   : >> { %s8123_s13 = sld [smem:[#allocation7 + %s9467_s29]]  ;;  %s9316_s29 = sadd.s32 6, %s8083_s19 }
 0x537   : >> { %s8127_s25 = sld [smem:[#allocation7 + %s9469_s17]]  ;;  %s2444_s4 = sadd.f32 %s2443_s27, %s8108_s5 }
 0x538   : >> { %9464 = sst [smem:[#allocation68_spill]] %s8115_s6  ;;  %s8157_s27 = sadd.s32 896, %s7826_s14 }
 0x539   : >> { %9466 = sst [smem:[#allocation69_spill]] %s8119_s16  ;;  %s8139_s16 = sadd.s32 640, %s7826_s14 }
 0x53a   : >> { %s8129_s15 = sld [smem:[#allocation7 + %s2401_s22]]  ;;  %s2406_s17 = sadd.f32 %s8101_s3, %s2403_s0  ;;  %v2352_v42 = vstv %s9502_s24 }
 0x53b   : >> { %s2446_s8 = sld [smem:[#allocation7 + %s9306_s20]]  ;;  %s9311_s18 = sadd.s32 1, %s8139_s16 }
 0x53c   : >> { %9468 = sst [smem:[#allocation70_spill]] %s8123_s13  ;;  %s9318_s20 = sadd.s32 7, %s8083_s19 }
 0x53d   : >> { %9470 = sst [smem:[#allocation71_spill]] %s8127_s25  ;;  %s9481_s25 = sadd.s32 1, %s8083_s19 }
 0x53e   : >> { %s8134_s6 = sld [smem:[#allocation7 + %s2404_s9]]  ;;  %s9514_s10 = sadd.s32 3, %s9500_s28 }
 0x53f   : >> { %s8144_s22 = sld [smem:[#allocation7 + %s9310_s7]]  ;;  %s9573_s24 = sadd.s32 4, %s8157_s27 }
 0x540   : >> { %9471 = sst [smem:[#allocation72_spill]] %s8129_s15  ;;  %s9480_s15 = sld [smem:[#allocation35_spill]] }
 0x541   : >> { %s2452_s1 = sld [smem:[#allocation7 + %s9309_s12]] }
 0x542   : >> { %s8151_s9 = sld [smem:[#allocation7 + %s9308_s26]]  ;;  %s8166_s26 = smul.f32 0.125, %s2406_s17 }
 0x543   : >> { %s8160_s3 = sld [smem:[#allocation7 + %s8139_s16]]  ;;  %s9329_s17 = sadd.s32 3, %s8139_s16 }
 0x544   : >> { %9472 = sst [smem:[#allocation73_spill]] %s8134_s6  ;;  %s9484_s13 = sld [smem:[#allocation38_spill]] }
 0x545   : >> { %s2447_s6 = sadd.f32 %s2446_s8, %s2444_s4  ;;  %s8164_s0 = sld [smem:[#allocation7 + %s9311_s18]] }
 0x546   : >> { %9475 = sst [smem:[#allocation76_spill]] %s8166_s26  ;;  %s9320_s8 = sadd.s32 2, %s8139_s16  ;;  %v2702_v24 = vstv %s9480_s15 }
 0x547   : >> { %s8171_s14 = sld [smem:[#allocation7 + %s9316_s29]]  ;;  %s9324_s4 = sadd.s32 1, %s8157_s27 }
 0x548   : >> { %9473 = sst [smem:[#allocation74_spill]] %s8151_s9  ;;  %s9503_s15 = sld [smem:[#allocation49_spill]] }
 0x549   : >> { %9474 = sst [smem:[#allocation75_spill]] %s8160_s3  ;;  %s9478_s26 = sld [smem:[#allocation34_spill]]  ;;  %v1903_v7 = vpop.xlane.xlu1 %1902 }
 0x54a   : >> { %s2450_s12 = sadd.f32 %s8144_s22, %s2447_s6  ;;  %s8177_s7 = sld [smem:[#allocation7 + %s9318_s20]]  ;;  %v2297_v21 = vstv %s9484_s13  ;;  %7037 = vrcp.f32 %v1903_v7  ;;  %v8394_v7 = vmul.f32 %v2495_v30, %v8351_v11  ;;  %v8418_v30 = vmul.f32 %v2594_v19, %v8351_v11 }
 0x54b   : >> { %s8181_s18 = sld [smem:[#allocation7 + %s9320_s8]]  ;;  %s9483_s20 = sadd.s32 2, %s8083_s19  ;;  %v8389_v60 = vmul.f32 %v2297_v21, %v8351_v11  ;;  %v8413_v21 = vmul.f32 %v2558_v18, %v8351_v11  ;;  %v8442_v19 = vmul.f32 %v2702_v24, %v8351_v11 }
 0x54c   : >> { %s8185_s5 = sld [smem:[#allocation7 + %s8157_s27]]  ;;  %s2416_s9 = sadd.f32 %s8164_s0, %s8160_s3 }
 0x54d   : >> { %9476 = sst [smem:[#allocation77_spill]] %s8171_s14  ;;  %s9492_s19 = sadd.s32 2, %s8157_s27  ;;  %v1962_v39 = vpop.xlane.xlu0 %1961 }
 0x54e   : >> { %s8189_s29 = sld [smem:[#allocation7 + %s9324_s4]]  ;;  %s8210_s22 = sadd.f32 %s2452_s1, %s2450_s12  ;;  %v2529_v43 = vstv %s9503_s15  ;;  %7039 = vrcp.f32 %v1962_v39 }
 0x54f   : >> { %s8193_s6 = sld [smem:[#allocation7 + %s9481_s25]]  ;;  %v2666_v23 = vstv %s9478_s26  ;;  %s9494_s0 = smov %s7990_s23 }
 0x550   : >> { %9477 = sst [smem:[#allocation78_spill]] %s8177_s7  ;;  %s9486_s8 = sld [smem:[#allocation37_spill]]  ;;  %v2705_v36 = vstv %s9494_s0  ;;  %v8437_v18 = vmul.f32 %v2666_v23, %v8351_v11 }
 0x551   : >> { %s8198_s7 = sld [smem:[#allocation7 + %s9483_s20]]  ;;  %s9548_s15 = sadd.s32 7, %s8157_s27  ;;  %v2025_v38 = vpop.xlane.xlu1 %2024 }
 0x552   : >> { %9479 = sst [smem:[#allocation79_spill]] %s8185_s5  ;;  %s9489_s4 = sld [smem:[#allocation26_spill]]  ;;  %v2084_v22 = vpop.xlane.xlu0 %2083  ;;  %7041 = vrcp.f32 %v2025_v38 }
 0x553   : >> { %s8202_s14 = sld [smem:[#allocation7 + %s9329_s17]]  ;;  %7043 = vrcp.f32 %v2084_v22 }
 0x554   : >> { %s9488_s5 = sld [smem:[#allocation39_spill]]  ;;  %s9490_s25 = sld [smem:[#allocation41_spill]]  ;;  %v7038_v63 = vpop.eup %7037 }
 0x555   : >> { %9482 = sst [smem:[#allocation80_spill]] %s8193_s6  ;;  %s9491_s6 = sld [smem:[#allocation42_spill]]  ;;  %v1905_v24 = vmul.f32 %v7038_v63, %v7805_v56 }
 0x556   : >> { %s9493_s20 = sld [smem:[#allocation43_spill]]  ;;  %s9495_s17 = sld [smem:[#allocation46_spill]]  ;;  %v2738_v25 = vstv %s9486_s8  ;;  %v2206_v20 = vpop.xlane.xlu0 %2205 }
 0x557   : >> { %9485 = sst [smem:[#allocation81_spill]] %s8198_s7  ;;  %s9496_s3 = sld [smem:[#allocation79_spill]]  ;;  %v2498_v39 = vmul.f32 %v2497_v26, %v1905_v24  ;;  %v2739_v14 = vmul.f32 %v2738_v25, %v8351_v11  ;;  %v2670_v26 = vmul.f32 %v2669_v35, %v1905_v24  ;;  %v2706_v25 = vmul.f32 %v2705_v36, %v1905_v24 }
 0x558   : >> { %s8214_s7 = sld [smem:[#allocation7 + %s9492_s19]]  ;;  %s9499_s19 = sadd.s32 4, %s8139_s16  ;;  %v7040_v22 = vpop.eup %7039  ;;  %7045 = vrcp.f32 %v2206_v20 }
 0x559   : >> { %s9497_s12 = sld [smem:[#allocation47_spill]]  ;;  %s9498_s1 = sld [smem:[#allocation36_spill]]  ;;  %v1964_v11 = vmul.f32 %v7040_v22, %v7809_v62  ;;  %v2147_v9 = vpop.xlane.xlu1 %2146  ;;  %v2707_v20 = vadd.f32 %v2706_v25, %v8442_v19 }
 0x55a   : >> { %v2525_v27 = vstv %s9488_s5  ;;  %s8228_s11 = sld [smem:[#allocation7 + %s9499_s19]]  ;;  %s6201_s26 = sshll.u32 %s9489_s4, 9  ;;  %v2561_v28 = vstv %s9490_s25  ;;  %7047 = vrcp.f32 %v2147_v9 }
 0x55b   : >> { %v2597_v33 = vstv %s9491_s6  ;;  %s9504_s23 = sld [smem:[#allocation50_spill]]  ;;  %s8236_s8 = sadd.f32 %s8181_s18, %s2416_s9  ;;  %v2526_v12 = vmul.f32 %v2525_v27, %v1905_v24  ;;  %v2562_v23 = vmul.f32 %v2561_v28, %v1905_v24  ;;  %v2913_v27 = vpop.permute.xlu0 %2912  ;;  %v2530_v62 = vmul.f32 %v2529_v43, %v1964_v11 }
 0x55c   : >> { %v2633_v34 = vstv %s9493_s20  ;;  %s9505_s30 = sld [smem:[#allocation74_spill]]  ;;  %s9507_s13 = sld [smem:[#allocation51_spill]]  ;;  %v2741_v37 = vstv %s9495_s17  ;;  %v2598_v8 = vmul.f32 %v2597_v33, %v1905_v24  ;;  %v2918_v61 = vsel %vm2856_vm2, %v2913_v27, 0 }
 0x55d   : >> { %s8241_s19 = scalar_lea.vmem %s9506_s21, %s6201_s26  ;;  %s9510_s4 = sld [smem:[#allocation53_spill]]  ;;  %v2634_v16 = vmul.f32 %v2633_v34, %v1905_v24  ;;  %v2499_v33 = vadd.f32 %v2498_v39, %v8394_v7  ;;  %v2527_v34 = vadd.f32 %v2526_v12, %v8408_v58  ;;  %v2563_v35 = vadd.f32 %v2562_v23, %v8413_v21  ;;  %6299 = vmatpush3.bf16.msra.mxu1 %v2918_v61 }
 0x55e   : >> { %9508 = sst [smem:[#allocation74_spill]] %s8241_s19  ;;  %s9511_s20 = sadd.s32 3, %s8157_s27  ;;  %v2599_v61 = vadd.f32 %v2598_v8, %v8418_v30 }
 0x55f   : >> { %s2472_s6 = sadd.f32 %s8189_s29, %s9496_s3  ;;  %s8249_s25 = sld [smem:[#allocation7 + %s9511_s20]]  ;;  %v2324_v40 = vstv %s9497_s12  ;;  %v2500_v41 = vstv %s9498_s1 }
 0x560   : >> { %9501 = sst [smem:[#allocation61_spill]] %s8228_s11  ;;  %s9509_s11 = sld [smem:[#allocation52_spill]]  ;;  %v2325_v56 = vmul.f32 %v2324_v40, %v1905_v24  ;;  %v2742_v40 = vmul.f32 %v2741_v37, %v1905_v24  ;;  %v2501_v36 = vmul.f32 %v2500_v41, %v1964_v11  ;;  %v2671_v41 = vadd.f32 %v2670_v26, %v8437_v18 }
 0x561   : >> { %s9512_s9 = sld [smem:[#allocation55_spill]]  ;;  %s9513_s18 = sld [smem:[#allocation56_spill]]  ;;  %v2565_v44 = vstv %s9504_s23  ;;  %v2269_v18 = vpop.xlane.xlu1 %2268 }
 0x562   : >> { %s8255_s21 = sld [smem:[#allocation7 + %s9514_s10]]  ;;  %s2456_s29 = sadd.f32 %s9505_s30, %s8210_s22  ;;  %v2601_v45 = vstv %s9507_s13  ;;  %v2326_v38 = vadd.f32 %v2325_v56, %v8389_v60  ;;  %v2353_v60 = vmul.f32 %v2352_v42, %v1964_v11  ;;  %v7042_v56 = vpop.eup %7041  ;;  %v2566_v7 = vmul.f32 %v2565_v44, %v1964_v11 }
 0x563   : >> { %s9515_s26 = sld [smem:[#allocation40_spill]]  ;;  %s9516_s17 = sld [smem:[#allocation57_spill]]  ;;  %v2673_v47 = vstv %s9510_s4  ;;  %v2602_v58 = vmul.f32 %v2601_v45, %v1964_v11  ;;  %v2635_v42 = vadd.f32 %v2634_v16, %v8432_v32  ;;  %v7044_v43 = vpop.eup %7043  ;;  %v2743_v44 = vadd.f32 %v2742_v40, %v2739_v14 }
 0x564   : >> { %s9517_s20 = sadd.s32 5, %s8139_s16  ;;  %s9518_s0 = sld [smem:[#allocation58_spill]]  ;;  %v2674_v37 = vmul.f32 %v2673_v47, %v1964_v11  ;;  %v2354_v45 = vadd.f32 %v2353_v60, %v2326_v38  ;;  %v2531_v47 = vadd.f32 %v2530_v62, %v2527_v34  ;;  %v2027_v39 = vmul.f32 %v7042_v56, %v7813_v2 }
 0x565   : >> { %s8265_s2 = sld [smem:[#allocation7 + %s9517_s20]]  ;;  %s2422_s5 = sadd.f32 %s8202_s14, %s8236_s8  ;;  %v2567_v9 = vadd.f32 %v2566_v7, %v2563_v35  ;;  %v2603_v21 = vadd.f32 %v2602_v58, %v2599_v61  ;;  %v2086_v24 = vmul.f32 %v7044_v43, %v7815_v3  ;;  %7049 = vrcp.f32 %v2269_v18 }
 0x566   : >> { %s9519_s19 = sld [smem:[#allocation77_spill]]  ;;  %v2637_v46 = vstv %s9509_s11  ;;  %s9520_s10 = sld [smem:[#allocation59_spill]]  ;;  %v2675_v32 = vadd.f32 %v2674_v37, %v2671_v41 }
 0x567   : >> { %s9521_s1 = sld [smem:[#allocation61_spill]]  ;;  %s9522_s12 = sld [smem:[#allocation60_spill]]  ;;  %v2709_v48 = vstv %s9512_s9  ;;  %v2745_v49 = vstv %s9513_s18  ;;  %v2638_v12 = vmul.f32 %v2637_v46, %v1964_v11  ;;  %v2502_v46 = vadd.f32 %v2501_v36, %v2499_v33 }
 0x568   : >> { %s9523_s30 = sld [smem:[#allocation62_spill]]  ;;  %s2475_s22 = sadd.f32 %s8214_s7, %s2472_s6  ;;  %v2710_v8 = vmul.f32 %v2709_v48, %v1964_v11  ;;  %v2746_v16 = vmul.f32 %v2745_v49, %v1964_v11 }
 0x569   : >> { %s9524_s20 = sadd.s32 4, %s8157_s27  ;;  %v2503_v50 = vstv %s9515_s26  ;;  %s9525_s11 = sld [smem:[#allocation63_spill]]  ;;  %v2533_v51 = vstv %s9516_s17  ;;  %v2639_v30 = vadd.f32 %v2638_v12, %v2635_v42 }
 0x56a   : >> { %s2480_s23 = sld [smem:[#allocation7 + %s9524_s20]]  ;;  %s9526_s4 = sadd.s32 4, %s9500_s28  ;;  %v2569_v52 = vstv %s9518_s0  ;;  %v2504_v19 = vmul.f32 %v2503_v50, %v2027_v39  ;;  %v2534_v23 = vmul.f32 %v2533_v51, %v2027_v39 }
 0x56b   : >> { %s9527_s13 = sld [smem:[#allocation78_spill]]  ;;  %s9339_s14 = sadd.s32 5, %s8157_s27  ;;  %v2570_v48 = vmul.f32 %v2569_v52, %v2027_v39 }
 0x56c   : >> { %s8282_s8 = sld [smem:[#allocation7 + %s9526_s4]]  ;;  %s2459_s9 = sadd.f32 %s9519_s19, %s2456_s29  ;;  %v2605_v53 = vstv %s9520_s10  ;;  %v2505_v3 = vadd.f32 %v2504_v19, %v2502_v46  ;;  %v2535_v52 = vadd.f32 %v2534_v23, %v2531_v47 }
 0x56d   : >> { %s9529_s18 = sadd.s32 6, %s8139_s16  ;;  %s9530_s6 = sld [smem:[#allocation64_spill]]  ;;  %v2641_v54 = vstv %s9522_s12  ;;  %v2606_v49 = vmul.f32 %v2605_v53, %v2027_v39  ;;  %v2571_v22 = vadd.f32 %v2570_v48, %v2567_v9  ;;  %v7046_v53 = vpop.eup %7045 }
 0x56e   : >> { %s2430_s7 = sld [smem:[#allocation7 + %s9529_s18]]  ;;  %s2425_s20 = sadd.f32 %s9521_s1, %s2422_s5  ;;  %v2677_v57 = vstv %s9523_s30  ;;  %v2642_v2 = vmul.f32 %v2641_v54, %v2027_v39  ;;  %v7048_v36 = vpop.eup %7047 }
 0x56f   : >> { %s2478_s17 = sadd.f32 %s8249_s25, %s2475_s22  ;;  %s8296_s4 = sld [smem:[#allocation7 + %s9339_s14]]  ;;  %v2713_v59 = vstv %s9525_s11  ;;  %v2678_v38 = vmul.f32 %v2677_v57, %v2027_v39  ;;  %v2607_v40 = vadd.f32 %v2606_v49, %v2603_v21 }
 0x570   : >> { %s9532_s0 = sadd.s32 5, %s9500_s28  ;;  %s9340_s29 = sadd.s32 6, %s8157_s27  ;;  %v2714_v50 = vmul.f32 %v2713_v59, %v2027_v39  ;;  %v2643_v54 = vadd.f32 %v2642_v2, %v2639_v30 }
 0x571   : >> { %s8301_s19 = sld [smem:[#allocation7 + %s9532_s0]]  ;;  %s2462_s18 = sadd.f32 %s9527_s13, %s2459_s9  ;;  %v2679_v26 = vadd.f32 %v2678_v38, %v2675_v32  ;;  %v2149_v32 = vmul.f32 %v7048_v36, %v7828_v13  ;;  %v7050_v13 = vpop.eup %7049 }
 0x572   : >> { %s9534_s1 = sadd.s32 6, %s9500_s28  ;;  %s2428_s25 = sadd.f32 %s8265_s2, %s2425_s20 }
 0x573   : >> { %s8308_s26 = sld [smem:[#allocation7 + %s9534_s1]]  ;;  %s9536_s22 = sadd.s32 7, %s8139_s16  ;;  %v2380_v55 = vstv %s9530_s6 }
 0x574   : >> { %s8314_s12 = sld [smem:[#allocation7 + %s9536_s22]]  ;;  %s8317_s30 = sadd.f32 %s2480_s23, %s2478_s17  ;;  %v2381_v14 = vmul.f32 %v2380_v55, %v2027_v39  ;;  %v2747_v55 = vadd.f32 %v2746_v16, %v2743_v44 }
 0x575   : >> { %s8321_s0 = sld [smem:[#allocation7 + %s9340_s29]]  ;;  %s9538_s13 = sadd.s32 7, %s9500_s28 }
 0x576   : >> { %s8326_s1 = sld [smem:[#allocation7 + %s9538_s13]]  ;;  %s8330_s22 = smul.f32 0.125, %s2462_s18  ;;  %v2382_v51 = vadd.f32 %v2381_v14, %v2354_v45 }
 0x577   : >> { %s9542_s23 = sadd.s32 1, %s8139_s16  ;;  %s8337_s28 = sadd.f32 %s2430_s7, %s2428_s25 }
 0x578   : >> { %s8334_s17 = sld [smem:[#allocation7 + %s9542_s23]]  ;;  %s9545_s13 = sadd.s32 2, %s8139_s16  ;;  %v9639_v19 = vstv %s8330_s22 }
 0x579   : >> { %s8341_s2 = sld [smem:[#allocation7 + %s9545_s13]]  ;;  %s2484_s18 = sadd.f32 %s8296_s4, %s8317_s30 }
 0x57a   : >> { %s8348_s23 = sld [smem:[#allocation7 + %s9548_s15]]  ;;  %s9551_s25 = sadd.s32 3, %s8139_s16 }
 0x57b   : >> { %s8356_s11 = sld [smem:[#allocation7 + %s9551_s25]]  ;;  %s9554_s13 = sadd.s32 4, %s8139_s16 }
 0x57c   : >> { %9540 = sst [smem:[#allocation77_spill]] %s8326_s1  ;;  %s9556_s30 = sadd.s32 5, %s8139_s16 }
 0x57d   : >> { %s8360_s10 = sld [smem:[#allocation7 + %s9554_s13]]  ;;  %s9559_s14 = sadd.s32 6, %s8139_s16 }
 0x57e   : >> { %9543 = sst [smem:[#allocation61_spill]] %s8334_s17  ;;  %s9563_s9 = sld [smem:[#allocation76_spill]] }
 0x57f   : >> { %9546 = sst [smem:[#allocation78_spill]] %s8341_s2  ;;  %s9568_s1 = sadd.s32 1, %s8157_s27 }
 0x580   : >> { %s8365_s15 = sld [smem:[#allocation7 + %s9556_s30]]  ;;  %s2434_s25 = sadd.f32 %s8314_s12, %s8337_s28 }
 0x581   : >> { %9553 = sst [smem:[#allocation38_spill]] %s8356_s11  ;;  %s9564_s11 = sadd.s32 7, %s8139_s16 }
 0x582   : >> { %s8369_s2 = sld [smem:[#allocation7 + %s9559_s14]]  ;;  %s9571_s12 = sadd.s32 3, %s8157_s27 }
 0x583   : >> { %9555 = sst [smem:[#allocation28_spill]] %s8360_s10  ;;  %s9575_s6 = sld [smem:[#allocation77_spill]] }
 0x584   : >> { %s8376_s13 = sld [smem:[#allocation7 + %s9564_s11]]  ;;  %s9570_s11 = sadd.s32 2, %s8157_s27  ;;  %v9624_v11 = vstv %s9563_s9 }
 0x585   : >> { %s8384_s14 = sld [smem:[#allocation7 + %s9568_s1]]  ;;  %s9577_s4 = sadd.s32 6, %s8157_s27  ;;  %v2409_v59 = vmul.f32 %v9624_v11, %v2086_v24 }
 0x586   : >> { %9558 = sst [smem:[#allocation30_spill]] %s8365_s15  ;;  %s9579_s10 = sadd.s32 7, %s8157_s27 }
 0x587   : >> { %s8380_s15 = sadd.f32 %s8321_s0, %s2484_s18  ;;  %s8399_s16 = sld [smem:[#allocation7 + %s9570_s11]]  ;;  %v2410_v42 = vadd.f32 %v2409_v59, %v2382_v51 }
 0x588   : >> { %9561 = sst [smem:[#allocation31_spill]] %s8369_s2  ;;  %s9572_s0 = sld [smem:[#allocation81_spill]] }
 0x589   : >> { %s8403_s28 = sld [smem:[#allocation7 + %s9571_s12]]  ;;  %s9574_s18 = sadd.s32 5, %s8157_s27 }
 0x58a   : >> { %s8423_s1 = sld [smem:[#allocation7 + %s9573_s24]]  ;;  %s8457_s29 = smul.f32 0.125, %s2434_s25 }
 0x58b   : >> { %s8427_s7 = sld [smem:[#allocation7 + %s9574_s18]]  ;;  %s2490_s2 = sadd.f32 %s8348_s23, %s8380_s15 }
 0x58c   : >> { %s8447_s12 = sld [smem:[#allocation7 + %s9577_s4]] }
 0x58d   : >> { %s8451_s18 = sld [smem:[#allocation7 + %s9579_s10]]  ;;  %s8474_s24 = smul.f32 0.125, %s2490_s2 }
 0x58e   : >> { %s9583_s3 = sld [smem:[#allocation30_spill]]  ;;  %s9585_s27 = sld [smem:[#allocation79_spill]]  ;;  %v9643_v2 = vstv %s9572_s0 }
 0x58f   : >> { %s9591_s11 = sld [smem:[#allocation74_spill]]  ;;  %v2492_v28 = vstv %s8474_s24  ;;  %s9614_s20 = sld [smem:[#allocation65_spill]] }
 0x590   : >> { %s9615_s30 = sld [smem:[#allocation48_spill]]  ;;  %s9616_s2 = sld [smem:[#allocation66_spill]] }
 0x591   : >> { %s9617_s4 = sld [smem:[#allocation68_spill]]  ;;  %s9618_s25 = sld [smem:[#allocation69_spill]] }
 0x592   : >> { %s9619_s23 = sld [smem:[#allocation70_spill]]  ;;  %s9620_s15 = sld [smem:[#allocation71_spill]] }
 0x593   : >> { %s9622_s10 = sld [smem:[#allocation72_spill]]  ;;  %s9623_s5 = sld [smem:[#allocation73_spill]] }
 0x594   : >> { %s9630_s17 = sld [smem:[#allocation67_spill]] }
 0x595   : >> { %v6671_v63 = vld [vmem:[%s9591_s11 + $0x44] ss:$8 sps:$4 sm:$0xff]   ;;  %v9621_v57 = vstv %s9614_s20  ;;  %s9631_s20 = sld [smem:[#allocation80_spill]]  ;;  %s9635_s9 = sld [smem:[#allocation75_spill]] }
 0x596   : >> { %3004 = vmatprep.subr.bf16.mxu1 %v6671_v63  ;;  %v2711_v63 = vadd.f32 %v2710_v8, %v2707_v20  ;;  %v2750_v27 = vmul.f32 %v9621_v57, %v2027_v39  ;;  %v9625_v33 = vstv %s9615_s30  ;;  %v9626_v35 = vstv %s9616_s2  ;;  %s9636_s30 = sld [smem:[#allocation61_spill]]  ;;  %s9637_s2 = sld [smem:[#allocation78_spill]] }
 0x597   : >> { %v2507_v34 = vmul.f32 %v9625_v33, %v2086_v24  ;;  %v2538_v60 = vmul.f32 %v9626_v35, %v2086_v24  ;;  %v9627_v56 = vstv %s9617_s4  ;;  %v9628_v58 = vstv %s9618_s25  ;;  %s9638_s4 = sld [smem:[#allocation38_spill]]  ;;  %s9641_s25 = sld [smem:[#allocation28_spill]] }
 0x598   : >> { %v2715_v25 = vadd.f32 %v2714_v50, %v2711_v63  ;;  %v2751_v62 = vadd.f32 %v2750_v27, %v2747_v55  ;;  %v2574_v7 = vmul.f32 %v9627_v56, %v2086_v24  ;;  %v2610_v12 = vmul.f32 %v9628_v58, %v2086_v24 }
 0x599   : >> { %v9629_v37 = vstv %s9619_s23  ;;  %v2508_v41 = vadd.f32 %v2507_v34, %v2505_v3  ;;  %v2539_v43 = vadd.f32 %v2538_v60, %v2535_v52  ;;  %v9632_v20 = vstv %s9620_s15  ;;  %s9644_s23 = sld [smem:[#allocation31_spill]] }
 0x59a   : >> { %v2646_v61 = vmul.f32 %v9629_v37, %v2086_v24  ;;  %v2682_v44 = vmul.f32 %v9632_v20, %v2086_v24  ;;  %v2575_v45 = vadd.f32 %v2574_v7, %v2571_v22  ;;  %v9633_v46 = vstv %s9622_s10 }
 0x59b   : >> { %v2718_v47 = vmul.f32 %v9633_v46, %v2086_v24  ;;  %v9634_v8 = vstv %s9623_s5  ;;  %v2208_v39 = vmul.f32 %v7046_v53, %v7821_v10  ;;  %v2611_v9 = vadd.f32 %v2610_v12, %v2607_v40 }
 0x59c   : >> { %v2754_v16 = vmul.f32 %v9634_v8, %v2086_v24  ;;  %v2647_v21 = vadd.f32 %v2646_v61, %v2643_v54  ;;  %v2683_v30 = vadd.f32 %v2682_v44, %v2679_v26  ;;  %v9640_v48 = vstv %s9630_s17 }
 0x59d   : >> { %v2719_v18 = vadd.f32 %v2718_v47, %v2715_v25  ;;  %v2465_v23 = vmul.f32 %v9639_v19, %v2208_v39  ;;  %v2513_v24 = vmul.f32 %v9640_v48, %v2208_v39  ;;  %v9642_v49 = vstv %s9631_s20 }
 0x59e   : >> { %v2755_v14 = vadd.f32 %v2754_v16, %v2751_v62  ;;  %v2546_v10 = vmul.f32 %v9642_v49, %v2208_v39  ;;  %v2582_v38 = vmul.f32 %v9643_v2, %v2208_v39  ;;  %v9645_v63 = vstv %s8255_s21 }
 0x59f   : >> { %v2618_v55 = vmul.f32 %v9645_v63, %v2208_v39  ;;  %v9646_v50 = vstv %s8282_s8  ;;  %v9647_v3 = vstv %s8301_s19  ;;  %v9648_v22 = vstv %s8308_s26 }
 0x5a0   : >> { %v2654_v51 = vmul.f32 %v9646_v50, %v2208_v39  ;;  %v2690_v52 = vmul.f32 %v9647_v3, %v2208_v39  ;;  %v2726_v53 = vmul.f32 %v9648_v22, %v2208_v39  ;;  %v9649_v40 = vstv %s9575_s6 }
 0x5a1   : >> { %v2762_v54 = vmul.f32 %v9649_v40, %v2208_v39  ;;  %v9650_v26 = vstv %s8457_s29  ;;  %v9651_v27 = vstv %s9635_s9  ;;  %v9652_v11 = vstv %s9636_s30  ;;  %s9669_s30 = sld [smem:[#allocation27_spill]] }
 0x5a2   : >> { %v2437_v57 = vmul.f32 %v9650_v26, %v2149_v32  ;;  %v2510_v25 = vmul.f32 %v9651_v27, %v2149_v32  ;;  %v2542_v59 = vmul.f32 %v9652_v11, %v2149_v32  ;;  %v9653_v33 = vstv %s9637_s2 }
 0x5a3   : >> { %v2578_v34 = vmul.f32 %v9653_v33, %v2149_v32  ;;  %v9654_v35 = vstv %s9638_s4  ;;  %v9655_v62 = vstv %s9641_s25  ;;  %v9656_v7 = vstv %s9583_s3  ;;  %s9667_s3 = sld [smem:[#allocation26_spill]]  ;;  %s9670_s4 = sld [smem:[#allocation87_spill]] }
 0x5a4   : >> { %v2614_v60 = vmul.f32 %v9654_v35, %v2149_v32  ;;  %v2438_v36 = vadd.f32 %v2437_v57, %v2410_v42  ;;  %v2650_v56 = vmul.f32 %v9655_v62, %v2149_v32  ;;  %v2686_v58 = vmul.f32 %v9656_v7, %v2149_v32 }
 0x5a5   : >> { %v9657_v12 = vstv %s9644_s23  ;;  %v2511_v61 = vadd.f32 %v2510_v25, %v2508_v41  ;;  %v2543_v20 = vadd.f32 %v2542_v59, %v2539_v43  ;;  %v2579_v44 = vadd.f32 %v2578_v34, %v2575_v45 }
 0x5a6   : >> { %v2722_v37 = vmul.f32 %v9657_v12, %v2149_v32  ;;  %v2615_v46 = vadd.f32 %v2614_v60, %v2611_v9  ;;  %v2651_v47 = vadd.f32 %v2650_v56, %v2647_v21  ;;  %v2687_v8 = vadd.f32 %v2686_v58, %v2683_v30 }
 0x5a7   : >> { %v9658_v42 = vstv %s8376_s13  ;;  %v2271_v19 = vmul.f32 %v7050_v13, %v7837_v15  ;;  %v2466_v48 = vadd.f32 %v2465_v23, %v2438_v36  ;;  %v2547_v49 = vadd.f32 %v2546_v10, %v2543_v20 }
 0x5a8   : >> { %v2723_v16 = vadd.f32 %v2722_v37, %v2719_v18  ;;  %v2758_v39 = vmul.f32 %v9658_v42, %v2149_v32  ;;  %v2583_v41 = vadd.f32 %v2582_v38, %v2579_v44  ;;  %v2619_v2 = vadd.f32 %v2618_v55, %v2615_v46 }
 0x5a9   : >> { %v2655_v45 = vadd.f32 %v2654_v51, %v2651_v47  ;;  %v2691_v63 = vadd.f32 %v2690_v52, %v2687_v8  ;;  %v2493_v9 = vmul.f32 %v2492_v28, %v2271_v19  ;;  %v9659_v21 = vstv %s9585_s27  ;;  %s8639_s21 = sshll.u32 %s9667_s3, 7  ;;  %s4001_s25 = scalar_lea.vmem %s9670_s4, %s9669_s30 }
 0x5aa   : >> { %v2759_v43 = vadd.f32 %v2758_v39, %v2755_v14  ;;  %v2516_v50 = vmul.f32 %v9659_v21, %v2271_v19  ;;  %v9660_v30 = vstv %s8384_s14  ;;  %v9661_v18 = vstv %s8399_s16  ;;  %s2903_s26 = sadd.s32 1, %s8639_s21  ;;  %s8643_s8 = sld [smem:[#allocation8 + %s8639_s21]] }
 0x5ab   : >> { %v2550_v3 = vmul.f32 %v9660_v30, %v2271_v19  ;;  %v2586_v22 = vmul.f32 %v9661_v18, %v2271_v19  ;;  %v9662_v40 = vstv %s8403_s28  ;;  %v9663_v15 = vstv %s8423_s1  ;;  %s8646_s19 = sld [smem:[#allocation10 + %s8639_s21]]  ;;  %s3131_s29 = sadd.s32 2, %s8639_s21 }
 0x5ac   : >> { %v2622_v32 = vmul.f32 %v9662_v40, %v2271_v19  ;;  %v2658_v23 = vmul.f32 %v9663_v15, %v2271_v19  ;;  %v9664_v10 = vstv %s8427_s7  ;;  %v2727_v13 = vadd.f32 %v2726_v53, %v2723_v16  ;;  %s8649_s22 = sld [smem:[#allocation8 + %s2903_s26]]  ;;  %s3565_s13 = sadd.s32 5, %s8639_s21 }
 0x5ad   : >> { %v2694_v38 = vmul.f32 %v9664_v10, %v2271_v19  ;;  %v2494_v14 = vadd.f32 %v2493_v9, %v2466_v48  ;;  %v2551_v55 = vadd.f32 %v2550_v3, %v2547_v49  ;;  %v2587_v51 = vadd.f32 %v2586_v22, %v2583_v41  ;;  %s8652_s14 = sld [smem:[#allocation10 + %s2903_s26]]  ;;  %s3421_s16 = sadd.s32 4, %s8639_s21 }
 0x5ae   : >> { %v9665_v52 = vstv %s8447_s12  ;;  %v2623_v28 = vadd.f32 %v2622_v32, %v2619_v2  ;;  %v2659_v57 = vadd.f32 %v2658_v23, %v2655_v45  ;;  %v2763_v25 = vadd.f32 %v2762_v54, %v2759_v43  ;;  %s8655_s0 = sld [smem:[#allocation8 + %s3131_s29]]  ;;  %s3855_s28 = sadd.s32 7, %s8639_s21 }
 0x5af   : >> { %v2730_v26 = vmul.f32 %v9665_v52, %v2271_v19  ;;  %v2695_v27 = vadd.f32 %v2694_v38, %v2691_v63  ;;  %v2552_v11 = vsub.f32 %v2551_v55, %v2494_v14  ;;  %v2588_v59 = vsub.f32 %v2587_v51, %v2494_v14  ;;  %s8658_s1 = sld [smem:[#allocation8 + %s3565_s13]]  ;;  %s3711_s7 = sadd.s32 6, %s8639_s21 }
 0x5b0   : >> { %v9666_v34 = vstv %s8451_s18  ;;  %v2624_v60 = vsub.f32 %v2623_v28, %v2494_v14  ;;  %v2660_v36 = vsub.f32 %v2659_v57, %v2494_v14  ;;  %v2514_v56 = vadd.f32 %v2513_v24, %v2511_v61  ;;  %s8661_s6 = sld [smem:[#allocation10 + %s3565_s13]]  ;;  %s3275_s17 = sadd.s32 3, %s8639_s21 }
 0x5b1   : >> { %v2731_v33 = vadd.f32 %v2730_v26, %v2727_v13  ;;  %v2766_v35 = vmul.f32 %v9666_v34, %v2271_v19  ;;  %v2696_v62 = vsub.f32 %v2695_v27, %v2494_v14  ;;  %2554 = vst.msk [vmem:[#allocation2 + $0x8] sm:$0xff] %vm1831_vm3, %v2552_v11  ;;  %2590 = vst.msk [vmem:[#allocation2 + $0x10] sm:$0xff] %vm1831_vm3, %v2588_v59  ;;  %s8663_s12 = sld [smem:[#allocation8 + %s3421_s16]]  ;;  %v2846_v45 = vstv %s8643_s8  ;;  %s6202_s23 = smul.u32 576, %s9667_s3 }
 0x5b2   : >> { %2626 = vst.msk [vmem:[#allocation2 + $0x18] sm:$0xff] %vm1831_vm3, %v2624_v60  ;;  %2662 = vst.msk [vmem:[#allocation2 + $0x20] sm:$0xff] %vm1831_vm3, %v2660_v36  ;;  %v2517_v54 = vadd.f32 %v2516_v50, %v2514_v56  ;;  %v2555_v37 = vmul.f32 %v2552_v11, %v2552_v11  ;;  %v2591_v61 = vmul.f32 %v2588_v59, %v2588_v59  ;;  %s8665_s24 = sld [smem:[#allocation10 + %s3421_s16]]  ;;  %v2849_v63 = vstv %s8646_s19  ;;  %s6203_s26 = smul.u32 768, %s9667_s3 }
 0x5b3   : >> { %v2732_v7 = vsub.f32 %v2731_v33, %v2494_v14  ;;  %v2767_v53 = vadd.f32 %v2766_v35, %v2763_v25  ;;  %2698 = vst.msk [vmem:[#allocation2 + $0x28] sm:$0xff] %vm1831_vm3, %v2696_v62  ;;  %v2627_v44 = vmul.f32 %v2624_v60, %v2624_v60  ;;  %v2663_v47 = vmul.f32 %v2660_v36, %v2660_v36  ;;  %s8667_s18 = sld [smem:[#allocation8 + %s3855_s28]]  ;;  %s8844_s21 = scalar_lea.vmem [#allocation3], %s6202_s23 }
 0x5b4   : >> { %v2518_v12 = vsub.f32 %v2517_v54, %v2494_v14  ;;  %v2699_v16 = vmul.f32 %v2696_v62, %v2696_v62  ;;  %s8669_s27 = sld [smem:[#allocation10 + %s3855_s28]]  ;;  %v2905_v9 = vstv %s8649_s22  ;;  %v2908_v21 = vstv %s8652_s14 }
 0x5b5   : >> { %v2768_v58 = vsub.f32 %v2767_v53, %v2494_v14  ;;  %2734 = vst.msk [vmem:[#allocation2 + $0x30] sm:$0xff] %vm1831_vm3, %v2732_v7  ;;  %v2735_v39 = vmul.f32 %v2732_v7, %v2732_v7  ;;  %s8671_s15 = sld [smem:[#allocation8 + %s3711_s7]]  ;;  %v3133_v50 = vstv %s8655_s0  ;;  %v3567_v30 = vstv %s8658_s1 }
 0x5b6   : >> { %2519 = vst.msk [vmem:[#allocation2] sm:$0xff] %vm1831_vm3, %v2518_v12  ;;  %v2520_v24 = vmul.f32 %v2518_v12, %v2518_v12  ;;  %s8673_s10 = sld [smem:[#allocation10 + %s3711_s7]]  ;;  %v3570_v32 = vstv %s8661_s6 }
 0x5b7   : >> { %2770 = vst.msk [vmem:[#allocation2 + $0x38] sm:$0xff] %vm1831_vm3, %v2768_v58  ;;  %v2771_v48 = vmul.f32 %v2768_v58, %v2768_v58  ;;  %s8681_s5 = sld [smem:[#allocation10 + %s3131_s29]]  ;;  %v3423_v15 = vstv %s8663_s12  ;;  %s4141_s12 = smul.u32 6, %s9667_s3 }
 0x5b8   : >> { %v2556_v20 = vadd.f32 %v2555_v37, %v2520_v24  ;;  %v2901_v22 = vld [vmem:[#allocation2 + $0x8] sm:$0xff]  ;;  %v3426_v23 = vstv %s8665_s24  ;;  %v3129_v28 = vld [vmem:[#allocation2 + $0x10] sm:$0xff]  ;;  %s8693_s20 = sld [smem:[#allocation8 + %s3275_s17]] }
 0x5b9   : >> { %v3857_v10 = vstv %s8667_s18  ;;  %v3419_v14 = vld [vmem:[#allocation2 + $0x20] sm:$0xff]  ;;  %s3279_s9 = sld [smem:[#allocation10 + %s3275_s17]] }
 0x5ba   : >> { %v2592_v46 = vadd.f32 %v2591_v61, %v2556_v20  ;;  %v3563_v40 = vld [vmem:[#allocation2 + $0x28] sm:$0xff]  ;;  %v3860_v51 = vstv %s8669_s27  ;;  %s9671_s29 = sld [smem:[#allocation92_spill]]  ;;  %s9672_s16 = sld [smem:[#allocation88_spill]] }
 0x5bb   : >> { %v3713_v26 = vstv %s8671_s15  ;;  %s9673_s7 = sld [smem:[#allocation89_spill]]  ;;  %s9674_s27 = sld [smem:[#allocation91_spill]] }
 0x5bc   : >> { %v2628_v8 = vadd.f32 %v2627_v44, %v2592_v46  ;;  %v3709_v52 = vld [vmem:[#allocation2 + $0x30] sm:$0xff]  ;;  %v3716_v35 = vstv %s8673_s10  ;;  %v6669_v44 = vld [vmem:[%s9591_s11 + $0x40] ss:$8 sps:$4 sm:$0xff]   ;;  %s9675_s17 = sld [smem:[#allocation93_spill]] }
 0x5bd   : >> { %v2843_v18 = vld [vmem:[#allocation2] sm:$0xff]  ;;  %v3136_v46 = vstv %s8681_s5 }
 0x5be   : >> { %v2664_v42 = vadd.f32 %v2663_v47, %v2628_v8  ;;  %v3853_v55 = vld [vmem:[#allocation2 + $0x38] sm:$0xff]  ;;  %v3144_v8 = vsel %vm2856_vm2, %v7875_v29, 0  ;;  %v6677_v29 = vld [vmem:[%s9591_s11 + $0x64] ss:$8 sps:$4 sm:$0xff]  }
 0x5bf   : >> { %v6674_v47 = vld [vmem:[%s9591_s11 + $0x54] ss:$8 sps:$4 sm:$0xff]  }
 0x5c0   : >> { %v2700_v19 = vadd.f32 %v2699_v16, %v2664_v42  ;;  %v9668_v16 = vmov 0.0   ;;  %v3273_v42 = vld [vmem:[#allocation2 + $0x18] sm:$0xff]  ;;  %s8910_s22 = scalar_lea.vmem %s9671_s29, %s6203_s26  ;;  %s4016_s0 = scalar_lea.vmem %s9672_s16, %s9669_s30 }
 0x5c1   : >> { %s4018_s6 = scalar_lea.vmem %s9673_s7, %s9669_s30  ;;  %s4142_s15 = scalar_lea.vmem %s9674_s27, %s4141_s12 }
 0x5c2   : >> { %v2736_v49 = vadd.f32 %v2735_v39, %v2700_v19  ;;  %s611_s29 = sadd.s32 1, %s9667_s3  }
 0x5c3   : >> { %p608_p7 = scmp.ge.s32.totalorder %s611_s29, 2  }
 0x5c4   : >> { %v2772_v41 = vadd.f32 %v2771_v48, %v2736_v49  ;;  %v6672_v48 = vld [vmem:[%s9591_s11 + $0x50] ss:$8 sps:$4 sm:$0xff]   ;;  %v3277_v49 = vstv %s8693_s20  ;;  %s4922_s20 = scalar_lea.vmem %s9675_s17, %s9669_s30  ;;  %s9678_s3 = sld [smem:[#allocation20_spill]] (%p608_p7) }
 0x5c5   : > { %s9680_s2 = sld [smem:[#allocation94_spill]] (%p608_p7)  ;;  %s9681_s23 = sld [smem:[#allocation95_spill]] (%p608_p7) }
 0x5c6   : >> { %v2773_v43 = vmul.f32 0.125, %v2772_v41  ;;  %v3285_v41 = vpop.permute.xlu1 %3284  ;;  %s9683_s26 = sld [smem:[#allocation23_spill]] (%p608_p7)  ;;  %s7267_s1 = smov (%p608_p7), [#allocation11]  }
 0x5c7   : > { %s9684_s13 = sld [smem:[#allocation99_spill]] (%p608_p7)  ;;  %s7158_s7 = sshll.u32 (%p608_p7), %s7267_s1, 4  ;;  %s7159_s7 = int_to_ptr.vmem [resolvable:$false] %s7158_s7 }
 0x5c8   : >> { %v2774_v2 = vadd.f32 1e-05, %v2773_v43 }
 0x5ca   : >> { %7051 = vrsqrt.f32 %v2774_v2  ;;  %s6204_s8 = sshll.u32 (%p608_p7), %s9678_s3, 8 }
 0x5cc   : > { %p9686_p11 = scmp.ne.s32.totalorder (%p608_p7), %s9683_s26, 0 }
 0x5cd   : > { %s9156_s14 = scalar_lea.hbm (%p608_p7), %s9684_s13, %s6204_s8 }
 0x5d4   : >> { %v7052_v3 = vpop.eup %7051 }
 0x5d5   : >> { %v2844_v38 = vmul.f32 %v7052_v3, %v2843_v18  ;;  %v2902_v13 = vmul.f32 %v7052_v3, %v2901_v22  ;;  %v3564_v57 = vmul.f32 %v7052_v3, %v3563_v40  ;;  %v3420_v27 = vmul.f32 %v7052_v3, %v3419_v14  ;;  %v6683_v18 = vld [vmem:[%s9591_s11 + $0x4] ss:$8 sps:$4 sm:$0xff]   ;;  %v6684_v40 = vld [vmem:[%s9591_s11 + $0xc0] ss:$8 sps:$4 sm:$0xff]   ;;  %v6702_v14 = vld [vmem:[%s9591_s11 + $0xf0] ss:$8 sps:$4 sm:$0xff]  }
 0x5d6   : >> { %v3854_v25 = vmul.f32 %v7052_v3, %v3853_v55  ;;  %v3710_v11 = vmul.f32 %v7052_v3, %v3709_v52  ;;  %v3130_v34 = vmul.f32 %v7052_v3, %v3129_v28  ;;  %v3274_v19 = vmul.f32 %v7052_v3, %v3273_v42  ;;  %v6681_v52 = vld [vmem:[%s9591_s11] ss:$8 sps:$4 sm:$0xff]  }
 0x5d7   : >> { %v2847_v59 = vmul.f32 %v2846_v45, %v2844_v38  ;;  %v2906_v33 = vmul.f32 %v2905_v9, %v2902_v13  ;;  %v3568_v60 = vmul.f32 %v3567_v30, %v3564_v57  ;;  %v3424_v36 = vmul.f32 %v3423_v15, %v3420_v27  ;;  %v6675_v45 = vld [vmem:[%s9591_s11 + $0x60] ss:$8 sps:$4 sm:$0xff]   ;;  %v6680_v9 = vld [vmem:[%s9591_s11 + $0x74] ss:$8 sps:$4 sm:$0xff]   ;;  %v6678_v30 = vld [vmem:[%s9591_s11 + $0x70] ss:$8 sps:$4 sm:$0xff]  }
 0x5d8   : >> { %v3858_v62 = vmul.f32 %v3857_v10, %v3854_v25  ;;  %v3714_v56 = vmul.f32 %v3713_v26, %v3710_v11  ;;  %v3134_v20 = vmul.f32 %v3133_v50, %v3130_v34  ;;  %v3278_v2 = vmul.f32 %v3277_v49, %v3274_v19  ;;  %v6692_v15 = vld [vmem:[%s9591_s11 + $0xd4] ss:$8 sps:$4 sm:$0xff]   ;;  %v6696_v10 = vld [vmem:[%s9591_s11 + $0xe0] ss:$8 sps:$4 sm:$0xff]   ;;  %v6698_v38 = vld [vmem:[%s9591_s11 + $0xe4] ss:$8 sps:$4 sm:$0xff]  }
 0x5d9   : >> { %v2850_v7 = vadd.f32 %v2849_v63, %v2847_v59  ;;  %v2909_v53 = vadd.f32 %v2908_v21, %v2906_v33  ;;  %v8695_v54 = vadd.f32 %v3570_v32, %v3568_v60  ;;  %v8697_v58 = vadd.f32 %v3426_v23, %v3424_v36  ;;  %v6686_v32 = vld [vmem:[%s9591_s11 + $0xc4] ss:$8 sps:$4 sm:$0xff]   ;;  %v6690_v23 = vld [vmem:[%s9591_s11 + $0xd0] ss:$8 sps:$4 sm:$0xff]   ;;  %v6704_v13 = vld [vmem:[%s9591_s11 + $0xf4] ss:$8 sps:$4 sm:$0xff]  }
 0x5da   : >> { %v8699_v12 = vadd.f32 %v3860_v51, %v3858_v62  ;;  %v8701_v37 = vadd.f32 %v3716_v35, %v3714_v56  ;;  %v3137_v39 = vadd.f32 %v3136_v46, %v3134_v20  ;;  %v3280_v63 = vstv %s3279_s9  ;;  %v6689_v27 = vld [vmem:[%s9591_s11 + $0x14] ss:$8 sps:$4 sm:$0xff]   ;;  %v6687_v34 = vld [vmem:[%s9591_s11 + $0x10] ss:$8 sps:$4 sm:$0xff]   ;;  %v6695_v35 = vld [vmem:[%s9591_s11 + $0x24] ss:$8 sps:$4 sm:$0xff]   ;;  %v3575_v20 = vpop.permute.xlu1 %3574 }
 0x5db   : >> { %v2851_v24 = vpack.c.bf16 %v2850_v7, %v2850_v7  ;;  %v2910_v61 = vpack.c.bf16 %v2909_v53, %v2909_v53  ;;  %v3290_v21 = vsel %vm2856_vm2, %v3285_v41, 0  ;;  %v3281_v50 = vadd.f32 %v3280_v63, %v3278_v2  ;;  %v6693_v36 = vld [vmem:[%s9591_s11 + $0x20] ss:$8 sps:$4 sm:$0xff]   ;;  %v6701_v56 = vld [vmem:[%s9591_s11 + $0x34] ss:$8 sps:$4 sm:$0xff]   ;;  %s9679_s9 = sld [smem:[#allocation25_spill]] (%p608_p7) }
 0x5dc   : >> { %v3138_v43 = vpack.c.bf16 %v3137_v39, %v3137_v39  ;;  %v7265_v22 = vmov 0   ;;  %v6705_v46 = vld [vmem:[%s9591_s11 + $0x80] ss:$8 sps:$4 sm:$0xff]   ;;  %v6710_v39 = vld [vmem:[%s9591_s11 + $0x94] ss:$8 sps:$4 sm:$0xff]   ;;  %v3572_v2 = vpack.c.bf16 %v8695_v54, %v8695_v54  ;;  %v3434_v54 = vsel %vm2856_vm2, %v7897_v31, 0 }
 0x5dd   : >> { %6295 = vmatmul.mubr.msk.bf16.vlgmr.msra.gmra.mrb[28].mxu0 %vm1831_vm3, %v2851_v24  ;;  %6301 = vmatmul.mubr.msk.bf16.vlgmr.msra.gmra.mrb[28].mxu1 %vm1831_vm3, %v2910_v61  ;;  %v3282_v3 = vpack.c.bf16 %v3281_v50, %v3281_v50  ;;  %v6699_v24 = vld [vmem:[%s9591_s11 + $0x30] ss:$8 sps:$4 sm:$0xff]   ;;  %v6707_v61 = vld [vmem:[%s9591_s11 + $0x84] ss:$8 sps:$4 sm:$0xff]   ;;  %v6717_v50 = vld [vmem:[%s9591_s11 + $0x140] ss:$8 sps:$4 sm:$0xff]  }
 0x5de   : >> { %6305 = vmatpush3.bf16.msra.mxu0 %v3144_v8  ;;  %6306 = vmatprep.mubr.msk.bf16.mxu0 %vm7263_vm1, %v9668_v16  ;;  %v6713_v41 = vld [vmem:[%s9591_s11 + $0xa4] ss:$8 sps:$4 sm:$0xff]   ;;  %v6714_v63 = vld [vmem:[%s9591_s11 + $0xb0] ss:$8 sps:$4 sm:$0xff]  }
 0x5df   : >> { %6310 = vmatprep.subr.bf16.mxu0 %v9668_v16  ;;  %3005 = vmatpush1.bf16.msra.mxu1 %v6669_v44  ;;  %v6719_v31 = vld [vmem:[%s9591_s11 + $0x144] ss:$8 sps:$4 sm:$0xff]  }
 0x5e0   : >> { %3006 = vmatprep.subr.bf16.mxu1 %v6674_v47  ;;  %3036 = vmatprep.mubr.bf16.mxu1 %v7265_v22 }
 0x5e1   : > { %s5605_s19 = sshll.u32 (%p608_p7), %s9679_s9, 4  ;;  %s9158_s19 = int_to_ptr.vmem [resolvable:$true] %s5605_s19 }
 0x5e2   : > { %s7154_s28 = scalar_lea.vmem (%p608_p7), %s9158_s19, 256  ;;  %p7161_p9 = scmp.lt.s32.totalorder (%p608_p7), %s9158_s19, %s7159_s7 }
 0x5e3   : >> { %3007 = vmatpush1.bf16.msra.mxu1 %v6672_v48  ;;  %v3580_v48 = vsel %vm2856_vm2, %v3575_v20, 0  ;;  %p7155_p8 = scmp.ne.s32.totalorder (%p608_p7), %s9158_s19, %s7154_s28 }
 0x5e4   : >> { %3008 = vmatprep.subr.bf16.mxu1 %v6677_v29  ;;  %v6708_v29 = vld [vmem:[%s9591_s11 + $0x90] ss:$8 sps:$4 sm:$0xff]  }
 0x5e5   : >> { %6307 = vmatmul.mubr.msk.bf16.vlgmr.msra.gmra.mrb[32].mxu0 %vm1831_vm3, %v3138_v43  ;;  %v6711_v43 = vld [vmem:[%s9591_s11 + $0xa0] ss:$8 sps:$4 sm:$0xff]   ;;  %p7156_p13 = pnand (%p608_p7), %p7155_p8, %p9686_p11 }
 0x5e6   : >> { %6311 = vmatpush3.bf16.msra.mxu0 %v3290_v21  ;;  %6312 = vmatprep.mubr.msk.bf16.mxu0 %vm7263_vm1, %v9668_v16  ;;  %v3428_v21 = vpack.c.bf16 %v8697_v58, %v8697_v58  ;;  %v6728_v58 = vld [vmem:[%s9591_s11 + $0x174] ss:$8 sps:$4 sm:$0xff]  }
 0x5e7   : >> { %3009 = vmatpush1.bf16.msra.mxu1 %v6675_v45  ;;  %3376 = vmatprep.subr.bf16.mxu0 %v6686_v32  ;;  %v6716_v45 = vld [vmem:[%s9591_s11 + $0xb4] ss:$8 sps:$4 sm:$0xff]   ;;  %v6726_v32 = vld [vmem:[%s9591_s11 + $0x170] ss:$8 sps:$4 sm:$0xff]   ;;  %p7157_p6 = pneg (%p608_p7), %p7156_p13 }
 0x5e8   : >> { %3010 = vmatprep.subr.bf16.mxu1 %v6680_v9 }
 0x5eb   : >> { %3011 = vmatpush1.bf16.msra.mxu1 %v6678_v30  ;;  %v6722_v30 = vld [vmem:[%s9591_s11 + $0x154] ss:$8 sps:$4 sm:$0xff]  }
 0x5ec   : >> { %3088 = vmatprep.subr.bf16.mxu1 %v6683_v18  ;;  %v6723_v18 = vld [vmem:[%s9591_s11 + $0x160] ss:$8 sps:$4 sm:$0xff]  }
 0x5ed   : >> { %6313 = vmatmul.mubr.msk.bf16.vlgmr.msra.gmra.mrb[36].mxu0 %vm1831_vm3, %v3282_v3  ;;  %v6720_v3 = vld [vmem:[%s9591_s11 + $0x150] ss:$8 sps:$4 sm:$0xff]  }
 0x5ee   : >> { %3408 = vmatprep.mubr.bf16.mxu0 %v7265_v22  ;;  %3377 = vmatpush1.bf16.msra.mxu0 %v6684_v40  ;;  %v6725_v40 = vld [vmem:[%s9591_s11 + $0x164] ss:$8 sps:$4 sm:$0xff]  }
 0x5ef   : >> { %3378 = vmatprep.subr.bf16.mxu0 %v6692_v15  ;;  %v6729_v15 = vld [vmem:[%s9591_s11 + $0x100] ss:$8 sps:$4 sm:$0xff]  }
 0x5f2   : >> { %3379 = vmatpush1.bf16.msra.mxu0 %v6690_v23  ;;  %v6731_v23 = vld [vmem:[%s9591_s11 + $0x104] ss:$8 sps:$4 sm:$0xff]  }
 0x5f3   : >> { %3380 = vmatprep.subr.bf16.mxu0 %v6698_v38  ;;  %v6734_v38 = vld [vmem:[%s9591_s11 + $0x114] ss:$8 sps:$4 sm:$0xff]  }
 0x5f6   : >> { %3381 = vmatpush1.bf16.msra.mxu0 %v6696_v10  ;;  %v6732_v10 = vld [vmem:[%s9591_s11 + $0x110] ss:$8 sps:$4 sm:$0xff]  }
 0x5f7   : >> { %3382 = vmatprep.subr.bf16.mxu0 %v6704_v13  ;;  %v6735_v13 = vld [vmem:[%s9591_s11 + $0x120] ss:$8 sps:$4 sm:$0xff]  }
 0x5fa   : >> { %3383 = vmatpush1.bf16.msra.mxu0 %v6702_v14  ;;  %v6737_v14 = vld [vmem:[%s9591_s11 + $0x124] ss:$8 sps:$4 sm:$0xff]  }
 0x5fb   : >> { %6322 = vmatprep.subr.bf16.mxu0 %v9668_v16 }
 0x6b0   : >> { %v2894_v55 = vpop.f32.mrb[28].mxu0  ;;  %v2954_v51 = vpop.f32.mrb[28].mxu1 }
 0x6b1   : >> { %v2960_v26 = vpack.c.bf16 %v2954_v51, %v2954_v51  ;;  %v6296_v28 = vpop.f32.mrb[29].mxu0  ;;  %v6302_v57 = vpop.f32.mrb[29].mxu1  ;;  %v2900_v47 = vpack.c.bf16 %v2894_v55, %v2894_v55  ;;  %v6740_v55 = vld [vmem:[%s9591_s11 + $0x134] ss:$8 sps:$4 sm:$0xff]   ;;  %v6738_v51 = vld [vmem:[%s9591_s11 + $0x130] ss:$8 sps:$4 sm:$0xff]  }
 0x6b2   : >> { %v2897_v25 = vpop.f32.mrb[30].mxu0  ;;  %v2957_v11 = vpop.f32.mrb[30].mxu1 }
 0x6b3   : >> { %v6297_v59 = vpop.f32.mrb[31].mxu0  ;;  %v6303_v33 = vpop.f32.mrb[31].mxu1  ;;  %5936 = vmatmul.mubr.msk.bf16.vlgmr.msra.gmra.mrb[32].mxu1 %vm619_vm0, %v2960_v26 }
 0x6b4   : >> { %3089 = vmatpush1.bf16.msra.mxu1 %v6681_v52  ;;  %3120 = vmatprep.mubr.bf16.mxu1 %v7265_v22 }
 0x6b5   : >> { %3090 = vmatprep.subr.bf16.mxu1 %v6689_v27 }
 0x6b8   : >> { %3091 = vmatpush1.bf16.msra.mxu1 %v6687_v34  ;;  %v3180_v60 = vpop.f32.mrb[32].mxu0 }
 0x6b9   : >> { %v6308_v62 = vpop.f32.mrb[33].mxu0  ;;  %3092 = vmatprep.subr.bf16.mxu1 %v6695_v35  ;;  %v3186_v9 = vpack.c.bf16 %v3180_v60, %v3180_v60 }
 0x6ba   : >> { %v3183_v7 = vpop.f32.mrb[34].mxu0 }
 0x6bb   : >> { %v6309_v53 = vpop.f32.mrb[35].mxu0 }
 0x6bc   : >> { %3093 = vmatpush1.bf16.msra.mxu1 %v6693_v36 }
 0x6bd   : >> { %3094 = vmatprep.subr.bf16.mxu1 %v6701_v56  ;;  %v3865_v56 = vpop.permute.xlu0 %3864 }
 0x6c0   : >> { %3095 = vmatpush1.bf16.msra.mxu1 %v6699_v24  ;;  %v3326_v44 = vpop.f32.mrb[36].mxu0 }
 0x6c1   : >> { %v3332_v8 = vpack.c.bf16 %v3326_v44, %v3326_v44  ;;  %v6314_v42 = vpop.f32.mrb[37].mxu0  ;;  %3230 = vmatprep.subr.bf16.mxu1 %v6707_v61  ;;  %v6743_v61 = vld [vmem:[%s9591_s11 + $0x1c4] ss:$8 sps:$4 sm:$0xff]   ;;  %v3870_v44 = vsel %vm2856_vm2, %v3865_v56, 0 }
 0x6c2   : >> { %v3329_v19 = vpop.f32.mrb[38].mxu0 }
 0x6c3   : >> { %5945 = vmatmul.mubr.msk.bf16.vlgmr.msra.gmra.mrb[36].mxu1 %vm619_vm0, %v2900_v47  ;;  %v6315_v49 = vpop.f32.mrb[39].mxu0  ;;  %5965 = vmatmul.mubr.msk.bf16.vlgmr.msra.gmra.mrb[40].mxu0 %vm619_vm0, %v3332_v8  ;;  %v6741_v8 = vld [vmem:[%s9591_s11 + $0x1c0] ss:$8 sps:$4 sm:$0xff]   ;;  %v3862_v19 = vpack.c.bf16 %v8699_v12, %v8699_v12 }
 0x6c4   : >> { %3231 = vmatpush1.bf16.msra.mxu1 %v6705_v46  ;;  %6323 = vmatpush3.bf16.msra.mxu0 %v3580_v48  ;;  %v6746_v48 = vld [vmem:[%s9591_s11 + $0x1d4] ss:$8 sps:$4 sm:$0xff]  }
 0x6c5   : >> { %3232 = vmatprep.subr.bf16.mxu1 %v6710_v39  ;;  %6324 = vmatprep.mubr.msk.bf16.mxu0 %vm7263_vm1, %v9668_v16 }
 0x6c6   : >> { %3262 = vmatprep.mubr.bf16.mxu1 %v7265_v22  ;;  %3666 = vmatprep.subr.bf16.mxu0 %v6719_v31  ;;  %v3718_v31 = vpack.c.bf16 %v8701_v37, %v8701_v37  ;;  %v6758_v37 = vld [vmem:[%s9591_s11 + $0x194] ss:$8 sps:$4 sm:$0xff]  }
 0x6c8   : >> { %3233 = vmatpush1.bf16.msra.mxu1 %v6708_v29 }
 0x6c9   : >> { %3234 = vmatprep.subr.bf16.mxu1 %v6713_v41 }
 0x6cb   : >> { %6325 = vmatmul.mubr.msk.bf16.vlgmr.msra.gmra.mrb[44].mxu0 %vm1831_vm3, %v3572_v2  ;;  %v6744_v2 = vld [vmem:[%s9591_s11 + $0x1d0] ss:$8 sps:$4 sm:$0xff]  }
 0x6cc   : >> { %3235 = vmatpush1.bf16.msra.mxu1 %v6711_v43  ;;  %3698 = vmatprep.mubr.bf16.mxu0 %v7265_v22 }
 0x6cd   : >> { %3236 = vmatprep.subr.bf16.mxu1 %v6716_v45  ;;  %3667 = vmatpush1.bf16.msra.mxu0 %v6717_v50 }
 0x6ce   : >> { %3668 = vmatprep.subr.bf16.mxu0 %v6722_v30  ;;  %v6747_v30 = vld [vmem:[%s9591_s11 + $0x1e0] ss:$8 sps:$4 sm:$0xff]  }
 0x6d0   : >> { %3237 = vmatpush1.bf16.msra.mxu1 %v6714_v63 }
 0x6d1   : >> { %6316 = vmatprep.subr.bf16.mxu1 %v9668_v16  ;;  %3669 = vmatpush1.bf16.msra.mxu0 %v6720_v3  ;;  %v6752_v3 = vld [vmem:[%s9591_s11 + $0x1f4] ss:$8 sps:$4 sm:$0xff]  }
 0x6d2   : >> { %3670 = vmatprep.subr.bf16.mxu0 %v6725_v40  ;;  %v6755_v40 = vld [vmem:[%s9591_s11 + $0x184] ss:$8 sps:$4 sm:$0xff]  }
 0x6d3   : >> { %5955 = vmatmul.mubr.msk.bf16.vlgmr.msra.gmra.mrb[40].mxu1 %vm619_vm0, %v3186_v9 }
 0x6d4   : >> { %6317 = vmatpush3.bf16.msra.mxu1 %v3434_v54  ;;  %6318 = vmatprep.mubr.msk.bf16.mxu1 %vm7263_vm1, %v9668_v16 }
 0x6d5   : >> { %3671 = vmatpush1.bf16.msra.mxu0 %v6723_v18  ;;  %3520 = vmatprep.subr.bf16.mxu1 %v6731_v23  ;;  %v6750_v18 = vld [vmem:[%s9591_s11 + $0x1f0] ss:$8 sps:$4 sm:$0xff]  }
 0x6d6   : >> { %3672 = vmatprep.subr.bf16.mxu0 %v6728_v58  ;;  %v6756_v58 = vld [vmem:[%s9591_s11 + $0x190] ss:$8 sps:$4 sm:$0xff]  }
 0x6d7   : >> { %v6762_v23 = vld [vmem:[%s9591_s11 + $0x1b0] ss:$8 sps:$4 sm:$0xff]  }
 0x6d9   : >> { %3673 = vmatpush1.bf16.msra.mxu0 %v6726_v32  ;;  %v6761_v32 = vld [vmem:[%s9591_s11 + $0x1a4] ss:$8 sps:$4 sm:$0xff]  }
 0x6da   : >> { %6334 = vmatprep.subr.bf16.mxu0 %v9668_v16 }
 0x6db   : >> { %6319 = vmatmul.mubr.msk.bf16.vlgmr.msra.gmra.mrb[44].mxu1 %vm1831_vm3, %v3428_v21  ;;  %v3724_v21 = vsel %vm2856_vm2, %v7861_v17, 0  ;;  %v6749_v17 = vld [vmem:[%s9591_s11 + $0x1e4] ss:$8 sps:$4 sm:$0xff]  }
 0x6dc   : >> { %3552 = vmatprep.mubr.bf16.mxu1 %v7265_v22  ;;  %3521 = vmatpush1.bf16.msra.mxu1 %v6729_v15  ;;  %v6764_v15 = vld [vmem:[%s9591_s11 + $0x1b4] ss:$8 sps:$4 sm:$0xff]  }
 0x6dd   : >> { %3522 = vmatprep.subr.bf16.mxu1 %v6734_v38 }
 0x6e0   : >> { %3523 = vmatpush1.bf16.msra.mxu1 %v6732_v10 }
 0x6e1   : >> { %3524 = vmatprep.subr.bf16.mxu1 %v6737_v14 }
 0x6e4   : >> { %3525 = vmatpush1.bf16.msra.mxu1 %v6735_v13 }
 0x6e5   : >> { %3526 = vmatprep.subr.bf16.mxu1 %v6740_v55 }
 0x6e8   : >> { %3527 = vmatpush1.bf16.msra.mxu1 %v6738_v51 }
 0x6e9   : >> { %6328 = vmatprep.subr.bf16.mxu1 %v9668_v16 }
 0x786   : >> { %v3038_v52 = vpop.f32.mrb[32].mxu1 }
 0x787   : >> { %v3040_v26 = vpop.f32.mrb[33].mxu1 }
 0x788   : >> { %v3042_v28 = vpop.f32.mrb[34].mxu1 }
 0x789   : >> { %v3043_v57 = vpop.f32.mrb[35].mxu1 }
 0x796   : >> { %v3122_v27 = vpop.f32.mrb[36].mxu1  ;;  %v3410_v25 = vpop.f32.mrb[40].mxu0 }
 0x797   : >> { %v3123_v11 = vadd.f32 %v3122_v27, %v3038_v52  ;;  %v3124_v59 = vpop.f32.mrb[37].mxu1  ;;  %v3412_v33 = vpop.f32.mrb[41].mxu0 }
 0x798   : >> { %v3125_v34 = vadd.f32 %v3124_v59, %v3040_v26  ;;  %v3126_v35 = vpop.f32.mrb[38].mxu1  ;;  %v3414_v60 = vpop.f32.mrb[42].mxu0 }
 0x799   : >> { %v3127_v36 = vpop.f32.mrb[39].mxu1  ;;  %v3415_v62 = vpop.f32.mrb[43].mxu0 }
 0x79e   : >> { %v3616_v7 = vpop.f32.mrb[44].mxu0 }
 0x79f   : >> { %v3622_v53 = vpack.c.bf16 %v3616_v7, %v3616_v7  ;;  %v6326_v24 = vpop.f32.mrb[45].mxu0 }
 0x7a0   : >> { %v3619_v20 = vpop.f32.mrb[46].mxu0 }
 0x7a1   : >> { %v6327_v46 = vpop.f32.mrb[47].mxu0  ;;  %5985 = vmatmul.mubr.msk.bf16.vlgmr.msra.gmra.mrb[48].mxu0 %vm619_vm0, %v3622_v53 }
 0x7a2   : >> { %6335 = vmatpush3.bf16.msra.mxu0 %v3870_v44  ;;  %6336 = vmatprep.mubr.msk.bf16.mxu0 %vm7263_vm1, %v9668_v16 }
 0x7a3   : >> { %3956 = vmatprep.subr.bf16.mxu0 %v6743_v61 }
 0x7a6   : >> { %v3264_v47 = vpop.f32.mrb[40].mxu1 }
 0x7a7   : >> { %v3271_v42 = vadd.f32 %v3264_v47, %v3123_v11  ;;  %v3266_v39 = vpop.f32.mrb[41].mxu1 }
 0x7a8   : >> { %v3272_v49 = vadd.f32 %v3266_v39, %v3125_v34  ;;  %v3268_v29 = vpop.f32.mrb[42].mxu1 }
 0x7a9   : >> { %v3269_v41 = vpop.f32.mrb[43].mxu1  ;;  %6337 = vmatmul.mubr.msk.bf16.vlgmr.msra.gmra.mrb[52].mxu0 %vm1831_vm3, %v3862_v19  ;;  %v3417_v43 = vadd.f32 %v3410_v25, %v3271_v42 }
 0x7aa   : >> { %3957 = vmatpush1.bf16.msra.mxu0 %v6741_v8  ;;  %3988 = vmatprep.mubr.bf16.mxu0 %v7265_v22  ;;  %v3418_v45 = vadd.f32 %v3412_v33, %v3272_v49  ;;  %v4002_v8 = vld [vmem:[%s4001_s25] sm:$0x3] }
 0x7ab   : >> { %3958 = vmatprep.subr.bf16.mxu0 %v6746_v48  ;;  %v4011_v29 = vrot.slane %v4002_v8, %v7604_v6 }
 0x7ae   : >> { %v3470_v63 = vpop.f32.mrb[44].mxu1  ;;  %3959 = vmatpush1.bf16.msra.mxu0 %v6744_v2 }
 0x7af   : >> { %v3476_v9 = vpack.c.bf16 %v3470_v63, %v3470_v63  ;;  %v6320_v12 = vpop.f32.mrb[45].mxu1  ;;  %3960 = vmatprep.subr.bf16.mxu0 %v6749_v17  ;;  %v6776_v17 = vld [vmem:[%s8844_s21 + $0x3c] ss:$24 sps:$4 sm:$0xff]  }
 0x7b0   : >> { %v3473_v54 = vpop.f32.mrb[46].mxu1 }
 0x7b1   : >> { %v6321_v50 = vpop.f32.mrb[47].mxu1  ;;  %5975 = vmatmul.mubr.msk.bf16.vlgmr.msra.gmra.mrb[48].mxu1 %vm619_vm0, %v3476_v9  ;;  %v6768_v54 = vld [vmem:[%s8844_s21 + $0x8] ss:$24 sps:$4 sm:$0xff]  }
 0x7b2   : >> { %6329 = vmatpush3.bf16.msra.mxu1 %v3724_v21  ;;  %6330 = vmatprep.mubr.msk.bf16.mxu1 %vm7263_vm1, %v9668_v16  ;;  %v6753_v16 = vld [vmem:[%s9591_s11 + $0x180] ss:$8 sps:$4 sm:$0xff]   ;;  %v6770_v21 = vld [vmem:[%s8844_s21 + $0xc] ss:$24 sps:$4 sm:$0xff]  }
 0x7b3   : >> { %3961 = vmatpush1.bf16.msra.mxu0 %v6747_v30  ;;  %3810 = vmatprep.subr.bf16.mxu1 %v6755_v40  ;;  %v6771_v50 = vld [vmem:[%s8844_s21 + $0x30] ss:$24 sps:$4 sm:$0xff]  }
 0x7b4   : >> { %3962 = vmatprep.subr.bf16.mxu0 %v6752_v3  ;;  %v6774_v30 = vld [vmem:[%s8844_s21 + $0x38] ss:$24 sps:$4 sm:$0xff]   ;;  %v6779_v3 = vld [vmem:[%s8844_s21 + $0x64] ss:$24 sps:$4 sm:$0xff]   ;;  %v6780_v40 = vld [vmem:[%s8844_s21 + $0x68] ss:$24 sps:$4 sm:$0xff]  }
 0x7b7   : >> { %3963 = vmatpush1.bf16.msra.mxu0 %v6750_v18  ;;  %v6777_v18 = vld [vmem:[%s8844_s21 + $0x60] ss:$24 sps:$4 sm:$0xff]  }
 0x7b8   : >> { %4579 = vmatprep.subr.bf16.mxu0 %v6770_v21  ;;  %v4019_v21 = vld [vmem:[%s4018_s6] sm:$0x3]  ;;  %s7160_s6 = scalar_lea.vmem (%p608_p7), %s7159_s7, 512 }
 0x7b9   : >> { %6331 = vmatmul.mubr.msk.bf16.vlgmr.msra.gmra.mrb[52].mxu1 %vm1831_vm3, %v3718_v31  ;;  %v6773_v31 = vld [vmem:[%s8844_s21 + $0x34] ss:$24 sps:$4 sm:$0xff]   ;;  %p7162_p2 = scmp.lt.s32.totalorder (%p608_p7), %s7160_s6, %s7154_s28 }
 0x7ba   : >> { %3842 = vmatprep.mubr.bf16.mxu1 %v7265_v22  ;;  %3811 = vmatpush1.bf16.msra.mxu1 %v6753_v16  ;;  %v6759_v22 = vld [vmem:[%s9591_s11 + $0x1a0] ss:$8 sps:$4 sm:$0xff]   ;;  %v6782_v16 = vld [vmem:[%s8844_s21 + $0x6c] ss:$24 sps:$4 sm:$0xff]  }
 0x7bb   : >> { %3812 = vmatprep.subr.bf16.mxu1 %v6758_v37  ;;  %v6785_v37 = vld [vmem:[%s8844_s21 + $0x94] ss:$24 sps:$4 sm:$0xff]   ;;  %p7163_p1 = por (%p608_p7), %p7162_p2, %p7161_p9 }
 0x7bd   : > { %p7164_p3 = pnand (%p608_p7), %p7163_p1, %p7157_p6 }
 0x7be   : >> { %3813 = vmatpush1.bf16.msra.mxu1 %v6756_v58  ;;  %v6788_v58 = vld [vmem:[%s8844_s21 + $0x9c] ss:$24 sps:$4 sm:$0xff]  }
 0x7bf   : >> { %3814 = vmatprep.subr.bf16.mxu1 %v6761_v32  ;;  %v6786_v32 = vld [vmem:[%s8844_s21 + $0x98] ss:$24 sps:$4 sm:$0xff]  }
 0x7c2   : >> { %3815 = vmatpush1.bf16.msra.mxu1 %v6759_v22  ;;  %v6783_v22 = vld [vmem:[%s8844_s21 + $0x90] ss:$24 sps:$4 sm:$0xff]  }
 0x7c3   : >> { %3816 = vmatprep.subr.bf16.mxu1 %v6764_v15  ;;  %v6791_v15 = vld [vmem:[%s8844_s21 + $0xc4] ss:$24 sps:$4 sm:$0xff]  }
 0x7c6   : >> { %3817 = vmatpush1.bf16.msra.mxu1 %v6762_v23  ;;  %v6794_v23 = vld [vmem:[%s8844_s21 + $0xcc] ss:$24 sps:$4 sm:$0xff]  }
 0x874   : >> { %v3700_v10 = vpop.f32.mrb[48].mxu0 }
 0x875   : >> { %v3702_v38 = vpop.f32.mrb[49].mxu0 }
 0x876   : >> { %v3704_v13 = vpop.f32.mrb[50].mxu0 }
 0x877   : >> { %v3705_v14 = vpop.f32.mrb[51].mxu0  ;;  %v6797_v13 = vld [vmem:[%s8844_s21 + $0xf4] ss:$24 sps:$4 sm:$0xff]  }
 0x878   : >> { %v6800_v14 = vld [vmem:[%s8844_s21 + $0xfc] ss:$24 sps:$4 sm:$0xff]  }
 0x87c   : >> { %v3906_v55 = vpop.f32.mrb[52].mxu0 }
 0x87d   : >> { %v3912_v51 = vpack.c.bf16 %v3906_v55, %v3906_v55  ;;  %v6338_v52 = vpop.f32.mrb[53].mxu0  ;;  %v6795_v55 = vld [vmem:[%s8844_s21 + $0xf0] ss:$24 sps:$4 sm:$0xff]  }
 0x87e   : >> { %v3909_v26 = vpop.f32.mrb[54].mxu0  ;;  %v6803_v52 = vld [vmem:[%s8844_s21 + $0x124] ss:$24 sps:$4 sm:$0xff]  }
 0x87f   : >> { %v6339_v28 = vpop.f32.mrb[55].mxu0  ;;  %6005 = vmatmul.mubr.msk.bf16.vlgmr.msra.gmra.mrb[56].mxu0 %vm619_vm0, %v3912_v51  ;;  %v6798_v51 = vld [vmem:[%s8844_s21 + $0xf8] ss:$24 sps:$4 sm:$0xff]  }
 0x880   : >> { %4580 = vmatpush1.bf16.msra.mxu0 %v6768_v54  ;;  %v6801_v26 = vld [vmem:[%s8844_s21 + $0x120] ss:$24 sps:$4 sm:$0xff]  }
 0x881   : >> { %4581 = vmatprep.subr.bf16.mxu0 %v6776_v17  ;;  %v4017_v54 = vld [vmem:[%s4016_s0] sm:$0x3] }
 0x884   : >> { %v3554_v57 = vpop.f32.mrb[48].mxu1  ;;  %4582 = vmatpush1.bf16.msra.mxu0 %v6774_v30 }
 0x885   : >> { %v3561_v27 = vadd.f32 %v3554_v57, %v3417_v43  ;;  %v3556_v25 = vpop.f32.mrb[49].mxu1  ;;  %v4007_v43 = vrot.slane %v4002_v8, %v7601_v5  ;;  %4583 = vmatprep.subr.bf16.mxu0 %v6782_v16  ;;  %v6822_v8 = vld [vmem:[%s8844_s21 + $0x1b8] ss:$24 sps:$4 sm:$0xff]   ;;  %v4055_v16 = vrot.slane %v4019_v21, %v7601_v5 }
 0x886   : >> { %v3562_v11 = vadd.f32 %v3556_v25, %v3418_v45  ;;  %v3558_v59 = vpop.f32.mrb[50].mxu1 }
 0x887   : >> { %v3559_v33 = vpop.f32.mrb[51].mxu1  ;;  %v3707_v34 = vadd.f32 %v3700_v10, %v3561_v27  ;;  %v6789_v10 = vld [vmem:[%s8844_s21 + $0xc0] ss:$24 sps:$4 sm:$0xff]  }
 0x888   : >> { %v3708_v35 = vadd.f32 %v3702_v38, %v3562_v11  ;;  %4584 = vmatpush1.bf16.msra.mxu0 %v6780_v40  ;;  %v6792_v38 = vld [vmem:[%s8844_s21 + $0xc8] ss:$24 sps:$4 sm:$0xff]  }
 0x889   : >> { %4585 = vmatprep.subr.bf16.mxu0 %v6788_v58 }
 0x88c   : >> { %v3760_v60 = vpop.f32.mrb[52].mxu1  ;;  %4586 = vmatpush1.bf16.msra.mxu0 %v6786_v32 }
 0x88d   : >> { %v3766_v36 = vpack.c.bf16 %v3760_v60, %v3760_v60  ;;  %v6332_v62 = vpop.f32.mrb[53].mxu1  ;;  %4587 = vmatprep.subr.bf16.mxu0 %v6794_v23  ;;  %v6804_v60 = vld [vmem:[%s8844_s21 + $0x128] ss:$24 sps:$4 sm:$0xff]  }
 0x88e   : >> { %v3763_v56 = vpop.f32.mrb[54].mxu1  ;;  %v6807_v62 = vld [vmem:[%s8844_s21 + $0x150] ss:$24 sps:$4 sm:$0xff]  }
 0x88f   : >> { %v6333_v7 = vpop.f32.mrb[55].mxu1  ;;  %5995 = vmatmul.mubr.msk.bf16.vlgmr.msra.gmra.mrb[56].mxu1 %vm619_vm0, %v3766_v36  ;;  %v6809_v36 = vld [vmem:[%s8844_s21 + $0x154] ss:$24 sps:$4 sm:$0xff]  }
 0x890   : >> { %4588 = vmatpush1.bf16.msra.mxu0 %v6792_v38  ;;  %v6812_v56 = vld [vmem:[%s8844_s21 + $0x15c] ss:$24 sps:$4 sm:$0xff]   ;;  %v6810_v7 = vld [vmem:[%s8844_s21 + $0x158] ss:$24 sps:$4 sm:$0xff]   ;;  %v6873_v38 = vld [vmem:[%s8910_s22] ss:$8 sps:$4 sm:$0xff]  }
 0x891   : >> { %4589 = vmatprep.subr.bf16.mxu0 %v6800_v14  ;;  %v6840_v14 = vld [vmem:[%s8844_s21 + $0x40] ss:$24 sps:$4 sm:$0xff]  }
 0x894   : >> { %4590 = vmatpush1.bf16.msra.mxu0 %v6798_v51  ;;  %v6879_v51 = vld [vmem:[%s8910_s22 + $0x10] ss:$8 sps:$4 sm:$0xff]  }
 0x952   : >> { %v3990_v53 = vpop.f32.mrb[56].mxu0 }
 0x953   : >> { %v3992_v24 = vpop.f32.mrb[57].mxu0 }
 0x954   : >> { %v3994_v61 = vpop.f32.mrb[58].mxu0 }
 0x955   : >> { %v3995_v20 = vpop.f32.mrb[59].mxu0  ;;  %v6818_v61 = vld [vmem:[%s8844_s21 + $0x18c] ss:$24 sps:$4 sm:$0xff]  }
 0x956   : >> { %v6816_v20 = vld [vmem:[%s8844_s21 + $0x188] ss:$24 sps:$4 sm:$0xff]  }
 0x962   : >> { %v3844_v44 = vpop.f32.mrb[56].mxu1 }
 0x963   : >> { %v3851_v46 = vadd.f32 %v3844_v44, %v3707_v34  ;;  %v3846_v47 = vpop.f32.mrb[57].mxu1  ;;  %v6821_v44 = vld [vmem:[%s8844_s21 + $0x1b4] ss:$24 sps:$4 sm:$0xff]  }
 0x964   : >> { %v3852_v42 = vadd.f32 %v3846_v47, %v3708_v35  ;;  %v3848_v39 = vpop.f32.mrb[58].mxu1  ;;  %v6806_v35 = vld [vmem:[%s8844_s21 + $0x12c] ss:$24 sps:$4 sm:$0xff]   ;;  %v6824_v47 = vld [vmem:[%s8844_s21 + $0x1bc] ss:$24 sps:$4 sm:$0xff]  }
 0x965   : >> { %v3997_v19 = vadd.f32 %v3990_v53, %v3851_v46  ;;  %v3849_v48 = vpop.f32.mrb[59].mxu1  ;;  %4591 = vmatprep.subr.bf16.mxu0 %v6806_v35  ;;  %v6815_v53 = vld [vmem:[%s8844_s21 + $0x184] ss:$24 sps:$4 sm:$0xff]   ;;  %v6819_v46 = vld [vmem:[%s8844_s21 + $0x1b0] ss:$24 sps:$4 sm:$0xff]  }
 0x966   : >> { %v3998_v49 = vadd.f32 %v3992_v24, %v3852_v42  ;;  %4592 = vmatpush1.bf16.msra.mxu0 %v6804_v60  ;;  %v6813_v24 = vld [vmem:[%s8844_s21 + $0x180] ss:$24 sps:$4 sm:$0xff]   ;;  %v6827_v39 = vld [vmem:[%s8844_s21 + $0x1e4] ss:$24 sps:$4 sm:$0xff]   ;;  %v6855_v35 = vld [vmem:[%s8844_s21 + $0x130] ss:$24 sps:$4 sm:$0xff]  }
 0x967   : >> { %v3999_v41 = vadd.f32 %v7248_v0, %v3997_v19  ;;  %v6765_v0 = vld [vmem:[%s8844_s21] ss:$24 sps:$4 sm:$0xff]   ;;  %4593 = vmatprep.subr.bf16.mxu0 %v6812_v56  ;;  %v6830_v48 = vld [vmem:[%s8844_s21 + $0x1ec] ss:$24 sps:$4 sm:$0xff]   ;;  %v6861_v56 = vld [vmem:[%s8844_s21 + $0x190] ss:$24 sps:$4 sm:$0xff]  }
 0x968   : >> { %v4000_v2 = vadd.f32 %v7244_v1, %v3998_v49  ;;  %v6767_v1 = vld [vmem:[%s8844_s21 + $0x4] ss:$24 sps:$4 sm:$0xff]   ;;  %v6825_v42 = vld [vmem:[%s8844_s21 + $0x1e0] ss:$24 sps:$4 sm:$0xff]   ;;  %v6833_v49 = vld [vmem:[%s8844_s21 + $0x214] ss:$24 sps:$4 sm:$0xff]  }
 0x969   : >> { %v8838_v63 = vadd.f32 %v4007_v43, %v3999_v41  ;;  %4538 = vmatprep.subr.bf16.mxu1 %v6767_v1  ;;  %v6828_v19 = vld [vmem:[%s8844_s21 + $0x1e8] ss:$24 sps:$4 sm:$0xff]   ;;  %v6834_v43 = vld [vmem:[%s8844_s21 + $0x218] ss:$24 sps:$4 sm:$0xff]   ;;  %v6860_v60 = vld [vmem:[%s8844_s21 + $0x164] ss:$24 sps:$4 sm:$0xff]  }
 0x96a   : >> { %v8836_v45 = vadd.f32 %v4011_v29, %v4000_v2  ;;  %4539 = vmatpush1.bf16.msra.mxu1 %v6765_v0  ;;  %4594 = vmatpush1.bf16.msra.mxu0 %v6810_v7  ;;  %v6836_v29 = vld [vmem:[%s8844_s21 + $0x21c] ss:$24 sps:$4 sm:$0xff]   ;;  %v6831_v41 = vld [vmem:[%s8844_s21 + $0x210] ss:$24 sps:$4 sm:$0xff]  }
 0x96b   : >> { %4540 = vmatprep.subr.bf16.mxu1 %v6773_v31  ;;  %4595 = vmatprep.subr.bf16.mxu0 %v6818_v61  ;;  %v6839_v2 = vld [vmem:[%s8844_s21 + $0x14] ss:$24 sps:$4 sm:$0xff]   ;;  %v4042_v31 = vrot.slane %v4017_v54, %v7601_v5  ;;  %v6866_v7 = vld [vmem:[%s8844_s21 + $0x1c4] ss:$24 sps:$4 sm:$0xff]   ;;  %v6867_v61 = vld [vmem:[%s8844_s21 + $0x1f0] ss:$24 sps:$4 sm:$0xff]  }
 0x96c   : >> { %v4020_v9 = vsel %vm619_vm0, %v8836_v45, 0.0 }
 0x96d   : >> { %v4021_v12 = vadd.f32 %v4020_v9, %v8838_v63  ;;  %v6875_v9 = vld [vmem:[%s8910_s22 + $0x4] ss:$8 sps:$4 sm:$0xff]  }
 0x96e   : >> { %4541 = vmatpush1.bf16.msra.mxu1 %v6771_v50  ;;  %4596 = vmatpush1.bf16.msra.mxu0 %v6816_v20  ;;  %v4046_v50 = vrot.slane %v4017_v54, %v7604_v6  ;;  %v6872_v20 = vld [vmem:[%s8844_s21 + $0x224] ss:$24 sps:$4 sm:$0xff]  }
 0x96f   : >> { %4022 = vadd.xlane.f32.xlu1 %v4021_v12  ;;  %4542 = vmatprep.subr.bf16.mxu1 %v6779_v3  ;;  %v6908_v54 = vld [vmem:[%s8910_s22 + $0x154] ss:$8 sps:$4 sm:$0xff]  }
 0x970   : >> { %4597 = vmatprep.subr.bf16.mxu0 %v6824_v47  ;;  %v6876_v47 = vld [vmem:[%s8910_s22 + $0x100] ss:$8 sps:$4 sm:$0xff]  }
 0x972   : >> { %4543 = vmatpush1.bf16.msra.mxu1 %v6777_v18  ;;  %4598 = vmatpush1.bf16.msra.mxu0 %v6822_v8  ;;  %v4059_v18 = vrot.slane %v4019_v21, %v7604_v6  ;;  %v6884_v8 = vld [vmem:[%s8910_s22 + $0x114] ss:$8 sps:$4 sm:$0xff]   ;;  %v6906_v21 = vld [vmem:[%s8910_s22 + $0x150] ss:$8 sps:$4 sm:$0xff]  }
 0x973   : >> { %4544 = vmatprep.subr.bf16.mxu1 %v6785_v37  ;;  %4599 = vmatprep.subr.bf16.mxu0 %v6830_v48  ;;  %v6893_v48 = vld [vmem:[%s8910_s22 + $0x34] ss:$8 sps:$4 sm:$0xff]  }
 0x976   : >> { %4545 = vmatpush1.bf16.msra.mxu1 %v6783_v22  ;;  %4600 = vmatpush1.bf16.msra.mxu0 %v6828_v19  ;;  %v6888_v19 = vld [vmem:[%s8910_s22 + $0x120] ss:$8 sps:$4 sm:$0xff]  }
 0x977   : >> { %4546 = vmatprep.subr.bf16.mxu1 %v6791_v15  ;;  %4601 = vmatprep.subr.bf16.mxu0 %v6836_v29  ;;  %v6837_v15 = vld [vmem:[%s8844_s21 + $0x10] ss:$24 sps:$4 sm:$0xff]   ;;  %v6896_v29 = vld [vmem:[%s8910_s22 + $0x134] ss:$8 sps:$4 sm:$0xff]  }
 0x97a   : >> { %4547 = vmatpush1.bf16.msra.mxu1 %v6789_v10  ;;  %4602 = vmatpush1.bf16.msra.mxu0 %v6834_v43  ;;  %v6842_v10 = vld [vmem:[%s8844_s21 + $0x44] ss:$24 sps:$4 sm:$0xff]  }
 0x97b   : >> { %4548 = vmatprep.subr.bf16.mxu1 %v6797_v13  ;;  %5415 = vmatprep.subr.bf16.mxu0 %v6875_v9  ;;  %v6881_v13 = vld [vmem:[%s8910_s22 + $0x14] ss:$8 sps:$4 sm:$0xff]   ;;  %v6899_v43 = vld [vmem:[%s8910_s22 + $0x44] ss:$8 sps:$4 sm:$0xff]  }
 0x97c   : >> { %v6902_v9 = vld [vmem:[%s8910_s22 + $0x144] ss:$8 sps:$4 sm:$0xff]  }
 0x97e   : >> { %4549 = vmatpush1.bf16.msra.mxu1 %v6795_v55  ;;  %v6845_v55 = vld [vmem:[%s8844_s21 + $0x74] ss:$24 sps:$4 sm:$0xff]  }
 0x97f   : >> { %4550 = vmatprep.subr.bf16.mxu1 %v6803_v52  ;;  %v6887_v52 = vld [vmem:[%s8910_s22 + $0x24] ss:$8 sps:$4 sm:$0xff]  }
 0x982   : >> { %4551 = vmatpush1.bf16.msra.mxu1 %v6801_v26  ;;  %v6843_v26 = vld [vmem:[%s8844_s21 + $0x70] ss:$24 sps:$4 sm:$0xff]  }
 0x983   : >> { %4552 = vmatprep.subr.bf16.mxu1 %v6809_v36  ;;  %v6858_v36 = vld [vmem:[%s8844_s21 + $0x160] ss:$24 sps:$4 sm:$0xff]  }
 0x986   : >> { %4553 = vmatpush1.bf16.msra.mxu1 %v6807_v62  ;;  %v6863_v62 = vld [vmem:[%s8844_s21 + $0x194] ss:$24 sps:$4 sm:$0xff]  }
 0x987   : >> { %4554 = vmatprep.subr.bf16.mxu1 %v6815_v53  ;;  %v6864_v53 = vld [vmem:[%s8844_s21 + $0x1c0] ss:$24 sps:$4 sm:$0xff]  }
 0x98a   : >> { %4555 = vmatpush1.bf16.msra.mxu1 %v6813_v24  ;;  %v6869_v24 = vld [vmem:[%s8844_s21 + $0x1f4] ss:$24 sps:$4 sm:$0xff]  }
 0x98b   : >> { %4556 = vmatprep.subr.bf16.mxu1 %v6821_v44  ;;  %v6870_v44 = vld [vmem:[%s8844_s21 + $0x220] ss:$24 sps:$4 sm:$0xff]  }
 0x98e   : >> { %4557 = vmatpush1.bf16.msra.mxu1 %v6819_v46  ;;  %v6878_v46 = vld [vmem:[%s8910_s22 + $0x104] ss:$8 sps:$4 sm:$0xff]  }
 0x98f   : >> { %4558 = vmatprep.subr.bf16.mxu1 %v6827_v39  ;;  %v6890_v39 = vld [vmem:[%s8910_s22 + $0x124] ss:$8 sps:$4 sm:$0xff]  }
 0x992   : >> { %4559 = vmatpush1.bf16.msra.mxu1 %v6825_v42  ;;  %v6882_v42 = vld [vmem:[%s8910_s22 + $0x110] ss:$8 sps:$4 sm:$0xff]  }
 0x993   : >> { %4560 = vmatprep.subr.bf16.mxu1 %v6833_v49  ;;  %v6891_v49 = vld [vmem:[%s8910_s22 + $0x30] ss:$8 sps:$4 sm:$0xff]  }
 0x996   : >> { %4561 = vmatpush1.bf16.msra.mxu1 %v6831_v41  ;;  %v6894_v41 = vld [vmem:[%s8910_s22 + $0x130] ss:$8 sps:$4 sm:$0xff]  }
 0x997   : >> { %4620 = vmatprep.subr.bf16.mxu1 %v6839_v2  ;;  %v6897_v2 = vld [vmem:[%s8910_s22 + $0x40] ss:$8 sps:$4 sm:$0xff]  }
 0x9fc   : >> { %v4023_v28 = vpop.xlane.xlu1 %4022 }
 0x9fd   : >> { %v4024_v57 = vmul.f32 0.0052083335, %v4023_v28  ;;  %v6848_v28 = vld [vmem:[%s8844_s21 + $0xa4] ss:$24 sps:$4 sm:$0xff]  }
 0x9ff   : >> { %v8873_v27 = vsub.f32 %v8838_v63, %v4024_v57  ;;  %v8876_v25 = vsub.f32 %v8836_v45, %v4024_v57  ;;  %v6885_v57 = vld [vmem:[%s8910_s22 + $0x20] ss:$8 sps:$4 sm:$0xff]  }
 0xa01   : >> { %v4028_v11 = vmul.f32 %v8876_v25, %v8876_v25  ;;  %v4027_v59 = vmul.f32 %v8873_v27, %v8873_v27 }
 0xa03   : >> { %v4029_v33 = vsel %vm619_vm0, %v4028_v11, 0.0  ;;  %v6849_v11 = vld [vmem:[%s8844_s21 + $0xd0] ss:$24 sps:$4 sm:$0xff]  }
 0xa04   : >> { %v4030_v34 = vadd.f32 %v4029_v33, %v4027_v59  ;;  %v6854_v59 = vld [vmem:[%s8844_s21 + $0x104] ss:$24 sps:$4 sm:$0xff]   ;;  %v6852_v33 = vld [vmem:[%s8844_s21 + $0x100] ss:$24 sps:$4 sm:$0xff]  }
 0xa06   : >> { %4031 = vadd.xlane.f32.xlu0 %v4030_v34  ;;  %v6857_v34 = vld [vmem:[%s8844_s21 + $0x134] ss:$24 sps:$4 sm:$0xff]  }
 0xa93   : >> { %v4032_v12 = vpop.xlane.xlu0 %4031 }
 0xa94   : >> { %v4033_v0 = vmul.f32 0.0052083335, %v4032_v12  ;;  %v6900_v12 = vld [vmem:[%s8910_s22 + $0x140] ss:$8 sps:$4 sm:$0xff]  }
 0xa96   : >> { %v4034_v1 = vadd.f32 1e-05, %v4033_v0  ;;  %v6905_v0 = vld [vmem:[%s8910_s22 + $0x54] ss:$8 sps:$4 sm:$0xff]  }
 0xa98   : >> { %7053 = vrsqrt.f32 %v4034_v1  ;;  %v6903_v1 = vld [vmem:[%s8910_s22 + $0x50] ss:$8 sps:$4 sm:$0xff]  }
 0xaa2   : >> { %v7054_v30 = vpop.eup %7053 }
 0xaa3   : >> { %v4036_v17 = vmul.f32 %v7054_v30, %v8873_v27  ;;  %v4037_v3 = vmul.f32 %v7054_v30, %v8876_v25  ;;  %v6846_v27 = vld [vmem:[%s8844_s21 + $0xa0] ss:$24 sps:$4 sm:$0xff]   ;;  %v6851_v25 = vld [vmem:[%s8844_s21 + $0xd4] ss:$24 sps:$4 sm:$0xff]   ;;  %s9682_s21 = sld [smem:[#allocation17_spill]] (%p608_p7) }
 0xaa4   : >> { %v6914_v30 = vld [vmem:[%s8910_s22 + $0x164] ss:$8 sps:$4 sm:$0xff]  }
 0xaa5   : >> { %v4050_v40 = vmul.f32 %v4046_v50, %v4037_v3  ;;  %v4049_v37 = vmul.f32 %v4042_v31, %v4036_v17  ;;  %v6911_v50 = vld [vmem:[%s8910_s22 + $0x64] ss:$8 sps:$4 sm:$0xff]   ;;  %v6909_v31 = vld [vmem:[%s8910_s22 + $0x60] ss:$8 sps:$4 sm:$0xff]   ;;  %v6917_v3 = vld [vmem:[%s8910_s22 + $0x74] ss:$8 sps:$4 sm:$0xff]  }
 0xaa6   : >> { %v6912_v17 = vld [vmem:[%s8910_s22 + $0x160] ss:$8 sps:$4 sm:$0xff]  }
 0xaa7   : >> { %v4063_v58 = vadd.f32 %v4059_v18, %v4050_v40  ;;  %v4062_v22 = vadd.f32 %v4055_v16, %v4049_v37  ;;  %v6915_v18 = vld [vmem:[%s8910_s22 + $0x70] ss:$8 sps:$4 sm:$0xff]   ;;  %v6920_v16 = vld [vmem:[%s8910_s22 + $0x174] ss:$8 sps:$4 sm:$0xff]   ;;  %v6923_v37 = vld [vmem:[%s8910_s22 + $0x84] ss:$8 sps:$4 sm:$0xff]  }
 0xaa8   : >> { %v6918_v40 = vld [vmem:[%s8910_s22 + $0x170] ss:$8 sps:$4 sm:$0xff]  }
 0xaa9   : >> { %v4065_v32 = vpack.c.bf16 %v4063_v58, %v4063_v58  ;;  %v8928_v23 = vpack.c.bf16 %v4062_v22, %v4062_v22  ;;  %v6921_v58 = vld [vmem:[%s8910_s22 + $0x80] ss:$8 sps:$4 sm:$0xff]   ;;  %v6926_v22 = vld [vmem:[%s8910_s22 + $0x184] ss:$8 sps:$4 sm:$0xff]   ;;  %s9685_s16 = sand.u32 (%p608_p7), 1, %s9682_s21  }
 0xaaa   : > { %s5591_s0 = scalar_lea.sflag (%p608_p7), [#allocation5], %s9685_s16 }
 0xaab   : >> { %6079 = vmatprep.mubr.msk.bf16.mxu1 %vm619_vm0, %v4065_v32  ;;  %6080 = vmatprep.mubr.msk.bf16.mxu0 %vm619_vm0, %v4065_v32 }
 0xaac   : >> { %4571 = vmatmul.mubr.bf16.vlgmr.msra.gmra.mrb[60].mxu1 %v8928_v23  ;;  %4612 = vmatmul.mubr.bf16.vlgmr.msra.gmra.mrb[60].mxu0 %v8928_v23 }
 0xaad   : >> { %4621 = vmatpush1.bf16.msra.mxu1 %v6837_v15  ;;  %6081 = vmatprep.mubr.msk.bf16.mxu1 %vm619_vm0, %v4065_v32  ;;  %v6924_v32 = vld [vmem:[%s8910_s22 + $0x180] ss:$8 sps:$4 sm:$0xff]   ;;  %v6929_v15 = vld [vmem:[%s8910_s22 + $0x94] ss:$8 sps:$4 sm:$0xff]  }
 0xaae   : >> { %4622 = vmatprep.subr.bf16.mxu1 %v6842_v10  ;;  %5416 = vmatpush1.bf16.msra.mxu0 %v6873_v38  ;;  %v6932_v10 = vld [vmem:[%s8910_s22 + $0x194] ss:$8 sps:$4 sm:$0xff]   ;;  %v6930_v38 = vld [vmem:[%s8910_s22 + $0x190] ss:$8 sps:$4 sm:$0xff]  }
 0xaaf   : >> { %5417 = vmatprep.subr.bf16.mxu0 %v6881_v13  ;;  %v6935_v13 = vld [vmem:[%s8910_s22 + $0xa4] ss:$8 sps:$4 sm:$0xff]  }
 0xab1   : >> { %4623 = vmatpush1.bf16.msra.mxu1 %v6840_v14  ;;  %v6933_v14 = vld [vmem:[%s8910_s22 + $0xa0] ss:$8 sps:$4 sm:$0xff]  }
 0xab2   : >> { %4624 = vmatprep.subr.bf16.mxu1 %v6845_v55  ;;  %5418 = vmatpush1.bf16.msra.mxu0 %v6879_v51  ;;  %v6938_v55 = vld [vmem:[%s8910_s22 + $0x1a4] ss:$8 sps:$4 sm:$0xff]   ;;  %v6936_v51 = vld [vmem:[%s8910_s22 + $0x1a0] ss:$8 sps:$4 sm:$0xff]  }
 0xab3   : >> { %5419 = vmatprep.subr.bf16.mxu0 %v6887_v52  ;;  %v6941_v52 = vld [vmem:[%s8910_s22 + $0xb4] ss:$8 sps:$4 sm:$0xff]  }
 0xab5   : >> { %4625 = vmatpush1.bf16.msra.mxu1 %v6843_v26  ;;  %v6939_v26 = vld [vmem:[%s8910_s22 + $0xb0] ss:$8 sps:$4 sm:$0xff]  }
 0xab6   : >> { %4626 = vmatprep.subr.bf16.mxu1 %v6848_v28  ;;  %5420 = vmatpush1.bf16.msra.mxu0 %v6885_v57  ;;  %v6944_v28 = vld [vmem:[%s8910_s22 + $0x1b4] ss:$8 sps:$4 sm:$0xff]   ;;  %v6942_v57 = vld [vmem:[%s8910_s22 + $0x1b0] ss:$8 sps:$4 sm:$0xff]  }
 0xab7   : >> { %5421 = vmatprep.subr.bf16.mxu0 %v6893_v48 }
 0xab9   : >> { %4627 = vmatpush1.bf16.msra.mxu1 %v6846_v27  ;;  %v6947_v27 = vld [vmem:[%s8910_s22 + $0xc4] ss:$8 sps:$4 sm:$0xff]  }
 0xaba   : >> { %4628 = vmatprep.subr.bf16.mxu1 %v6851_v25  ;;  %5422 = vmatpush1.bf16.msra.mxu0 %v6891_v49  ;;  %v6945_v25 = vld [vmem:[%s8910_s22 + $0xc0] ss:$8 sps:$4 sm:$0xff]  }
 0xabb   : >> { %5423 = vmatprep.subr.bf16.mxu0 %v6899_v43 }
 0xabd   : >> { %4629 = vmatpush1.bf16.msra.mxu1 %v6849_v11  ;;  %v6950_v11 = vld [vmem:[%s8910_s22 + $0x1c4] ss:$8 sps:$4 sm:$0xff]  }
 0xabe   : >> { %4630 = vmatprep.subr.bf16.mxu1 %v6854_v59  ;;  %5424 = vmatpush1.bf16.msra.mxu0 %v6897_v2  ;;  %v6948_v59 = vld [vmem:[%s8910_s22 + $0x1c0] ss:$8 sps:$4 sm:$0xff]  }
 0xabf   : >> { %5425 = vmatprep.subr.bf16.mxu0 %v6905_v0 }
 0xac1   : >> { %4631 = vmatpush1.bf16.msra.mxu1 %v6852_v33  ;;  %v6953_v33 = vld [vmem:[%s8910_s22 + $0xd4] ss:$8 sps:$4 sm:$0xff]  }
 0xac2   : >> { %4632 = vmatprep.subr.bf16.mxu1 %v6857_v34  ;;  %5426 = vmatpush1.bf16.msra.mxu0 %v6903_v1  ;;  %v6951_v34 = vld [vmem:[%s8910_s22 + $0xd0] ss:$8 sps:$4 sm:$0xff]  }
 0xac3   : >> { %5427 = vmatprep.subr.bf16.mxu0 %v6911_v50 }
 0xac5   : >> { %4633 = vmatpush1.bf16.msra.mxu1 %v6855_v35  ;;  %v6956_v35 = vld [vmem:[%s8910_s22 + $0x1d4] ss:$8 sps:$4 sm:$0xff]  }
 0xac6   : >> { %4634 = vmatprep.subr.bf16.mxu1 %v6860_v60  ;;  %5428 = vmatpush1.bf16.msra.mxu0 %v6909_v31  ;;  %v6954_v60 = vld [vmem:[%s8910_s22 + $0x1d0] ss:$8 sps:$4 sm:$0xff]  }
 0xac7   : >> { %5429 = vmatprep.subr.bf16.mxu0 %v6917_v3 }
 0xac9   : >> { %4635 = vmatpush1.bf16.msra.mxu1 %v6858_v36  ;;  %v6959_v36 = vld [vmem:[%s8910_s22 + $0xe4] ss:$8 sps:$4 sm:$0xff]  }
 0xaca   : >> { %4636 = vmatprep.subr.bf16.mxu1 %v6863_v62  ;;  %5430 = vmatpush1.bf16.msra.mxu0 %v6915_v18  ;;  %v6957_v62 = vld [vmem:[%s8910_s22 + $0xe0] ss:$8 sps:$4 sm:$0xff]  }
 0xacb   : >> { %5431 = vmatprep.subr.bf16.mxu0 %v6923_v37 }
 0xacd   : >> { %4637 = vmatpush1.bf16.msra.mxu1 %v6861_v56  ;;  %v6962_v56 = vld [vmem:[%s8910_s22 + $0x1e4] ss:$8 sps:$4 sm:$0xff]  }
 0xace   : >> { %4638 = vmatprep.subr.bf16.mxu1 %v6866_v7  ;;  %5432 = vmatpush1.bf16.msra.mxu0 %v6921_v58  ;;  %v6960_v7 = vld [vmem:[%s8910_s22 + $0x1e0] ss:$8 sps:$4 sm:$0xff]  }
 0xacf   : >> { %5433 = vmatprep.subr.bf16.mxu0 %v6929_v15 }
 0xad1   : >> { %4639 = vmatpush1.bf16.msra.mxu1 %v6864_v53  ;;  %v6965_v53 = vld [vmem:[%s8910_s22 + $0xf4] ss:$8 sps:$4 sm:$0xff]  }
 0xad2   : >> { %4640 = vmatprep.subr.bf16.mxu1 %v6869_v24  ;;  %v6963_v24 = vld [vmem:[%s8910_s22 + $0xf0] ss:$8 sps:$4 sm:$0xff]  }
 0xad5   : >> { %4641 = vmatpush1.bf16.msra.mxu1 %v6867_v61  ;;  %v6968_v61 = vld [vmem:[%s8910_s22 + $0x1f4] ss:$8 sps:$4 sm:$0xff]  }
 0xad6   : >> { %4642 = vmatprep.subr.bf16.mxu1 %v6872_v20  ;;  %v6966_v20 = vld [vmem:[%s8910_s22 + $0x1f0] ss:$8 sps:$4 sm:$0xff]  }
 0xad9   : >> { %4643 = vmatpush1.bf16.msra.mxu1 %v6870_v44  ;;  %v6971_v44 = vld [vmem:[%s8910_s22 + $0x204] ss:$8 sps:$4 sm:$0xff]  }
 0xada   : >> { %5456 = vmatprep.subr.bf16.mxu1 %v6878_v46  ;;  %v4155_v46 = vsub.s32 2, %v7590_v4 }
 0xadc   : >> { %4653 = vmatmul.mubr.bf16.vlgmr.msra.gmra.mrb[64].mxu1 %v8928_v23  ;;  %v6927_v23 = vld [vmem:[%s8910_s22 + $0x90] ss:$8 sps:$4 sm:$0xff]  }
 0xadd   : >> { %5457 = vmatpush1.bf16.msra.mxu1 %v6876_v47  ;;  %5434 = vmatpush1.bf16.msra.mxu0 %v6927_v23  ;;  %v9027_v47 = vld [vmem:[%s4142_s15] sm:$0x3f] }
 0xade   : >> { %5458 = vmatprep.subr.bf16.mxu1 %v6884_v8  ;;  %5435 = vmatprep.subr.bf16.mxu0 %v6935_v13  ;;  %v4159_v8 = vsub.s32 3, %v7590_v4 }
 0xae0   : >> { %v4160_v48 = vrot.slane %v9027_v47, %v4159_v8 }
 0xae1   : >> { %5459 = vmatpush1.bf16.msra.mxu1 %v6882_v42  ;;  %5436 = vmatpush1.bf16.msra.mxu0 %v6933_v14  ;;  %v4148_v42 = vrot.slane %v9027_v47, %v7601_v5 }
 0xae2   : >> { %5460 = vmatprep.subr.bf16.mxu1 %v6890_v39  ;;  %5437 = vmatprep.subr.bf16.mxu0 %v6941_v52  ;;  %v4156_v39 = vrot.slane %v9027_v47, %v4155_v46 }
 0xae5   : >> { %5461 = vmatpush1.bf16.msra.mxu1 %v6888_v19  ;;  %5438 = vmatpush1.bf16.msra.mxu0 %v6939_v26  ;;  %v4152_v19 = vrot.slane %v9027_v47, %v7604_v6 }
 0xae6   : >> { %5462 = vmatprep.subr.bf16.mxu1 %v6896_v29  ;;  %5439 = vmatprep.subr.bf16.mxu0 %v6947_v27 }
 0xae9   : >> { %5463 = vmatpush1.bf16.msra.mxu1 %v6894_v41  ;;  %5440 = vmatpush1.bf16.msra.mxu0 %v6945_v25 }
 0xaea   : >> { %5464 = vmatprep.subr.bf16.mxu1 %v6902_v9  ;;  %5441 = vmatprep.subr.bf16.mxu0 %v6953_v33 }
 0xaed   : >> { %5465 = vmatpush1.bf16.msra.mxu1 %v6900_v12  ;;  %5442 = vmatpush1.bf16.msra.mxu0 %v6951_v34 }
 0xaee   : >> { %5466 = vmatprep.subr.bf16.mxu1 %v6908_v54  ;;  %5443 = vmatprep.subr.bf16.mxu0 %v6959_v36 }
 0xaf1   : >> { %5467 = vmatpush1.bf16.msra.mxu1 %v6906_v21  ;;  %5444 = vmatpush1.bf16.msra.mxu0 %v6957_v62 }
 0xaf2   : >> { %5468 = vmatprep.subr.bf16.mxu1 %v6914_v30  ;;  %5445 = vmatprep.subr.bf16.mxu0 %v6965_v53 }
 0xaf5   : >> { %5469 = vmatpush1.bf16.msra.mxu1 %v6912_v17  ;;  %5446 = vmatpush1.bf16.msra.mxu0 %v6963_v24 }
 0xaf6   : >> { %5470 = vmatprep.subr.bf16.mxu1 %v6920_v16  ;;  %5497 = vmatprep.subr.bf16.mxu0 %v6971_v44 }
 0xaf9   : >> { %5471 = vmatpush1.bf16.msra.mxu1 %v6918_v40 }
 0xafa   : >> { %5472 = vmatprep.subr.bf16.mxu1 %v6926_v22 }
 0xafd   : >> { %5473 = vmatpush1.bf16.msra.mxu1 %v6924_v32 }
 0xafe   : >> { %5474 = vmatprep.subr.bf16.mxu1 %v6932_v10 }
 0xb01   : >> { %5475 = vmatpush1.bf16.msra.mxu1 %v6930_v38 }
 0xb02   : >> { %5476 = vmatprep.subr.bf16.mxu1 %v6938_v55 }
 0xb05   : >> { %5477 = vmatpush1.bf16.msra.mxu1 %v6936_v51 }
 0xb06   : >> { %5478 = vmatprep.subr.bf16.mxu1 %v6944_v28 }
 0xb09   : >> { %5479 = vmatpush1.bf16.msra.mxu1 %v6942_v57 }
 0xb0a   : >> { %5480 = vmatprep.subr.bf16.mxu1 %v6950_v11 }
 0xb0d   : >> { %5481 = vmatpush1.bf16.msra.mxu1 %v6948_v59 }
 0xb0e   : >> { %5482 = vmatprep.subr.bf16.mxu1 %v6956_v35 }
 0xb11   : >> { %5483 = vmatpush1.bf16.msra.mxu1 %v6954_v60 }
 0xb12   : >> { %5484 = vmatprep.subr.bf16.mxu1 %v6962_v56 }
 0xb15   : >> { %5485 = vmatpush1.bf16.msra.mxu1 %v6960_v7 }
 0xb16   : >> { %5486 = vmatprep.subr.bf16.mxu1 %v6968_v61 }
 0xb19   : >> { %5487 = vmatpush1.bf16.msra.mxu1 %v6966_v20 }
 0xb7f   : >> { %v4572_v49 = vpop.f32.mrb[60].mxu1  ;;  %v4613_v29 = vpop.f32.mrb[60].mxu0 }
 0xb80   : >> { %v9036_v41 = vadd.f32 %v4572_v49, %v4148_v42  ;;  %v9038_v43 = vadd.f32 %v4613_v29, %v4156_v39  ;;  %v4574_v2 = vpop.f32.mrb[61].mxu1  ;;  %v4615_v9 = vpop.f32.mrb[61].mxu0 }
 0xb81   : >> { %v9040_v12 = vadd.f32 %v4574_v2, %v4152_v19  ;;  %v9042_v0 = vadd.f32 %v4615_v9, %v4160_v48  ;;  %v4576_v1 = vpop.f32.mrb[62].mxu1  ;;  %v4617_v54 = vpop.f32.mrb[62].mxu0 }
 0xb82   : >> { %v9045_v21 = vmul.f32 0.70710677, %v9036_v41  ;;  %v9048_v50 = vmul.f32 0.70710677, %v9038_v43  ;;  %v4577_v16 = vpop.f32.mrb[63].mxu1  ;;  %v4618_v22 = vpop.f32.mrb[63].mxu0 }
 0xb83   : >> { %v9051_v31 = vmul.f32 0.70710677, %v9040_v12  ;;  %v9057_v18 = vmul.f32 0.70710677, %v9042_v0 }
 0xb84   : >> { %v4685_v30 = vand.u32 2147483647, %v9045_v21  ;;  %v4687_v17 = vand.u32 2147483647, %v9048_v50  ;;  %vm4673_vm4 = vcmp.ge.f32.partialorder %v9045_v21, 0.0  ;;  %vm4675_vm5 = vcmp.ge.f32.partialorder %v9048_v50, 0.0 }
 0xb85   : >> { %v4686_v3 = vand.u32 2147483647, %v9051_v31  ;;  %v4688_v23 = vand.u32 2147483647, %v9057_v18  ;;  %vm4674_vm6 = vcmp.ge.f32.partialorder %v9051_v31, 0.0  ;;  %vm4676_vm7 = vcmp.ge.f32.partialorder %v9057_v18, 0.0 }
 0xb86   : >> { %v4691_v40 = vmul.f32 0.3275911, %v4685_v30  ;;  %v4693_v37 = vmul.f32 0.3275911, %v4687_v17  ;;  %v4763_v14 = vsub.f32 0.0, %v4685_v30  ;;  %v4765_v55 = vsub.f32 0.0, %v4687_v17 }
 0xb87   : >> { %v4692_v58 = vmul.f32 0.3275911, %v4686_v3  ;;  %v4694_v38 = vmul.f32 0.3275911, %v4688_v23  ;;  %v4764_v26 = vsub.f32 0.0, %v4686_v3  ;;  %v4766_v11 = vsub.f32 0.0, %v4688_v23 }
 0xb88   : >> { %v4697_v32 = vadd.f32 1.0, %v4691_v40  ;;  %v4699_v15 = vadd.f32 1.0, %v4693_v37  ;;  %v4769_v52 = vmul.f32 %v4763_v14, %v4685_v30  ;;  %v4771_v27 = vmul.f32 %v4765_v55, %v4687_v17 }
 0xb89   : >> { %v4698_v10 = vadd.f32 1.0, %v4692_v58  ;;  %v4700_v13 = vadd.f32 1.0, %v4694_v38  ;;  %v4770_v60 = vmul.f32 %v4764_v26, %v4686_v3  ;;  %v4772_v24 = vmul.f32 %v4766_v11, %v4688_v23 }
 0xb8a   : >> { %7055 = vrcp.f32 %v4697_v32  ;;  %v4775_v34 = vmul.f32 1.442695, %v4769_v52  ;;  %v4779_v62 = vmul.f32 1.442695, %v4771_v27  ;;  %v4163_v26 = vsub.s32 4, %v7590_v4 }
 0xb8b   : >> { %7057 = vrcp.f32 %v4699_v15  ;;  %v4777_v8 = vmul.f32 1.442695, %v4770_v60  ;;  %v4781_v49 = vmul.f32 1.442695, %v4772_v24 }
 0xb8c   : >> { %7059 = vrcp.f32 %v4698_v10 }
 0xb8d   : >> { %7061 = vrcp.f32 %v4700_v13 }
 0xb8e   : >> { %7063 = vpow2.f32 %v4775_v34 }
 0xb8f   : >> { %7065 = vpow2.f32 %v4779_v62 }
 0xb90   : >> { %7067 = vpow2.f32 %v4777_v8 }
 0xb91   : >> { %7069 = vpow2.f32 %v4781_v49 }
 0xb94   : >> { %v7056_v51 = vpop.eup %7055 }
 0xb95   : >> { %v7058_v28 = vpop.eup %7057  ;;  %v4709_v57 = vmul.f32 1.0614054, %v7056_v51 }
 0xb96   : >> { %v4711_v25 = vmul.f32 1.0614054, %v7058_v28  ;;  %v7060_v33 = vpop.eup %7059 }
 0xb97   : >> { %v4715_v59 = vadd.f32 -1.4531521, %v4709_v57  ;;  %v4710_v56 = vmul.f32 1.0614054, %v7060_v33  ;;  %v7062_v7 = vpop.eup %7061  ;;  %v4167_v57 = vsub.s32 5, %v7590_v4  ;;  %v4164_v4 = vrot.slane %v9027_v47, %v4163_v26 }
 0xb98   : >> { %v4717_v35 = vadd.f32 -1.4531521, %v4711_v25  ;;  %v4712_v44 = vmul.f32 1.0614054, %v7062_v7  ;;  %v7064_v23 = vpop.eup %7063  ;;  %v6980_v26 = vld [vmem:[%s8910_s22 + $0x234] ss:$8 sps:$4 sm:$0xff]  }
 0xb99   : >> { %v4721_v36 = vmul.f32 %v7056_v51, %v4715_v59  ;;  %v4716_v20 = vadd.f32 -1.4531521, %v4710_v56  ;;  %v7066_v38 = vpop.eup %7065  ;;  %v7266_v59 = vmov -1.0   ;;  %v4168_v56 = vrot.slane %v9027_v47, %v4167_v57 }
 0xb9a   : >> { %v4723_v53 = vmul.f32 %v7058_v28, %v4717_v35  ;;  %v4718_v19 = vadd.f32 -1.4531521, %v4712_v44  ;;  %v7068_v11 = vpop.eup %7067  ;;  %v4681_v62 = vsel %vm4675_vm5, 1.0, %v7266_v59  ;;  %v4682_v8 = vsel %vm4676_vm7, 1.0, %v7266_v59 }
 0xb9b   : >> { %v4727_v61 = vadd.f32 1.4214138, %v4721_v36  ;;  %v4722_v39 = vmul.f32 %v7060_v33, %v4716_v20  ;;  %v7070_v36 = vpop.eup %7069 }
 0xb9c   : >> { %v4729_v46 = vadd.f32 1.4214138, %v4723_v53  ;;  %v4724_v9 = vmul.f32 %v7062_v7, %v4718_v19 }
 0xb9d   : >> { %v4733_v42 = vmul.f32 %v7056_v51, %v4727_v61  ;;  %v4728_v2 = vadd.f32 1.4214138, %v4722_v39  ;;  %v4680_v61 = vsel %vm4674_vm6, 1.0, %v7266_v59 }
 0xb9e   : >> { %v4735_v48 = vmul.f32 %v7058_v28, %v4729_v46  ;;  %v4730_v17 = vadd.f32 1.4214138, %v4724_v9  ;;  %v4662_v46 = vmul.f32 0.5, %v9040_v12 }
 0xb9f   : >> { %v4739_v29 = vadd.f32 -0.28449672, %v4733_v42  ;;  %v4734_v30 = vmul.f32 %v7060_v33, %v4728_v2 }
 0xba0   : >> { %v4741_v1 = vadd.f32 -0.28449672, %v4735_v48  ;;  %v4736_v37 = vmul.f32 %v7062_v7, %v4730_v17 }
 0xba1   : >> { %v4745_v54 = vmul.f32 %v7056_v51, %v4739_v29  ;;  %v4740_v40 = vadd.f32 -0.28449672, %v4734_v30  ;;  %v4664_v30 = vmul.f32 0.5, %v9042_v0 }
 0xba2   : >> { %v4747_v3 = vmul.f32 %v7058_v28, %v4741_v1  ;;  %v4742_v15 = vadd.f32 -0.28449672, %v4736_v37 }
 0xba3   : >> { %v4751_v16 = vadd.f32 0.2548296, %v4745_v54  ;;  %v4746_v32 = vmul.f32 %v7060_v33, %v4740_v40 }
 0xba4   : >> { %v4753_v58 = vadd.f32 0.2548296, %v4747_v3  ;;  %v4748_v55 = vmul.f32 %v7062_v7, %v4742_v15  ;;  %v6974_v15 = vld [vmem:[%s8910_s22 + $0x214] ss:$8 sps:$4 sm:$0xff]  }
 0xba5   : >> { %v4757_v22 = vmul.f32 %v7056_v51, %v4751_v16  ;;  %v4752_v14 = vadd.f32 0.2548296, %v4746_v32 }
 0xba6   : >> { %v4759_v10 = vmul.f32 %v7058_v28, %v4753_v58  ;;  %v4754_v51 = vadd.f32 0.2548296, %v4748_v55  ;;  %v4679_v28 = vsel %vm4673_vm4, 1.0, %v7266_v59  ;;  %v6969_v58 = vld [vmem:[%s8910_s22 + $0x200] ss:$8 sps:$4 sm:$0xff]  }
 0xba7   : >> { %v4787_v13 = vmul.f32 %v7064_v23, %v4757_v22  ;;  %v4758_v25 = vmul.f32 %v7060_v33, %v4752_v14  ;;  %v6972_v14 = vld [vmem:[%s8910_s22 + $0x210] ss:$8 sps:$4 sm:$0xff]   ;;  %v6977_v55 = vld [vmem:[%s8910_s22 + $0x224] ss:$8 sps:$4 sm:$0xff]  }
 0xba8   : >> { %v4789_v52 = vmul.f32 %v7066_v38, %v4759_v10  ;;  %v4760_v60 = vmul.f32 %v7062_v7, %v4754_v51  ;;  %v4661_v7 = vmul.f32 0.5, %v9036_v41  ;;  %v4663_v41 = vmul.f32 0.5, %v9038_v43  ;;  %v6983_v51 = vld [vmem:[%s8910_s22 + $0x244] ss:$8 sps:$4 sm:$0xff]  }
 0xba9   : >> { %v4793_v27 = vsub.f32 1.0, %v4787_v13  ;;  %v4788_v21 = vmul.f32 %v7068_v11, %v4758_v25  ;;  %v6978_v25 = vld [vmem:[%s8910_s22 + $0x230] ss:$8 sps:$4 sm:$0xff]  }
 0xbaa   : >> { %v4795_v34 = vsub.f32 1.0, %v4789_v52  ;;  %v4790_v53 = vmul.f32 %v7070_v36, %v4760_v60  ;;  %v6975_v52 = vld [vmem:[%s8910_s22 + $0x220] ss:$8 sps:$4 sm:$0xff]  }
 0xbab   : >> { %v4799_v35 = vmul.f32 %v4793_v27, %v4679_v28  ;;  %v4794_v33 = vsub.f32 1.0, %v4788_v21  ;;  %v6981_v60 = vld [vmem:[%s8910_s22 + $0x240] ss:$8 sps:$4 sm:$0xff]  }
 0xbac   : >> { %v4801_v50 = vmul.f32 %v4795_v34, %v4681_v62  ;;  %v4796_v44 = vsub.f32 1.0, %v4790_v53  ;;  %v6986_v62 = vld [vmem:[%s8910_s22 + $0x254] ss:$8 sps:$4 sm:$0xff]  }
 0xbad   : >> { %v4805_v24 = vadd.f32 1.0, %v4799_v35  ;;  %v4800_v20 = vmul.f32 %v4794_v33, %v4680_v61 }
 0xbae   : >> { %v4807_v39 = vadd.f32 1.0, %v4801_v50  ;;  %v4802_v19 = vmul.f32 %v4796_v44, %v4682_v8 }
 0xbaf   : >> { %v4654_v31 = vpop.f32.mrb[64].mxu1  ;;  %v4806_v49 = vadd.f32 1.0, %v4800_v20  ;;  %v4811_v29 = vmul.f32 %v4805_v24, %v4661_v7  ;;  %v6984_v24 = vld [vmem:[%s8910_s22 + $0x250] ss:$8 sps:$4 sm:$0xff]   ;;  %v6989_v20 = vld [vmem:[%s8910_s22 + $0x264] ss:$8 sps:$4 sm:$0xff]  }
 0xbb0   : >> { %v9074_v42 = vadd.f32 %v4654_v31, %v4164_v4  ;;  %v4656_v47 = vpop.f32.mrb[65].mxu1  ;;  %v4808_v54 = vadd.f32 1.0, %v4802_v19  ;;  %v4813_v3 = vmul.f32 %v4807_v39, %v4663_v41 }
 0xbb1   : >> { %v9076_v48 = vadd.f32 %v4656_v47, %v4168_v56  ;;  %v4658_v18 = vpop.f32.mrb[66].mxu1  ;;  %v4812_v1 = vmul.f32 %v4806_v49, %v4662_v46  ;;  %v4817_v22 = vpack.c.bf16 %v4811_v29, %v4811_v29  ;;  %v6987_v46 = vld [vmem:[%s8910_s22 + $0x260] ss:$8 sps:$4 sm:$0xff]   ;;  %v6992_v47 = vld [vmem:[%s8910_s22 + $0x274] ss:$8 sps:$4 sm:$0xff]  }
 0xbb2   : >> { %v4671_v2 = vmul.f32 0.70710677, %v9074_v42  ;;  %v4659_v9 = vpop.f32.mrb[67].mxu1  ;;  %v4814_v32 = vmul.f32 %v4808_v54, %v4664_v30  ;;  %v4819_v38 = vpack.c.bf16 %v4813_v3, %v4813_v3  ;;  %v6990_v49 = vld [vmem:[%s8910_s22 + $0x270] ss:$8 sps:$4 sm:$0xff]  }
 0xbb3   : >> { %v9081_v12 = vmul.f32 0.70710677, %v9076_v48  ;;  %v4818_v37 = vpack.c.bf16 %v4812_v1, %v4812_v1  ;;  %v6993_v54 = vld [vmem:[%s8910_s22 + $0x280] ss:$8 sps:$4 sm:$0xff]   ;;  %v6998_v3 = vld [vmem:[%s8910_s22 + $0x294] ss:$8 sps:$4 sm:$0xff]  }
 0xbb4   : >> { %vm4677_vm8 = vcmp.ge.f32.partialorder %v4671_v2, 0.0  ;;  %v4689_v17 = vand.u32 2147483647, %v4671_v2  ;;  %v4820_v10 = vpack.c.bf16 %v4814_v32, %v4814_v32  ;;  %v6995_v2 = vld [vmem:[%s8910_s22 + $0x284] ss:$8 sps:$4 sm:$0xff]  }
 0xbb5   : >> { %v9085_v16 = vsel %vm4677_vm8, 1.0, %v7266_v59  ;;  %v4690_v40 = vand.u32 2147483647, %v9081_v12  ;;  %5447 = vmatprep.mubr.bf16.mxu0 %v4818_v37  ;;  %vm4678_vm9 = vcmp.ge.f32.partialorder %v9081_v12, 0.0  ;;  %v6999_v12 = vld [vmem:[%s8910_s22 + $0x2a0] ss:$8 sps:$4 sm:$0xff]  }
 0xbb6   : >> { %v4695_v43 = vmul.f32 0.3275911, %v4689_v17  ;;  %5448 = vmatmul.mubr.bf16.vlgmr.msra.gmra.mrb[64].mxu0 %v4817_v22  ;;  %5488 = vmatprep.mubr.bf16.mxu1 %v4820_v10  ;;  %v4767_v57 = vsub.f32 0.0, %v4689_v17 }
 0xbb7   : >> { %v4696_v23 = vmul.f32 0.3275911, %v4690_v40  ;;  %5498 = vmatpush1.bf16.msra.mxu0 %v6969_v58  ;;  %5489 = vmatmul.mubr.bf16.vlgmr.msra.gmra.mrb[68].mxu1 %v4819_v38  ;;  %v4768_v27 = vsub.f32 0.0, %v4690_v40  ;;  %v4665_v38 = vmul.f32 0.5, %v9074_v42 }
 0xbb8   : >> { %v4701_v0 = vadd.f32 1.0, %v4695_v43  ;;  %5499 = vmatprep.subr.bf16.mxu0 %v6974_v15  ;;  %v4773_v28 = vmul.f32 %v4767_v57, %v4689_v17  ;;  %v6996_v43 = vld [vmem:[%s8910_s22 + $0x290] ss:$8 sps:$4 sm:$0xff]   ;;  %v7001_v15 = vld [vmem:[%s8910_s22 + $0x2a4] ss:$8 sps:$4 sm:$0xff]  }
 0xbb9   : >> { %v4702_v13 = vadd.f32 1.0, %v4696_v23  ;;  %v4774_v21 = vmul.f32 %v4768_v27, %v4690_v40  ;;  %v7007_v57 = vld [vmem:[%s8910_s22 + $0x2c4] ss:$8 sps:$4 sm:$0xff]   ;;  %v7005_v27 = vld [vmem:[%s8910_s22 + $0x2c0] ss:$8 sps:$4 sm:$0xff]  }
 0xbba   : >> { %7071 = vrcp.f32 %v4701_v0  ;;  %v4783_v56 = vmul.f32 1.442695, %v4773_v28  ;;  %v4684_v0 = vsel %vm4678_vm9, 1.0, %v7266_v59  ;;  %v7002_v59 = vld [vmem:[%s8910_s22 + $0x2b0] ss:$8 sps:$4 sm:$0xff]  }
 0xbbb   : >> { %7073 = vrcp.f32 %v4702_v13  ;;  %5500 = vmatpush1.bf16.msra.mxu0 %v6972_v14  ;;  %v4785_v53 = vmul.f32 1.442695, %v4774_v21  ;;  %v4666_v14 = vmul.f32 0.5, %v9076_v48  ;;  %v7010_v48 = vld [vmem:[%s8910_s22 + $0x2d4] ss:$8 sps:$4 sm:$0xff]  }
 0xbbc   : >> { %5501 = vmatprep.subr.bf16.mxu0 %v6977_v55  ;;  %7075 = vpow2.f32 %v4783_v56  ;;  %v7004_v55 = vld [vmem:[%s8910_s22 + $0x2b4] ss:$8 sps:$4 sm:$0xff]   ;;  %v4923_v21 = vld [vmem:[%s4922_s20] sm:$0x3] }
 0xbbd   : >> { %7077 = vpow2.f32 %v4785_v53  ;;  %v7016_v28 = vld [vmem:[%s8910_s22 + $0x2f4] ss:$8 sps:$4 sm:$0xff]  }
 0xbbf   : >> { %5502 = vmatpush1.bf16.msra.mxu0 %v6975_v52 }
 0xbc0   : >> { %5503 = vmatprep.subr.bf16.mxu0 %v6980_v26 }
 0xbc3   : >> { %5504 = vmatpush1.bf16.msra.mxu0 %v6978_v25  ;;  %v7008_v25 = vld [vmem:[%s8910_s22 + $0x2d0] ss:$8 sps:$4 sm:$0xff]  }
 0xbc4   : >> { %v7072_v11 = vpop.eup %7071  ;;  %5505 = vmatprep.subr.bf16.mxu0 %v6983_v51  ;;  %v7013_v51 = vld [vmem:[%s8910_s22 + $0x2e4] ss:$8 sps:$4 sm:$0xff]  }
 0xbc5   : >> { %v7074_v34 = vpop.eup %7073  ;;  %v4713_v35 = vmul.f32 1.0614054, %v7072_v11 }
 0xbc6   : >> { %v4714_v36 = vmul.f32 1.0614054, %v7074_v34  ;;  %v7076_v30 = vpop.eup %7075 }
 0xbc7   : >> { %v4719_v4 = vadd.f32 -1.4531521, %v4713_v35  ;;  %5506 = vmatpush1.bf16.msra.mxu0 %v6981_v60  ;;  %v7078_v40 = vpop.eup %7077  ;;  %v4928_v60 = vrot.slane %v4923_v21, %v7601_v5 }
 0xbc8   : >> { %v4720_v50 = vadd.f32 -1.4531521, %v4714_v36  ;;  %5507 = vmatprep.subr.bf16.mxu0 %v6986_v62  ;;  %v4932_v36 = vrot.slane %v4923_v21, %v7604_v6 }
 0xbc9   : >> { %v4725_v33 = vmul.f32 %v7072_v11, %v4719_v4 }
 0xbca   : >> { %v4726_v61 = vmul.f32 %v7074_v34, %v4720_v50 }
 0xbcb   : >> { %v4731_v44 = vadd.f32 1.4214138, %v4725_v33  ;;  %5508 = vmatpush1.bf16.msra.mxu0 %v6984_v24 }
 0xbcc   : >> { %v4732_v31 = vadd.f32 1.4214138, %v4726_v61  ;;  %5509 = vmatprep.subr.bf16.mxu0 %v6989_v20 }
 0xbcd   : >> { %v4737_v7 = vmul.f32 %v7072_v11, %v4731_v44 }
 0xbce   : >> { %v4738_v8 = vmul.f32 %v7074_v34, %v4732_v31 }
 0xbcf   : >> { %v4743_v39 = vadd.f32 -0.28449672, %v4737_v7  ;;  %5510 = vmatpush1.bf16.msra.mxu0 %v6987_v46 }
 0xbd0   : >> { %v4744_v19 = vadd.f32 -0.28449672, %v4738_v8  ;;  %5511 = vmatprep.subr.bf16.mxu0 %v6992_v47 }
 0xbd1   : >> { %v4749_v18 = vmul.f32 %v7072_v11, %v4743_v39 }
 0xbd2   : >> { %v4750_v29 = vmul.f32 %v7074_v34, %v4744_v19 }
 0xbd3   : >> { %v4755_v9 = vadd.f32 0.2548296, %v4749_v18  ;;  %5512 = vmatpush1.bf16.msra.mxu0 %v6990_v49 }
 0xbd4   : >> { %v4756_v41 = vadd.f32 0.2548296, %v4750_v29  ;;  %5513 = vmatprep.subr.bf16.mxu0 %v6995_v2 }
 0xbd5   : >> { %v4761_v1 = vmul.f32 %v7072_v11, %v4755_v9  ;;  %v7011_v11 = vld [vmem:[%s8910_s22 + $0x2e0] ss:$8 sps:$4 sm:$0xff]  }
 0xbd6   : >> { %v4762_v17 = vmul.f32 %v7074_v34, %v4756_v41  ;;  %v7014_v34 = vld [vmem:[%s8910_s22 + $0x2f0] ss:$8 sps:$4 sm:$0xff]  }
 0xbd7   : >> { %v4791_v37 = vmul.f32 %v7076_v30, %v4761_v1  ;;  %5514 = vmatpush1.bf16.msra.mxu0 %v6993_v54 }
 0xbd8   : >> { %v4792_v58 = vmul.f32 %v7078_v40, %v4762_v17  ;;  %5515 = vmatprep.subr.bf16.mxu0 %v6998_v3 }
 0xbd9   : >> { %v4797_v22 = vsub.f32 1.0, %v4791_v37 }
 0xbda   : >> { %v4798_v32 = vsub.f32 1.0, %v4792_v58 }
 0xbdb   : >> { %v4803_v23 = vmul.f32 %v4797_v22, %v9085_v16  ;;  %5516 = vmatpush1.bf16.msra.mxu0 %v6996_v43  ;;  %v5541_v43 = vld [vmem:[%s9681_s23] sm:$0x3] (%p608_p7) }
 0xbdc   : >> { %v4804_v10 = vmul.f32 %v4798_v32, %v4684_v0  ;;  %5517 = vmatprep.subr.bf16.mxu0 %v7001_v15 }
 0xbdd   : >> { %v4809_v13 = vadd.f32 1.0, %v4803_v23 }
 0xbde   : >> { %v4810_v52 = vadd.f32 1.0, %v4804_v10 }
 0xbdf   : >> { %v4815_v26 = vmul.f32 %v4809_v13, %v4665_v38  ;;  %5518 = vmatpush1.bf16.msra.mxu0 %v6999_v12  ;;  %v5579_v38 = vrot.slane (%p608_p7), %v5541_v43, %v7601_v5  ;;  %v5583_v13 = vrot.slane (%p608_p7), %v5541_v43, %v7604_v6 }
 0xbe0   : >> { %v4816_v16 = vmul.f32 %v4810_v52, %v4666_v14  ;;  %5519 = vmatprep.subr.bf16.mxu0 %v7004_v55 }
 0xbe1   : >> { %v4821_v35 = vpack.c.bf16 %v4815_v26, %v4815_v26 }
 0xbe2   : >> { %v4822_v42 = vpack.c.bf16 %v4816_v16, %v4816_v16 }
 0xbe3   : >> { %5520 = vmatpush1.bf16.msra.mxu0 %v7002_v59 }
 0xbe4   : >> { %5529 = vmatprep.mubr.bf16.mxu0 %v4822_v42  ;;  %5521 = vmatprep.subr.bf16.mxu0 %v7007_v57 }
 0xbe7   : >> { %5522 = vmatpush1.bf16.msra.mxu0 %v7005_v27 }
 0xbe8   : >> { %5523 = vmatprep.subr.bf16.mxu0 %v7010_v48 }
 0xbeb   : >> { %5524 = vmatpush1.bf16.msra.mxu0 %v7008_v25 }
 0xbec   : >> { %5525 = vmatprep.subr.bf16.mxu0 %v7013_v51 }
 0xbef   : >> { %5526 = vmatpush1.bf16.msra.mxu0 %v7011_v11 }
 0xbf0   : >> { %5527 = vmatprep.subr.bf16.mxu0 %v7016_v28 }
 0xbf3   : >> { %5528 = vmatpush1.bf16.msra.mxu0 %v7014_v34 }
 0xbf6   : >> { %5530 = vmatmul.mubr.bf16.vlgmr.msra.gmra.mrb[68].mxu0 %v4821_v35 }
 0xc89   : >> { %v5449_v62 = vpop.f32.mrb[64].mxu0 }
 0xc8a   : >> { %v5450_v4 = vadd.f32 %v5449_v62, %v4928_v60  ;;  %v5451_v56 = vpop.f32.mrb[65].mxu0  ;;  %v5490_v53 = vpop.f32.mrb[68].mxu1 }
 0xc8b   : >> { %v5452_v50 = vadd.f32 %v5451_v56, %v4932_v36  ;;  %v5453_v33 = vpop.f32.mrb[66].mxu0  ;;  %v5492_v20 = vpop.f32.mrb[69].mxu1 }
 0xc8c   : >> { %v5454_v24 = vpop.f32.mrb[67].mxu0  ;;  %v5491_v61 = vadd.f32 %v5490_v53, %v5450_v4  ;;  %v5494_v31 = vpop.f32.mrb[70].mxu1 }
 0xc8d   : >> { %v5493_v44 = vadd.f32 %v5492_v20, %v5452_v50  ;;  %v5495_v7 = vpop.f32.mrb[71].mxu1 }
 0xcc9   : >> { %v5531_v46 = vpop.f32.mrb[68].mxu0  ;;  %610 = sbr.rel (!%p608_p7) target bundleno = 135 (0x87), region = 166 }
 0xcca   : >> { %v5532_v8 = vadd.f32 %v5531_v46, %v5491_v61  ;;  %v5533_v47 = vpop.f32.mrb[69].mxu0 }
 0xccb   : >> { %v5534_v39 = vadd.f32 %v5533_v47, %v5493_v44  ;;  %v5535_v19 = vpop.f32.mrb[70].mxu0 }
 0xccc   : >> { %v5538_v18 = vadd.f32 %v5532_v8, %v8838_v63   ;;  %v5536_v49 = vpop.f32.mrb[71].mxu0 }
 0xccd   : >> { %v5539_v29 = vadd.f32 %v5534_v39, %v8836_v45  }
 0xcce   : >> { %v9677_v0 = vmov %v5538_v18 }
 0xccf   : >> { %v9676_v1 = vmov %v5539_v29  ;;  %v5543_v2 = vsel (%p608_p7), %vm619_vm0, %v5539_v29, 0.0 }
 0xcd0   : > { %v5544_v9 = vadd.f32 %v5543_v2, %v5538_v18  ;;  %v5540_v1 = vld [vmem:[%s9680_s2] sm:$0x3] }
 0xcd1   : > { %v5566_v32 = vrot.slane %v5540_v1, %v7601_v5  ;;  %v5570_v15 = vrot.slane %v5540_v1, %v7604_v6 }
 0xcd2   : > { %5545 = vadd.xlane.f32.xlu0 %v5544_v9 }
 0xd5f   : > { %v5546_v41 = vpop.xlane.xlu0 %5545 }
 0xd60   : > { %v5548_v54 = vmul.f32 0.0052083335, %v5546_v41 }
 0xd62   : > { %v5549_v63 = vsub.f32 %v5538_v18, %v5548_v54  ;;  %v5550_v30 = vsub.f32 %v5539_v29, %v5548_v54 }
 0xd64   : > { %v5551_v17 = vmul.f32 %v5549_v63, %v5549_v63  ;;  %v5552_v45 = vmul.f32 %v5550_v30, %v5550_v30 }
 0xd66   : > { %v5553_v3 = vsel %vm619_vm0, %v5552_v45, 0.0 }
 0xd67   : > { %v5554_v40 = vadd.f32 %v5553_v3, %v5551_v17 }
 0xd69   : > { %5555 = vadd.xlane.f32.xlu0 %v5554_v40 }
 0xdf6   : > { %v5556_v37 = vpop.xlane.xlu0 %5555 }
 0xdf7   : > { %v5557_v58 = vmul.f32 0.0052083335, %v5556_v37 }
 0xdf9   : > { %v5558_v22 = vadd.f32 1e-05, %v5557_v58 }
 0xdfb   : > { %7079 = vrsqrt.f32 %v5558_v22 }
 0xe05   : > { %v7080_v23 = vpop.eup %7079 }
 0xe06   : > { %v5560_v0 = vmul.f32 %v7080_v23, %v5549_v63  ;;  %v5561_v10 = vmul.f32 %v7080_v23, %v5550_v30 }
 0xe08   : > { %v5573_v12 = vmul.f32 %v5566_v32, %v5560_v0  ;;  %v5574_v14 = vmul.f32 %v5570_v15, %v5561_v10 }
 0xe0a   : > { %v5586_v55 = vadd.f32 %v5579_v38, %v5573_v12  ;;  %v5587_v52 = vadd.f32 %v5583_v13, %v5574_v14 }
 0xe0c   : > { %5588 = vst [vmem:[%s9679_s9] sm:$0xff] %v5586_v55  ;;  %5589 = vst.msk [vmem:[%s9679_s9 + $0x8] sm:$0xff] %vm619_vm0, %v5587_v52 }
 0xe0d   : > { %7167 = shalt.err (!%p7164_p3)
}
 0xe0e   : > { %s7168_s12 = scalar_lea.hbm %s9156_s14, 256  ;;  %s7172_s27 = scalar_lea.hbm %s9684_s13, 512 }
 0xe0f   : > { %p7169_p0 = scmp.ne.s32.totalorder %s9156_s14, %s7168_s12  ;;  %p7173_p12 = scmp.lt.u32.totalorder %s9156_s14, %s9684_s13 }
 0xe10   : > { %p7174_p10 = scmp.lt.u32.totalorder %s7172_s27, %s7168_s12  ;;  %p7176_p8 = scmp.lt.u32.totalorder %s7168_s12, %s9156_s14 }
 0xe11   : > { %p7170_p4 = pnand %p7169_p0, %p9686_p11 }
 0xe12   : > { %p7175_p7 = por %p7174_p10, %p7173_p12 }
 0xe13   : > { %p7171_p5 = pneg %p7170_p4 }
 0xe14   : > { %p7177_p13 = por %p7176_p8, %p7175_p7 }
 0xe16   : > { %p7178_p6 = pnand %p7177_p13, %p7171_p5 }
 0xe18   : > { %7181 = shalt.err (!%p7178_p6)
}
 0xe19   : > { %6356 = dma.vmem_to_hbm [thread:$0]  (%p9686_p11), %s9158_s19, 256, %s9156_s14, %s5591_s0  }
 0xe1a PF: > { %s9687_s5 = sld [smem:[#allocation19_spill]]  ;;  %s9688_s17 = sld [smem:[#allocation16_spill]] }
 0xe1b   : > { %s9689_s20 = sld [smem:[#allocation24_spill]] }
 0xe20   : > { %p6383_p9 = scmp.ge.s32.totalorder %s9687_s5, 2  ;;  %s5617_s3 = sand.u32 1, %s9688_s17  }
 0xe21   : > { %p9690_p2 = scmp.ne.s32.totalorder %s9689_s20, 0  ;;  %s5618_s9 = scalar_lea.sflag [#allocation5], %s5617_s3 }
 0xe23   : > { %p6372_p1 = pnand %p6383_p9, %p9690_p2 }
 0xe25   : > { %7223 = dma.done.wait (!%p6372_p1), %s5618_s9, 256  }
 0xe26   : > { %7225 = vsyncadd (!%p6372_p1), %s5618_s9, 4294967040  ;;  %s9691_s27 = sld [smem:[#allocation21_spill]]  ;;  %s9692_s24 = sld [smem:[#allocation17_spill]] }
 0xe27   : > { %s9693_s25 = sld [smem:[#allocation18_spill]]  ;;  %s9694_s26 = sld [smem:[#allocation22_spill]] }
 0xe2c   : > { %p30_p3 = scmp.ge.s32.totalorder %s9691_s27, 4  }
 0xe2e   :  { %32 = sbr.rel (!%p30_p3) target bundleno = 25 (0x19), region = 177 }
 0xe35   :  { %5623 = vsyncpa [#allocation4], 1 }
 0xe36   :  { %5625 = vsyncpa [#allocation4 + $0x1], 1 }
 0xe37   :  { %5626 = vsyncpa [#allocation5], 1 }
 0xe38   :  { %5628 = vsyncpa [#allocation5 + $0x1], 1 }
 0xe39   :  { %5629 = vsyncpa [#allocation6], 1 }
 0xe3a   :  { %5631 = vsyncpa [#allocation6 + $0x1], 1 }
 0xe3b   :  { %5632 = vsyncpa [#allocation9], 1 }

</bundles_post_ra>
